<compile_context>
chip_gen: v6e
topology: v6e:2x2x1
jax: 0.10.0
libtpu: 0.0.40
codegen_flags: <defaults>
</compile_context>

<pallas_src>
import jax
import jax.numpy as jnp
from jax.experimental import pallas as pl
from jax.experimental.pallas import tpu as pltpu
from jax.scipy.special import logsumexp


def _make_clip_loss_kernel(tm, tn, n, text_resident):
    def kernel(scale_ref, img_ref, txt_ref, out_ref,
               row_m, row_l, col_m, col_l, acc):
        i = pl.program_id(0)
        j = pl.program_id(1)
        n_i = pl.num_programs(0)
        n_j = pl.num_programs(1)

        # ---- one-time init of grid-persistent accumulators ----
        @pl.when(jnp.logical_and(i == 0, j == 0))
        def _():
            col_m[...] = jnp.full_like(col_m, -jnp.inf)
            col_l[...] = jnp.zeros_like(col_l)
            acc[0] = jnp.float32(0.0)      # running sum of row logsumexp
            acc[1] = jnp.float32(0.0)      # running sum of diagonal logits

        # ---- per-row-tile init (state carried across the inner j axis) ----
        @pl.when(j == 0)
        def _():
            row_m[...] = jnp.full_like(row_m, -jnp.inf)
            row_l[...] = jnp.zeros_like(row_l)

        img = img_ref[...]                                       # (tm, D)
        if text_resident:
            txt = txt_ref[pl.ds(pl.multiple_of(j * tn, tn), tn), :]
        else:
            txt = txt_ref[...]                                   # (tn, D)

        # (tm, tn) logits tile: native-dtype (bf16) MXU matmul, f32 accumulation;
        # contraction via dimension_numbers so no transpose is materialized.
        raw = jax.lax.dot_general(
            img, txt,
            dimension_numbers=(((1,), (1,)), ((), ())),
            preferred_element_type=jnp.float32)
        logits = raw * scale_ref[0]                              # f32 scale on VPU

        # Shared per-tile max -> single exp pass for row AND column sums.
        m_t = jnp.max(logits)
        e = jnp.exp(logits - m_t)                                # (tm, tn), <= 1

        # ---- online row logsumexp update ----
        row_sum = jnp.sum(e, axis=1, keepdims=True)              # (tm, 1)
        m_old = row_m[...]
        m_new = jnp.maximum(m_old, m_t)
        row_l[...] = (row_l[...] * jnp.exp(m_old - m_new)
                      + row_sum * jnp.exp(m_t - m_new))
        row_m[...] = m_new

        # ---- online column logsumexp update ((n_j, tn) persistent scratch) ----
        col_sum = jnp.sum(e, axis=0, keepdims=True)              # (1, tn)
        cs = pl.ds(j, 1)
        cm_old = col_m[cs, :]
        cm_new = jnp.maximum(cm_old, m_t)
        col_l[cs, :] = (col_l[cs, :] * jnp.exp(cm_old - cm_new)
                        + col_sum * jnp.exp(m_t - cm_new))
        col_m[cs, :] = cm_new

        # ---- diagonal (labels = arange), read from the same f32 logits ----
        row0 = i * tm
        col0 = j * tn
        hits_diag = jnp.logical_and(row0 < col0 + tn, col0 < row0 + tm)

        @pl.when(hits_diag)
        def _():
            rel = (jax.lax.broadcasted_iota(jnp.int32, (tm, tn), 0)
                   - jax.lax.broadcasted_iota(jnp.int32, (tm, tn), 1))
            diag = jnp.where(rel == (col0 - row0), logits, 0.0)
            acc[1] = acc[1] + jnp.sum(diag)

        # ---- finish this row tile: fold its logsumexp into the scalar sum ----
        @pl.when(j == n_j - 1)
        def _():
            acc[0] = acc[0] + jnp.sum(row_m[...] + jnp.log(row_l[...]))

        # ---- final grid step: finish column logsumexp and emit the loss ----
        @pl.when(jnp.logical_and(i == n_i - 1, j == n_j - 1))
        def _():
            col_lse = col_m[...] + jnp.log(col_l[...])           # (n_j, tn)
            total = 0.5 * (acc[0] + jnp.sum(col_lse)) - acc[1]
            out_ref[0, 0] = total * (1.0 / n)

    return kernel


def _pick_tiles(n):
    def pick(cands):
        for t in cands:
            if t <= n and n % t == 0:
                return t
        return n
    tm = pick((1024, 512, 256, 128, 64, 32, 16, 8))   # large row tile: arithmetic intensity
    tn = pick((256, 128, 512, 64, 32, 16, 8))          # 256 matches the MXU width
    return tm, tn


def _vmem_capacity_bytes():
    """Generation-aware physical VMEM; conservative (v7x-sized) fallback."""
    try:
        info = pltpu.get_tpu_info()
        for attr in ("vmem_capacity_bytes", "vmem_size_bytes", "vmem_bytes"):
            v = getattr(info, attr, None)
            if v:
                return int(v)
    except Exception:
        pass
    return 64 << 20


def clip_loss(image_features, text_features, logit_scale, *,
              tm=None, tn=None, use_bf16_matmul=True, text_resident=None):
    """image_features: (N, D), text_features: (N, D), logit_scale: scalar."""
    n, d = image_features.shape
    assert text_features.shape == (n, d)

    img = image_features
    txt = text_features
    if use_bf16_matmul and img.dtype == jnp.float32:
        # bf16 MXU path (f32 accumulation in the kernel); also halves streamed bytes.
        img = img.astype(jnp.bfloat16)
        txt = txt.astype(jnp.bfloat16)

    if tm is None or tn is None:
        auto_tm, auto_tn = _pick_tiles(n)
        tm = tm if tm is not None else auto_tm
        tn = tn if tn is not None else auto_tn
    assert n % tm == 0 and n % tn == 0, "batch size must be divisible by the tile sizes"
    n_i, n_j = n // tm, n // tn
    itemsize = img.dtype.itemsize

    # Generation-aware VMEM budget: leave headroom below physical (v7x: 64 MiB),
    # allow up to ~100 MiB on v5e/v6e (128 MiB physical).
    vmem_cap = _vmem_capacity_bytes()
    budget_cap = max(32 << 20, min(vmem_cap - (12 << 20), 100 << 20))

    f32_temps = 4 * tm * tn * 4                      # logits + e + compiler temps
    img_bufs = 2 * tm * d * itemsize                 # double-buffered image rows
    if text_resident is None:
        text_resident = (2 * n * d * itemsize + img_bufs + f32_temps
                         + (8 << 20)) <= budget_cap

    txt_bufs = (2 * n * d * itemsize) if text_resident else (3 * tn * d * itemsize)
    need = (img_bufs + txt_bufs + f32_temps
            + 2 * n_j * tn * 4 + 2 * tm * 4          # col/row accumulators
            + (8 << 20))                             # Mosaic internal scratch headroom
    vmem_limit = int(max(32 << 20, min(need, budget_cap)))

    scale_arr = jnp.asarray(logit_scale, jnp.float32).reshape(1)

    if text_resident:
        # Full-extent block + constant index_map: fetched once, reused across grid.
        txt_spec = pl.BlockSpec((n, d), lambda i, j: (0, 0))
    else:
        kw = {}
        if n_j >= 3:
            kw["pipeline_mode"] = pl.Buffered(3)     # hide DMA at row-tile boundaries
        txt_spec = pl.BlockSpec((tn, d), lambda i, j: (j, 0), **kw)

    text_reads = n * d if text_resident else n_i * n * d
    cost = pl.CostEstimate(
        flops=2 * n * n * d,
        transcendentals=n * n,
        bytes_accessed=int((n * d + text_reads) * itemsize + 4),
    )

    kernel = _make_clip_loss_kernel(tm, tn, n, text_resident)

    out = pl.pallas_call(
        kernel,
        out_shape=jax.ShapeDtypeStruct((1, 1), jnp.float32),
        grid=(n_i, n_j),
        in_specs=[
            pl.BlockSpec(memory_space=pltpu.MemorySpace.SMEM),   # logit_scale
            pl.BlockSpec((tm, d), lambda i, j: (i, 0)),          # image rows
            txt_spec,                                            # text rows
        ],
        out_specs=pl.BlockSpec(memory_space=pltpu.MemorySpace.SMEM),
        scratch_shapes=[
            pltpu.VMEM((tm, 1), jnp.float32),    # running row max
            pltpu.VMEM((tm, 1), jnp.float32),    # running row sum-exp
            pltpu.VMEM((n_j, tn), jnp.float32),  # running col max   (lane-dense rows)
            pltpu.VMEM((n_j, tn), jnp.float32),  # running col sum-exp
            pltpu.SMEM((2,), jnp.float32),       # [sum_row_lse, sum_diag]
        ],
        compiler_params=pltpu.CompilerParams(
            dimension_semantics=("arbitrary", "arbitrary"),
            vmem_limit_bytes=vmem_limit,
        ),
        cost_estimate=cost,
    )(scale_arr, img, txt)
    return out[0, 0]


def clip_loss_ref(image_features, text_features, logit_scale):
    # Pure-JAX reference matching the PyTorch module.
    logits_img = logit_scale * image_features @ text_features.T
    logits_txt = logit_scale * text_features @ image_features.T
    labels = jnp.arange(logits_img.shape[0])

    def ce(logits):
        lse = logsumexp(logits, axis=-1)
        return jnp.mean(lse - logits[jnp.arange(logits.shape[0]), labels])

    return 0.5 * (ce(logits_img) + ce(logits_txt))


if __name__ == "__main__":
    key = jax.random.PRNGKey(0)
    k1, k2 = jax.random.split(key)

    N, D = 512, 64   # small demo shapes; asymmetric tiles exercise a multi-tile grid
    img = jax.random.normal(k1, (N, D), dtype=jnp.float32)
    txt = jax.random.normal(k2, (N, D), dtype=jnp.float32)
    # L2-normalize as CLIP does upstream of the loss (deterministic "init").
    img = img / jnp.linalg.norm(img, axis=-1, keepdims=True)
    txt = txt / jnp.linalg.norm(txt, axis=-1, keepdims=True)
    logit_scale = jnp.float32(jnp.exp(jnp.float32(2.6592)))  # ~= 1 / 0.07

    # References: the default kernel path runs the MXU in bf16, so compare it
    # against the f32 loss of bf16-quantized features; the f32 kernel path is
    # compared against the exact f32 reference.
    img_q = img.astype(jnp.bfloat16).astype(jnp.float32)
    txt_q = txt.astype(jnp.bfloat16).astype(jnp.float32)
    ref_bf16 = jax.block_until_ready(clip_loss_ref(img_q, txt_q, logit_scale))
    ref_f32 = jax.block_until_ready(clip_loss_ref(img, txt, logit_scale))

    # (a) default: bf16 MXU, auto asymmetric tiles, text pinned in VMEM.
    out_a = jax.block_until_ready(clip_loss(img, txt, logit_scale))
    assert jnp.allclose(out_a, ref_bf16, rtol=1e-4, atol=1e-4), (out_a, ref_bf16)

    # (b) bf16, explicit asymmetric tiles, text VMEM-resident, multi-row-tile grid.
    out_b = jax.block_until_ready(
        clip_loss(img, txt, logit_scale, tm=256, tn=128, text_resident=True))
    assert jnp.allclose(out_b, ref_bf16, rtol=1e-4, atol=1e-4), (out_b, ref_bf16)

    # (c) bf16, streamed text path (3-deep buffering) forced.
    out_c = jax.block_until_ready(
        clip_loss(img, txt, logit_scale, tm=256, tn=128, text_resident=False))
    assert jnp.allclose(out_c, ref_bf16, rtol=1e-4, atol=1e-4), (out_c, ref_bf16)

    # (d) full-f32 path against the exact f32 reference.
    out_d = jax.block_until_ready(
        clip_loss(img, txt, logit_scale, tm=128, tn=128, use_bf16_matmul=False))
    assert jnp.allclose(out_d, ref_f32, rtol=1e-4, atol=1e-4), (out_d, ref_f32)

    print("KERNEL_OK")
</pallas_src>

<mosaic_0001>
module attributes {stable_mosaic.version = 11 : i64} {
  func.func @kernel(%arg0: i32, %arg1: i32, %arg2: memref<1xf32, #tpu.memory_space<smem>>, %arg3: memref<512x64xbf16, #tpu.memory_space<vmem>>, %arg4: memref<512x64xbf16, #tpu.memory_space<vmem>>, %arg5: memref<1x1xf32, #tpu.memory_space<smem>>, %arg6: memref<512x1xf32, #tpu.memory_space<vmem>>, %arg7: memref<512x1xf32, #tpu.memory_space<vmem>>, %arg8: memref<2x256xf32, #tpu.memory_space<vmem>>, %arg9: memref<2x256xf32, #tpu.memory_space<vmem>>, %arg10: memref<2xf32, #tpu.memory_space<smem>>) attributes {dimension_semantics = [#tpu.dimension_semantics<arbitrary>, #tpu.dimension_semantics<arbitrary>], iteration_bounds = array<i64: 1, 2>, scalar_prefetch = 0 : i64, scratch_operands = 5 : i64, tpu.core_type = #tpu.core_type<tc>, window_params = [{transform_indices = @transform_0, window_bounds = array<i64: 1>}, {transform_indices = @transform_1, window_bounds = array<i64: 512, 64>}, {pipeline_mode = #tpu.pipeline_mode<synchronous>, transform_indices = @transform_2, window_bounds = array<i64: 512, 64>}, {transform_indices = @transform_3, window_bounds = array<i64: 1, 1>}]} {
    %c0_i32 = arith.constant 0 : i32
    %0 = arith.cmpi eq, %arg0, %c0_i32 : i32
    %c0_i32_0 = arith.constant 0 : i32
    %1 = arith.cmpi eq, %arg1, %c0_i32_0 : i32
    %2 = arith.andi %0, %1 : i1
    %3 = arith.extui %2 : i1 to i32
    %c0_i32_1 = arith.constant 0 : i32
    %4 = arith.cmpi ne, %3, %c0_i32_1 : i32
    scf.if %4 {
      %cst_30 = arith.constant 0xFF800000 : f32
      %77 = vector.broadcast %cst_30 : f32 to vector<2x256xf32>
      %c0_31 = arith.constant 0 : index
      %c0_32 = arith.constant 0 : index
      %78 = vector.load %arg8[%c0_31, %c0_32] : memref<2x256xf32, #tpu.memory_space<vmem>>, vector<2x256xf32>
      tpu.vector_store %arg8[%c0_31, %c0_32], %77 {strides = array<i32>} : memref<2x256xf32, #tpu.memory_space<vmem>>, vector<2x256xf32>,
      %cst_33 = arith.constant 0.000000e+00 : f32
      %79 = vector.broadcast %cst_33 : f32 to vector<2x256xf32>
      %c0_34 = arith.constant 0 : index
      %c0_35 = arith.constant 0 : index
      %80 = vector.load %arg9[%c0_34, %c0_35] : memref<2x256xf32, #tpu.memory_space<vmem>>, vector<2x256xf32>
      tpu.vector_store %arg9[%c0_34, %c0_35], %79 {strides = array<i32>} : memref<2x256xf32, #tpu.memory_space<vmem>>, vector<2x256xf32>,
      %cst_36 = arith.constant 0.000000e+00 : f32
      %c0_37 = arith.constant 0 : index
      %81 = memref.load %arg10[%c0_37] : memref<2xf32, #tpu.memory_space<smem>>
      memref.store %cst_36, %arg10[%c0_37] : memref<2xf32, #tpu.memory_space<smem>>
      %cst_38 = arith.constant 0.000000e+00 : f32
      %c1 = arith.constant 1 : index
      %82 = memref.load %arg10[%c1] : memref<2xf32, #tpu.memory_space<smem>>
      memref.store %cst_38, %arg10[%c1] : memref<2xf32, #tpu.memory_space<smem>>
    } else {
    }
    %c0_i32_2 = arith.constant 0 : i32
    %5 = arith.cmpi eq, %arg1, %c0_i32_2 : i32
    %6 = arith.extui %5 : i1 to i32
    %c0_i32_3 = arith.constant 0 : i32
    %7 = arith.cmpi ne, %6, %c0_i32_3 : i32
    scf.if %7 {
      %cst_30 = arith.constant 0xFF800000 : f32
      %77 = vector.broadcast %cst_30 : f32 to vector<512x1xf32>
      %c0_31 = arith.constant 0 : index
      %c0_32 = arith.constant 0 : index
      %78 = vector.load %arg6[%c0_31, %c0_32] : memref<512x1xf32, #tpu.memory_space<vmem>>, vector<512x1xf32>
      tpu.vector_store %arg6[%c0_31, %c0_32], %77 {strides = array<i32>} : memref<512x1xf32, #tpu.memory_space<vmem>>, vector<512x1xf32>,
      %cst_33 = arith.constant 0.000000e+00 : f32
      %79 = vector.broadcast %cst_33 : f32 to vector<512x1xf32>
      %c0_34 = arith.constant 0 : index
      %c0_35 = arith.constant 0 : index
      %80 = vector.load %arg7[%c0_34, %c0_35] : memref<512x1xf32, #tpu.memory_space<vmem>>, vector<512x1xf32>
      tpu.vector_store %arg7[%c0_34, %c0_35], %79 {strides = array<i32>} : memref<512x1xf32, #tpu.memory_space<vmem>>, vector<512x1xf32>,
    } else {
    }
    %c0 = arith.constant 0 : index
    %c0_4 = arith.constant 0 : index
    %8 = vector.load %arg3[%c0, %c0_4] : memref<512x64xbf16, #tpu.memory_space<vmem>>, vector<512x64xbf16>
    %c256_i32 = arith.constant 256 : i32
    %9 = arith.muli %arg1, %c256_i32 : i32
    %10 = tpu.assume_multiple %9, 256 : i32
    %11 = arith.index_cast %10 : i32 to index
    %c0_5 = arith.constant 0 : index
    %12 = vector.load %arg4[%11, %c0_5] : memref<512x64xbf16, #tpu.memory_space<vmem>>, vector<256x64xbf16>
    %cst = arith.constant dense<0.000000e+00> : vector<512x256xf32>
    %13 = tpu.matmul %8, %12, %cst {dimension_numbers = #tpu.dot_dimension_numbers<[1], [1], [0], [0], [0, 0, 1, 0], [], []>} : vector<512x64xbf16>, vector<256x64xbf16>, vector<512x256xf32> -> vector<512x256xf32>
    %c0_6 = arith.constant 0 : index
    %14 = memref.load %arg2[%c0_6] : memref<1xf32, #tpu.memory_space<smem>>
    %15 = vector.broadcast %14 : f32 to vector<512x256xf32>
    %16 = arith.mulf %13, %15 : vector<512x256xf32>
    %17 = vector.shape_cast %16 : vector<512x256xf32> to vector<1x512x256xf32>
    %cst_7 = arith.constant dense<0xFF800000> : vector<1xf32>
    %18 = vector.multi_reduction <maximumf>, %17, %cst_7 [1, 2] : vector<1x512x256xf32> to vector<1xf32>
    %19 = vector.shape_cast %18 : vector<1xf32> to vector<1x1x1xf32>
    %20 = vector.extract %19[0, 0, 0] : f32 from vector<1x1x1xf32>
    %21 = vector.broadcast %20 : f32 to vector<512x256xf32>
    %22 = arith.subf %16, %21 : vector<512x256xf32>
    %23 = math.exp %22 : vector<512x256xf32>
    %cst_8 = arith.constant dense<0.000000e+00> : vector<512xf32>
    %24 = vector.multi_reduction <add>, %23, %cst_8 [1] : vector<512x256xf32> to vector<512xf32>
    %25 = vector.shape_cast %24 : vector<512xf32> to vector<512x1xf32>
    %c0_9 = arith.constant 0 : index
    %c0_10 = arith.constant 0 : index
    %26 = vector.load %arg6[%c0_9, %c0_10] : memref<512x1xf32, #tpu.memory_space<vmem>>, vector<512x1xf32>
    %27 = vector.broadcast %20 : f32 to vector<512x1xf32>
    %28 = arith.maximumf %26, %27 : vector<512x1xf32>
    %c0_11 = arith.constant 0 : index
    %c0_12 = arith.constant 0 : index
    %29 = vector.load %arg7[%c0_11, %c0_12] : memref<512x1xf32, #tpu.memory_space<vmem>>, vector<512x1xf32>
    %30 = arith.subf %26, %28 : vector<512x1xf32>
    %31 = math.exp %30 : vector<512x1xf32>
    %32 = arith.mulf %29, %31 : vector<512x1xf32>
    %33 = vector.broadcast %20 : f32 to vector<512x1xf32>
    %34 = arith.subf %33, %28 : vector<512x1xf32>
    %35 = math.exp %34 : vector<512x1xf32>
    %36 = arith.mulf %25, %35 : vector<512x1xf32>
    %37 = arith.addf %32, %36 : vector<512x1xf32>
    %c0_13 = arith.constant 0 : index
    %c0_14 = arith.constant 0 : index
    %38 = vector.load %arg7[%c0_13, %c0_14] : memref<512x1xf32, #tpu.memory_space<vmem>>, vector<512x1xf32>
    tpu.vector_store %arg7[%c0_13, %c0_14], %37 {strides = array<i32>} : memref<512x1xf32, #tpu.memory_space<vmem>>, vector<512x1xf32>,
    %c0_15 = arith.constant 0 : index
    %c0_16 = arith.constant 0 : index
    %39 = vector.load %arg6[%c0_15, %c0_16] : memref<512x1xf32, #tpu.memory_space<vmem>>, vector<512x1xf32>
    tpu.vector_store %arg6[%c0_15, %c0_16], %28 {strides = array<i32>} : memref<512x1xf32, #tpu.memory_space<vmem>>, vector<512x1xf32>,
    %cst_17 = arith.constant dense<0.000000e+00> : vector<256xf32>
    %40 = vector.multi_reduction <add>, %23, %cst_17 [0] : vector<512x256xf32> to vector<256xf32>
    %41 = vector.shape_cast %40 : vector<256xf32> to vector<1x256xf32>
    %42 = arith.index_cast %arg1 : i32 to index
    %c0_18 = arith.constant 0 : index
    %43 = vector.load %arg8[%42, %c0_18] : memref<2x256xf32, #tpu.memory_space<vmem>>, vector<1x256xf32>
    %44 = vector.broadcast %20 : f32 to vector<1x256xf32>
    %45 = arith.maximumf %43, %44 : vector<1x256xf32>
    %46 = arith.index_cast %arg1 : i32 to index
    %c0_19 = arith.constant 0 : index
    %47 = vector.load %arg9[%46, %c0_19] : memref<2x256xf32, #tpu.memory_space<vmem>>, vector<1x256xf32>
    %48 = arith.subf %43, %45 : vector<1x256xf32>
    %49 = math.exp %48 : vector<1x256xf32>
    %50 = arith.mulf %47, %49 : vector<1x256xf32>
    %51 = vector.broadcast %20 : f32 to vector<1x256xf32>
    %52 = arith.subf %51, %45 : vector<1x256xf32>
    %53 = math.exp %52 : vector<1x256xf32>
    %54 = arith.mulf %41, %53 : vector<1x256xf32>
    %55 = arith.addf %50, %54 : vector<1x256xf32>
    %56 = arith.index_cast %arg1 : i32 to index
    %c0_20 = arith.constant 0 : index
    %57 = vector.load %arg9[%56, %c0_20] : memref<2x256xf32, #tpu.memory_space<vmem>>, vector<1x256xf32>
    tpu.vector_store %arg9[%56, %c0_20], %55 {strides = array<i32>} : memref<2x256xf32, #tpu.memory_space<vmem>>, vector<1x256xf32>,
    %58 = arith.index_cast %arg1 : i32 to index
    %c0_21 = arith.constant 0 : index
    %59 = vector.load %arg8[%58, %c0_21] : memref<2x256xf32, #tpu.memory_space<vmem>>, vector<1x256xf32>
    tpu.vector_store %arg8[%58, %c0_21], %45 {strides = array<i32>} : memref<2x256xf32, #tpu.memory_space<vmem>>, vector<1x256xf32>,
    %c512_i32 = arith.constant 512 : i32
    %60 = arith.muli %arg0, %c512_i32 : i32
    %c256_i32_22 = arith.constant 256 : i32
    %61 = arith.muli %arg1, %c256_i32_22 : i32
    %c256_i32_23 = arith.constant 256 : i32
    %62 = arith.addi %61, %c256_i32_23 : i32
    %63 = arith.cmpi slt, %60, %62 : i32
    %c512_i32_24 = arith.constant 512 : i32
    %64 = arith.addi %60, %c512_i32_24 : i32
    %65 = arith.cmpi slt, %61, %64 : i32
    %66 = arith.andi %63, %65 : i1
    %67 = arith.extui %66 : i1 to i32
    %c0_i32_25 = arith.constant 0 : i32
    %68 = arith.cmpi ne, %67, %c0_i32_25 : i32
    scf.if %68 {
      %77 = tpu.iota {dimensions = array<i32: 0>} : vector<512x256xi32>
      %78 = tpu.iota {dimensions = array<i32: 1>} : vector<512x256xi32>
      %79 = arith.subi %77, %78 : vector<512x256xi32>
      %80 = arith.subi %61, %60 : i32
      %81 = vector.broadcast %80 : i32 to vector<512x256xi32>
      %82 = arith.cmpi eq, %79, %81 : vector<512x256xi32>
      %cst_30 = arith.constant 0.000000e+00 : f32
      %83 = vector.broadcast %cst_30 : f32 to vector<512x256xf32>
      %84 = arith.select %82, %16, %83 : vector<512x256xi1>, vector<512x256xf32>
      %c1 = arith.constant 1 : index
      %85 = memref.load %arg10[%c1] : memref<2xf32, #tpu.memory_space<smem>>
      %86 = vector.shape_cast %84 : vector<512x256xf32> to vector<1x512x256xf32>
      %cst_31 = arith.constant dense<0.000000e+00> : vector<1xf32>
      %87 = vector.multi_reduction <add>, %86, %cst_31 [1, 2] : vector<1x512x256xf32> to vector<1xf32>
      %88 = vector.shape_cast %87 : vector<1xf32> to vector<1x1x1xf32>
      %89 = vector.extract %88[0, 0, 0] : f32 from vector<1x1x1xf32>
      %90 = arith.addf %85, %89 : f32
      %c1_32 = arith.constant 1 : index
      %91 = memref.load %arg10[%c1_32] : memref<2xf32, #tpu.memory_space<smem>>
      memref.store %90, %arg10[%c1_32] : memref<2xf32, #tpu.memory_space<smem>>
    } else {
    }
    %c1_i32 = arith.constant 1 : i32
    %69 = arith.cmpi eq, %arg1, %c1_i32 : i32
    %70 = arith.extui %69 : i1 to i32
    %c0_i32_26 = arith.constant 0 : i32
    %71 = arith.cmpi ne, %70, %c0_i32_26 : i32
    scf.if %71 {
      %c0_30 = arith.constant 0 : index
      %77 = memref.load %arg10[%c0_30] : memref<2xf32, #tpu.memory_space<smem>>
      %c0_31 = arith.constant 0 : index
      %c0_32 = arith.constant 0 : index
      %78 = vector.load %arg6[%c0_31, %c0_32] : memref<512x1xf32, #tpu.memory_space<vmem>>, vector<512x1xf32>
      %c0_33 = arith.constant 0 : index
      %c0_34 = arith.constant 0 : index
      %79 = vector.load %arg7[%c0_33, %c0_34] : memref<512x1xf32, #tpu.memory_space<vmem>>, vector<512x1xf32>
      %80 = math.log %79 : vector<512x1xf32>
      %81 = arith.addf %78, %80 : vector<512x1xf32>
      %82 = vector.shape_cast %81 : vector<512x1xf32> to vector<1x512x1xf32>
      %cst_35 = arith.constant dense<0.000000e+00> : vector<1xf32>
      %83 = vector.multi_reduction <add>, %82, %cst_35 [1, 2] : vector<1x512x1xf32> to vector<1xf32>
      %84 = vector.shape_cast %83 : vector<1xf32> to vector<1x1x1xf32>
      %85 = vector.extract %84[0, 0, 0] : f32 from vector<1x1x1xf32>
      %86 = arith.addf %77, %85 : f32
      %c0_36 = arith.constant 0 : index
      %87 = memref.load %arg10[%c0_36] : memref<2xf32, #tpu.memory_space<smem>>
      memref.store %86, %arg10[%c0_36] : memref<2xf32, #tpu.memory_space<smem>>
    } else {
    }
    %c0_i32_27 = arith.constant 0 : i32
    %72 = arith.cmpi eq, %arg0, %c0_i32_27 : i32
    %c1_i32_28 = arith.constant 1 : i32
    %73 = arith.cmpi eq, %arg1, %c1_i32_28 : i32
    %74 = arith.andi %72, %73 : i1
    %75 = arith.extui %74 : i1 to i32
    %c0_i32_29 = arith.constant 0 : i32
    %76 = arith.cmpi ne, %75, %c0_i32_29 : i32
    scf.if %76 {
      %c0_30 = arith.constant 0 : index
      %c0_31 = arith.constant 0 : index
      %77 = vector.load %arg8[%c0_30, %c0_31] : memref<2x256xf32, #tpu.memory_space<vmem>>, vector<2x256xf32>
      %c0_32 = arith.constant 0 : index
      %c0_33 = arith.constant 0 : index
      %78 = vector.load %arg9[%c0_32, %c0_33] : memref<2x256xf32, #tpu.memory_space<vmem>>, vector<2x256xf32>
      %79 = math.log %78 : vector<2x256xf32>
      %80 = arith.addf %77, %79 : vector<2x256xf32>
      %c0_34 = arith.constant 0 : index
      %81 = memref.load %arg10[%c0_34] : memref<2xf32, #tpu.memory_space<smem>>
      %82 = vector.shape_cast %80 : vector<2x256xf32> to vector<1x2x256xf32>
      %cst_35 = arith.constant dense<0.000000e+00> : vector<1xf32>
      %83 = vector.multi_reduction <add>, %82, %cst_35 [1, 2] : vector<1x2x256xf32> to vector<1xf32>
      %84 = vector.shape_cast %83 : vector<1xf32> to vector<1x1x1xf32>
      %85 = vector.extract %84[0, 0, 0] : f32 from vector<1x1x1xf32>
      %86 = arith.addf %81, %85 : f32
      %cst_36 = arith.constant 5.000000e-01 : f32
      %87 = arith.mulf %cst_36, %86 : f32
      %c1 = arith.constant 1 : index
      %88 = memref.load %arg10[%c1] : memref<2xf32, #tpu.memory_space<smem>>
      %89 = arith.subf %87, %88 : f32
      %cst_37 = arith.constant 0.001953125 : f32
      %90 = arith.mulf %89, %cst_37 : f32
      %c0_38 = arith.constant 0 : index
      %c0_39 = arith.constant 0 : index
      %91 = memref.load %arg5[%c0_38, %c0_39] : memref<1x1xf32, #tpu.memory_space<smem>>
      memref.store %90, %arg5[%c0_38, %c0_39] : memref<1x1xf32, #tpu.memory_space<smem>>
    } else {
    }
    return
  }
  func.func @transform_0(%arg0: i32, %arg1: i32) -> i32 {
    %c0_i32 = arith.constant 0 : i32
    %c0_i32_0 = arith.constant 0 : i32
    return %c0_i32 : i32
  }
  func.func @transform_1(%arg0: i32, %arg1: i32) -> (i32, i32) {
    %c0_i32 = arith.constant 0 : i32
    %c0_i32_0 = arith.constant 0 : i32
    return %arg0, %c0_i32 : i32, i32
  }
  func.func @transform_2(%arg0: i32, %arg1: i32) -> (i32, i32) {
    %c0_i32 = arith.constant 0 : i32
    %c0_i32_0 = arith.constant 0 : i32
    %c0_i32_1 = arith.constant 0 : i32
    return %c0_i32, %c0_i32_0 : i32, i32
  }
  func.func @transform_3(%arg0: i32, %arg1: i32) -> (i32, i32) {
    %c0_i32 = arith.constant 0 : i32
    %c0_i32_0 = arith.constant 0 : i32
    %c0_i32_1 = arith.constant 0 : i32
    return %c0_i32, %c0_i32_0 : i32, i32
  }
}

</mosaic_0001>

<bundles_post_ra>
// kernel: tpu_custom_call.1
= control target key start
LH: loop header
LB: loop body
LE: loop exit
PB: predicated region body
PF: predicated region fallthrough
CT: control target
= control target key end

     0   :  { %s10821_s0 = inlined_call_operand.<no memory space> [shape: f32[1], index: 0, kind: input, shape index: {}]   ;;  %s10822_s1 = inlined_call_operand.vmem [shape: bf16[512,64], index: 1, kind: input, shape index: {}]   ;;  %s10823_s2 = inlined_call_operand.vmem [shape: bf16[512,64], index: 2, kind: input, shape index: {}]   ;;  %s10824_s3 = inlined_call_operand.hbm [shape: f32[1,1], index: 3, kind: output, shape index: {}]  }
   0x1   :  { %8 = sst [smem:[#allocation7]] %s10821_s0 }
   0x2   :  { %9 = vsyncpa [#allocation9], 0  ;;  %s5287_s14 = smov 0   ;;  %s5289_s15 = smov 0  }
   0x3   :  { %s5291_s16 = smov 0  }
   0x4 LB: > { %s4264_s0 = sadd.s32 4294967295, %s5254_s16   ;;  %s24_s17 = sadd.s32 1, %s5250_s15  ;;  %s5254_s16 = sphi %s5291_s16, %s15_s16   ;;  %s5250_s15 = sphi %s5289_s15, %s12502_s15   ;;  %s5246_s14 = sphi %s5287_s14, %s12501_s14  }
   0x5   : > { %p25_p0 = scmp.ge.s32.totalorder %s24_s17, 2  ;;  %p4267_p1 = scmp.ge.s32.totalorder %s5254_s16, 1 }
   0x6   : > { %p147_p2 = scmp.lt.s32.totalorder %s5254_s16, 3 }
   0x7   : > { %s12504_s17 = smov (%p25_p0, %s24_s17), 0 }
   0x8   : > { %p148_p3 = pnand %p4267_p1, %p147_p2 }
   0xa   : > { %151 = sbr.rel (%p148_p3) target bundleno = 2220 (0x8ac), region = 32 }
   0xf   : > { %p174_p4 = scmp.eq.s32.totalorder %s5246_s14, 0 }
  0x10   : > { %v5256_v0 = vmov (%p174_p4), -inf   ;;  %v5257_v1 = vmov (%p174_p4), 0.0   ;;  %s5258_s18 = smov (%p174_p4), 0.0  }
  0x11   : > { %178 = sbr.rel (!%p174_p4) target bundleno = 22 (0x16), region = 36  ;;  %179 = vst [vmem:[#allocation4] sm:$0xf] (%p174_p4), %v5256_v0  ;;  %180 = vst [vmem:[#allocation5] sm:$0xf] (%p174_p4), %v5257_v1  ;;  %182 = sst [smem:[#allocation6]] (%p174_p4), %s5258_s18 }
  0x12   : > { %184 = sst [smem:[#allocation6 + $0x1]] (%p174_p4), %s5258_s18 }
  0x16 PF: > { %p4269_p5 = scmp.ne.s32.totalorder %s5246_s14, 0 }
  0x18   : > { %187 = sbr.rel (%p4269_p5) target bundleno = 94 (0x5e), region = 40 }
  0x1d   : > { %vm188_vm0 = vcmask 7168   ;;  %v5259_v2 = vmov -inf   ;;  %v5260_v3 = vmov 0.0  }
  0x1e   : > { %189 = vst.msk [vmem:[#allocation2] sm:$0xff] %vm188_vm0, %v5259_v2  ;;  %190 = vst.msk [vmem:[#allocation2 + $0x8] sm:$0xff] %vm188_vm0, %v5259_v2 }
  0x1f   : > { %191 = vst.msk [vmem:[#allocation2 + $0x10] sm:$0xff] %vm188_vm0, %v5259_v2  ;;  %192 = vst.msk [vmem:[#allocation2 + $0x18] sm:$0xff] %vm188_vm0, %v5259_v2 }
  0x20   : > { %193 = vst.msk [vmem:[#allocation2 + $0x20] sm:$0xff] %vm188_vm0, %v5259_v2  ;;  %194 = vst.msk [vmem:[#allocation2 + $0x28] sm:$0xff] %vm188_vm0, %v5259_v2 }
  0x21   : > { %195 = vst.msk [vmem:[#allocation2 + $0x30] sm:$0xff] %vm188_vm0, %v5259_v2  ;;  %196 = vst.msk [vmem:[#allocation2 + $0x38] sm:$0xff] %vm188_vm0, %v5259_v2 }
  0x22   : > { %197 = vst.msk [vmem:[#allocation2 + $0x40] sm:$0xff] %vm188_vm0, %v5259_v2  ;;  %198 = vst.msk [vmem:[#allocation2 + $0x48] sm:$0xff] %vm188_vm0, %v5259_v2 }
  0x23   : > { %199 = vst.msk [vmem:[#allocation2 + $0x50] sm:$0xff] %vm188_vm0, %v5259_v2  ;;  %200 = vst.msk [vmem:[#allocation2 + $0x58] sm:$0xff] %vm188_vm0, %v5259_v2 }
  0x24   : > { %201 = vst.msk [vmem:[#allocation2 + $0x60] sm:$0xff] %vm188_vm0, %v5259_v2  ;;  %202 = vst.msk [vmem:[#allocation2 + $0x68] sm:$0xff] %vm188_vm0, %v5259_v2 }
  0x25   : > { %203 = vst.msk [vmem:[#allocation2 + $0x70] sm:$0xff] %vm188_vm0, %v5259_v2  ;;  %204 = vst.msk [vmem:[#allocation2 + $0x78] sm:$0xff] %vm188_vm0, %v5259_v2 }
  0x26   : > { %205 = vst.msk [vmem:[#allocation2 + $0x80] sm:$0xff] %vm188_vm0, %v5259_v2  ;;  %206 = vst.msk [vmem:[#allocation2 + $0x88] sm:$0xff] %vm188_vm0, %v5259_v2 }
  0x27   : > { %207 = vst.msk [vmem:[#allocation2 + $0x90] sm:$0xff] %vm188_vm0, %v5259_v2  ;;  %208 = vst.msk [vmem:[#allocation2 + $0x98] sm:$0xff] %vm188_vm0, %v5259_v2 }
  0x28   : > { %209 = vst.msk [vmem:[#allocation2 + $0xa0] sm:$0xff] %vm188_vm0, %v5259_v2  ;;  %210 = vst.msk [vmem:[#allocation2 + $0xa8] sm:$0xff] %vm188_vm0, %v5259_v2 }
  0x29   : > { %211 = vst.msk [vmem:[#allocation2 + $0xb0] sm:$0xff] %vm188_vm0, %v5259_v2  ;;  %212 = vst.msk [vmem:[#allocation2 + $0xb8] sm:$0xff] %vm188_vm0, %v5259_v2 }
  0x2a   : > { %213 = vst.msk [vmem:[#allocation2 + $0xc0] sm:$0xff] %vm188_vm0, %v5259_v2  ;;  %214 = vst.msk [vmem:[#allocation2 + $0xc8] sm:$0xff] %vm188_vm0, %v5259_v2 }
  0x2b   : > { %215 = vst.msk [vmem:[#allocation2 + $0xd0] sm:$0xff] %vm188_vm0, %v5259_v2  ;;  %216 = vst.msk [vmem:[#allocation2 + $0xd8] sm:$0xff] %vm188_vm0, %v5259_v2 }
  0x2c   : > { %217 = vst.msk [vmem:[#allocation2 + $0xe0] sm:$0xff] %vm188_vm0, %v5259_v2  ;;  %218 = vst.msk [vmem:[#allocation2 + $0xe8] sm:$0xff] %vm188_vm0, %v5259_v2 }
  0x2d   : > { %219 = vst.msk [vmem:[#allocation2 + $0xf0] sm:$0xff] %vm188_vm0, %v5259_v2  ;;  %220 = vst.msk [vmem:[#allocation2 + $0xf8] sm:$0xff] %vm188_vm0, %v5259_v2 }
  0x2e   : > { %221 = vst.msk [vmem:[#allocation2 + $0x100] sm:$0xff] %vm188_vm0, %v5259_v2  ;;  %222 = vst.msk [vmem:[#allocation2 + $0x108] sm:$0xff] %vm188_vm0, %v5259_v2 }
  0x2f   : > { %223 = vst.msk [vmem:[#allocation2 + $0x110] sm:$0xff] %vm188_vm0, %v5259_v2  ;;  %224 = vst.msk [vmem:[#allocation2 + $0x118] sm:$0xff] %vm188_vm0, %v5259_v2 }
  0x30   : > { %225 = vst.msk [vmem:[#allocation2 + $0x120] sm:$0xff] %vm188_vm0, %v5259_v2  ;;  %226 = vst.msk [vmem:[#allocation2 + $0x128] sm:$0xff] %vm188_vm0, %v5259_v2 }
  0x31   : > { %227 = vst.msk [vmem:[#allocation2 + $0x130] sm:$0xff] %vm188_vm0, %v5259_v2  ;;  %228 = vst.msk [vmem:[#allocation2 + $0x138] sm:$0xff] %vm188_vm0, %v5259_v2 }
  0x32   : > { %229 = vst.msk [vmem:[#allocation2 + $0x140] sm:$0xff] %vm188_vm0, %v5259_v2  ;;  %230 = vst.msk [vmem:[#allocation2 + $0x148] sm:$0xff] %vm188_vm0, %v5259_v2 }
  0x33   : > { %231 = vst.msk [vmem:[#allocation2 + $0x150] sm:$0xff] %vm188_vm0, %v5259_v2  ;;  %232 = vst.msk [vmem:[#allocation2 + $0x158] sm:$0xff] %vm188_vm0, %v5259_v2 }
  0x34   : > { %233 = vst.msk [vmem:[#allocation2 + $0x160] sm:$0xff] %vm188_vm0, %v5259_v2  ;;  %234 = vst.msk [vmem:[#allocation2 + $0x168] sm:$0xff] %vm188_vm0, %v5259_v2 }
  0x35   : > { %235 = vst.msk [vmem:[#allocation2 + $0x170] sm:$0xff] %vm188_vm0, %v5259_v2  ;;  %236 = vst.msk [vmem:[#allocation2 + $0x178] sm:$0xff] %vm188_vm0, %v5259_v2 }
  0x36   : > { %237 = vst.msk [vmem:[#allocation2 + $0x180] sm:$0xff] %vm188_vm0, %v5259_v2  ;;  %238 = vst.msk [vmem:[#allocation2 + $0x188] sm:$0xff] %vm188_vm0, %v5259_v2 }
  0x37   : > { %239 = vst.msk [vmem:[#allocation2 + $0x190] sm:$0xff] %vm188_vm0, %v5259_v2  ;;  %240 = vst.msk [vmem:[#allocation2 + $0x198] sm:$0xff] %vm188_vm0, %v5259_v2 }
  0x38   : > { %241 = vst.msk [vmem:[#allocation2 + $0x1a0] sm:$0xff] %vm188_vm0, %v5259_v2  ;;  %242 = vst.msk [vmem:[#allocation2 + $0x1a8] sm:$0xff] %vm188_vm0, %v5259_v2 }
  0x39   : > { %243 = vst.msk [vmem:[#allocation2 + $0x1b0] sm:$0xff] %vm188_vm0, %v5259_v2  ;;  %244 = vst.msk [vmem:[#allocation2 + $0x1b8] sm:$0xff] %vm188_vm0, %v5259_v2 }
  0x3a   : > { %245 = vst.msk [vmem:[#allocation2 + $0x1c0] sm:$0xff] %vm188_vm0, %v5259_v2  ;;  %246 = vst.msk [vmem:[#allocation2 + $0x1c8] sm:$0xff] %vm188_vm0, %v5259_v2 }
  0x3b   : > { %247 = vst.msk [vmem:[#allocation2 + $0x1d0] sm:$0xff] %vm188_vm0, %v5259_v2  ;;  %248 = vst.msk [vmem:[#allocation2 + $0x1d8] sm:$0xff] %vm188_vm0, %v5259_v2 }
  0x3c   : > { %249 = vst.msk [vmem:[#allocation2 + $0x1e0] sm:$0xff] %vm188_vm0, %v5259_v2  ;;  %250 = vst.msk [vmem:[#allocation2 + $0x1e8] sm:$0xff] %vm188_vm0, %v5259_v2 }
  0x3d   : > { %251 = vst.msk [vmem:[#allocation2 + $0x1f0] sm:$0xff] %vm188_vm0, %v5259_v2  ;;  %252 = vst.msk [vmem:[#allocation2 + $0x1f8] sm:$0xff] %vm188_vm0, %v5259_v2 }
  0x3e   : > { %253 = vst.msk [vmem:[#allocation3] sm:$0xff] %vm188_vm0, %v5260_v3  ;;  %254 = vst.msk [vmem:[#allocation3 + $0x8] sm:$0xff] %vm188_vm0, %v5260_v3 }
  0x3f   : > { %255 = vst.msk [vmem:[#allocation3 + $0x10] sm:$0xff] %vm188_vm0, %v5260_v3  ;;  %256 = vst.msk [vmem:[#allocation3 + $0x18] sm:$0xff] %vm188_vm0, %v5260_v3 }
  0x40   : > { %257 = vst.msk [vmem:[#allocation3 + $0x20] sm:$0xff] %vm188_vm0, %v5260_v3  ;;  %258 = vst.msk [vmem:[#allocation3 + $0x28] sm:$0xff] %vm188_vm0, %v5260_v3 }
  0x41   : > { %259 = vst.msk [vmem:[#allocation3 + $0x30] sm:$0xff] %vm188_vm0, %v5260_v3  ;;  %260 = vst.msk [vmem:[#allocation3 + $0x38] sm:$0xff] %vm188_vm0, %v5260_v3 }
  0x42   : > { %261 = vst.msk [vmem:[#allocation3 + $0x40] sm:$0xff] %vm188_vm0, %v5260_v3  ;;  %262 = vst.msk [vmem:[#allocation3 + $0x48] sm:$0xff] %vm188_vm0, %v5260_v3 }
  0x43   : > { %263 = vst.msk [vmem:[#allocation3 + $0x50] sm:$0xff] %vm188_vm0, %v5260_v3  ;;  %264 = vst.msk [vmem:[#allocation3 + $0x58] sm:$0xff] %vm188_vm0, %v5260_v3 }
  0x44   : > { %265 = vst.msk [vmem:[#allocation3 + $0x60] sm:$0xff] %vm188_vm0, %v5260_v3  ;;  %266 = vst.msk [vmem:[#allocation3 + $0x68] sm:$0xff] %vm188_vm0, %v5260_v3 }
  0x45   : > { %267 = vst.msk [vmem:[#allocation3 + $0x70] sm:$0xff] %vm188_vm0, %v5260_v3  ;;  %268 = vst.msk [vmem:[#allocation3 + $0x78] sm:$0xff] %vm188_vm0, %v5260_v3 }
  0x46   : > { %269 = vst.msk [vmem:[#allocation3 + $0x80] sm:$0xff] %vm188_vm0, %v5260_v3  ;;  %270 = vst.msk [vmem:[#allocation3 + $0x88] sm:$0xff] %vm188_vm0, %v5260_v3 }
  0x47   : > { %271 = vst.msk [vmem:[#allocation3 + $0x90] sm:$0xff] %vm188_vm0, %v5260_v3  ;;  %272 = vst.msk [vmem:[#allocation3 + $0x98] sm:$0xff] %vm188_vm0, %v5260_v3 }
  0x48   : > { %273 = vst.msk [vmem:[#allocation3 + $0xa0] sm:$0xff] %vm188_vm0, %v5260_v3  ;;  %274 = vst.msk [vmem:[#allocation3 + $0xa8] sm:$0xff] %vm188_vm0, %v5260_v3 }
  0x49   : > { %275 = vst.msk [vmem:[#allocation3 + $0xb0] sm:$0xff] %vm188_vm0, %v5260_v3  ;;  %276 = vst.msk [vmem:[#allocation3 + $0xb8] sm:$0xff] %vm188_vm0, %v5260_v3 }
  0x4a   : > { %277 = vst.msk [vmem:[#allocation3 + $0xc0] sm:$0xff] %vm188_vm0, %v5260_v3  ;;  %278 = vst.msk [vmem:[#allocation3 + $0xc8] sm:$0xff] %vm188_vm0, %v5260_v3 }
  0x4b   : > { %279 = vst.msk [vmem:[#allocation3 + $0xd0] sm:$0xff] %vm188_vm0, %v5260_v3  ;;  %280 = vst.msk [vmem:[#allocation3 + $0xd8] sm:$0xff] %vm188_vm0, %v5260_v3 }
  0x4c   : > { %281 = vst.msk [vmem:[#allocation3 + $0xe0] sm:$0xff] %vm188_vm0, %v5260_v3  ;;  %282 = vst.msk [vmem:[#allocation3 + $0xe8] sm:$0xff] %vm188_vm0, %v5260_v3 }
  0x4d   : > { %283 = vst.msk [vmem:[#allocation3 + $0xf0] sm:$0xff] %vm188_vm0, %v5260_v3  ;;  %284 = vst.msk [vmem:[#allocation3 + $0xf8] sm:$0xff] %vm188_vm0, %v5260_v3 }
  0x4e   : > { %285 = vst.msk [vmem:[#allocation3 + $0x100] sm:$0xff] %vm188_vm0, %v5260_v3  ;;  %286 = vst.msk [vmem:[#allocation3 + $0x108] sm:$0xff] %vm188_vm0, %v5260_v3 }
  0x4f   : > { %287 = vst.msk [vmem:[#allocation3 + $0x110] sm:$0xff] %vm188_vm0, %v5260_v3  ;;  %288 = vst.msk [vmem:[#allocation3 + $0x118] sm:$0xff] %vm188_vm0, %v5260_v3 }
  0x50   : > { %289 = vst.msk [vmem:[#allocation3 + $0x120] sm:$0xff] %vm188_vm0, %v5260_v3  ;;  %290 = vst.msk [vmem:[#allocation3 + $0x128] sm:$0xff] %vm188_vm0, %v5260_v3 }
  0x51   : > { %291 = vst.msk [vmem:[#allocation3 + $0x130] sm:$0xff] %vm188_vm0, %v5260_v3  ;;  %292 = vst.msk [vmem:[#allocation3 + $0x138] sm:$0xff] %vm188_vm0, %v5260_v3 }
  0x52   : > { %293 = vst.msk [vmem:[#allocation3 + $0x140] sm:$0xff] %vm188_vm0, %v5260_v3  ;;  %294 = vst.msk [vmem:[#allocation3 + $0x148] sm:$0xff] %vm188_vm0, %v5260_v3 }
  0x53   : > { %295 = vst.msk [vmem:[#allocation3 + $0x150] sm:$0xff] %vm188_vm0, %v5260_v3  ;;  %296 = vst.msk [vmem:[#allocation3 + $0x158] sm:$0xff] %vm188_vm0, %v5260_v3 }
  0x54   : > { %297 = vst.msk [vmem:[#allocation3 + $0x160] sm:$0xff] %vm188_vm0, %v5260_v3  ;;  %298 = vst.msk [vmem:[#allocation3 + $0x168] sm:$0xff] %vm188_vm0, %v5260_v3 }
  0x55   : > { %299 = vst.msk [vmem:[#allocation3 + $0x170] sm:$0xff] %vm188_vm0, %v5260_v3  ;;  %300 = vst.msk [vmem:[#allocation3 + $0x178] sm:$0xff] %vm188_vm0, %v5260_v3 }
  0x56   : > { %301 = vst.msk [vmem:[#allocation3 + $0x180] sm:$0xff] %vm188_vm0, %v5260_v3  ;;  %302 = vst.msk [vmem:[#allocation3 + $0x188] sm:$0xff] %vm188_vm0, %v5260_v3 }
  0x57   : > { %303 = vst.msk [vmem:[#allocation3 + $0x190] sm:$0xff] %vm188_vm0, %v5260_v3  ;;  %304 = vst.msk [vmem:[#allocation3 + $0x198] sm:$0xff] %vm188_vm0, %v5260_v3 }
  0x58   : > { %305 = vst.msk [vmem:[#allocation3 + $0x1a0] sm:$0xff] %vm188_vm0, %v5260_v3  ;;  %306 = vst.msk [vmem:[#allocation3 + $0x1a8] sm:$0xff] %vm188_vm0, %v5260_v3 }
  0x59   : > { %307 = vst.msk [vmem:[#allocation3 + $0x1b0] sm:$0xff] %vm188_vm0, %v5260_v3  ;;  %308 = vst.msk [vmem:[#allocation3 + $0x1b8] sm:$0xff] %vm188_vm0, %v5260_v3 }
  0x5a   : > { %309 = vst.msk [vmem:[#allocation3 + $0x1c0] sm:$0xff] %vm188_vm0, %v5260_v3  ;;  %310 = vst.msk [vmem:[#allocation3 + $0x1c8] sm:$0xff] %vm188_vm0, %v5260_v3 }
  0x5b   : > { %311 = vst.msk [vmem:[#allocation3 + $0x1d0] sm:$0xff] %vm188_vm0, %v5260_v3  ;;  %312 = vst.msk [vmem:[#allocation3 + $0x1d8] sm:$0xff] %vm188_vm0, %v5260_v3 }
  0x5c   : > { %313 = vst.msk [vmem:[#allocation3 + $0x1e0] sm:$0xff] %vm188_vm0, %v5260_v3  ;;  %314 = vst.msk [vmem:[#allocation3 + $0x1e8] sm:$0xff] %vm188_vm0, %v5260_v3 }
  0x5d   : > { %315 = vst.msk [vmem:[#allocation3 + $0x1f0] sm:$0xff] %vm188_vm0, %v5260_v3  ;;  %316 = vst.msk [vmem:[#allocation3 + $0x1f8] sm:$0xff] %vm188_vm0, %v5260_v3 }
  0x5e PF: > { %s5567_s19 = sshll.u32 %s5246_s14, 8  ;;  %vm658_vm1 = vcmask 523264   ;;  %v5574_v4 = vld [vmem:[%s10822_s1] sm:$0xff]   ;;  %v4541_v30 = vld [vmem:[%s10822_s1 + $0x8] sm:$0xff]   ;;  %v4542_v32 = vld [vmem:[%s10822_s1 + $0x10] sm:$0xff]   ;;  %s3034_s30 = sshra.s32 %s5246_s14, 1 }
  0x5f   : > { %s382_s20 = sshra.s32 %s5567_s19, 3  ;;  %s3092_s21 = sadd.s32 256, %s5567_s19  ;;  %4382 = vmatprep.mubr.msk.bf16.mxu0 %vm658_vm1, %v5574_v4  ;;  %v4544_v15 = vld [vmem:[%s10822_s1 + $0x80] sm:$0xff]   ;;  %v4546_v31 = vld [vmem:[%s10822_s1 + $0x88] sm:$0xff]   ;;  %v4548_v33 = vld [vmem:[%s10822_s1 + $0x90] sm:$0xff]   ;;  %vm11100_vm3 = vcmask 7168  }
  0x60   : > { %s4271_s24 = sshll.u32 %s382_s20, 2  ;;  %p4354_p6 = scmp.gt.s32.totalorder %s3092_s21, 0  ;;  %4414 = vmatprep.mubr.msk.bf16.mxu1 %vm658_vm1, %v4544_v15  ;;  %v4543_v34 = vld [vmem:[%s10822_s1 + $0x18] sm:$0xff]   ;;  %v4545_v36 = vld [vmem:[%s10822_s1 + $0x20] sm:$0xff]   ;;  %v4547_v38 = vld [vmem:[%s10822_s1 + $0x28] sm:$0xff]  }
  0x61   : > { %s5579_s27 = scalar_lea.vmem %s10823_s2, %s4271_s24  ;;  %p3095_p7 = scmp.lt.s32.totalorder %s5567_s19, 512  ;;  %v4550_v35 = vld [vmem:[%s10822_s1 + $0x98] sm:$0xff]   ;;  %v4552_v37 = vld [vmem:[%s10822_s1 + $0xa0] sm:$0xff]   ;;  %v4554_v39 = vld [vmem:[%s10822_s1 + $0xa8] sm:$0xff]  }
  0x62   : > { %v4524_v5 = vld [vmem:[%s5579_s27 + $0x78] sm:$0xff]   ;;  %v4526_v7 = vld [vmem:[%s5579_s27 + $0x70] sm:$0xff]   ;;  %v4528_v11 = vld [vmem:[%s5579_s27 + $0x68] sm:$0xff]   ;;  %s3037_s4 = sand.u32 1, %s5246_s14  ;;  %s4364_s5 = sshll.u32 %s3034_s30, 2 }
  0x63   : > { %p5585_p8 = pnand %p4354_p6, %p3095_p7  ;;  %v4525_v6 = vld [vmem:[%s5579_s27 + $0x38] sm:$0xff]   ;;  %4462 = vmatprep.subr.msk.bf16.mxu0 %vm658_vm1, %v4524_v5  ;;  %4463 = vmatprep.subr.msk.bf16.mxu1 %vm658_vm1, %v4524_v5  ;;  %v4527_v9 = vld [vmem:[%s5579_s27 + $0x30] sm:$0xff]   ;;  %v4529_v12 = vld [vmem:[%s5579_s27 + $0x28] sm:$0xff]   ;;  %s6559_s6 = sadd.s32 %s4364_s5, %s3037_s4 }
  0x64   : > { %v777_v8 = vsel %vm658_vm1, %v4525_v6, 0  ;;  %v774_v10 = vsel %vm658_vm1, %v4527_v9, 0  ;;  %v4530_v13 = vld [vmem:[%s5579_s27 + $0x60] sm:$0xff]   ;;  %v771_v14 = vsel %vm658_vm1, %v4529_v12, 0  ;;  %v4532_v18 = vld [vmem:[%s5579_s27 + $0x58] sm:$0xff]   ;;  %v4534_v21 = vld [vmem:[%s5579_s27 + $0x50] sm:$0xff]  }
  0x65   : > { %4367 = vmatpush3.bf16.xpose.msra.mxu0 %v777_v8  ;;  %4454 = vmatpush3.bf16.xpose.msra.mxu1 %v777_v8  ;;  %v4531_v16 = vld [vmem:[%s5579_s27 + $0x20] sm:$0xff]   ;;  %v4533_v19 = vld [vmem:[%s5579_s27 + $0x18] sm:$0xff]   ;;  %v4535_v22 = vld [vmem:[%s5579_s27 + $0x10] sm:$0xff]   ;;  %s3041_s7 = scalar_lea.vmem [#allocation4], %s6559_s6  ;;  %s3044_s8 = scalar_lea.vmem [#allocation5], %s6559_s6 }
  0x66   : > { %4464 = vmatprep.subr.msk.bf16.mxu0 %vm658_vm1, %v4526_v7  ;;  %4465 = vmatprep.subr.msk.bf16.mxu1 %vm658_vm1, %v4526_v7  ;;  %v768_v17 = vsel %vm658_vm1, %v4531_v16, 0  ;;  %v765_v20 = vsel %vm658_vm1, %v4533_v19, 0  ;;  %v762_v23 = vsel %vm658_vm1, %v4535_v22, 0  ;;  %v4536_v24 = vld [vmem:[%s5579_s27 + $0x48] sm:$0xff]   ;;  %v4538_v27 = vld [vmem:[%s5579_s27 + $0x40] sm:$0xff]   ;;  %v4549_v40 = vld [vmem:[%s10822_s1 + $0x30] sm:$0xff]  }
  0x67   : > { %v4537_v25 = vld [vmem:[%s5579_s27 + $0x8] sm:$0xff]   ;;  %v4539_v28 = vld [vmem:[%s5579_s27] sm:$0xff]   ;;  %v4556_v41 = vld [vmem:[%s10822_s1 + $0xb0] sm:$0xff]   ;;  %s1156_s27 = sld [smem:[#allocation7]] }
  0x68   : > { %v759_v26 = vsel %vm658_vm1, %v4537_v25, 0  ;;  %v756_v29 = vsel %vm658_vm1, %v4539_v28, 0  ;;  %v4551_v42 = vld [vmem:[%s10822_s1 + $0x38] sm:$0xff]   ;;  %v4553_v44 = vld [vmem:[%s10822_s1 + $0x40] sm:$0xff]   ;;  %v4555_v46 = vld [vmem:[%s10822_s1 + $0x48] sm:$0xff]  }
  0x69   : > { %v4558_v43 = vld [vmem:[%s10822_s1 + $0xb8] sm:$0xff]   ;;  %v4560_v45 = vld [vmem:[%s10822_s1 + $0xc0] sm:$0xff]   ;;  %v4562_v47 = vld [vmem:[%s10822_s1 + $0xc8] sm:$0xff]  }
  0x6a   : > { %v4557_v48 = vld [vmem:[%s10822_s1 + $0x50] sm:$0xff]   ;;  %v4559_v50 = vld [vmem:[%s10822_s1 + $0x58] sm:$0xff]   ;;  %v4561_v52 = vld [vmem:[%s10822_s1 + $0x60] sm:$0xff]  }
  0x6b   : > { %v4564_v49 = vld [vmem:[%s10822_s1 + $0xd0] sm:$0xff]   ;;  %v4566_v51 = vld [vmem:[%s10822_s1 + $0xd8] sm:$0xff]   ;;  %v4568_v53 = vld [vmem:[%s10822_s1 + $0xe0] sm:$0xff]  }
  0x6c   : > { %v4563_v54 = vld [vmem:[%s10822_s1 + $0x68] sm:$0xff]   ;;  %v4565_v56 = vld [vmem:[%s10822_s1 + $0x70] sm:$0xff]   ;;  %v4567_v58 = vld [vmem:[%s10822_s1 + $0x78] sm:$0xff]  }
  0x6d   : > { %4369 = vmatpush3.bf16.xpose.msra.mxu0 %v774_v10  ;;  %4455 = vmatpush3.bf16.xpose.msra.mxu1 %v774_v10  ;;  %v4569_v55 = vld [vmem:[%s10822_s1 + $0xe8] sm:$0xff]   ;;  %v4570_v57 = vld [vmem:[%s10822_s1 + $0xf0] sm:$0xff]   ;;  %v4571_v59 = vld [vmem:[%s10822_s1 + $0xf8] sm:$0xff]   ;;  %v5787_v61 = vstv %s1156_s27 }
  0x6e   : > { %4466 = vmatprep.subr.msk.bf16.mxu0 %vm658_vm1, %v4528_v11  ;;  %4467 = vmatprep.subr.msk.bf16.mxu1 %vm658_vm1, %v4528_v11 }
  0x75   : > { %4371 = vmatpush3.bf16.xpose.msra.mxu0 %v771_v14  ;;  %4456 = vmatpush3.bf16.xpose.msra.mxu1 %v771_v14 }
  0x76   : > { %4468 = vmatprep.subr.msk.bf16.mxu0 %vm658_vm1, %v4530_v13  ;;  %4469 = vmatprep.subr.msk.bf16.mxu1 %vm658_vm1, %v4530_v13 }
  0x7d   : > { %4373 = vmatpush3.bf16.xpose.msra.mxu0 %v768_v17  ;;  %4457 = vmatpush3.bf16.xpose.msra.mxu1 %v768_v17 }
  0x7e   : > { %4470 = vmatprep.subr.msk.bf16.mxu0 %vm658_vm1, %v4532_v18  ;;  %4471 = vmatprep.subr.msk.bf16.mxu1 %vm658_vm1, %v4532_v18 }
  0x85   : > { %4375 = vmatpush3.bf16.xpose.msra.mxu0 %v765_v20  ;;  %4458 = vmatpush3.bf16.xpose.msra.mxu1 %v765_v20 }
  0x86   : > { %4472 = vmatprep.subr.msk.bf16.mxu0 %vm658_vm1, %v4534_v21  ;;  %4473 = vmatprep.subr.msk.bf16.mxu1 %vm658_vm1, %v4534_v21 }
  0x8d   : > { %4377 = vmatpush3.bf16.xpose.msra.mxu0 %v762_v23  ;;  %4459 = vmatpush3.bf16.xpose.msra.mxu1 %v762_v23 }
  0x8e   : > { %4474 = vmatprep.subr.msk.bf16.mxu0 %vm658_vm1, %v4536_v24  ;;  %4475 = vmatprep.subr.msk.bf16.mxu1 %vm658_vm1, %v4536_v24 }
  0x95   : > { %4379 = vmatpush3.bf16.xpose.msra.mxu0 %v759_v26  ;;  %4460 = vmatpush3.bf16.xpose.msra.mxu1 %v759_v26 }
  0x96   : > { %4476 = vmatprep.subr.msk.bf16.mxu0 %vm658_vm1, %v4538_v27  ;;  %4477 = vmatprep.subr.msk.bf16.mxu1 %vm658_vm1, %v4538_v27 }
  0x9d   : > { %4381 = vmatpush3.bf16.xpose.msra.mxu0 %v756_v29  ;;  %4461 = vmatpush3.bf16.xpose.msra.mxu1 %v756_v29 }
  0xa4   : > { %4383 = vmatmul.mubr.msk.bf16.vlgmr.msra.gmra.mxu0 %vm658_vm1, %v5574_v4  ;;  %4415 = vmatmul.mubr.msk.bf16.vlgmr.msra.gmra.mxu1 %vm658_vm1, %v4544_v15 }
  0xa5   : > { %4384 = vmatprep.mubr.msk.bf16.mxu0 %vm658_vm1, %v4541_v30  ;;  %4416 = vmatprep.mubr.msk.bf16.mxu1 %vm658_vm1, %v4546_v31 }
  0xac   : > { %4385 = vmatmul.mubr.msk.bf16.gmra.mxu0 %vm658_vm1, %v4541_v30  ;;  %4417 = vmatmul.mubr.msk.bf16.gmra.mxu1 %vm658_vm1, %v4546_v31 }
  0xad   : > { %4386 = vmatprep.mubr.msk.bf16.mxu0 %vm658_vm1, %v4542_v32  ;;  %4418 = vmatprep.mubr.msk.bf16.mxu1 %vm658_vm1, %v4548_v33 }
  0xb4   : > { %4387 = vmatmul.mubr.msk.bf16.gmra.mxu0 %vm658_vm1, %v4542_v32  ;;  %4419 = vmatmul.mubr.msk.bf16.gmra.mxu1 %vm658_vm1, %v4548_v33 }
  0xb5   : > { %4388 = vmatprep.mubr.msk.bf16.mxu0 %vm658_vm1, %v4543_v34  ;;  %4420 = vmatprep.mubr.msk.bf16.mxu1 %vm658_vm1, %v4550_v35 }
  0xbc   : > { %4389 = vmatmul.mubr.msk.bf16.gmra.mxu0 %vm658_vm1, %v4543_v34  ;;  %4421 = vmatmul.mubr.msk.bf16.gmra.mxu1 %vm658_vm1, %v4550_v35 }
  0xbd   : > { %4390 = vmatprep.mubr.msk.bf16.mxu0 %vm658_vm1, %v4545_v36  ;;  %4422 = vmatprep.mubr.msk.bf16.mxu1 %vm658_vm1, %v4552_v37 }
  0xc4   : > { %4391 = vmatmul.mubr.msk.bf16.gmra.mxu0 %vm658_vm1, %v4545_v36  ;;  %4423 = vmatmul.mubr.msk.bf16.gmra.mxu1 %vm658_vm1, %v4552_v37 }
  0xc5   : > { %4392 = vmatprep.mubr.msk.bf16.mxu0 %vm658_vm1, %v4547_v38  ;;  %4424 = vmatprep.mubr.msk.bf16.mxu1 %vm658_vm1, %v4554_v39 }
  0xcc   : > { %4393 = vmatmul.mubr.msk.bf16.gmra.mxu0 %vm658_vm1, %v4547_v38  ;;  %4425 = vmatmul.mubr.msk.bf16.gmra.mxu1 %vm658_vm1, %v4554_v39 }
  0xcd   : > { %4394 = vmatprep.mubr.msk.bf16.mxu0 %vm658_vm1, %v4549_v40  ;;  %4426 = vmatprep.mubr.msk.bf16.mxu1 %vm658_vm1, %v4556_v41 }
  0xd4   : > { %4395 = vmatmul.mubr.msk.bf16.gmra.mxu0 %vm658_vm1, %v4549_v40  ;;  %4427 = vmatmul.mubr.msk.bf16.gmra.mxu1 %vm658_vm1, %v4556_v41 }
  0xd5   : > { %4396 = vmatprep.mubr.msk.bf16.mxu0 %vm658_vm1, %v4551_v42  ;;  %4428 = vmatprep.mubr.msk.bf16.mxu1 %vm658_vm1, %v4558_v43 }
  0xdc   : > { %4397 = vmatmul.mubr.msk.bf16.gmra.mxu0 %vm658_vm1, %v4551_v42  ;;  %4429 = vmatmul.mubr.msk.bf16.gmra.mxu1 %vm658_vm1, %v4558_v43 }
  0xdd   : > { %4398 = vmatprep.mubr.msk.bf16.mxu0 %vm658_vm1, %v4553_v44  ;;  %4430 = vmatprep.mubr.msk.bf16.mxu1 %vm658_vm1, %v4560_v45 }
  0xe4   : > { %4399 = vmatmul.mubr.msk.bf16.gmra.mxu0 %vm658_vm1, %v4553_v44  ;;  %4431 = vmatmul.mubr.msk.bf16.gmra.mxu1 %vm658_vm1, %v4560_v45 }
  0xe5   : > { %4400 = vmatprep.mubr.msk.bf16.mxu0 %vm658_vm1, %v4555_v46  ;;  %4432 = vmatprep.mubr.msk.bf16.mxu1 %vm658_vm1, %v4562_v47 }
  0xec   : > { %4401 = vmatmul.mubr.msk.bf16.gmra.mxu0 %vm658_vm1, %v4555_v46  ;;  %4433 = vmatmul.mubr.msk.bf16.gmra.mxu1 %vm658_vm1, %v4562_v47 }
  0xed   : > { %4402 = vmatprep.mubr.msk.bf16.mxu0 %vm658_vm1, %v4557_v48  ;;  %4434 = vmatprep.mubr.msk.bf16.mxu1 %vm658_vm1, %v4564_v49 }
  0xf4   : > { %4403 = vmatmul.mubr.msk.bf16.gmra.mxu0 %vm658_vm1, %v4557_v48  ;;  %4435 = vmatmul.mubr.msk.bf16.gmra.mxu1 %vm658_vm1, %v4564_v49 }
  0xf5   : > { %4404 = vmatprep.mubr.msk.bf16.mxu0 %vm658_vm1, %v4559_v50  ;;  %4436 = vmatprep.mubr.msk.bf16.mxu1 %vm658_vm1, %v4566_v51 }
  0xfc   : > { %4405 = vmatmul.mubr.msk.bf16.gmra.mxu0 %vm658_vm1, %v4559_v50  ;;  %4437 = vmatmul.mubr.msk.bf16.gmra.mxu1 %vm658_vm1, %v4566_v51 }
  0xfd   : > { %4406 = vmatprep.mubr.msk.bf16.mxu0 %vm658_vm1, %v4561_v52  ;;  %4438 = vmatprep.mubr.msk.bf16.mxu1 %vm658_vm1, %v4568_v53 }
 0x104   : > { %4407 = vmatmul.mubr.msk.bf16.gmra.mxu0 %vm658_vm1, %v4561_v52  ;;  %4439 = vmatmul.mubr.msk.bf16.gmra.mxu1 %vm658_vm1, %v4568_v53 }
 0x105   : > { %4408 = vmatprep.mubr.msk.bf16.mxu0 %vm658_vm1, %v4563_v54  ;;  %4440 = vmatprep.mubr.msk.bf16.mxu1 %vm658_vm1, %v4569_v55 }
 0x10c   : > { %4409 = vmatmul.mubr.msk.bf16.gmra.mxu0 %vm658_vm1, %v4563_v54  ;;  %4441 = vmatmul.mubr.msk.bf16.gmra.mxu1 %vm658_vm1, %v4569_v55 }
 0x10d   : > { %4410 = vmatprep.mubr.msk.bf16.mxu0 %vm658_vm1, %v4565_v56  ;;  %4442 = vmatprep.mubr.msk.bf16.mxu1 %vm658_vm1, %v4570_v57 }
 0x114   : > { %4411 = vmatmul.mubr.msk.bf16.gmra.mxu0 %vm658_vm1, %v4565_v56  ;;  %4443 = vmatmul.mubr.msk.bf16.gmra.mxu1 %vm658_vm1, %v4570_v57 }
 0x115   : > { %4412 = vmatprep.mubr.msk.bf16.mxu0 %vm658_vm1, %v4567_v58  ;;  %4444 = vmatprep.mubr.msk.bf16.mxu1 %vm658_vm1, %v4571_v59 }
 0x11c   : > { %4413 = vmatmul.mubr.msk.bf16.gmra.mxu0 %vm658_vm1, %v4567_v58  ;;  %4445 = vmatmul.mubr.msk.bf16.gmra.mxu1 %vm658_vm1, %v4571_v59 }
 0x164   : > { %v5785_v60 = vpop.f32.mrf.mxu0  ;;  %v997_v62 = vpop.f32.mrf.mxu1 }
 0x165   : > { %v5790_v63 = vmul.f32 %v5787_v61, %v997_v62 }
 0x166   : > { %v5792_v0 = vpop.f32.mrf.mxu0  ;;  %v999_v1 = vpop.f32.mrf.mxu1 }
 0x167   : > { %11157 = vst [vmem:[#allocation11_spill] sm:$0xff] %v5790_v63  ;;  %v5795_v2 = vmul.f32 %v5787_v61, %v999_v1 }
 0x168   : > { %v5797_v3 = vpop.f32.mrf.mxu0  ;;  %v1001_v4 = vpop.f32.mrf.mxu1 }
 0x169   : > { %11158 = vst [vmem:[#allocation12_spill] sm:$0xff] %v5795_v2  ;;  %v1346_v5 = vmax.f32 %v5795_v2, %v5790_v63  ;;  %v5802_v6 = vmul.f32 %v5787_v61, %v1001_v4 }
 0x16a   : > { %v5804_v7 = vpop.f32.mrf.mxu0  ;;  %v1003_v8 = vpop.f32.mrf.mxu1 }
 0x16b   : > { %11159 = vst [vmem:[#allocation13_spill] sm:$0xff] %v5802_v6  ;;  %v1350_v9 = vmax.f32 %v1346_v5, %v5802_v6  ;;  %v5808_v10 = vmul.f32 %v5787_v61, %v1003_v8 }
 0x16c   : > { %v5810_v11 = vpop.f32.mrf.mxu0  ;;  %v1007_v12 = vpop.f32.mrf.mxu1 }
 0x16d   : > { %11160 = vst [vmem:[#allocation14_spill] sm:$0xff] %v5808_v10  ;;  %v1354_v13 = vmax.f32 %v1350_v9, %v5808_v10  ;;  %v5814_v14 = vmul.f32 %v5787_v61, %v1007_v12 }
 0x16e   : > { %v5816_v15 = vpop.f32.mrf.mxu0  ;;  %v1009_v16 = vpop.f32.mrf.mxu1 }
 0x16f   : > { %11161 = vst [vmem:[#allocation15_spill] sm:$0xff] %v5814_v14  ;;  %v1358_v17 = vmax.f32 %v1354_v13, %v5814_v14  ;;  %v5820_v18 = vmul.f32 %v5787_v61, %v1009_v16 }
 0x170   : > { %v5822_v19 = vpop.f32.mrf.mxu0  ;;  %v1011_v20 = vpop.f32.mrf.mxu1 }
 0x171   : > { %11162 = vst [vmem:[#allocation16_spill] sm:$0xff] %v5820_v18  ;;  %v1362_v21 = vmax.f32 %v1358_v17, %v5820_v18  ;;  %v5826_v22 = vmul.f32 %v5787_v61, %v1011_v20 }
 0x172   : > { %v5828_v23 = vpop.f32.mrf.mxu0  ;;  %v1013_v24 = vpop.f32.mrf.mxu1 }
 0x173   : > { %11163 = vst [vmem:[#allocation17_spill] sm:$0xff] %v5826_v22  ;;  %v1366_v25 = vmax.f32 %v1362_v21, %v5826_v22  ;;  %v5832_v26 = vmul.f32 %v5787_v61, %v1013_v24  ;;  %v6088_v63 = vmul.f32 %v5787_v61, %v5828_v23 }
 0x174   : > { %v5834_v27 = vpop.f32.mrf.mxu0  ;;  %v1017_v28 = vpop.f32.mrf.mxu1 }
 0x175   : > { %11164 = vst [vmem:[#allocation18_spill] sm:$0xff] %v5832_v26  ;;  %v1347_v29 = vmax.f32 %v5832_v26, %v1366_v25  ;;  %v5838_v30 = vmul.f32 %v5787_v61, %v1017_v28  ;;  %11206 = vst [vmem:[#allocation60_spill] sm:$0xff] %v6088_v63 }
 0x176   : > { %v5840_v31 = vpop.f32.mrf.mxu0  ;;  %v1019_v32 = vpop.f32.mrf.mxu1 }
 0x177   : > { %11165 = vst [vmem:[#allocation19_spill] sm:$0xff] %v5838_v30  ;;  %v1351_v33 = vmax.f32 %v1347_v29, %v5838_v30  ;;  %v5844_v34 = vmul.f32 %v5787_v61, %v1019_v32 }
 0x178   : > { %v5846_v35 = vpop.f32.mrf.mxu0  ;;  %v1021_v36 = vpop.f32.mrf.mxu1 }
 0x179   : > { %11166 = vst [vmem:[#allocation20_spill] sm:$0xff] %v5844_v34  ;;  %v1355_v37 = vmax.f32 %v1351_v33, %v5844_v34  ;;  %v5850_v38 = vmul.f32 %v5787_v61, %v1021_v36 }
 0x17a   : > { %v5852_v39 = vpop.f32.mrf.mxu0  ;;  %v1023_v40 = vpop.f32.mrf.mxu1 }
 0x17b   : > { %11167 = vst [vmem:[#allocation21_spill] sm:$0xff] %v5850_v38  ;;  %v1359_v41 = vmax.f32 %v1355_v37, %v5850_v38  ;;  %v5856_v42 = vmul.f32 %v5787_v61, %v1023_v40 }
 0x17c   : > { %v5858_v43 = vpop.f32.mrf.mxu0  ;;  %v1027_v44 = vpop.f32.mrf.mxu1 }
 0x17d   : > { %11168 = vst [vmem:[#allocation22_spill] sm:$0xff] %v5856_v42  ;;  %v1363_v45 = vmax.f32 %v1359_v41, %v5856_v42  ;;  %v5862_v46 = vmul.f32 %v5787_v61, %v1027_v44 }
 0x17e   : > { %v5864_v47 = vpop.f32.mrf.mxu0  ;;  %v1029_v48 = vpop.f32.mrf.mxu1 }
 0x17f   : > { %11169 = vst [vmem:[#allocation23_spill] sm:$0xff] %v5862_v46  ;;  %v1367_v49 = vmax.f32 %v1363_v45, %v5862_v46  ;;  %v5868_v50 = vmul.f32 %v5787_v61, %v1029_v48 }
 0x180   : > { %v5870_v51 = vpop.f32.mrf.mxu0  ;;  %v1031_v52 = vpop.f32.mrf.mxu1 }
 0x181   : > { %11170 = vst [vmem:[#allocation24_spill] sm:$0xff] %v5868_v50  ;;  %v1370_v53 = vmax.f32 %v5868_v50, %v1367_v49  ;;  %v5874_v54 = vmul.f32 %v5787_v61, %v1031_v52 }
 0x182   : > { %v5876_v55 = vpop.f32.mrf.mxu0  ;;  %v1033_v56 = vpop.f32.mrf.mxu1 }
 0x183   : > { %11171 = vst [vmem:[#allocation25_spill] sm:$0xff] %v5874_v54  ;;  %v1374_v57 = vmax.f32 %v1370_v53, %v5874_v54  ;;  %v5880_v58 = vmul.f32 %v5787_v61, %v1033_v56 }
 0x184   : > { %v5882_v59 = vpop.f32.mrf.mxu0  ;;  %v1037_v62 = vpop.f32.mrf.mxu1 }
 0x185   : > { %11172 = vst [vmem:[#allocation26_spill] sm:$0xff] %v5880_v58  ;;  %v1378_v1 = vmax.f32 %v1374_v57, %v5880_v58  ;;  %v5886_v4 = vmul.f32 %v5787_v61, %v1037_v62  ;;  %v6109_v23 = vmul.f32 %v5787_v61, %v5882_v59 }
 0x186   : > { %v5888_v5 = vpop.f32.mrf.mxu0  ;;  %v1039_v8 = vpop.f32.mrf.mxu1 }
 0x187   : > { %11173 = vst [vmem:[#allocation27_spill] sm:$0xff] %v5886_v4  ;;  %v1382_v9 = vmax.f32 %v1378_v1, %v5886_v4  ;;  %v5892_v12 = vmul.f32 %v5787_v61, %v1039_v8  ;;  %11210 = vst [vmem:[#allocation64_spill] sm:$0xff] %v6109_v23 }
 0x188   : > { %v5894_v13 = vpop.f32.mrf.mxu0  ;;  %v1041_v16 = vpop.f32.mrf.mxu1 }
 0x189   : > { %11174 = vst [vmem:[#allocation28_spill] sm:$0xff] %v5892_v12  ;;  %v1386_v17 = vmax.f32 %v1382_v9, %v5892_v12  ;;  %v5898_v20 = vmul.f32 %v5787_v61, %v1041_v16 }
 0x18a   : > { %v5900_v21 = vpop.f32.mrf.mxu0  ;;  %v1043_v24 = vpop.f32.mrf.mxu1 }
 0x18b   : > { %11175 = vst [vmem:[#allocation29_spill] sm:$0xff] %v5898_v20  ;;  %v1390_v25 = vmax.f32 %v1386_v17, %v5898_v20  ;;  %v5904_v28 = vmul.f32 %v5787_v61, %v1043_v24 }
 0x18c   : > { %v5906_v29 = vpop.f32.mrf.mxu0  ;;  %v1047_v32 = vpop.f32.mrf.mxu1 }
 0x18d   : > { %11176 = vst [vmem:[#allocation30_spill] sm:$0xff] %v5904_v28  ;;  %v1394_v33 = vmax.f32 %v1390_v25, %v5904_v28  ;;  %v5910_v36 = vmul.f32 %v5787_v61, %v1047_v32  ;;  %v6128_v59 = vmul.f32 %v5787_v61, %v5906_v29 }
 0x18e   : > { %v5912_v37 = vpop.f32.mrf.mxu0  ;;  %v1049_v40 = vpop.f32.mrf.mxu1 }
 0x18f   : > { %11177 = vst [vmem:[#allocation31_spill] sm:$0xff] %v5910_v36  ;;  %v1348_v41 = vmax.f32 %v5910_v36, %v1394_v33  ;;  %v5916_v44 = vmul.f32 %v5787_v61, %v1049_v40  ;;  %11213 = vst [vmem:[#allocation67_spill] sm:$0xff] %v6128_v59 }
 0x190   : > { %v5918_v45 = vpop.f32.mrf.mxu0  ;;  %v1051_v48 = vpop.f32.mrf.mxu1 }
 0x191   : > { %11178 = vst [vmem:[#allocation32_spill] sm:$0xff] %v5916_v44  ;;  %v1352_v49 = vmax.f32 %v1348_v41, %v5916_v44  ;;  %v5922_v52 = vmul.f32 %v5787_v61, %v1051_v48 }
 0x192   : > { %v5924_v53 = vpop.f32.mrf.mxu0  ;;  %v1053_v56 = vpop.f32.mrf.mxu1 }
 0x193   : > { %11179 = vst [vmem:[#allocation33_spill] sm:$0xff] %v5922_v52  ;;  %v1356_v57 = vmax.f32 %v1352_v49, %v5922_v52  ;;  %v5928_v62 = vmul.f32 %v5787_v61, %v1053_v56 }
 0x194   : > { %v5930_v1 = vpop.f32.mrf.mxu0  ;;  %v1057_v8 = vpop.f32.mrf.mxu1 }
 0x195   : > { %11180 = vst [vmem:[#allocation34_spill] sm:$0xff] %v5928_v62  ;;  %v1360_v9 = vmax.f32 %v1356_v57, %v5928_v62  ;;  %v5934_v16 = vmul.f32 %v5787_v61, %v1057_v8 }
 0x196   : > { %v5936_v17 = vpop.f32.mrf.mxu0  ;;  %v1059_v24 = vpop.f32.mrf.mxu1 }
 0x197   : > { %11181 = vst [vmem:[#allocation35_spill] sm:$0xff] %v5934_v16  ;;  %v1364_v25 = vmax.f32 %v1360_v9, %v5934_v16  ;;  %v5940_v32 = vmul.f32 %v5787_v61, %v1059_v24 }
 0x198   : > { %v5942_v33 = vpop.f32.mrf.mxu0  ;;  %v1061_v40 = vpop.f32.mrf.mxu1 }
 0x199   : > { %11182 = vst [vmem:[#allocation36_spill] sm:$0xff] %v5940_v32  ;;  %v1368_v41 = vmax.f32 %v1364_v25, %v5940_v32  ;;  %v5946_v48 = vmul.f32 %v5787_v61, %v1061_v40 }
 0x19a   : > { %v5948_v49 = vpop.f32.mrf.mxu0  ;;  %v1063_v56 = vpop.f32.mrf.mxu1 }
 0x19b   : > { %11183 = vst [vmem:[#allocation37_spill] sm:$0xff] %v5946_v48  ;;  %v1371_v57 = vmax.f32 %v5946_v48, %v1368_v41  ;;  %v5952_v8 = vmul.f32 %v5787_v61, %v1063_v56 }
 0x19c   : > { %v5954_v9 = vpop.f32.mrf.mxu0  ;;  %v1067_v24 = vpop.f32.mrf.mxu1 }
 0x19d   : > { %11184 = vst [vmem:[#allocation38_spill] sm:$0xff] %v5952_v8  ;;  %v1375_v16 = vmax.f32 %v1371_v57, %v5952_v8  ;;  %v5958_v62 = vmul.f32 %v5787_v61, %v1067_v24 }
 0x19e   : > { %v5960_v25 = vpop.f32.mrf.mxu0  ;;  %v1069_v40 = vpop.f32.mrf.mxu1 }
 0x19f   : > { %11185 = vst [vmem:[#allocation39_spill] sm:$0xff] %v5958_v62  ;;  %v1379_v32 = vmax.f32 %v1375_v16, %v5958_v62  ;;  %v5964_v52 = vmul.f32 %v5787_v61, %v1069_v40 }
 0x1a0   : > { %v5966_v41 = vpop.f32.mrf.mxu0  ;;  %v1071_v56 = vpop.f32.mrf.mxu1 }
 0x1a1   : > { %11186 = vst [vmem:[#allocation40_spill] sm:$0xff] %v5964_v52  ;;  %v1383_v48 = vmax.f32 %v1379_v32, %v5964_v52  ;;  %v5970_v44 = vmul.f32 %v5787_v61, %v1071_v56 }
 0x1a2   : > { %v5972_v57 = vpop.f32.mrf.mxu0  ;;  %v1073_v24 = vpop.f32.mrf.mxu1 }
 0x1a3   : > { %11187 = vst [vmem:[#allocation41_spill] sm:$0xff] %v5970_v44  ;;  %v1387_v8 = vmax.f32 %v1383_v48, %v5970_v44  ;;  %v5976_v36 = vmul.f32 %v5787_v61, %v1073_v24 }
 0x1a4   : > { %v5978_v16 = vpop.f32.mrf.mxu0  ;;  %v1077_v40 = vpop.f32.mrf.mxu1 }
 0x1a5   : > { %11188 = vst [vmem:[#allocation42_spill] sm:$0xff] %v5976_v36  ;;  %v1391_v62 = vmax.f32 %v1387_v8, %v5976_v36  ;;  %v5982_v28 = vmul.f32 %v5787_v61, %v1077_v40 }
 0x1a6   : > { %v5984_v32 = vpop.f32.mrf.mxu0  ;;  %v1079_v56 = vpop.f32.mrf.mxu1 }
 0x1a7   : > { %11189 = vst [vmem:[#allocation43_spill] sm:$0xff] %v5982_v28  ;;  %v1395_v52 = vmax.f32 %v1391_v62, %v5982_v28  ;;  %v5988_v20 = vmul.f32 %v5787_v61, %v1079_v56 }
 0x1a8   : > { %v5990_v48 = vpop.f32.mrf.mxu0  ;;  %v1081_v24 = vpop.f32.mrf.mxu1 }
 0x1a9   : > { %11190 = vst [vmem:[#allocation44_spill] sm:$0xff] %v5988_v20  ;;  %v1349_v4 = vmax.f32 %v5988_v20, %v1395_v52  ;;  %v5996_v8 = vmul.f32 %v5787_v61, %v1081_v24 }
 0x1aa   : > { %v5992_v44 = vpop.f32.mrf.mxu0  ;;  %v1083_v12 = vpop.f32.mrf.mxu1 }
 0x1ab   : > { %11191 = vst [vmem:[#allocation45_spill] sm:$0xff] %v5996_v8  ;;  %v1353_v56 = vmax.f32 %v1349_v4, %v5996_v8  ;;  %v6004_v28 = vmul.f32 %v5787_v61, %v1083_v12 }
 0x1ac   : > { %v5998_v40 = vpop.f32.mrf.mxu0  ;;  %v1087_v36 = vpop.f32.mrf.mxu1 }
 0x1ad   : > { %11192 = vst [vmem:[#allocation46_spill] sm:$0xff] %v6004_v28  ;;  %v1357_v24 = vmax.f32 %v1353_v56, %v6004_v28  ;;  %v6012_v20 = vmul.f32 %v5787_v61, %v1087_v36 }
 0x1ae   : > { %v6000_v58 = vpop.f32.mrf.mxu0  ;;  %v1089_v62 = vpop.f32.mrf.mxu1 }
 0x1af   : > { %11193 = vst [vmem:[#allocation47_spill] sm:$0xff] %v6012_v20  ;;  %v1361_v12 = vmax.f32 %v1357_v24, %v6012_v20  ;;  %v6020_v8 = vmul.f32 %v5787_v61, %v1089_v62  ;;  %v6040_v62 = vmul.f32 %v5787_v61, %v5810_v11  ;;  %v6060_v11 = vmul.f32 %v5787_v61, %v5816_v15 }
 0x1b0   : > { %v6006_v54 = vpop.f32.mrf.mxu0  ;;  %v1091_v50 = vpop.f32.mrf.mxu1  ;;  %v6080_v15 = vmul.f32 %v5787_v61, %v5792_v0  ;;  %v6100_v0 = vmul.f32 %v5787_v61, %v5804_v7  ;;  %v6117_v7 = vmul.f32 %v5787_v61, %v5852_v39 }
 0x1b1   : > { %11194 = vst [vmem:[#allocation48_spill] sm:$0xff] %v6020_v8  ;;  %v1365_v36 = vmax.f32 %v1361_v12, %v6020_v8  ;;  %v6030_v28 = vmul.f32 %v5787_v61, %v1091_v50  ;;  %11196 = vst [vmem:[#allocation50_spill] sm:$0xff] %v6040_v62  ;;  %v6052_v50 = vmul.f32 %v5787_v61, %v5785_v60 }
 0x1b2   : > { %v6008_v46 = vpop.f32.mrf.mxu0  ;;  %v1093_v52 = vpop.f32.mrf.mxu1  ;;  %v6056_v8 = vmul.f32 %v5787_v61, %v5834_v27  ;;  %11200 = vst [vmem:[#allocation54_spill] sm:$0xff] %v6060_v11  ;;  %v6072_v60 = vmul.f32 %v5787_v61, %v5858_v43  ;;  %11204 = vst [vmem:[#allocation58_spill] sm:$0xff] %v6080_v15  ;;  %v6092_v43 = vmul.f32 %v5787_v61, %v5840_v31 }
 0x1b3   : > { %11195 = vst [vmem:[#allocation49_spill] sm:$0xff] %v6030_v28  ;;  %v1369_v20 = vmax.f32 %v1365_v36, %v6030_v28  ;;  %v6044_v10 = vmul.f32 %v5787_v61, %v1093_v52  ;;  %11198 = vst [vmem:[#allocation52_spill] sm:$0xff] %v6052_v50  ;;  %v6064_v52 = vmul.f32 %v5787_v61, %v5822_v19 }
 0x1b4   : > { %v6014_v42 = vpop.f32.mrf.mxu0  ;;  %v1097_v38 = vpop.f32.mrf.mxu1  ;;  %11199 = vst [vmem:[#allocation53_spill] sm:$0xff] %v6056_v8  ;;  %v1286_v28 = vmax.f32 %v6052_v50, %v6040_v62  ;;  %11202 = vst [vmem:[#allocation56_spill] sm:$0xff] %v6072_v60  ;;  %v6084_v19 = vmul.f32 %v5787_v61, %v5797_v3  ;;  %v6105_v3 = vmul.f32 %v5787_v61, %v5846_v35 }
 0x1b5   : > { %11197 = vst [vmem:[#allocation51_spill] sm:$0xff] %v6044_v10  ;;  %11201 = vst [vmem:[#allocation55_spill] sm:$0xff] %v6064_v52  ;;  %v1372_v27 = vmax.f32 %v6044_v10, %v1369_v20  ;;  %v6076_v2 = vmul.f32 %v5787_v61, %v1097_v38  ;;  %v1287_v31 = vmax.f32 %v6080_v15, %v6060_v11 }
 0x1b6   : > { %v6016_v34 = vpop.f32.mrf.mxu0  ;;  %v1099_v4 = vpop.f32.mrf.mxu1  ;;  %11205 = vst [vmem:[#allocation59_spill] sm:$0xff] %v6084_v19  ;;  %11207 = vst [vmem:[#allocation61_spill] sm:$0xff] %v6092_v43  ;;  %v1290_v10 = vmax.f32 %v1286_v28, %v6056_v8  ;;  %v1288_v62 = vmax.f32 %v6084_v19, %v6064_v52  ;;  %v6121_v28 = vmul.f32 %v5787_v61, %v5864_v47 }
 0x1b7   : > { %11203 = vst [vmem:[#allocation57_spill] sm:$0xff] %v6076_v2  ;;  %11208 = vst [vmem:[#allocation62_spill] sm:$0xff] %v6100_v0  ;;  %v1376_v11 = vmax.f32 %v1372_v27, %v6076_v2  ;;  %v6132_v52 = vmul.f32 %v5787_v61, %v1099_v4  ;;  %v1289_v39 = vmax.f32 %v6100_v0, %v6088_v63 }
 0x1b8   : > { %v6022_v30 = vpop.f32.mrf.mxu0  ;;  %v1101_v26 = vpop.f32.mrf.mxu1  ;;  %11209 = vst [vmem:[#allocation63_spill] sm:$0xff] %v6105_v3  ;;  %11211 = vst [vmem:[#allocation65_spill] sm:$0xff] %v6117_v7  ;;  %v1294_v8 = vmax.f32 %v1290_v10, %v6072_v60  ;;  %v1291_v19 = vmax.f32 %v1287_v31, %v6092_v43  ;;  %v6139_v47 = vmul.f32 %v5787_v61, %v5870_v51 }
 0x1b9   : > { %11212 = vst [vmem:[#allocation66_spill] sm:$0xff] %v6121_v28  ;;  %11214 = vst [vmem:[#allocation68_spill] sm:$0xff] %v6132_v52  ;;  %v6143_v10 = vmul.f32 %v5787_v61, %v5888_v5  ;;  %v1292_v4 = vmax.f32 %v1288_v62, %v6105_v3  ;;  %v6152_v27 = vmul.f32 %v5787_v61, %v5876_v55 }
 0x1ba   : > { %v6024_v22 = vpop.f32.mrf.mxu0  ;;  %v6026_v56 = vpop.f32.mrf.mxu1  ;;  %11215 = vst [vmem:[#allocation69_spill] sm:$0xff] %v6139_v47  ;;  %v1298_v31 = vmax.f32 %v1294_v8, %v6109_v23  ;;  %v6157_v51 = vmul.f32 %v5787_v61, %v5930_v1  ;;  %v1293_v2 = vmax.f32 %v1289_v39, %v6117_v7  ;;  %v1295_v5 = vmax.f32 %v1291_v19, %v6121_v28  ;;  %v11296_v28 = vld [vmem:[#allocation67_spill] sm:$0xff] }
 0x1bb   : > { %11216 = vst [vmem:[#allocation70_spill] sm:$0xff] %v6143_v10  ;;  %11217 = vst [vmem:[#allocation71_spill] sm:$0xff] %v6152_v27  ;;  %v6163_v43 = vmul.f32 %v5787_v61, %v5894_v13  ;;  %v6167_v62 = vmul.f32 %v5787_v61, %v5912_v37  ;;  %v6176_v1 = vmul.f32 %v5787_v61, %v5954_v9 }
 0x1bc   : > { %v6032_v18 = vpop.f32.mrf.mxu0  ;;  %v6034_v14 = vpop.f32.mrf.mxu1  ;;  %11218 = vst [vmem:[#allocation72_spill] sm:$0xff] %v6157_v51  ;;  %v1302_v8 = vmax.f32 %v1298_v31, %v6128_v59  ;;  %v1380_v19 = vmax.f32 %v1376_v11, %v6132_v52  ;;  %v6180_v39 = vmul.f32 %v5787_v61, %v1101_v26  ;;  %v1296_v13 = vmax.f32 %v1292_v4, %v6139_v47 }
 0x1bd   : > { %11219 = vst [vmem:[#allocation73_spill] sm:$0xff] %v6163_v43  ;;  %11220 = vst [vmem:[#allocation74_spill] sm:$0xff] %v6167_v62  ;;  %v1299_v37 = vmax.f32 %v1295_v5, %v6143_v10  ;;  %v6186_v23 = vmul.f32 %v5787_v61, %v5900_v21  ;;  %v6190_v31 = vmul.f32 %v5787_v61, %v5936_v17 }
 0x1be   : > { %v6036_v24 = vpop.f32.mrf.mxu0  ;;  %v6048_v12 = vpop.f32.mrf.mxu1  ;;  %11221 = vst [vmem:[#allocation75_spill] sm:$0xff] %v6176_v1  ;;  %11222 = vst [vmem:[#allocation76_spill] sm:$0xff] %v6180_v39  ;;  %v1297_v9 = vmax.f32 %v1293_v2, %v6152_v27  ;;  %v6195_v11 = vmul.f32 %v5787_v61, %v5918_v45  ;;  %v1306_v26 = vmax.f32 %v1302_v8, %v6157_v51  ;;  %v11299_v27 = vmov 0 }
 0x1bf   : > { %11223 = vst [vmem:[#allocation77_spill] sm:$0xff] %v6186_v23  ;;  %11224 = vst [vmem:[#allocation78_spill] sm:$0xff] %v6190_v31  ;;  %v6200_v4 = vmul.f32 %v5787_v61, %v5978_v16  ;;  %v1300_v21 = vmax.f32 %v1296_v13, %v6163_v43  ;;  %v1303_v5 = vmax.f32 %v1299_v37, %v6167_v62 }
 0x1c0   : > { %v6046_v6 = vpop.f32.mrf.mxu0  ;;  %v6096_v38 = vpop.f32.mrf.mxu1  ;;  %11225 = vst [vmem:[#allocation79_spill] sm:$0xff] %v6195_v11  ;;  %v6206_v17 = vmul.f32 %v5787_v61, %v5924_v53  ;;  %v6210_v2 = vmul.f32 %v5787_v61, %v5960_v25  ;;  %v1310_v8 = vmax.f32 %v1306_v26, %v6176_v1  ;;  %v6217_v16 = vmul.f32 %v5787_v61, %v5998_v40 }
 0x1c1   : > { %11226 = vst [vmem:[#allocation80_spill] sm:$0xff] %v6200_v4  ;;  %v1384_v13 = vmax.f32 %v1380_v19, %v6180_v39  ;;  %v6222_v37 = vmul.f32 %v5787_v61, %v6026_v56  ;;  %v1301_v53 = vmax.f32 %v1297_v9, %v6186_v23  ;;  %v1307_v25 = vmax.f32 %v1303_v5, %v6190_v31 }
 0x1c2   : > { %v6066_v36 = vpop.f32.mrf.mxu0  ;;  %v6147_v60 = vpop.f32.mrf.mxu1  ;;  %11227 = vst [vmem:[#allocation81_spill] sm:$0xff] %v6206_v17  ;;  %11228 = vst [vmem:[#allocation82_spill] sm:$0xff] %v6210_v2  ;;  %v6228_v51 = vmul.f32 %v5787_v61, %v5942_v33  ;;  %v6232_v26 = vmul.f32 %v5787_v61, %v5984_v32  ;;  %v1304_v19 = vmax.f32 %v1300_v21, %v6195_v11 }
 0x1c3   : > { %11229 = vst [vmem:[#allocation83_spill] sm:$0xff] %v6217_v16  ;;  %11230 = vst [vmem:[#allocation84_spill] sm:$0xff] %v6222_v37  ;;  %v6239_v56 = vmul.f32 %v5787_v61, %v5948_v49  ;;  %v1314_v9 = vmax.f32 %v1310_v8, %v6200_v4  ;;  %v6244_v5 = vmul.f32 %v5787_v61, %v6014_v42 }
 0x1c4   : > { %v6094_v20 = vpop.f32.mrf.mxu0  ;;  %v6171_v3 = vpop.f32.mrf.mxu1  ;;  %11231 = vst [vmem:[#allocation85_spill] sm:$0xff] %v6228_v51  ;;  %11232 = vst [vmem:[#allocation86_spill] sm:$0xff] %v6232_v26  ;;  %v1305_v33 = vmax.f32 %v1301_v53, %v6206_v17  ;;  %v1311_v39 = vmax.f32 %v1307_v25, %v6210_v2  ;;  %v6250_v32 = vmul.f32 %v5787_v61, %v5966_v41 }
 0x1c5   : > { %11233 = vst [vmem:[#allocation87_spill] sm:$0xff] %v6239_v56  ;;  %11234 = vst [vmem:[#allocation88_spill] sm:$0xff] %v6244_v5  ;;  %v6254_v21 = vmul.f32 %v5787_v61, %v6000_v58  ;;  %v1318_v8 = vmax.f32 %v1314_v9, %v6217_v16  ;;  %v6263_v42 = vmul.f32 %v5787_v61, %v6032_v18 }
 0x1c6   : > { %v6123_v35 = vpop.f32.mrf.mxu0  ;;  %v6212_v52 = vpop.f32.mrf.mxu1  ;;  %11235 = vst [vmem:[#allocation89_spill] sm:$0xff] %v6250_v32  ;;  %v1388_v53 = vmax.f32 %v1384_v13, %v6222_v37  ;;  %v6268_v41 = vmul.f32 %v5787_v61, %v6034_v14  ;;  %v1308_v25 = vmax.f32 %v1304_v19, %v6228_v51  ;;  %v1315_v58 = vmax.f32 %v1311_v39, %v6232_v26  ;;  %v11323_v26 = vld [vmem:[#allocation15_spill] sm:$0xff] }
 0x1c7   : > { %11236 = vst [vmem:[#allocation90_spill] sm:$0xff] %v6254_v21  ;;  %11237 = vst [vmem:[#allocation91_spill] sm:$0xff] %v6263_v42  ;;  %v6274_v4 = vmul.f32 %v5787_v61, %v5990_v48  ;;  %v6278_v9 = vmul.f32 %v5787_v61, %v6016_v34  ;;  %v1309_v16 = vmax.f32 %v1305_v33, %v6239_v56 }
 0x1c8   : > { %v6145_v29 = vpop.f32.mrf.mxu0  ;;  %v6258_v1 = vpop.f32.mrf.mxu1  ;;  %11238 = vst [vmem:[#allocation92_spill] sm:$0xff] %v6268_v41  ;;  %v6283_v13 = vmul.f32 %v5787_v61, %v5972_v57  ;;  %v1322_v14 = vmax.f32 %v1318_v8, %v6244_v5  ;;  %v6288_v39 = vmul.f32 %v5787_v61, %v6094_v20  ;;  %v1312_v48 = vmax.f32 %v1308_v25, %v6250_v32 }
 0x1c9   : > { %11239 = vst [vmem:[#allocation93_spill] sm:$0xff] %v6274_v4  ;;  %11240 = vst [vmem:[#allocation94_spill] sm:$0xff] %v6278_v9  ;;  %v1319_v19 = vmax.f32 %v1315_v58, %v6254_v21  ;;  %v6294_v34 = vmul.f32 %v5787_v61, %v6006_v54  ;;  %v6298_v33 = vmul.f32 %v5787_v61, %v6036_v24  ;;  %v11322_v21 = vld [vmem:[#allocation14_spill] sm:$0xff] }
 0x1ca   : > { %v6169_v55 = vpop.f32.mrf.mxu0  ;;  %11241 = vst [vmem:[#allocation95_spill] sm:$0xff] %v6283_v13  ;;  %11242 = vst [vmem:[#allocation96_spill] sm:$0xff] %v6288_v39  ;;  %v6300_v37 = vpop.f32.mrf.mxu1  ;;  %v1326_v8 = vmax.f32 %v1322_v14, %v6263_v42  ;;  %v1392_v25 = vmax.f32 %v1388_v53, %v6268_v41  ;;  %v6309_v58 = vmul.f32 %v5787_v61, %v6048_v12  ;;  %v11304_v10 = vld [vmem:[#allocation83_spill] sm:$0xff] }
 0x1cb   : > { %11243 = vst [vmem:[#allocation97_spill] sm:$0xff] %v6294_v34  ;;  %11244 = vst [vmem:[#allocation98_spill] sm:$0xff] %v6298_v33  ;;  %v1316_v54 = vmax.f32 %v1312_v48, %v6274_v4  ;;  %v6314_v24 = vmul.f32 %v5787_v61, %v5992_v44  ;;  %v1323_v5 = vmax.f32 %v1319_v19, %v6278_v9 }
 0x1cc   : > { %v967_v59 = vpop.f32.mrf.mxu0  ;;  %11246 = vst [vmem:[#allocation100_spill] sm:$0xff] %v6309_v58  ;;  %v6319_v14 = vmul.f32 %v5787_v61, %v6022_v30  ;;  %v6321_v42 = vpop.f32.mrf.mxu1  ;;  %v1313_v53 = vmax.f32 %v1309_v16, %v6283_v13  ;;  %v1330_v12 = vmax.f32 %v1326_v8, %v6288_v39  ;;  %v6327_v48 = vmul.f32 %v5787_v61, %v6123_v35 }
 0x1cd   : > { %v6304_v20 = vmul.f32 %v5787_v61, %v967_v59  ;;  %11247 = vst [vmem:[#allocation101_spill] sm:$0xff] %v6314_v24  ;;  %v1320_v19 = vmax.f32 %v1316_v54, %v6294_v34  ;;  %v6335_v30 = vmul.f32 %v5787_v61, %v6008_v46  ;;  %v1327_v41 = vmax.f32 %v1323_v5, %v6298_v33  ;;  %v6615_v34 = vld [vmem:[%s3041_s7] ss:$2 sm:$0x3] }
 0x1ce   : > { %v969_v45 = vpop.f32.mrf.mxu0  ;;  %11248 = vst [vmem:[#allocation102_spill] sm:$0xff] %v6319_v14  ;;  %11249 = vst [vmem:[#allocation103_spill] sm:$0xff] %v6327_v48  ;;  %v6340_v16 = vmul.f32 %v5787_v61, %v6046_v6  ;;  %v6349_v54 = vmul.f32 %v5787_v61, %v6096_v38  ;;  %v1317_v46 = vmax.f32 %v1313_v53, %v6314_v24 }
 0x1cf   : > { %11245 = vst [vmem:[#allocation99_spill] sm:$0xff] %v6304_v20  ;;  %11251 = vst [vmem:[#allocation105_spill] sm:$0xff] %v6335_v30  ;;  %v1334_v39 = vmax.f32 %v1330_v12, %v6304_v20  ;;  %v6344_v35 = vmul.f32 %v5787_v61, %v969_v45  ;;  %v1324_v5 = vmax.f32 %v1320_v19, %v6319_v14  ;;  %v1129_v20 = vpop.f32.mrf.mxu1  ;;  %v11320_v14 = vld [vmem:[#allocation12_spill] sm:$0xff] }
 0x1d0   : > { %v6234_v40 = vpop.f32.mrf.mxu0  ;;  %11252 = vst [vmem:[#allocation106_spill] sm:$0xff] %v6340_v16  ;;  %11254 = vst [vmem:[#allocation108_spill] sm:$0xff] %v6349_v54  ;;  %v6355_v6 = vmul.f32 %v5787_v61, %v6024_v22  ;;  %v6359_v12 = vmul.f32 %v5787_v61, %v6145_v29  ;;  %v1321_v19 = vmax.f32 %v1317_v46, %v6335_v30 }
 0x1d1   : > { %11253 = vst [vmem:[#allocation107_spill] sm:$0xff] %v6344_v35  ;;  %v1328_v22 = vmax.f32 %v1324_v5, %v6340_v16  ;;  %v6373_v29 = vmul.f32 %v5787_v61, %v6066_v36  ;;  %v6377_v33 = vmul.f32 %v5787_v61, %v6234_v40  ;;  %v6389_v36 = vmul.f32 %v5787_v61, %v6147_v60  ;;  %v11308_v51 = vld [vmem:[#allocation96_spill] sm:$0xff] }
 0x1d2   : > { %v6256_v49 = vpop.f32.mrf.mxu0  ;;  %11255 = vst [vmem:[#allocation109_spill] sm:$0xff] %v6355_v6  ;;  %11256 = vst [vmem:[#allocation110_spill] sm:$0xff] %v6359_v12  ;;  %v1325_v46 = vmax.f32 %v1321_v19, %v6355_v6  ;;  %v6403_v60 = vmul.f32 %v5787_v61, %v6171_v3 }
 0x1d3   : > { %11259 = vst [vmem:[#allocation113_spill] sm:$0xff] %v6373_v29  ;;  %11260 = vst [vmem:[#allocation114_spill] sm:$0xff] %v6377_v33  ;;  %v1332_v5 = vmax.f32 %v1328_v22, %v6359_v12  ;;  %v11321_v12 = vld [vmem:[#allocation13_spill] sm:$0xff] }
 0x1d4   : > { %v977_v18 = vpop.f32.mrf.mxu0  ;;  %11262 = vst [vmem:[#allocation116_spill] sm:$0xff] %v6389_v36  ;;  %v1329_v19 = vmax.f32 %v1325_v46, %v6373_v29  ;;  %11265 = vst [vmem:[#allocation119_spill] sm:$0xff] %v6403_v60 }
 0x1d5   : > { %v6330_v44 = vmul.f32 %v5787_v61, %v977_v18  ;;  %v1396_v18 = vmax.f32 %v1392_v25, %v6309_v58  ;;  %v1331_v25 = vmax.f32 %v1327_v41, %v6327_v48  ;;  %v1131_v48 = vpop.f32.mrf.mxu1  ;;  %v1336_v22 = vmax.f32 %v1332_v5, %v6377_v33  ;;  %11310 = vst [vmem:[#allocation142_spill] sm:$0xff] %v6615_v34 }
 0x1d6   : > { %v979_v57 = vpop.f32.mrf.mxu0  ;;  %v11311_v56 = vld [vmem:[#allocation99_spill] sm:$0xff] }
 0x1d7   : > { %11250 = vst [vmem:[#allocation104_spill] sm:$0xff] %v6330_v44  ;;  %v1338_v58 = vmax.f32 %v1334_v39, %v6330_v44  ;;  %v6364_v38 = vmul.f32 %v5787_v61, %v979_v57  ;;  %v1335_v39 = vmax.f32 %v1331_v25, %v6344_v35  ;;  %v1373_v57 = vmax.f32 %v6349_v54, %v1396_v18 }
 0x1d8   : > { %v981_v59 = vpop.f32.mrf.mxu0  ;;  %v6393_v25 = vmul.f32 %v5787_v61, %v6169_v55  ;;  %v6407_v54 = vmul.f32 %v5787_v61, %v6256_v49 }
 0x1d9   : > { %11257 = vst [vmem:[#allocation111_spill] sm:$0xff] %v6364_v38  ;;  %v1339_v18 = vmax.f32 %v1335_v39, %v6364_v38 }
 0x1da   : > { %v983_v8 = vpop.f32.mrf.mxu0  ;;  %11263 = vst [vmem:[#allocation117_spill] sm:$0xff] %v6393_v25  ;;  %11266 = vst [vmem:[#allocation120_spill] sm:$0xff] %v6407_v54  ;;  %v1333_v46 = vmax.f32 %v1329_v19, %v6393_v25  ;;  %v6428_v19 = vmul.f32 %v5787_v61, %v6212_v52  ;;  %v6443_v52 = vmul.f32 %v5787_v61, %v6321_v42 }
 0x1db   : > { %v6417_v3 = vmul.f32 %v5787_v61, %v983_v8 }
 0x1dc   : > { %v987_v45 = vpop.f32.mrf.mxu0  ;;  %v1337_v49 = vmax.f32 %v1333_v46, %v6407_v54  ;;  %11270 = vst [vmem:[#allocation124_spill] sm:$0xff] %v6428_v19  ;;  %v6439_v46 = vmul.f32 %v5787_v61, %v6300_v37  ;;  %11273 = vst [vmem:[#allocation127_spill] sm:$0xff] %v6443_v52 }
 0x1dd   : > { %v6367_v53 = vmul.f32 %v5787_v61, %v987_v45  ;;  %11268 = vst [vmem:[#allocation122_spill] sm:$0xff] %v6417_v3 }
 0x1de   : > { %v989_v41 = vpop.f32.mrf.mxu0  ;;  %11272 = vst [vmem:[#allocation126_spill] sm:$0xff] %v6439_v46 }
 0x1df   : > { %11258 = vst [vmem:[#allocation112_spill] sm:$0xff] %v6367_v53  ;;  %v1342_v45 = vmax.f32 %v1338_v58, %v6367_v53  ;;  %v6383_v44 = vmul.f32 %v5787_v61, %v989_v41  ;;  %v6397_v58 = vmul.f32 %v5787_v61, %v981_v59 }
 0x1e0   : > { %v991_v40 = vpop.f32.mrf.mxu0 }
 0x1e1   : > { %11261 = vst [vmem:[#allocation115_spill] sm:$0xff] %v6383_v44  ;;  %11264 = vst [vmem:[#allocation118_spill] sm:$0xff] %v6397_v58  ;;  %v1377_v41 = vmax.f32 %v1373_v57, %v1342_v45  ;;  %v1343_v39 = vmax.f32 %v1339_v18, %v6383_v44  ;;  %v6412_v59 = vmul.f32 %v5787_v61, %v991_v40  ;;  %v1133_v45 = vpop.f32.mrf.mxu1 }
 0x1e2   : > { %v993_v57 = vpop.f32.mrf.mxu0  ;;  %v1340_v5 = vmax.f32 %v1336_v22, %v6397_v58 }
 0x1e3   : > { %v1381_v55 = vmax.f32 %v1377_v41, %v6389_v36  ;;  %11267 = vst [vmem:[#allocation121_spill] sm:$0xff] %v6412_v59  ;;  %v6423_v18 = vmul.f32 %v5787_v61, %v993_v57  ;;  %v1137_v40 = vpop.f32.mrf.mxu1  ;;  %v1341_v36 = vmax.f32 %v1337_v49, %v6417_v3 }
 0x1e4   : > { %v1344_v41 = vmax.f32 %v1340_v5, %v6412_v59  ;;  %v6448_v5 = vmul.f32 %v5787_v61, %v1129_v20  ;;  %v6459_v42 = vmul.f32 %v5787_v61, %v1137_v40 }
 0x1e5   : > { %v1385_v53 = vmax.f32 %v1381_v55, %v1343_v39  ;;  %11269 = vst [vmem:[#allocation123_spill] sm:$0xff] %v6423_v18  ;;  %v1345_v22 = vmax.f32 %v1341_v36, %v6423_v18  ;;  %v1139_v55 = vpop.f32.mrf.mxu1 }
 0x1e6   : > { %11274 = vst [vmem:[#allocation128_spill] sm:$0xff] %v6448_v5  ;;  %11277 = vst [vmem:[#allocation131_spill] sm:$0xff] %v6459_v42 }
 0x1e7   : > { %v1389_v38 = vmax.f32 %v1385_v53, %v6403_v60  ;;  %v6434_v53 = vmul.f32 %v5787_v61, %v6258_v1 }
 0x1e9   : > { %v1393_v44 = vmax.f32 %v1389_v38, %v1344_v41  ;;  %11271 = vst [vmem:[#allocation125_spill] sm:$0xff] %v6434_v53  ;;  %v1141_v38 = vpop.f32.mrf.mxu1  ;;  %v6452_v41 = vmul.f32 %v5787_v61, %v1131_v48 }
 0x1eb   : > { %v1397_v8 = vmax.f32 %v1393_v44, %v6428_v19  ;;  %v1143_v1 = vpop.f32.mrf.mxu1  ;;  %11275 = vst [vmem:[#allocation129_spill] sm:$0xff] %v6452_v41 }
 0x1ed   : > { %v1398_v39 = vmax.f32 %v1345_v22, %v1397_v8  ;;  %v6456_v8 = vmul.f32 %v5787_v61, %v1133_v45  ;;  %v1147_v22 = vpop.f32.mrf.mxu1 }
 0x1ee   : > { %v6475_v40 = vmul.f32 %v5787_v61, %v1147_v22 }
 0x1ef   : > { %v1399_v57 = vmax.f32 %v6434_v53, %v1398_v39  ;;  %11276 = vst [vmem:[#allocation130_spill] sm:$0xff] %v6456_v8 }
 0x1f0   : > { %11281 = vst [vmem:[#allocation135_spill] sm:$0xff] %v6475_v40 }
 0x1f1   : > { %v1400_v44 = vmax.f32 %v6439_v46, %v1399_v57  ;;  %v6464_v57 = vmul.f32 %v5787_v61, %v1139_v55 }
 0x1f3   : > { %v1401_v36 = vmax.f32 %v6443_v52, %v1400_v44  ;;  %11278 = vst [vmem:[#allocation132_spill] sm:$0xff] %v6464_v57  ;;  %v1149_v44 = vpop.f32.mrf.mxu1 }
 0x1f5   : > { %v1402_v49 = vmax.f32 %v6448_v5, %v1401_v36  ;;  %v6468_v36 = vmul.f32 %v5787_v61, %v1141_v38 }
 0x1f7   : > { %v1403_v37 = vmax.f32 %v6452_v41, %v1402_v49  ;;  %11279 = vst [vmem:[#allocation133_spill] sm:$0xff] %v6468_v36  ;;  %v6472_v49 = vmul.f32 %v5787_v61, %v1143_v1 }
 0x1f9   : > { %v1404_v39 = vmax.f32 %v6456_v8, %v1403_v37  ;;  %11280 = vst [vmem:[#allocation134_spill] sm:$0xff] %v6472_v49  ;;  %v1151_v37 = vpop.f32.mrf.mxu1 }
 0x1fb   : > { %v1405_v20 = vmax.f32 %v6459_v42, %v1404_v39  ;;  %v6480_v42 = vmul.f32 %v5787_v61, %v1149_v44 }
 0x1fd   : > { %v1406_v48 = vmax.f32 %v6464_v57, %v1405_v20  ;;  %11282 = vst [vmem:[#allocation136_spill] sm:$0xff] %v6480_v42  ;;  %v1153_v20 = vpop.f32.mrf.mxu1  ;;  %v6484_v57 = vmul.f32 %v5787_v61, %v1151_v37 }
 0x1ff   : > { %v1407_v45 = vmax.f32 %v6468_v36, %v1406_v48  ;;  %11283 = vst [vmem:[#allocation137_spill] sm:$0xff] %v6484_v57  ;;  %v6488_v48 = vmul.f32 %v5787_v61, %v1153_v20 }
 0x201   : > { %v1408_v39 = vmax.f32 %v6472_v49, %v1407_v45  ;;  %11284 = vst [vmem:[#allocation138_spill] sm:$0xff] %v6488_v48 }
 0x203   : > { %v1409_v55 = vmax.f32 %v6475_v40, %v1408_v39 }
 0x205   : > { %v1410_v38 = vmax.f32 %v6480_v42, %v1409_v55  ;;  %v5261_v55 = vmov 1966171168   ;;  %v10983_v42 = vlaneseq }
 0x206   : > { %v3070_v37 = vunpack.c.l.s4 %v5261_v55  ;;  %v11297_v55 = vld [vmem:[#allocation72_spill] sm:$0xff] }
 0x207   : > { %v1411_v1 = vmax.f32 %v6484_v57, %v1410_v38  ;;  %v6492_v38 = vshrl.u32 %v10983_v42, 7  ;;  %v11298_v42 = vlaneseq }
 0x208   : > { %v3071_v61 = vunpack.c.0.s8 %v3070_v37  ;;  %v11289_v37 = vld [vmem:[#allocation54_spill] sm:$0xff] }
 0x209   : > { %v1412_v22 = vmax.f32 %v6488_v48, %v1411_v1  ;;  %11285 = vst [vmem:[#allocation139_spill] sm:$0xff] %v6492_v38  ;;  %vm6562_vm2 = vcmp.lt.s32.totalorder %v11298_v42, 256  ;;  %v11305_v42 = vld [vmem:[#allocation88_spill] sm:$0xff]  ;;  %v11306_v48 = vld [vmem:[#allocation91_spill] sm:$0xff]  ;;  %v11307_v1 = vld [vmem:[#allocation98_spill] sm:$0xff] }
 0x20a   : > { %v11300_v27 = vsel %vm6562_vm2, 4294967295, %v11299_v27 }
 0x20b   : > { %1413 = vmax.xlane.f32.xlu0 %v1412_v22  ;;  %v11287_v22 = vld [vmem:[#allocation59_spill] sm:$0xff]  ;;  %11301 = vst [vmem:[#allocation141_spill] sm:$0xff] %v11300_v27 }
 0x294   : > { %v1414_v45 = vpop.xlane.xlu0 %1413 }
 0x295   : > { %v1415_v49 = vrot.slane %v1414_v45, 4 }
 0x297   : > { %v1416_v39 = vmax.f32 %v1414_v45, %v1415_v49  ;;  %v11290_v49 = vld [vmem:[#allocation55_spill] sm:$0xff]  ;;  %v11292_v45 = vld [vmem:[#allocation61_spill] sm:$0xff] }
 0x299   : > { %v1417_v40 = vrot.slane %v1416_v39, 2 }
 0x29b   : > { %v1418_v44 = vmax.f32 %v1416_v39, %v1417_v40  ;;  %v6499_v40 = vsub.s32 %v3071_v61, %v6492_v38  ;;  %v11293_v39 = vld [vmem:[#allocation63_spill] sm:$0xff]  ;;  %v11294_v61 = vld [vmem:[#allocation56_spill] sm:$0xff] }
 0x29c   : > { %v11302_v38 = vld [vmem:[#allocation75_spill] sm:$0xff] }
 0x29d   : > { %v1419_v36 = vrot.slane %v1418_v44, 1  ;;  %11286 = vst [vmem:[#allocation140_spill] sm:$0xff] %v6499_v40  ;;  %v11295_v40 = vld [vmem:[#allocation64_spill] sm:$0xff] }
 0x29f   : > { %v1420_v8 = vmax.f32 %v1418_v44, %v1419_v36  ;;  %v11288_v44 = vld [vmem:[#allocation50_spill] sm:$0xff]  ;;  %v11303_v36 = vld [vmem:[#allocation80_spill] sm:$0xff] }
 0x2a1   : > { %4478 = vpush %v1420_v8  ;;  %v11291_v8 = vld [vmem:[#allocation53_spill] sm:$0xff] }
 0x2d2   : > { %s4479_s29 = spop %4478 }
 0x2d3   : > { %v6494_v20 = vstv %s4479_s29 }
 0x2d4   : > { %v6645_v17 = vmax.f32 %v6615_v34, %v6494_v20  ;;  %v11318_v16 = vsub.f32 %v11287_v22, %v6494_v20  ;;  %v11319_v33 = vsub.f32 %v6100_v0, %v6494_v20  ;;  %v11329_v22 = vsub.f32 %v6080_v15, %v6494_v20  ;;  %v11342_v15 = vld [vmem:[#allocation32_spill] sm:$0xff] }
 0x2d5   : > { %v11366_v34 = vsub.f32 %v11288_v44, %v6494_v20  ;;  %v11371_v25 = vsub.f32 %v11290_v49, %v6494_v20  ;;  %v11373_v49 = vsub.f32 %v11291_v8, %v6494_v20  ;;  %v11382_v46 = vsub.f32 %v6117_v7, %v6494_v20  ;;  %v11386_v7 = vld [vmem:[#allocation66_spill] sm:$0xff] }
 0x2d6   : > { %11317 = vst [vmem:[#allocation143_spill] sm:$0xff] %v6645_v17  ;;  %v1555_v35 = vmul.f32 1.442695, %v11318_v16  ;;  %v1557_v9 = vmul.f32 1.442695, %v11319_v33  ;;  %v11326_v33 = vsub.f32 %v6052_v50, %v6494_v20  ;;  %v11336_v16 = vld [vmem:[#allocation26_spill] sm:$0xff] }
 0x2d7   : > { %3090 = vst.msk [vmem:[%s3041_s7] ss:$2 sm:$0x3] %vm6562_vm2, %v6645_v17  ;;  %v1553_v2 = vmul.f32 1.442695, %v11329_v22  ;;  %v11370_v22 = vsub.f32 %v11289_v37, %v6494_v20 }
 0x2d8   : > { %4572 = vpow2.f32 %v1555_v35  ;;  %v1551_v59 = vmul.f32 1.442695, %v11326_v33  ;;  %v1559_v58 = vmul.f32 1.442695, %v11366_v34  ;;  %v11372_v34 = vsub.f32 %v6088_v63, %v6494_v20 }
 0x2d9   : > { %4574 = vpow2.f32 %v1557_v9  ;;  %v1561_v35 = vmul.f32 1.442695, %v11370_v22  ;;  %v1567_v37 = vmul.f32 1.442695, %v11373_v49  ;;  %v1573_v41 = vmul.f32 1.442695, %v11382_v46 }
 0x2da   : > { %4576 = vpow2.f32 %v1551_v59  ;;  %v1563_v59 = vmul.f32 1.442695, %v11371_v25  ;;  %v1565_v19 = vmul.f32 1.442695, %v11372_v34  ;;  %v11376_v34 = vsub.f32 %v11292_v45, %v6494_v20 }
 0x2db   : > { %4578 = vpow2.f32 %v1553_v2  ;;  %v11388_v49 = vsub.f32 %v6139_v47, %v6494_v20 }
 0x2dc   : > { %4580 = vpow2.f32 %v1559_v58  ;;  %v1569_v63 = vmul.f32 1.442695, %v11376_v34  ;;  %v11379_v58 = vsub.f32 %v11293_v39, %v6494_v20  ;;  %v11384_v39 = vsub.f32 %v11294_v61, %v6494_v20 }
 0x2dd   : > { %4582 = vpow2.f32 %v1561_v35  ;;  %v1579_v61 = vmul.f32 1.442695, %v11388_v49  ;;  %v11392_v35 = vld [vmem:[#allocation70_spill] sm:$0xff] }
 0x2de   : > { %v1571_v52 = vmul.f32 1.442695, %v11379_v58  ;;  %4584 = vpow2.f32 %v1563_v59  ;;  %v1575_v59 = vmul.f32 1.442695, %v11384_v39  ;;  %v11389_v39 = vld [vmem:[#allocation71_spill] sm:$0xff]  ;;  %v11393_v50 = vsub.f32 %v11392_v35, %v6494_v20 }
 0x2df   : > { %4586 = vpow2.f32 %v1565_v19  ;;  %v11387_v19 = vsub.f32 %v11386_v7, %v6494_v20  ;;  %v11397_v35 = vsub.f32 %v6167_v62, %v6494_v20  ;;  %v11403_v62 = vld [vmem:[#allocation85_spill] sm:$0xff] }
 0x2e0   : > { %4588 = vpow2.f32 %v1567_v37  ;;  %v11391_v37 = vsub.f32 %v11295_v40, %v6494_v20  ;;  %v1585_v7 = vmul.f32 1.442695, %v11393_v50  ;;  %v11396_v40 = vsub.f32 %v11296_v28, %v6494_v20 }
 0x2e1   : > { %v1577_v46 = vmul.f32 1.442695, %v11387_v19  ;;  %4590 = vpow2.f32 %v1569_v63  ;;  %v11394_v63 = vsub.f32 %v6163_v43, %v6494_v20  ;;  %v1593_v50 = vmul.f32 1.442695, %v11397_v35  ;;  %v11405_v43 = vld [vmem:[#allocation87_spill] sm:$0xff] }
 0x2e2   : > { %v1583_v34 = vmul.f32 1.442695, %v11391_v37  ;;  %4592 = vpow2.f32 %v1571_v52  ;;  %v1591_v52 = vmul.f32 1.442695, %v11396_v40  ;;  %v11402_v28 = vsub.f32 %v6190_v31, %v6494_v20 }
 0x2e3   : > { %v1587_v19 = vmul.f32 1.442695, %v11394_v63  ;;  %4594 = vpow2.f32 %v1573_v41  ;;  %v11399_v63 = vld [vmem:[#allocation81_spill] sm:$0xff] }
 0x2e4   : > { %4596 = vpow2.f32 %v1575_v59  ;;  %v11400_v41 = vsub.f32 %v11399_v63, %v6494_v20  ;;  %v1601_v40 = vmul.f32 1.442695, %v11402_v28  ;;  %v11404_v59 = vsub.f32 %v11403_v62, %v6494_v20 }
 0x2e5   : > { %v6764_v33 = vpop.eup %4572  ;;  %4598 = vpow2.f32 %v1577_v46  ;;  %v11407_v63 = vsub.f32 %v11302_v38, %v6494_v20  ;;  %v11408_v46 = vld [vmem:[#allocation82_spill] sm:$0xff]  ;;  %v11410_v62 = vsub.f32 %v6250_v32, %v6494_v20  ;;  %v11412_v38 = vsub.f32 %v11303_v36, %v6494_v20 }
 0x2e6   : > { %v6775_v9 = vpop.eup %4574  ;;  %v1597_v49 = vmul.f32 1.442695, %v11400_v41  ;;  %v1603_v35 = vmul.f32 1.442695, %v11404_v59  ;;  %4600 = vpow2.f32 %v1579_v61  ;;  %v11409_v41 = vsub.f32 %v11408_v46, %v6494_v20 }
 0x2e7   : > { %v1810_v25 = vadd.f32 %v6775_v9, %v6764_v33  ;;  %v6800_v44 = vpop.eup %4576  ;;  %v6891_v28 = vmul.f32 1.442695, %v11410_v62  ;;  %v6901_v59 = vmul.f32 1.442695, %v11412_v38  ;;  %v11417_v36 = vsub.f32 %v11304_v10, %v6494_v20 }
 0x2e8   : > { %v6809_v5 = vpop.eup %4578 }
 0x2e9   : > { %1811 = vadd.xlane.f32.xlu1 %v1810_v25  ;;  %v1807_v58 = vadd.f32 %v6809_v5, %v6800_v44  ;;  %v11390_v25 = vsub.f32 %v11389_v39, %v6494_v20  ;;  %v6923_v38 = vmul.f32 1.442695, %v11417_v36 }
 0x2eb   : > { %v1581_v45 = vmul.f32 1.442695, %v11390_v25  ;;  %1808 = vadd.xlane.f32.xlu0 %v1807_v58  ;;  %v11395_v25 = vsub.f32 %v6186_v23, %v6494_v20  ;;  %v11398_v58 = vsub.f32 %v6195_v11, %v6494_v20 }
 0x2ed   : > { %v1589_v39 = vmul.f32 1.442695, %v11395_v25  ;;  %v1595_v37 = vmul.f32 1.442695, %v11398_v58  ;;  %v11401_v25 = vsub.f32 %v11297_v55, %v6494_v20  ;;  %v11406_v58 = vsub.f32 %v11405_v43, %v6494_v20 }
 0x2ee   : > { %v6881_v55 = vmul.f32 1.442695, %v11407_v63  ;;  %4602 = vpow2.f32 %v1581_v45  ;;  %v11411_v43 = vsub.f32 %v6283_v13, %v6494_v20  ;;  %v11415_v45 = vsub.f32 %v6274_v4, %v6494_v20 }
 0x2ef   : > { %v1599_v23 = vmul.f32 1.442695, %v11401_v25  ;;  %v6876_v11 = vmul.f32 1.442695, %v11406_v58  ;;  %v6886_v25 = vmul.f32 1.442695, %v11409_v41  ;;  %4604 = vpow2.f32 %v1583_v34  ;;  %v6908_v41 = vpop.eup %4580 }
 0x2f0   : > { %v6896_v61 = vmul.f32 1.442695, %v11411_v43  ;;  %v11413_v58 = vld [vmem:[#allocation86_spill] sm:$0xff]  ;;  %v6913_v62 = vmul.f32 1.442695, %v11415_v45  ;;  %v11416_v43 = vsub.f32 %v6314_v24, %v6494_v20  ;;  %4606 = vpow2.f32 %v1585_v7  ;;  %v11420_v45 = vld [vmem:[#allocation97_spill] sm:$0xff] }
 0x2f1   : > { %v11414_v63 = vsub.f32 %v11413_v58, %v6494_v20  ;;  %v6925_v58 = vpop.eup %4582  ;;  %v11418_v34 = vld [vmem:[#allocation90_spill] sm:$0xff]  ;;  %v11421_v4 = vsub.f32 %v11420_v45, %v6494_v20  ;;  %4608 = vpow2.f32 %v1587_v19  ;;  %v11423_v7 = vsub.f32 %v11305_v42, %v6494_v20 }
 0x2f2   : > { %v6918_v13 = vmul.f32 1.442695, %v11416_v43  ;;  %v11422_v43 = vsub.f32 %v6335_v30, %v6494_v20  ;;  %v6942_v10 = vpop.eup %4584  ;;  %4610 = vpow2.f32 %v1589_v39  ;;  %v11428_v19 = vsub.f32 %v6355_v6, %v6494_v20  ;;  %v11431_v39 = vld [vmem:[#allocation106_spill] sm:$0xff] }
 0x2f3   : > { %v6906_v46 = vmul.f32 1.442695, %v11414_v63  ;;  %v11419_v63 = vsub.f32 %v11418_v34, %v6494_v20  ;;  %v6935_v31 = vmul.f32 1.442695, %v11421_v4  ;;  %v6947_v36 = vmul.f32 1.442695, %v11423_v7 }
 0x2f4   : > { %v6940_v24 = vmul.f32 1.442695, %v11422_v43  ;;  %v11424_v34 = vld [vmem:[#allocation94_spill] sm:$0xff]  ;;  %v6959_v43 = vpop.eup %4586  ;;  %v6964_v30 = vmul.f32 1.442695, %v11428_v19  ;;  %v11429_v42 = vsub.f32 %v11306_v48, %v6494_v20  ;;  %4612 = vpow2.f32 %v1591_v52  ;;  %v11435_v52 = vld [vmem:[#allocation103_spill] sm:$0xff] }
 0x2f5   : > { %v6930_v32 = vmul.f32 1.442695, %v11419_v63  ;;  %v11425_v63 = vsub.f32 %v11424_v34, %v6494_v20  ;;  %v11426_v4 = vld [vmem:[#allocation102_spill] sm:$0xff]  ;;  %v11430_v34 = vsub.f32 %v11307_v1, %v6494_v20  ;;  %v11433_v19 = vsub.f32 %v6373_v29, %v6494_v20 }
 0x2f6   : > { %v11427_v45 = vsub.f32 %v11426_v4, %v6494_v20  ;;  %v6969_v7 = vmul.f32 1.442695, %v11429_v42  ;;  %v6976_v4 = vpop.eup %4588  ;;  %v11434_v48 = vsub.f32 %v11308_v51, %v6494_v20  ;;  %4614 = vpow2.f32 %v1593_v50 }
 0x2f7   : > { %v6952_v47 = vmul.f32 1.442695, %v11425_v63  ;;  %v6974_v63 = vmul.f32 1.442695, %v11430_v34  ;;  %v6986_v6 = vmul.f32 1.442695, %v11433_v19  ;;  %v6993_v1 = vpop.eup %4590  ;;  %v11436_v34 = vsub.f32 %v11435_v52, %v6494_v20 }
 0x2f8   : > { %v6957_v17 = vmul.f32 1.442695, %v11427_v45  ;;  %v11432_v45 = vsub.f32 %v11431_v39, %v6494_v20  ;;  %v6991_v42 = vmul.f32 1.442695, %v11434_v48  ;;  %v11437_v39 = vld [vmem:[#allocation110_spill] sm:$0xff]  ;;  %v11439_v19 = vld [vmem:[#allocation117_spill] sm:$0xff]  ;;  %4616 = vpow2.f32 %v1595_v37  ;;  %v7010_v51 = vpop.eup %4592 }
 0x2f9   : > { %v6998_v8 = vmul.f32 1.442695, %v11436_v34  ;;  %v11440_v29 = vsub.f32 %v11439_v19, %v6494_v20  ;;  %v11441_v50 = vsub.f32 %v11311_v56, %v6494_v20  ;;  %v11442_v52 = vld [vmem:[#allocation107_spill] sm:$0xff]  ;;  %4618 = vpow2.f32 %v1597_v49  ;;  %v11447_v56 = vld [vmem:[#allocation104_spill] sm:$0xff]  ;;  %v11453_v49 = vld [vmem:[#allocation118_spill] sm:$0xff] }
 0x2fa   : > { %v6981_v57 = vmul.f32 1.442695, %v11432_v45  ;;  %v11438_v45 = vsub.f32 %v11437_v39, %v6494_v20  ;;  %v11443_v34 = vsub.f32 %v11442_v52, %v6494_v20  ;;  %v11444_v39 = vld [vmem:[#allocation114_spill] sm:$0xff]  ;;  %v11446_v37 = vsub.f32 %v6407_v54, %v6494_v20  ;;  %v11450_v52 = vld [vmem:[#allocation111_spill] sm:$0xff] }
 0x2fb   : > { %v7008_v53 = vmul.f32 1.442695, %v11440_v29  ;;  %v7015_v48 = vmul.f32 1.442695, %v11441_v50  ;;  %v7027_v29 = vpop.eup %4594  ;;  %v11448_v50 = vsub.f32 %v11447_v56, %v6494_v20  ;;  %4620 = vpow2.f32 %v1599_v23  ;;  %v11459_v56 = vld [vmem:[#allocation112_spill] sm:$0xff]  ;;  %v11462_v23 = vld [vmem:[#allocation115_spill] sm:$0xff] }
 0x2fc   : > { %v7003_v22 = vmul.f32 1.442695, %v11438_v45  ;;  %v7020_v60 = vmul.f32 1.442695, %v11443_v34  ;;  %v11445_v45 = vsub.f32 %v11444_v39, %v6494_v20  ;;  %v7032_v19 = vmul.f32 1.442695, %v11446_v37  ;;  %v7044_v39 = vpop.eup %4596 }
 0x2fd   : > { %v7037_v0 = vmul.f32 1.442695, %v11448_v50  ;;  %v11451_v34 = vsub.f32 %v11450_v52, %v6494_v20  ;;  %v11456_v37 = vld [vmem:[#allocation122_spill] sm:$0xff]  ;;  %v11460_v50 = vsub.f32 %v11459_v56, %v6494_v20  ;;  %4622 = vpow2.f32 %v1601_v40  ;;  %v7061_v52 = vpop.eup %4598  ;;  %v11468_v40 = vld [vmem:[#allocation11_spill] sm:$0xff] }
 0x2fe   : > { %v7025_v3 = vmul.f32 1.442695, %v11445_v45  ;;  %v11454_v45 = vsub.f32 %v11453_v49, %v6494_v20  ;;  %v11457_v54 = vsub.f32 %v11456_v37, %v6494_v20  ;;  %v11464_v49 = vld [vmem:[#allocation121_spill] sm:$0xff]  ;;  %4624 = vpow2.f32 %v1603_v35  ;;  %v7078_v56 = vpop.eup %4600 }
 0x2ff   : > { %11449 = vst [vmem:[#allocation144_spill] sm:$0xff] %v7037_v0  ;;  %v7042_v18 = vmul.f32 1.442695, %v11451_v34  ;;  %v7059_v0 = vmul.f32 1.442695, %v11460_v50  ;;  %v11463_v34 = vsub.f32 %v11462_v23, %v6494_v20  ;;  %v11469_v50 = vsub.f32 %v11468_v40, %v6494_v20  ;;  %v7096_v35 = vpop.eup %4602 }
 0x300   : > { %v7049_v27 = vmul.f32 1.442695, %v11454_v45  ;;  %v7054_v2 = vmul.f32 1.442695, %v11457_v54  ;;  %v11465_v45 = vsub.f32 %v11464_v49, %v6494_v20  ;;  %v11466_v54 = vld [vmem:[#allocation123_spill] sm:$0xff]  ;;  %v11470_v23 = vsub.f32 %v11320_v14, %v6494_v20 }
 0x301   : > { %11452 = vst [vmem:[#allocation145_spill] sm:$0xff] %v7042_v18  ;;  %11461 = vst [vmem:[#allocation148_spill] sm:$0xff] %v7059_v0  ;;  %v7066_v18 = vmul.f32 1.442695, %v11463_v34  ;;  %v11467_v37 = vsub.f32 %v11466_v54, %v6494_v20  ;;  %v7083_v0 = vmul.f32 1.442695, %v11469_v50  ;;  %v11471_v49 = vsub.f32 %v11321_v12, %v6494_v20 }
 0x302   : > { %11455 = vst [vmem:[#allocation146_spill] sm:$0xff] %v7049_v27  ;;  %11458 = vst [vmem:[#allocation147_spill] sm:$0xff] %v7054_v2  ;;  %v7071_v27 = vmul.f32 1.442695, %v11465_v45  ;;  %v7088_v34 = vmul.f32 1.442695, %v11470_v23  ;;  %4626 = vpow2.f32 %v6876_v11  ;;  %v11473_v54 = vsub.f32 %v11322_v21, %v6494_v20  ;;  %v7114_v11 = vpop.eup %4604 }
 0x303   : > { %v7076_v2 = vmul.f32 1.442695, %v11467_v37  ;;  %v7093_v45 = vmul.f32 1.442695, %v11471_v49  ;;  %v11475_v40 = vsub.f32 %v11323_v26, %v6494_v20  ;;  %v11476_v50 = vld [vmem:[#allocation16_spill] sm:$0xff]  ;;  %4628 = vpow2.f32 %v6881_v55  ;;  %v11479_v49 = vld [vmem:[#allocation17_spill] sm:$0xff] }
 0x304   : > { %v7101_v37 = vmul.f32 1.442695, %v11473_v54  ;;  %v11477_v23 = vsub.f32 %v11476_v50, %v6494_v20  ;;  %v11482_v54 = vld [vmem:[#allocation18_spill] sm:$0xff]  ;;  %4630 = vpow2.f32 %v6886_v25  ;;  %v7129_v50 = vpop.eup %4606  ;;  %v11485_v55 = vld [vmem:[#allocation19_spill] sm:$0xff]  ;;  %v2965_v25 = vadd.f32 %v6809_v5, %v6775_v9 }
 0x305   : > { %11472 = vst [vmem:[#allocation149_spill] sm:$0xff] %v7093_v45  ;;  %v7106_v14 = vmul.f32 1.442695, %v11475_v40  ;;  %v11480_v45 = vsub.f32 %v11479_v49, %v6494_v20  ;;  %v2896_v40 = vadd.f32 %v6800_v44, %v6764_v33  ;;  %v11488_v49 = vld [vmem:[#allocation20_spill] sm:$0xff]  ;;  %4632 = vpow2.f32 %v6891_v28  ;;  %v11493_v5 = vld [vmem:[#allocation22_spill] sm:$0xff] }
 0x306   : > { %11474 = vst [vmem:[#allocation150_spill] sm:$0xff] %v7101_v37  ;;  %v7111_v12 = vmul.f32 1.442695, %v11477_v23  ;;  %v11483_v37 = vsub.f32 %v11482_v54, %v6494_v20  ;;  %v11486_v23 = vsub.f32 %v11485_v55, %v6494_v20  ;;  %4634 = vpow2.f32 %v6896_v61 }
 0x307   : > { %v7119_v21 = vmul.f32 1.442695, %v11480_v45  ;;  %v11489_v45 = vsub.f32 %v11488_v49, %v6494_v20  ;;  %v1813_v33 = vadd.f32 %v6925_v58, %v6908_v41  ;;  %v2897_v44 = vadd.f32 %v6908_v41, %v2896_v40  ;;  %v11495_v40 = vld [vmem:[#allocation23_spill] sm:$0xff] }
 0x308   : > { %11478 = vst [vmem:[#allocation151_spill] sm:$0xff] %v7111_v12  ;;  %v7124_v26 = vmul.f32 1.442695, %v11483_v37  ;;  %v7134_v12 = vmul.f32 1.442695, %v11486_v23  ;;  %v7144_v37 = vpop.eup %4608  ;;  %v1816_v54 = vadd.f32 %v6959_v43, %v6942_v10  ;;  %v11491_v23 = vld [vmem:[#allocation21_spill] sm:$0xff]  ;;  %v11494_v9 = vsub.f32 %v11493_v5, %v6494_v20 }
 0x309   : > { %11481 = vst [vmem:[#allocation152_spill] sm:$0xff] %v7119_v21  ;;  %v7139_v21 = vmul.f32 1.442695, %v11489_v45  ;;  %v7152_v55 = vpop.eup %4610  ;;  %v11492_v28 = vsub.f32 %v11491_v23, %v6494_v20  ;;  %4636 = vpow2.f32 %v6901_v59  ;;  %v2966_v61 = vadd.f32 %v6925_v58, %v2965_v25  ;;  %1814 = vadd.xlane.f32.xlu1 %v1813_v33  ;;  %v11499_v58 = vld [vmem:[#allocation25_spill] sm:$0xff] }
 0x30a   : > { %11484 = vst [vmem:[#allocation153_spill] sm:$0xff] %v7124_v26  ;;  %11487 = vst [vmem:[#allocation154_spill] sm:$0xff] %v7134_v12  ;;  %v7162_v45 = vmul.f32 1.442695, %v11494_v9  ;;  %v7166_v41 = vpop.eup %4612  ;;  %v11497_v26 = vld [vmem:[#allocation24_spill] sm:$0xff]  ;;  %4638 = vpow2.f32 %v6906_v46  ;;  %1817 = vadd.xlane.f32.xlu0 %v1816_v54  ;;  %v2898_v59 = vadd.f32 %v6942_v10, %v2897_v44  ;;  %v11500_v25 = vsub.f32 %v11499_v58, %v6494_v20 }
 0x30b   : > { %11490 = vst [vmem:[#allocation155_spill] sm:$0xff] %v7139_v21  ;;  %v7157_v49 = vmul.f32 1.442695, %v11492_v28  ;;  %v11496_v21 = vsub.f32 %v11495_v40, %v6494_v20  ;;  %v11498_v23 = vsub.f32 %v11497_v26, %v6494_v20  ;;  %v7180_v5 = vpop.eup %4614  ;;  %4640 = vpow2.f32 %v6913_v62  ;;  %v7194_v26 = vld [vmem:[#allocation2 + $0x8] sm:$0xff] }
 0x30c   : > { %v7185_v9 = vmul.f32 1.442695, %v11500_v25  ;;  %v2967_v46 = vadd.f32 %v6959_v43, %v2966_v61  ;;  %11503 = vst [vmem:[#allocation157_spill] sm:$0xff] %v7194_v26  ;;  %v7196_v33 = vpop.eup %4616  ;;  %4642 = vpow2.f32 %v6918_v13  ;;  %v1819_v10 = vadd.f32 %v6993_v1, %v6976_v4  ;;  %v11506_v61 = vld [vmem:[#allocation28_spill] sm:$0xff] }
 0x30d   : > { %v7171_v12 = vmul.f32 1.442695, %v11496_v21  ;;  %v7176_v28 = vmul.f32 1.442695, %v11498_v23  ;;  %v11501_v21 = vsub.f32 %v11336_v16, %v6494_v20  ;;  %v2899_v44 = vadd.f32 %v6976_v4, %v2898_v59  ;;  %v7204_v54 = vpop.eup %4618  ;;  %v11504_v23 = vld [vmem:[#allocation27_spill] sm:$0xff]  ;;  %v11508_v59 = vld [vmem:[#allocation29_spill] sm:$0xff] }
 0x30e   : > { %v1822_v16 = vadd.f32 %v7027_v29, %v7010_v51  ;;  %v11505_v62 = vsub.f32 %v11504_v23, %v6494_v20  ;;  %v11507_v58 = vsub.f32 %v11506_v61, %v6494_v20  ;;  %4644 = vpow2.f32 %v6923_v38  ;;  %v7218_v4 = vpop.eup %4620  ;;  %1820 = vadd.xlane.f32.xlu1 %v1819_v10  ;;  %v7231_v38 = vld [vmem:[#allocation2] sm:$0xff] }
 0x30f   : > { %v7190_v40 = vmul.f32 1.442695, %v11501_v21  ;;  %v2968_v13 = vadd.f32 %v6993_v1, %v2967_v46  ;;  %v11509_v21 = vsub.f32 %v11508_v59, %v6494_v20  ;;  %4646 = vpow2.f32 %v6930_v32  ;;  %11511 = vst [vmem:[#allocation159_spill] sm:$0xff] %v7231_v38  ;;  %v7233_v1 = vpop.eup %4622  ;;  %v11512_v46 = vld [vmem:[#allocation30_spill] sm:$0xff] }
 0x310   : > { %v7209_v43 = vmul.f32 1.442695, %v11505_v62  ;;  %v7214_v25 = vmul.f32 1.442695, %v11507_v58  ;;  %1823 = vadd.xlane.f32.xlu0 %v1822_v16  ;;  %v2900_v23 = vadd.f32 %v7010_v51, %v2899_v44  ;;  %v7229_v62 = vmax.f32 %v7194_v26, %v6494_v20  ;;  %v7242_v10 = vpop.eup %4624 }
 0x311   : > { %11502 = vst [vmem:[#allocation156_spill] sm:$0xff] %v7190_v40  ;;  %v7223_v40 = vmul.f32 1.442695, %v11509_v21  ;;  %v11513_v61 = vsub.f32 %v11512_v46, %v6494_v20  ;;  %4648 = vpow2.f32 %v6935_v31  ;;  %v2969_v32 = vadd.f32 %v7027_v29, %v2968_v13  ;;  %v7253_v31 = vpop.eup %4626  ;;  %v11515_v29 = vld [vmem:[#allocation31_spill] sm:$0xff]  ;;  %v7266_v46 = vld [vmem:[#allocation2 + $0x10] sm:$0xff] }
 0x312   : > { %11510 = vst [vmem:[#allocation158_spill] sm:$0xff] %v7229_v62  ;;  %v1825_v51 = vadd.f32 %v7061_v52, %v7044_v39  ;;  %v2901_v44 = vadd.f32 %v7044_v39, %v2900_v23  ;;  %v1828_v16 = vadd.f32 %v7096_v35, %v7078_v56  ;;  %2833 = vst.msk [vmem:[#allocation2 + $0x8] sm:$0xff] %vm11100_vm3, %v7229_v62  ;;  %4650 = vpow2.f32 %v6940_v24 }
 0x313   : > { %v7238_v58 = vmul.f32 1.442695, %v11513_v61  ;;  %v11516_v13 = vsub.f32 %v11515_v29, %v6494_v20  ;;  %v2970_v39 = vadd.f32 %v7061_v52, %v2969_v32  ;;  %v7264_v23 = vmax.f32 %v7231_v38, %v6494_v20  ;;  %11519 = vst [vmem:[#allocation163_spill] sm:$0xff] %v7266_v46  ;;  %v7268_v61 = vpop.eup %4628  ;;  %v11521_v29 = vld [vmem:[#allocation33_spill] sm:$0xff]  ;;  %v11523_v32 = vld [vmem:[#allocation34_spill] sm:$0xff] }
 0x314   : > { %v11520_v59 = vsub.f32 %v11342_v15, %v6494_v20  ;;  %4652 = vpow2.f32 %v6947_v36  ;;  %1826 = vadd.xlane.f32.xlu1 %v1825_v51  ;;  %1829 = vadd.xlane.f32.xlu0 %v1828_v16  ;;  %v2902_v24 = vadd.f32 %v7078_v56, %v2901_v44  ;;  %v7282_v52 = vpop.eup %4630  ;;  %v1831_v56 = vadd.f32 %v7129_v50, %v7114_v11  ;;  %v11527_v16 = vld [vmem:[#allocation35_spill] sm:$0xff]  ;;  %v11531_v38 = vld [vmem:[#allocation37_spill] sm:$0xff] }
 0x315   : > { %11514 = vst [vmem:[#allocation160_spill] sm:$0xff] %v7238_v58  ;;  %v7258_v21 = vmul.f32 1.442695, %v11516_v13  ;;  %11518 = vst [vmem:[#allocation162_spill] sm:$0xff] %v7264_v23  ;;  %v11522_v13 = vsub.f32 %v11521_v29, %v6494_v20  ;;  %4654 = vpow2.f32 %v6952_v47  ;;  %v2971_v15 = vadd.f32 %v7096_v35, %v2970_v39  ;;  %v7295_v36 = vpop.eup %4632  ;;  %v11529_v29 = vld [vmem:[#allocation36_spill] sm:$0xff] }
 0x316   : > { %v7273_v26 = vmul.f32 1.442695, %v11520_v59  ;;  %2832 = vst.msk [vmem:[#allocation2] sm:$0xff] %vm11100_vm3, %v7264_v23  ;;  %v2903_v51 = vadd.f32 %v7114_v11, %v2902_v24  ;;  %v1834_v44 = vadd.f32 %v7152_v55, %v7144_v37  ;;  %v7304_v47 = vmax.f32 %v7266_v46, %v6494_v20  ;;  %v7306_v35 = vpop.eup %4634  ;;  %v7320_v24 = vld [vmem:[#allocation2 + $0x18] sm:$0xff] }
 0x317   : > { %11517 = vst [vmem:[#allocation161_spill] sm:$0xff] %v7258_v21  ;;  %v7278_v62 = vmul.f32 1.442695, %v11522_v13  ;;  %v11524_v21 = vsub.f32 %v11523_v32, %v6494_v20  ;;  %v11530_v13 = vsub.f32 %v11529_v29, %v6494_v20  ;;  %4656 = vpow2.f32 %v6957_v17  ;;  %v7322_v59 = vpop.eup %4636  ;;  %v7356_v29 = vld [vmem:[#allocation2 + $0x20] sm:$0xff]  ;;  %v11540_v17 = vld [vmem:[#allocation41_spill] sm:$0xff] }
 0x318   : > { %11526 = vst [vmem:[#allocation165_spill] sm:$0xff] %v7304_v47  ;;  %v2972_v11 = vadd.f32 %v7129_v50, %v2971_v15  ;;  %v11532_v23 = vsub.f32 %v11531_v38, %v6494_v20  ;;  %4658 = vpow2.f32 %v6964_v30  ;;  %1832 = vadd.xlane.f32.xlu1 %v1831_v56  ;;  %1835 = vadd.xlane.f32.xlu0 %v1834_v44  ;;  %2834 = vst.msk [vmem:[#allocation2 + $0x10] sm:$0xff] %vm11100_vm3, %v7304_v47  ;;  %v7335_v50 = vpop.eup %4638  ;;  %v11533_v15 = vld [vmem:[#allocation38_spill] sm:$0xff] }
 0x319   : > { %v7287_v58 = vmul.f32 1.442695, %v11524_v21  ;;  %v11528_v21 = vsub.f32 %v11527_v16, %v6494_v20  ;;  %v7316_v32 = vmul.f32 1.442695, %v11530_v13  ;;  %v2904_v16 = vadd.f32 %v7144_v37, %v2903_v51  ;;  %11535 = vst [vmem:[#allocation166_spill] sm:$0xff] %v7356_v29 }
 0x31a   : > { %4660 = vpow2.f32 %v6969_v7  ;;  %v2973_v30 = vadd.f32 %v7152_v55, %v2972_v11  ;;  %v1837_v37 = vadd.f32 %v7180_v5, %v7166_v41  ;;  %v1840_v51 = vadd.f32 %v7204_v54, %v7196_v33  ;;  %v11536_v55 = vld [vmem:[#allocation39_spill] sm:$0xff] }
 0x31b   : > { %11525 = vst [vmem:[#allocation164_spill] sm:$0xff] %v7287_v58  ;;  %v7311_v39 = vmul.f32 1.442695, %v11528_v21  ;;  %v7327_v58 = vmul.f32 1.442695, %v11532_v23  ;;  %v11534_v21 = vsub.f32 %v11533_v15, %v6494_v20  ;;  %v7346_v23 = vpop.eup %4640  ;;  %4662 = vpow2.f32 %v6974_v63  ;;  %v11538_v15 = vld [vmem:[#allocation40_spill] sm:$0xff] }
 0x31c   : > { %v2905_v56 = vadd.f32 %v7166_v41, %v2904_v16  ;;  %v7354_v44 = vmax.f32 %v7320_v24, %v6494_v20  ;;  %v7358_v7 = vpop.eup %4642  ;;  %v11537_v13 = vsub.f32 %v11536_v55, %v6494_v20  ;;  %v11539_v63 = vsub.f32 %v11538_v15, %v6494_v20  ;;  %1838 = vadd.xlane.f32.xlu1 %v1837_v37  ;;  %v11545_v15 = vld [vmem:[#allocation43_spill] sm:$0xff] }
 0x31d   : > { %v7340_v38 = vmul.f32 1.442695, %v11534_v21  ;;  %4664 = vpow2.f32 %v6981_v57  ;;  %v2974_v16 = vadd.f32 %v7180_v5, %v2973_v30  ;;  %v7372_v21 = vpop.eup %4644  ;;  %v11541_v46 = vsub.f32 %v11540_v17, %v6494_v20  ;;  %1841 = vadd.xlane.f32.xlu0 %v1840_v51  ;;  %v11542_v5 = vld [vmem:[#allocation42_spill] sm:$0xff] }
 0x31e   : > { %v7363_v11 = vmul.f32 1.442695, %v11537_v13  ;;  %v7368_v41 = vmul.f32 1.442695, %v11539_v63  ;;  %4666 = vpow2.f32 %v6986_v6  ;;  %v2906_v55 = vadd.f32 %v7196_v33, %v2905_v56  ;;  %2835 = vst.msk [vmem:[#allocation2 + $0x18] sm:$0xff] %vm11100_vm3, %v7354_v44  ;;  %v7385_v57 = vpop.eup %4646 }
 0x31f   : > { %v7377_v47 = vmul.f32 1.442695, %v11541_v46  ;;  %v11543_v30 = vsub.f32 %v11542_v5, %v6494_v20  ;;  %4668 = vpow2.f32 %v6991_v42  ;;  %v2975_v6 = vadd.f32 %v7204_v54, %v2974_v16  ;;  %v7398_v46 = vld [vmem:[#allocation2 + $0x28] sm:$0xff]  ;;  %v7400_v37 = vpop.eup %4648 }
 0x320   : > { %v7396_v33 = vmax.f32 %v7356_v29, %v6494_v20  ;;  %11544 = vst [vmem:[#allocation167_spill] sm:$0xff] %v7398_v46  ;;  %4670 = vpow2.f32 %v6998_v8  ;;  %v1843_v56 = vadd.f32 %v7233_v1, %v7218_v4  ;;  %v2907_v51 = vadd.f32 %v7218_v4, %v2906_v55  ;;  %v7419_v5 = vpop.eup %4650  ;;  %v11547_v4 = vld [vmem:[#allocation44_spill] sm:$0xff]  ;;  %v11570_v29 = vld [vmem:[#allocation146_spill] sm:$0xff] }
 0x321   : > { %v7390_v17 = vmul.f32 1.442695, %v11543_v30  ;;  %v1846_v42 = vadd.f32 %v7253_v31, %v7242_v10  ;;  %v11546_v54 = vsub.f32 %v11545_v15, %v6494_v20  ;;  %4672 = vpow2.f32 %v7003_v22  ;;  %v11550_v15 = vld [vmem:[#allocation45_spill] sm:$0xff] }
 0x322   : > { %v2976_v16 = vadd.f32 %v7233_v1, %v2975_v6  ;;  %2836 = vst.msk [vmem:[#allocation2 + $0x20] sm:$0xff] %vm11100_vm3, %v7396_v33  ;;  %v11548_v55 = vsub.f32 %v11547_v4, %v6494_v20  ;;  %4674 = vpow2.f32 %v7008_v53  ;;  %1844 = vadd.xlane.f32.xlu1 %v1843_v56  ;;  %v2908_v22 = vadd.f32 %v7242_v10, %v2907_v51  ;;  %v7432_v6 = vpop.eup %4652  ;;  %v7443_v56 = vld [vmem:[#allocation2 + $0x30] sm:$0xff] }
 0x323   : > { %v7411_v63 = vmul.f32 1.442695, %v11546_v54  ;;  %1847 = vadd.xlane.f32.xlu0 %v1846_v42  ;;  %v7430_v1 = vmax.f32 %v7398_v46, %v6494_v20  ;;  %v11551_v54 = vsub.f32 %v11550_v15, %v6494_v20  ;;  %4676 = vpow2.f32 %v7015_v48  ;;  %11552 = vst [vmem:[#allocation169_spill] sm:$0xff] %v7443_v56  ;;  %v7445_v10 = vpop.eup %4654  ;;  %v11553_v48 = vld [vmem:[#allocation46_spill] sm:$0xff]  ;;  %v11555_v15 = vld [vmem:[#allocation47_spill] sm:$0xff] }
 0x324   : > { %v7424_v30 = vmul.f32 1.442695, %v11548_v55  ;;  %v2977_v4 = vadd.f32 %v7253_v31, %v2976_v16  ;;  %v1849_v53 = vadd.f32 %v7282_v52, %v7268_v61  ;;  %4678 = vpow2.f32 %v7020_v60  ;;  %v11557_v55 = vld [vmem:[#allocation48_spill] sm:$0xff] }
 0x325   : > { %11549 = vst [vmem:[#allocation168_spill] sm:$0xff] %v7430_v1  ;;  %v7437_v8 = vmul.f32 1.442695, %v11551_v54  ;;  %v2909_v51 = vadd.f32 %v7268_v61, %v2908_v22  ;;  %v1852_v42 = vadd.f32 %v7306_v35, %v7295_v36  ;;  %2837 = vst.msk [vmem:[#allocation2 + $0x28] sm:$0xff] %vm11100_vm3, %v7430_v1  ;;  %v11554_v31 = vsub.f32 %v11553_v48, %v6494_v20  ;;  %v7467_v22 = vpop.eup %4656 }
 0x326   : > { %v11556_v54 = vsub.f32 %v11555_v15, %v6494_v20  ;;  %4680 = vpow2.f32 %v7025_v3  ;;  %v2978_v61 = vadd.f32 %v7282_v52, %v2977_v4  ;;  %v11558_v13 = vsub.f32 %v11557_v55, %v6494_v20  ;;  %1850 = vadd.xlane.f32.xlu1 %v1849_v53  ;;  %v7480_v3 = vld [vmem:[#allocation2 + $0x38] sm:$0xff]  ;;  %v7482_v52 = vpop.eup %4658 }
 0x327   : > { %v7458_v16 = vmul.f32 1.442695, %v11554_v31  ;;  %4682 = vpow2.f32 %v7032_v19  ;;  %1853 = vadd.xlane.f32.xlu0 %v1852_v42  ;;  %v2910_v48 = vadd.f32 %v7295_v36, %v2909_v51  ;;  %v7478_v31 = vmax.f32 %v7443_v56, %v6494_v20  ;;  %11561 = vst [vmem:[#allocation172_spill] sm:$0xff] %v7480_v3  ;;  %v11562_v4 = vld [vmem:[#allocation49_spill] sm:$0xff]  ;;  %v7493_v53 = vpop.eup %4660 }
 0x328   : > { %v7463_v60 = vmul.f32 1.442695, %v11556_v54  ;;  %v7472_v46 = vmul.f32 1.442695, %v11558_v13  ;;  %v11563_v15 = vsub.f32 %v11562_v4, %v6494_v20  ;;  %v11565_v13 = vld [vmem:[#allocation144_spill] sm:$0xff]  ;;  %v2979_v19 = vadd.f32 %v7306_v35, %v2978_v61  ;;  %v11566_v51 = vld [vmem:[#allocation145_spill] sm:$0xff] }
 0x329   : > { %11560 = vst [vmem:[#allocation171_spill] sm:$0xff] %v7478_v31  ;;  %4684 = vpow2.f32 %v11565_v13  ;;  %v1855_v36 = vadd.f32 %v7335_v50, %v7322_v59  ;;  %v2911_v42 = vadd.f32 %v7322_v59, %v2910_v48  ;;  %v1858_v54 = vadd.f32 %v7358_v7, %v7346_v23  ;;  %2838 = vst.msk [vmem:[#allocation2 + $0x30] sm:$0xff] %vm11100_vm3, %v7478_v31  ;;  %v11567_v35 = vld [vmem:[#allocation51_spill] sm:$0xff]  ;;  %v11573_v56 = vld [vmem:[#allocation57_spill] sm:$0xff] }
 0x32a   : > { %11559 = vst [vmem:[#allocation170_spill] sm:$0xff] %v7472_v46  ;;  %v7487_v55 = vmul.f32 1.442695, %v11563_v15  ;;  %4686 = vpow2.f32 %v11566_v51  ;;  %v7503_v15 = vpop.eup %4662  ;;  %v11568_v61 = vsub.f32 %v11567_v35, %v6494_v20  ;;  %v2980_v59 = vadd.f32 %v7335_v50, %v2979_v19  ;;  %v7516_v51 = vld [vmem:[#allocation2 + $0x40] sm:$0xff]  ;;  %v11575_v35 = vld [vmem:[#allocation68_spill] sm:$0xff] }
 0x32b   : > { %4688 = vpow2.f32 %v11570_v29  ;;  %v7514_v48 = vmax.f32 %v7480_v3, %v6494_v20  ;;  %11572 = vst [vmem:[#allocation146_spill] sm:$0xff] %v7516_v51  ;;  %v7518_v4 = vpop.eup %4664  ;;  %v11574_v31 = vsub.f32 %v11573_v56, %v6494_v20  ;;  %v11578_v29 = vld [vmem:[#allocation147_spill] sm:$0xff]  ;;  %1856 = vadd.xlane.f32.xlu1 %v1855_v36  ;;  %1859 = vadd.xlane.f32.xlu0 %v1858_v54  ;;  %v11586_v3 = vld [vmem:[#allocation92_spill] sm:$0xff] }
 0x32c   : > { %11564 = vst [vmem:[#allocation173_spill] sm:$0xff] %v7487_v55  ;;  %v7508_v13 = vmul.f32 1.442695, %v11568_v61  ;;  %v11576_v61 = vsub.f32 %v11575_v35, %v6494_v20  ;;  %4690 = vpow2.f32 %v11578_v29  ;;  %v2912_v50 = vadd.f32 %v7346_v23, %v2911_v42  ;;  %v7532_v19 = vpop.eup %4666  ;;  %v11579_v55 = vld [vmem:[#allocation148_spill] sm:$0xff] }
 0x32d   : > { %11571 = vst [vmem:[#allocation145_spill] sm:$0xff] %v7514_v48  ;;  %v7523_v1 = vmul.f32 1.442695, %v11574_v31  ;;  %4692 = vpow2.f32 %v11579_v55  ;;  %v2981_v46 = vadd.f32 %v7358_v7, %v2980_v59  ;;  %v1861_v56 = vadd.f32 %v7385_v57, %v7372_v21  ;;  %2839 = vst.msk [vmem:[#allocation2 + $0x38] sm:$0xff] %vm11100_vm3, %v7514_v48  ;;  %v7542_v35 = vpop.eup %4668  ;;  %v11581_v42 = vld [vmem:[#allocation76_spill] sm:$0xff] }
 0x32e   : > { %11569 = vst [vmem:[#allocation144_spill] sm:$0xff] %v7508_v13  ;;  %v7528_v13 = vmul.f32 1.442695, %v11576_v61  ;;  %4694 = vpow2.f32 %v7066_v18  ;;  %v2913_v23 = vadd.f32 %v7372_v21, %v2912_v50  ;;  %v1864_v55 = vadd.f32 %v7419_v5, %v7400_v37  ;;  %v7552_v36 = vpop.eup %4670  ;;  %v11583_v61 = vld [vmem:[#allocation84_spill] sm:$0xff]  ;;  %v7566_v50 = vld [vmem:[#allocation2 + $0x48] sm:$0xff] }
 0x32f   : > { %v7550_v7 = vmax.f32 %v7516_v51, %v6494_v20  ;;  %v11582_v54 = vsub.f32 %v11581_v42, %v6494_v20  ;;  %v11584_v29 = vsub.f32 %v11583_v61, %v6494_v20  ;;  %4696 = vpow2.f32 %v7071_v27  ;;  %11585 = vst [vmem:[#allocation148_spill] sm:$0xff] %v7566_v50  ;;  %v7568_v31 = vpop.eup %4672  ;;  %1862 = vadd.xlane.f32.xlu1 %v1861_v56  ;;  %v7602_v61 = vld [vmem:[#allocation2 + $0x50] sm:$0xff]  ;;  %v11599_v51 = vld [vmem:[#allocation119_spill] sm:$0xff] }
 0x330   : > { %11577 = vst [vmem:[#allocation174_spill] sm:$0xff] %v7528_v13  ;;  %v2982_v21 = vadd.f32 %v7385_v57, %v2981_v46  ;;  %v11587_v48 = vsub.f32 %v11586_v3, %v6494_v20  ;;  %4698 = vpow2.f32 %v7076_v2  ;;  %1865 = vadd.xlane.f32.xlu0 %v1864_v55  ;;  %v2914_v42 = vadd.f32 %v7400_v37, %v2913_v23  ;;  %v7581_v57 = vpop.eup %4674  ;;  %v11589_v46 = vld [vmem:[#allocation100_spill] sm:$0xff] }
 0x331   : > { %11580 = vst [vmem:[#allocation147_spill] sm:$0xff] %v7550_v7  ;;  %v7557_v59 = vmul.f32 1.442695, %v11582_v54  ;;  %v7562_v18 = vmul.f32 1.442695, %v11584_v29  ;;  %2840 = vst.msk [vmem:[#allocation2 + $0x40] sm:$0xff] %vm11100_vm3, %v7550_v7  ;;  %v11590_v54 = vsub.f32 %v11589_v46, %v6494_v20  ;;  %4700 = vpow2.f32 %v7083_v0 }
 0x332   : > { %v7573_v13 = vmul.f32 1.442695, %v11587_v48  ;;  %v2983_v2 = vadd.f32 %v7419_v5, %v2982_v21  ;;  %v1867_v37 = vadd.f32 %v7445_v10, %v7432_v6  ;;  %v7592_v48 = vpop.eup %4676  ;;  %4702 = vpow2.f32 %v7088_v34  ;;  %11593 = vst [vmem:[#allocation178_spill] sm:$0xff] %v7602_v61  ;;  %v11594_v5 = vld [vmem:[#allocation108_spill] sm:$0xff] }
 0x333   : > { %v7586_v3 = vmul.f32 1.442695, %v11590_v54  ;;  %v2915_v56 = vadd.f32 %v7432_v6, %v2914_v42  ;;  %v1870_v23 = vadd.f32 %v7482_v52, %v7467_v22  ;;  %v7600_v55 = vmax.f32 %v7566_v50, %v6494_v20  ;;  %v7604_v0 = vpop.eup %4678  ;;  %v11596_v46 = vld [vmem:[#allocation116_spill] sm:$0xff]  ;;  %v11598_v42 = vld [vmem:[#allocation149_spill] sm:$0xff] }
 0x334   : > { %11588 = vst [vmem:[#allocation175_spill] sm:$0xff] %v7573_v13  ;;  %v11595_v29 = vsub.f32 %v11594_v5, %v6494_v20  ;;  %v11597_v34 = vsub.f32 %v11596_v46, %v6494_v20  ;;  %4704 = vpow2.f32 %v11598_v42  ;;  %v2984_v54 = vadd.f32 %v7445_v10, %v2983_v2  ;;  %v7618_v27 = vpop.eup %4680  ;;  %v11601_v13 = vld [vmem:[#allocation150_spill] sm:$0xff]  ;;  %1868 = vadd.xlane.f32.xlu1 %v1867_v37  ;;  %v11602_v2 = vld [vmem:[#allocation124_spill] sm:$0xff] }
 0x335   : > { %11591 = vst [vmem:[#allocation176_spill] sm:$0xff] %v7586_v3  ;;  %11592 = vst [vmem:[#allocation177_spill] sm:$0xff] %v7600_v55  ;;  %v11600_v7 = vsub.f32 %v11599_v51, %v6494_v20  ;;  %4706 = vpow2.f32 %v11601_v13  ;;  %1871 = vadd.xlane.f32.xlu0 %v1870_v23  ;;  %v2916_v5 = vadd.f32 %v7467_v22, %v2915_v56  ;;  %v7631_v10 = vpop.eup %4682  ;;  %v11606_v56 = vld [vmem:[#allocation151_spill] sm:$0xff] }
 0x336   : > { %v7609_v21 = vmul.f32 1.442695, %v11595_v29  ;;  %v7614_v6 = vmul.f32 1.442695, %v11597_v34  ;;  %2841 = vst.msk [vmem:[#allocation2 + $0x48] sm:$0xff] %vm11100_vm3, %v7600_v55  ;;  %v11603_v46 = vsub.f32 %v11602_v2, %v6494_v20  ;;  %4708 = vpow2.f32 %v7106_v14  ;;  %v7646_v37 = vpop.eup %4684 }
 0x337   : > { %v7623_v3 = vmul.f32 1.442695, %v11600_v7  ;;  %v2985_v13 = vadd.f32 %v7482_v52, %v2984_v54  ;;  %v7642_v22 = vmax.f32 %v7602_v61, %v6494_v20  ;;  %v7644_v7 = vld [vmem:[#allocation2 + $0x58] sm:$0xff]  ;;  %4710 = vpow2.f32 %v11606_v56  ;;  %v7654_v42 = vpop.eup %4686 }
 0x338   : > { %v7636_v51 = vmul.f32 1.442695, %v11603_v46  ;;  %11605 = vst [vmem:[#allocation150_spill] sm:$0xff] %v7644_v7  ;;  %v1873_v23 = vadd.f32 %v7503_v15, %v7493_v53  ;;  %v2917_v34 = vadd.f32 %v7493_v53, %v2916_v5  ;;  %v1876_v14 = vadd.f32 %v7532_v19, %v7518_v4  ;;  %v11607_v52 = vld [vmem:[#allocation125_spill] sm:$0xff]  ;;  %v11609_v46 = vld [vmem:[#allocation152_spill] sm:$0xff]  ;;  %v7667_v53 = vpop.eup %4688  ;;  %v11610_v5 = vld [vmem:[#allocation126_spill] sm:$0xff] }
 0x339   : > { %11604 = vst [vmem:[#allocation149_spill] sm:$0xff] %v7642_v22  ;;  %v11608_v54 = vsub.f32 %v11607_v52, %v6494_v20  ;;  %4712 = vpow2.f32 %v11609_v46  ;;  %v2986_v29 = vadd.f32 %v7503_v15, %v2985_v13  ;;  %2842 = vst.msk [vmem:[#allocation2 + $0x50] sm:$0xff] %vm11100_vm3, %v7642_v22  ;;  %v11611_v50 = vsub.f32 %v11610_v5, %v6494_v20  ;;  %v11613_v52 = vld [vmem:[#allocation153_spill] sm:$0xff]  ;;  %v7680_v13 = vpop.eup %4690  ;;  %v11615_v46 = vld [vmem:[#allocation127_spill] sm:$0xff] }
 0x33a   : > { %4714 = vpow2.f32 %v11613_v52  ;;  %1874 = vadd.xlane.f32.xlu1 %v1873_v23  ;;  %1877 = vadd.xlane.f32.xlu0 %v1876_v14  ;;  %v7678_v15 = vmax.f32 %v7644_v7, %v6494_v20  ;;  %v11616_v56 = vsub.f32 %v11615_v46, %v6494_v20  ;;  %v11618_v5 = vld [vmem:[#allocation154_spill] sm:$0xff]  ;;  %v1879_v23 = vadd.f32 %v7552_v36, %v7542_v35 }
 0x33b   : > { %v7659_v2 = vmul.f32 1.442695, %v11608_v54  ;;  %v7672_v55 = vmul.f32 1.442695, %v11611_v50  ;;  %v2918_v54 = vadd.f32 %v7518_v4, %v2917_v34  ;;  %4716 = vpow2.f32 %v11618_v5  ;;  %v7691_v14 = vld [vmem:[#allocation2 + $0x60] sm:$0xff]  ;;  %v7693_v4 = vpop.eup %4692  ;;  %v11620_v34 = vld [vmem:[#allocation155_spill] sm:$0xff] }
 0x33c   : > { %11614 = vst [vmem:[#allocation152_spill] sm:$0xff] %v7678_v15  ;;  %v7685_v61 = vmul.f32 1.442695, %v11616_v56  ;;  %v2987_v50 = vadd.f32 %v7532_v19, %v2986_v29  ;;  %11619 = vst [vmem:[#allocation154_spill] sm:$0xff] %v7691_v14  ;;  %4718 = vpow2.f32 %v11620_v34  ;;  %v1882_v46 = vadd.f32 %v7581_v57, %v7568_v31  ;;  %v7703_v19 = vpop.eup %4694  ;;  %v11621_v29 = vld [vmem:[#allocation128_spill] sm:$0xff]  ;;  %v11625_v7 = vld [vmem:[#allocation130_spill] sm:$0xff] }
 0x33d   : > { %11612 = vst [vmem:[#allocation151_spill] sm:$0xff] %v7672_v55  ;;  %v2919_v52 = vadd.f32 %v7542_v35, %v2918_v54  ;;  %2843 = vst.msk [vmem:[#allocation2 + $0x58] sm:$0xff] %vm11100_vm3, %v7678_v15  ;;  %v11622_v5 = vsub.f32 %v11621_v29, %v6494_v20  ;;  %4720 = vpow2.f32 %v7157_v49  ;;  %v7717_v56 = vpop.eup %4696  ;;  %v11626_v15 = vsub.f32 %v11625_v7, %v6494_v20  ;;  %v7730_v49 = vld [vmem:[#allocation2 + $0x68] sm:$0xff] }
 0x33e   : > { %11617 = vst [vmem:[#allocation153_spill] sm:$0xff] %v7685_v61  ;;  %v11623_v61 = vld [vmem:[#allocation129_spill] sm:$0xff]  ;;  %v2988_v54 = vadd.f32 %v7552_v36, %v2987_v50  ;;  %4722 = vpow2.f32 %v7162_v45  ;;  %1880 = vadd.xlane.f32.xlu1 %v1879_v23  ;;  %1883 = vadd.xlane.f32.xlu0 %v1882_v46  ;;  %11628 = vst [vmem:[#allocation179_spill] sm:$0xff] %v7730_v49  ;;  %v7732_v36 = vpop.eup %4698  ;;  %v11629_v50 = vld [vmem:[#allocation131_spill] sm:$0xff] }
 0x33f   : > { %v7708_v22 = vmul.f32 1.442695, %v11622_v5  ;;  %v11624_v34 = vsub.f32 %v11623_v61, %v6494_v20  ;;  %v7722_v55 = vmul.f32 1.442695, %v11626_v15  ;;  %v2920_v29 = vadd.f32 %v7568_v31, %v2919_v52  ;;  %v7743_v15 = vpop.eup %4700 }
 0x340   : > { %v7728_v61 = vmax.f32 %v7691_v14, %v6494_v20  ;;  %v11630_v5 = vsub.f32 %v11629_v50, %v6494_v20  ;;  %4724 = vpow2.f32 %v7171_v12  ;;  %v2989_v45 = vadd.f32 %v7581_v57, %v2988_v54  ;;  %v7753_v12 = vpop.eup %4702  ;;  %v11631_v57 = vld [vmem:[#allocation132_spill] sm:$0xff] }
 0x341   : > { %v7713_v35 = vmul.f32 1.442695, %v11624_v34  ;;  %v1885_v31 = vadd.f32 %v7604_v0, %v7592_v48  ;;  %4726 = vpow2.f32 %v7176_v28  ;;  %v2921_v23 = vadd.f32 %v7592_v48, %v2920_v29  ;;  %v7766_v29 = vld [vmem:[#allocation2 + $0x70] sm:$0xff]  ;;  %v7768_v50 = vpop.eup %4704 }
 0x342   : > { %11627 = vst [vmem:[#allocation155_spill] sm:$0xff] %v7728_v61  ;;  %v7737_v7 = vmul.f32 1.442695, %v11630_v5  ;;  %v1888_v52 = vadd.f32 %v7631_v10, %v7618_v27  ;;  %2844 = vst.msk [vmem:[#allocation2 + $0x60] sm:$0xff] %vm11100_vm3, %v7728_v61  ;;  %v11632_v34 = vsub.f32 %v11631_v57, %v6494_v20  ;;  %4728 = vpow2.f32 %v7185_v9  ;;  %v11636_v5 = vld [vmem:[#allocation133_spill] sm:$0xff]  ;;  %v11638_v57 = vld [vmem:[#allocation134_spill] sm:$0xff] }
 0x343   : > { %v2990_v28 = vadd.f32 %v7604_v0, %v2989_v45  ;;  %v7764_v48 = vmax.f32 %v7730_v49, %v6494_v20  ;;  %11635 = vst [vmem:[#allocation182_spill] sm:$0xff] %v7766_v29  ;;  %v11637_v46 = vsub.f32 %v11636_v5, %v6494_v20  ;;  %v11641_v9 = vld [vmem:[#allocation156_spill] sm:$0xff]  ;;  %1886 = vadd.xlane.f32.xlu1 %v1885_v31  ;;  %v7782_v45 = vpop.eup %4706  ;;  %v11648_v49 = vld [vmem:[#allocation137_spill] sm:$0xff] }
 0x344   : > { %v7758_v54 = vmul.f32 1.442695, %v11632_v34  ;;  %v11639_v34 = vsub.f32 %v11638_v57, %v6494_v20  ;;  %4730 = vpow2.f32 %v11641_v9  ;;  %1889 = vadd.xlane.f32.xlu0 %v1888_v52  ;;  %v2922_v0 = vadd.f32 %v7618_v27, %v2921_v23  ;;  %v7792_v57 = vpop.eup %4708  ;;  %v11643_v23 = vld [vmem:[#allocation135_spill] sm:$0xff] }
 0x345   : > { %11634 = vst [vmem:[#allocation181_spill] sm:$0xff] %v7764_v48  ;;  %v7773_v14 = vmul.f32 1.442695, %v11637_v46  ;;  %4732 = vpow2.f32 %v7209_v43  ;;  %v1891_v46 = vadd.f32 %v7654_v42, %v7646_v37  ;;  %2845 = vst.msk [vmem:[#allocation2 + $0x68] sm:$0xff] %vm11100_vm3, %v7764_v48  ;;  %v1894_v43 = vadd.f32 %v7680_v13, %v7667_v53  ;;  %v7802_v31 = vpop.eup %4710 }
 0x346   : > { %11633 = vst [vmem:[#allocation180_spill] sm:$0xff] %v7758_v54  ;;  %v7778_v61 = vmul.f32 1.442695, %v11639_v34  ;;  %v2991_v54 = vadd.f32 %v7631_v10, %v2990_v28  ;;  %4734 = vpow2.f32 %v7214_v25  ;;  %v2923_v27 = vadd.f32 %v7646_v37, %v2922_v0  ;;  %v11645_v34 = vld [vmem:[#allocation136_spill] sm:$0xff]  ;;  %v7816_v0 = vld [vmem:[#allocation2 + $0x78] sm:$0xff]  ;;  %v7818_v5 = vpop.eup %4712 }
 0x347   : > { %v7800_v10 = vmax.f32 %v7766_v29, %v6494_v20  ;;  %v11644_v52 = vsub.f32 %v11643_v23, %v6494_v20  ;;  %v11646_v9 = vsub.f32 %v11645_v34, %v6494_v20  ;;  %4736 = vpow2.f32 %v7223_v40  ;;  %11647 = vst [vmem:[#allocation184_spill] sm:$0xff] %v7816_v0  ;;  %v11650_v23 = vld [vmem:[#allocation160_spill] sm:$0xff]  ;;  %1892 = vadd.xlane.f32.xlu1 %v1891_v46 }
 0x348   : > { %11640 = vst [vmem:[#allocation183_spill] sm:$0xff] %v7778_v61  ;;  %v2992_v37 = vadd.f32 %v7654_v42, %v2991_v54  ;;  %v11649_v48 = vsub.f32 %v11648_v49, %v6494_v20  ;;  %4738 = vpow2.f32 %v11650_v23  ;;  %1895 = vadd.xlane.f32.xlu0 %v1894_v43  ;;  %v7831_v42 = vpop.eup %4714  ;;  %v11651_v54 = vld [vmem:[#allocation138_spill] sm:$0xff]  ;;  %v7850_v23 = vmax.f32 %v7816_v0, %v6494_v20 }
 0x349   : > { %11642 = vst [vmem:[#allocation156_spill] sm:$0xff] %v7800_v10  ;;  %v7807_v28 = vmul.f32 1.442695, %v11644_v52  ;;  %v7812_v25 = vmul.f32 1.442695, %v11646_v9  ;;  %v2924_v52 = vadd.f32 %v7667_v53, %v2923_v27  ;;  %2846 = vst.msk [vmem:[#allocation2 + $0x70] sm:$0xff] %vm11100_vm3, %v7800_v10  ;;  %v11652_v34 = vsub.f32 %v11651_v54, %v6494_v20  ;;  %v7842_v27 = vpop.eup %4716 }
 0x34a   : > { %v7823_v61 = vmul.f32 1.442695, %v11649_v48  ;;  %v11654_v48 = vld [vmem:[#allocation161_spill] sm:$0xff]  ;;  %v2993_v46 = vadd.f32 %v7680_v13, %v2992_v37  ;;  %v1897_v53 = vadd.f32 %v7703_v19, %v7693_v4  ;;  %v1900_v9 = vadd.f32 %v7732_v36, %v7717_v56  ;;  %v7852_v54 = vld [vmem:[#allocation2 + $0x80] sm:$0xff]  ;;  %v11657_v37 = vld [vmem:[#allocation143_spill] sm:$0xff]  ;;  %2847 = vst.msk [vmem:[#allocation2 + $0x78] sm:$0xff] %vm11100_vm3, %v7850_v23 }
 0x34b   : > { %v7836_v49 = vmul.f32 1.442695, %v11652_v34  ;;  %4740 = vpow2.f32 %v11654_v48  ;;  %v2925_v43 = vadd.f32 %v7693_v4, %v2924_v52  ;;  %11655 = vst [vmem:[#allocation161_spill] sm:$0xff] %v7852_v54  ;;  %v7854_v34 = vpop.eup %4718  ;;  %v11656_v13 = vld [vmem:[#allocation142_spill] sm:$0xff] }
 0x34c   : > { %4742 = vpow2.f32 %v7273_v26  ;;  %v11658_v48 = vsub.f32 %v11656_v13, %v11657_v37  ;;  %v11659_v26 = vsub.f32 %v6494_v20, %v11657_v37  ;;  %v2994_v52 = vadd.f32 %v7703_v19, %v2993_v46  ;;  %v7868_v29 = vpop.eup %4720  ;;  %1898 = vadd.xlane.f32.xlu1 %v1897_v53  ;;  %1901 = vadd.xlane.f32.xlu0 %v1900_v9  ;;  %v11661_v10 = vld [vmem:[#allocation158_spill] sm:$0xff] }
 0x34d   : > { %11653 = vst [vmem:[#allocation160_spill] sm:$0xff] %v7836_v49  ;;  %4744 = vpow2.f32 %v7278_v62  ;;  %v11660_v49 = vld [vmem:[#allocation164_spill] sm:$0xff]  ;;  %v2926_v62 = vadd.f32 %v7717_v56, %v2925_v43  ;;  %v2448_v13 = vsub.f32 %v6494_v20, %v11661_v10  ;;  %v7878_v37 = vpop.eup %4722  ;;  %v7889_v56 = vmax.f32 %v7852_v54, %v6494_v20  ;;  %v7891_v43 = vld [vmem:[#allocation2 + $0x88] sm:$0xff] }
 0x34e   : > { %v7860_v40 = vmul.f32 1.442695, %v11658_v48  ;;  %v7865_v4 = vmul.f32 1.442695, %v11659_v26  ;;  %4746 = vpow2.f32 %v11660_v49  ;;  %v2995_v19 = vadd.f32 %v7732_v36, %v2994_v52  ;;  %v11662_v49 = vld [vmem:[#allocation157_spill] sm:$0xff]  ;;  %11664 = vst [vmem:[#allocation142_spill] sm:$0xff] %v7891_v43  ;;  %v7893_v9 = vpop.eup %4724 }
 0x34f   : > { %4748 = vpow2.f32 %v7311_v39  ;;  %v11663_v46 = vsub.f32 %v11662_v49, %v11661_v10  ;;  %v1903_v39 = vadd.f32 %v7753_v12, %v7743_v15  ;;  %v2927_v36 = vadd.f32 %v7743_v15, %v2926_v62  ;;  %v7901_v26 = vpop.eup %4726  ;;  %v11665_v49 = vld [vmem:[#allocation162_spill] sm:$0xff]  ;;  %2848 = vst.msk [vmem:[#allocation2 + $0x80] sm:$0xff] %vm11100_vm3, %v7889_v56  ;;  %v11668_v54 = vld [vmem:[#allocation159_spill] sm:$0xff] }
 0x350   : > { %4750 = vpow2.f32 %v7316_v32  ;;  %v1906_v10 = vadd.f32 %v7782_v45, %v7768_v50  ;;  %v2996_v52 = vadd.f32 %v7753_v12, %v2995_v19  ;;  %v7911_v48 = vpop.eup %4728  ;;  %v7919_v12 = vmax.f32 %v7891_v43, %v6494_v20  ;;  %v11670_v43 = vld [vmem:[#allocation163_spill] sm:$0xff] }
 0x351   : > { %v7885_v53 = vmul.f32 1.442695, %v11663_v46  ;;  %4752 = vpow2.f32 %v7327_v58  ;;  %v2447_v46 = vsub.f32 %v6494_v20, %v11665_v49  ;;  %1904 = vadd.xlane.f32.xlu1 %v1903_v39  ;;  %v2928_v15 = vadd.f32 %v7768_v50, %v2927_v36  ;;  %v7921_v62 = vpop.eup %4730 }
 0x352   : > { %4754 = vpow2.f32 %v7340_v38  ;;  %1907 = vadd.xlane.f32.xlu0 %v1906_v10  ;;  %v7915_v58 = vmul.f32 1.442695, %v2448_v13  ;;  %11666 = vst [vmem:[#allocation143_spill] sm:$0xff] %v7919_v12  ;;  %v2997_v19 = vadd.f32 %v7782_v45, %v2996_v52  ;;  %v1909_v32 = vadd.f32 %v7802_v31, %v7792_v57  ;;  %v11667_v38 = vld [vmem:[#allocation165_spill] sm:$0xff]  ;;  %v7929_v10 = vld [vmem:[#allocation2 + $0x90] sm:$0xff]  ;;  %v7931_v50 = vpop.eup %4732  ;;  %2849 = vst.msk [vmem:[#allocation2 + $0x88] sm:$0xff] %vm11100_vm3, %v7919_v12 }
 0x353   : > { %4756 = vpow2.f32 %v7363_v11  ;;  %v2449_v39 = vsub.f32 %v6494_v20, %v11667_v38  ;;  %v2929_v13 = vadd.f32 %v7792_v57, %v2928_v15  ;;  %v1912_v36 = vadd.f32 %v7831_v42, %v7818_v5  ;;  %v7941_v45 = vpop.eup %4734 }
 0x354   : > { %4758 = vpow2.f32 %v7368_v41  ;;  %v2998_v52 = vadd.f32 %v7802_v31, %v2997_v19  ;;  %v11669_v41 = vsub.f32 %v11668_v54, %v11665_v49  ;;  %v7950_v57 = vmul.f32 1.442695, %v2447_v46  ;;  %v7952_v15 = vpop.eup %4736  ;;  %v7965_v54 = vld [vmem:[#allocation2 + $0x98] sm:$0xff] }
 0x355   : > { %4760 = vpow2.f32 %v7377_v47  ;;  %1910 = vadd.xlane.f32.xlu1 %v1909_v32  ;;  %v2930_v11 = vadd.f32 %v7818_v5, %v2929_v13  ;;  %v11671_v47 = vsub.f32 %v11670_v43, %v11667_v38  ;;  %v7963_v31 = vmax.f32 %v7929_v10, %v6494_v20  ;;  %v7967_v49 = vpop.eup %4738  ;;  %v11678_v38 = vld [vmem:[#allocation166_spill] sm:$0xff] }
 0x356   : > { %v7948_v0 = vmul.f32 1.442695, %v11669_v41  ;;  %4762 = vpow2.f32 %v7390_v17  ;;  %1913 = vadd.xlane.f32.xlu0 %v1912_v36  ;;  %v2999_v17 = vadd.f32 %v7831_v42, %v2998_v52  ;;  %v1915_v5 = vadd.f32 %v7854_v34, %v7842_v27 }
 0x357   : > { %v7959_v12 = vmul.f32 1.442695, %v11671_v47  ;;  %4764 = vpow2.f32 %v7411_v63  ;;  %v7973_v46 = vmul.f32 1.442695, %v2449_v39  ;;  %v2931_v32 = vadd.f32 %v7842_v27, %v2930_v11  ;;  %2850 = vst.msk [vmem:[#allocation2 + $0x90] sm:$0xff] %vm11100_vm3, %v7963_v31  ;;  %v7995_v39 = vld [vmem:[#allocation2 + $0xa0] sm:$0xff] }
 0x358   : > { %v7975_v43 = vpop.eup %4740  ;;  %4766 = vpow2.f32 %v7424_v30  ;;  %v1918_v19 = vadd.f32 %v7878_v37, %v7868_v29  ;;  %v3000_v42 = vadd.f32 %v7854_v34, %v2999_v17  ;;  %v2450_v30 = vsub.f32 %v6494_v20, %v7354_v44 }
 0x359   : > { %v7985_v63 = vpop.eup %4742  ;;  %4768 = vpow2.f32 %v7437_v8  ;;  %v7993_v27 = vmax.f32 %v7965_v54, %v6494_v20  ;;  %1916 = vadd.xlane.f32.xlu1 %v1915_v5  ;;  %v2932_v36 = vadd.f32 %v7868_v29, %v2931_v32  ;;  %v11672_v8 = vsub.f32 %v7320_v24, %v7354_v44  ;;  %v11674_v44 = vld [vmem:[#allocation170_spill] sm:$0xff]  ;;  %v11675_v5 = vld [vmem:[#allocation173_spill] sm:$0xff] }
 0x35a   : > { %v7997_v13 = vpop.eup %4744  ;;  %4770 = vpow2.f32 %v7458_v16  ;;  %1919 = vadd.xlane.f32.xlu0 %v1918_v19  ;;  %v2451_v11 = vsub.f32 %v6494_v20, %v7396_v33  ;;  %v3001_v41 = vadd.f32 %v7878_v37, %v3000_v42  ;;  %v1921_v16 = vadd.f32 %v7901_v26, %v7893_v9  ;;  %v11676_v42 = vld [vmem:[#allocation168_spill] sm:$0xff] }
 0x35b   : > { %v8004_v34 = vmul.f32 1.442695, %v11672_v8  ;;  %v8008_v52 = vpop.eup %4746  ;;  %4772 = vpow2.f32 %v7463_v60  ;;  %2851 = vst.msk [vmem:[#allocation2 + $0x98] sm:$0xff] %vm11100_vm3, %v7993_v27  ;;  %v2933_v47 = vadd.f32 %v7893_v9, %v2932_v36  ;;  %v1924_v60 = vadd.f32 %v7921_v62, %v7911_v48  ;;  %v11677_v36 = vld [vmem:[#allocation144_spill] sm:$0xff] }
 0x35c   : > { %v8018_v24 = vpop.eup %4748  ;;  %4774 = vpow2.f32 %v11674_v44  ;;  %v8026_v37 = vmax.f32 %v7995_v39, %v6494_v20  ;;  %v3002_v32 = vadd.f32 %v7901_v26, %v3001_v41  ;;  %v8032_v19 = vmul.f32 1.442695, %v2450_v30  ;;  %v8036_v44 = vld [vmem:[#allocation2 + $0xa8] sm:$0xff] }
 0x35d   : > { %11673 = vst [vmem:[#allocation164_spill] sm:$0xff] %v8004_v34  ;;  %v8028_v17 = vpop.eup %4750  ;;  %4776 = vpow2.f32 %v11675_v5  ;;  %v2452_v8 = vsub.f32 %v6494_v20, %v11676_v42  ;;  %1922 = vadd.xlane.f32.xlu1 %v1921_v16  ;;  %v2934_v29 = vadd.f32 %v7911_v48, %v2933_v47  ;;  %v11679_v5 = vsub.f32 %v11678_v38, %v7396_v33  ;;  %v11681_v38 = vld [vmem:[#allocation174_spill] sm:$0xff] }
 0x35e   : > { %v8038_v9 = vpop.eup %4752  ;;  %4778 = vpow2.f32 %v11677_v36  ;;  %1925 = vadd.xlane.f32.xlu0 %v1924_v60  ;;  %2852 = vst.msk [vmem:[#allocation2 + $0xa0] sm:$0xff] %vm11100_vm3, %v8026_v37  ;;  %v3003_v41 = vadd.f32 %v7921_v62, %v3002_v32  ;;  %v1927_v48 = vadd.f32 %v7941_v45, %v7931_v50  ;;  %v8057_v16 = vmul.f32 1.442695, %v2451_v11  ;;  %v11683_v32 = vld [vmem:[#allocation167_spill] sm:$0xff] }
 0x35f   : > { %v8045_v34 = vmul.f32 1.442695, %v11679_v5  ;;  %v8051_v30 = vpop.eup %4754  ;;  %4780 = vpow2.f32 %v7523_v1  ;;  %v2935_v47 = vadd.f32 %v7931_v50, %v2934_v29  ;;  %v1930_v60 = vadd.f32 %v7967_v49, %v7952_v15  ;;  %v8069_v1 = vld [vmem:[#allocation2 + $0xb0] sm:$0xff] }
 0x360   : > { %11680 = vst [vmem:[#allocation158_spill] sm:$0xff] %v8057_v16  ;;  %v8059_v33 = vpop.eup %4756  ;;  %4782 = vpow2.f32 %v11681_v38  ;;  %v8067_v36 = vmax.f32 %v8036_v44, %v6494_v20  ;;  %11682 = vst [vmem:[#allocation157_spill] sm:$0xff] %v8069_v1  ;;  %v3004_v11 = vadd.f32 %v7941_v45, %v3003_v41  ;;  %v11684_v5 = vsub.f32 %v11683_v32, %v11676_v42  ;;  %v11687_v16 = vld [vmem:[#allocation171_spill] sm:$0xff] }
 0x361   : > { %v8071_v62 = vpop.eup %4758  ;;  %4784 = vpow2.f32 %v7557_v59  ;;  %v8080_v50 = vmul.f32 1.442695, %v2452_v8  ;;  %1928 = vadd.xlane.f32.xlu1 %v1927_v48  ;;  %v2936_v26 = vadd.f32 %v7952_v15, %v2935_v47  ;;  %v2453_v59 = vsub.f32 %v6494_v20, %v11687_v16  ;;  %v11688_v8 = vld [vmem:[#allocation175_spill] sm:$0xff]  ;;  %v8105_v47 = vld [vmem:[#allocation2 + $0xb8] sm:$0xff] }
 0x362   : > { %v8078_v38 = vmul.f32 1.442695, %v11684_v5  ;;  %v8082_v29 = vpop.eup %4760  ;;  %4786 = vpow2.f32 %v7562_v18  ;;  %1931 = vadd.xlane.f32.xlu0 %v1930_v60  ;;  %2853 = vst.msk [vmem:[#allocation2 + $0xa8] sm:$0xff] %vm11100_vm3, %v8067_v36  ;;  %v3005_v41 = vadd.f32 %v7967_v49, %v3004_v11  ;;  %v11689_v18 = vld [vmem:[#allocation169_spill] sm:$0xff]  ;;  %v8103_v15 = vmax.f32 %v8069_v1, %v6494_v20  ;;  %11692 = vst [vmem:[#allocation163_spill] sm:$0xff] %v8105_v47  ;;  %v11693_v5 = vld [vmem:[#allocation176_spill] sm:$0xff] }
 0x363   : > { %11686 = vst [vmem:[#allocation165_spill] sm:$0xff] %v8080_v50  ;;  %v8092_v42 = vpop.eup %4762  ;;  %4788 = vpow2.f32 %v11688_v8  ;;  %v11690_v48 = vsub.f32 %v11689_v18, %v11687_v16  ;;  %v1933_v8 = vadd.f32 %v7985_v63, %v7975_v43  ;;  %v2937_v49 = vadd.f32 %v7975_v43, %v2936_v26  ;;  %v11699_v50 = vld [vmem:[#allocation151_spill] sm:$0xff] }
 0x364   : > { %11685 = vst [vmem:[#allocation162_spill] sm:$0xff] %v8078_v38  ;;  %v8107_v32 = vpop.eup %4764  ;;  %4790 = vpow2.f32 %v11693_v5  ;;  %v1936_v16 = vadd.f32 %v8008_v52, %v7997_v13  ;;  %v3006_v18 = vadd.f32 %v7985_v63, %v3005_v41  ;;  %2854 = vst.msk [vmem:[#allocation2 + $0xb0] sm:$0xff] %vm11100_vm3, %v8103_v15  ;;  %v8133_v63 = vmax.f32 %v8105_v47, %v6494_v20  ;;  %v11700_v47 = vld [vmem:[#allocation146_spill] sm:$0xff] }
 0x365   : > { %v8099_v60 = vmul.f32 1.442695, %v11690_v48  ;;  %v8115_v11 = vpop.eup %4766  ;;  %4792 = vpow2.f32 %v7609_v21  ;;  %v11694_v48 = vld [vmem:[#allocation145_spill] sm:$0xff]  ;;  %1934 = vadd.xlane.f32.xlu1 %v1933_v8  ;;  %v2938_v43 = vadd.f32 %v7997_v13, %v2937_v49  ;;  %v8129_v21 = vmul.f32 1.442695, %v2453_v59 }
 0x366   : > { %v2454_v45 = vsub.f32 %v6494_v20, %v11694_v48  ;;  %4794 = vpow2.f32 %v7614_v6  ;;  %1937 = vadd.xlane.f32.xlu0 %v1936_v16  ;;  %v3007_v41 = vadd.f32 %v8008_v52, %v3006_v18  ;;  %v1939_v5 = vadd.f32 %v8028_v17, %v8018_v24  ;;  %v11696_v6 = vld [vmem:[#allocation147_spill] sm:$0xff]  ;;  %v8143_v16 = vld [vmem:[#allocation2 + $0xc0] sm:$0xff]  ;;  %2855 = vst.msk [vmem:[#allocation2 + $0xb8] sm:$0xff] %vm11100_vm3, %v8133_v63 }
 0x367   : > { %11691 = vst [vmem:[#allocation159_spill] sm:$0xff] %v8099_v60  ;;  %v8125_v60 = vpop.eup %4768  ;;  %11695 = vst [vmem:[#allocation170_spill] sm:$0xff] %v8129_v21  ;;  %4796 = vpow2.f32 %v7623_v3  ;;  %v2455_v8 = vsub.f32 %v6494_v20, %v11696_v6  ;;  %v2939_v59 = vadd.f32 %v8018_v24, %v2938_v43  ;;  %v1942_v49 = vadd.f32 %v8051_v30, %v8038_v9  ;;  %v11697_v21 = vld [vmem:[#allocation172_spill] sm:$0xff] }
 0x368   : > { %v8135_v26 = vpop.eup %4770  ;;  %4798 = vpow2.f32 %v7636_v51  ;;  %v3008_v18 = vadd.f32 %v8028_v17, %v3007_v41  ;;  %v11698_v51 = vsub.f32 %v11697_v21, %v11694_v48  ;;  %v8164_v24 = vmul.f32 1.442695, %v2454_v45  ;;  %v8179_v48 = vld [vmem:[#allocation2 + $0xc8] sm:$0xff]  ;;  %v11702_v21 = vld [vmem:[#allocation153_spill] sm:$0xff] }
 0x369   : > { %v8145_v13 = vpop.eup %4772  ;;  %4800 = vpow2.f32 %v7659_v2  ;;  %1940 = vadd.xlane.f32.xlu1 %v1939_v5  ;;  %v2940_v3 = vadd.f32 %v8038_v9, %v2939_v59  ;;  %v11701_v2 = vsub.f32 %v11700_v47, %v11696_v6  ;;  %v8177_v17 = vmax.f32 %v8143_v16, %v6494_v20 }
 0x36a   : > { %v8155_v52 = vpop.eup %4774  ;;  %v8162_v1 = vmul.f32 1.442695, %v11698_v51  ;;  %4802 = vpow2.f32 %v11699_v50  ;;  %1943 = vadd.xlane.f32.xlu0 %v1942_v49  ;;  %v3009_v50 = vadd.f32 %v8051_v30, %v3008_v18  ;;  %v1945_v9 = vadd.f32 %v8071_v62, %v8059_v33  ;;  %v11704_v49 = vld [vmem:[#allocation177_spill] sm:$0xff] }
 0x36b   : > { %v8166_v43 = vpop.eup %4776  ;;  %v8173_v38 = vmul.f32 1.442695, %v11701_v2  ;;  %4804 = vpow2.f32 %v11702_v21  ;;  %v8187_v5 = vmul.f32 1.442695, %v2455_v8  ;;  %v2941_v41 = vadd.f32 %v8059_v33, %v2940_v3  ;;  %2856 = vst.msk [vmem:[#allocation2 + $0xc0] sm:$0xff] %vm11100_vm3, %v8177_v17  ;;  %v8209_v3 = vld [vmem:[#allocation2 + $0xd0] sm:$0xff] }
 0x36c   : > { %v8181_v45 = vpop.eup %4778  ;;  %4806 = vpow2.f32 %v7708_v22  ;;  %v1948_v6 = vadd.f32 %v8092_v42, %v8082_v29  ;;  %v3010_v8 = vadd.f32 %v8071_v62, %v3009_v50  ;;  %v2456_v22 = vsub.f32 %v6494_v20, %v11704_v49  ;;  %v11708_v21 = vld [vmem:[#allocation149_spill] sm:$0xff] }
 0x36d   : > { %11703 = vst [vmem:[#allocation173_spill] sm:$0xff] %v8187_v5  ;;  %v8189_v47 = vpop.eup %4780  ;;  %4808 = vpow2.f32 %v7713_v35  ;;  %v8207_v33 = vmax.f32 %v8179_v48, %v6494_v20  ;;  %1946 = vadd.xlane.f32.xlu1 %v1945_v9  ;;  %v2942_v51 = vadd.f32 %v8082_v29, %v2941_v41  ;;  %v11705_v35 = vld [vmem:[#allocation148_spill] sm:$0xff]  ;;  %v2457_v50 = vsub.f32 %v6494_v20, %v11708_v21 }
 0x36e   : > { %v8199_v30 = vpop.eup %4782  ;;  %4810 = vpow2.f32 %v7860_v40  ;;  %1949 = vadd.xlane.f32.xlu0 %v1948_v6  ;;  %v11706_v62 = vsub.f32 %v11705_v35, %v11704_v49  ;;  %v3011_v5 = vadd.f32 %v8092_v42, %v3010_v8  ;;  %v1951_v40 = vadd.f32 %v8115_v11, %v8107_v32  ;;  %v11709_v35 = vld [vmem:[#allocation178_spill] sm:$0xff]  ;;  %v11712_v29 = vld [vmem:[#allocation180_spill] sm:$0xff] }
 0x36f   : > { %v8211_v18 = vpop.eup %4784  ;;  %4812 = vpow2.f32 %v7865_v4  ;;  %2857 = vst.msk [vmem:[#allocation2 + $0xc8] sm:$0xff] %vm11100_vm3, %v8207_v33  ;;  %v2943_v41 = vadd.f32 %v8107_v32, %v2942_v51  ;;  %v1954_v4 = vadd.f32 %v8135_v26, %v8125_v60  ;;  %v8240_v42 = vmax.f32 %v8209_v3, %v6494_v20  ;;  %v8253_v32 = vld [vmem:[#allocation2 + $0xd8] sm:$0xff] }
 0x370   : > { %v8218_v2 = vmul.f32 1.442695, %v11706_v62  ;;  %v8222_v59 = vpop.eup %4786  ;;  %4814 = vpow2.f32 %v7722_v55  ;;  %v3012_v8 = vadd.f32 %v8115_v11, %v3011_v5  ;;  %v8246_v49 = vmul.f32 1.442695, %v2456_v22 }
 0x371   : > { %v8232_v9 = vpop.eup %4788  ;;  %4816 = vpow2.f32 %v7737_v7  ;;  %v11710_v55 = vsub.f32 %v11709_v35, %v11708_v21  ;;  %1952 = vadd.xlane.f32.xlu1 %v1951_v40  ;;  %v11713_v7 = vld [vmem:[#allocation152_spill] sm:$0xff]  ;;  %2858 = vst.msk [vmem:[#allocation2 + $0xd0] sm:$0xff] %vm11100_vm3, %v8240_v42  ;;  %v1957_v40 = vadd.f32 %v8155_v52, %v8145_v13  ;;  %v1960_v35 = vadd.f32 %v8181_v45, %v8166_v43 }
 0x372   : > { %11707 = vst [vmem:[#allocation168_spill] sm:$0xff] %v8218_v2  ;;  %v8242_v6 = vpop.eup %4790  ;;  %4818 = vpow2.f32 %v11712_v29  ;;  %1955 = vadd.xlane.f32.xlu0 %v1954_v4  ;;  %v2944_v2 = vadd.f32 %v8125_v60, %v2943_v41  ;;  %v2458_v11 = vsub.f32 %v6494_v20, %v11713_v7  ;;  %v3013_v21 = vadd.f32 %v8135_v26, %v3012_v8  ;;  %v11715_v41 = vld [vmem:[#allocation183_spill] sm:$0xff]  ;;  %v11717_v8 = vld [vmem:[#allocation150_spill] sm:$0xff] }
 0x373   : > { %v8251_v62 = vmul.f32 1.442695, %v11710_v55  ;;  %v8255_v51 = vpop.eup %4792  ;;  %4820 = vpow2.f32 %v7773_v14  ;;  %v8271_v29 = vmul.f32 1.442695, %v2457_v50  ;;  %v8281_v55 = vmax.f32 %v8253_v32, %v6494_v20  ;;  %v8283_v14 = vld [vmem:[#allocation2 + $0xe0] sm:$0xff] }
 0x374   : > { %v8265_v22 = vpop.eup %4794  ;;  %4822 = vpow2.f32 %v11715_v41  ;;  %v2945_v4 = vadd.f32 %v8145_v13, %v2944_v2  ;;  %11716 = vst [vmem:[#allocation174_spill] sm:$0xff] %v8283_v14  ;;  %v3014_v50 = vadd.f32 %v8155_v52, %v3013_v21  ;;  %v11718_v41 = vsub.f32 %v11717_v8, %v11713_v7  ;;  %v11720_v13 = vld [vmem:[#allocation155_spill] sm:$0xff] }
 0x375   : > { %11711 = vst [vmem:[#allocation144_spill] sm:$0xff] %v8251_v62  ;;  %11714 = vst [vmem:[#allocation166_spill] sm:$0xff] %v8271_v29  ;;  %v8273_v60 = vpop.eup %4796  ;;  %4824 = vpow2.f32 %v7885_v53  ;;  %v2459_v2 = vsub.f32 %v6494_v20, %v11720_v13  ;;  %1958 = vadd.xlane.f32.xlu1 %v1957_v40  ;;  %v8300_v52 = vmul.f32 1.442695, %v2458_v11  ;;  %v8317_v11 = vmax.f32 %v8283_v14, %v6494_v20 }
 0x376   : > { %v8285_v26 = vpop.eup %4798  ;;  %v8292_v5 = vmul.f32 1.442695, %v11718_v41  ;;  %4826 = vpow2.f32 %v7807_v28  ;;  %1961 = vadd.xlane.f32.xlu0 %v1960_v35  ;;  %v2946_v62 = vadd.f32 %v8166_v43, %v2945_v4  ;;  %2859 = vst.msk [vmem:[#allocation2 + $0xd8] sm:$0xff] %vm11100_vm3, %v8281_v55  ;;  %v3015_v21 = vadd.f32 %v8181_v45, %v3014_v50  ;;  %v11722_v28 = vld [vmem:[#allocation154_spill] sm:$0xff]  ;;  %v8319_v4 = vld [vmem:[#allocation2 + $0xe8] sm:$0xff] }
 0x377   : > { %v8296_v29 = vpop.eup %4800  ;;  %11721 = vst [vmem:[#allocation171_spill] sm:$0xff] %v8300_v52  ;;  %4828 = vpow2.f32 %v7915_v58  ;;  %v11723_v40 = vsub.f32 %v11722_v28, %v11720_v13  ;;  %v1963_v45 = vadd.f32 %v8199_v30, %v8189_v47  ;;  %v1966_v50 = vadd.f32 %v8222_v59, %v8211_v18  ;;  %v3045_v41 = vld [vmem:[%s3044_s8] ss:$2 sm:$0x3]  ;;  %2860 = vst.msk [vmem:[#allocation2 + $0xe0] sm:$0xff] %vm11100_vm3, %v8317_v11 }
 0x378   : > { %11719 = vst [vmem:[#allocation167_spill] sm:$0xff] %v8292_v5  ;;  %v8306_v7 = vpop.eup %4802  ;;  %4830 = vpow2.f32 %v7812_v25  ;;  %v2947_v58 = vadd.f32 %v8189_v47, %v2946_v62  ;;  %v3016_v13 = vadd.f32 %v8199_v30, %v3015_v21  ;;  %v8336_v28 = vmul.f32 1.442695, %v2459_v2  ;;  %v11735_v5 = vld [vmem:[#allocation179_spill] sm:$0xff] }
 0x379   : > { %v8313_v43 = vmul.f32 1.442695, %v11723_v40  ;;  %v8321_v35 = vpop.eup %4804  ;;  %4832 = vpow2.f32 %v7948_v0  ;;  %1964 = vadd.xlane.f32.xlu1 %v1963_v45  ;;  %v11726_v40 = vld [vmem:[#allocation181_spill] sm:$0xff]  ;;  %v8350_v0 = vmax.f32 %v8319_v4, %v6494_v20  ;;  %v1969_v25 = vadd.f32 %v8242_v6, %v8232_v9 }
 0x37a   : > { %v8329_v8 = vpop.eup %4806  ;;  %11725 = vst [vmem:[#allocation169_spill] sm:$0xff] %v8336_v28  ;;  %4834 = vpow2.f32 %v7823_v61  ;;  %1967 = vadd.xlane.f32.xlu0 %v1966_v50  ;;  %v2948_v62 = vadd.f32 %v8211_v18, %v2947_v58  ;;  %v2460_v30 = vsub.f32 %v6494_v20, %v11726_v40  ;;  %v3017_v21 = vadd.f32 %v8222_v59, %v3016_v13  ;;  %v11727_v61 = vld [vmem:[#allocation156_spill] sm:$0xff] }
 0x37b   : > { %11724 = vst [vmem:[#allocation175_spill] sm:$0xff] %v8313_v43  ;;  %v8342_v47 = vpop.eup %4808  ;;  %4836 = vpow2.f32 %v7950_v57  ;;  %v2461_v45 = vsub.f32 %v6494_v20, %v11727_v61  ;;  %v11728_v18 = vld [vmem:[#allocation160_spill] sm:$0xff]  ;;  %v1972_v28 = vadd.f32 %v8265_v22, %v8255_v51  ;;  %2861 = vst.msk [vmem:[#allocation2 + $0xe8] sm:$0xff] %vm11100_vm3, %v8350_v0  ;;  %v11731_v57 = vld [vmem:[#allocation139_spill] sm:$0xff]  ;;  %v11736_v14 = vsub.f32 %v11735_v5, %v11726_v40 }
 0x37c   : > { %v4811_v2 = vpop.eup %4810  ;;  %4838 = vpow2.f32 %v11728_v18  ;;  %v2949_v53 = vadd.f32 %v8232_v9, %v2948_v62  ;;  %v8366_v59 = vld [vmem:[#allocation2 + $0xf0] sm:$0xff]  ;;  %v11732_v43 = vsub.s32 0, %v11731_v57  ;;  %v11734_v18 = vsub.s32 1, %v11731_v57  ;;  %v11739_v57 = vld [vmem:[#allocation182_spill] sm:$0xff] }
 0x37d   : > { %v4813_v50 = vpop.eup %4812  ;;  %v8359_v58 = vmul.f32 %v4811_v2, %v3045_v41  ;;  %11730 = vst [vmem:[#allocation145_spill] sm:$0xff] %v8366_v59  ;;  %v3018_v9 = vadd.f32 %v8242_v6, %v3017_v21  ;;  %v2462_v62 = vsub.f32 %v6494_v20, %v7850_v23  ;;  %1970 = vadd.xlane.f32.xlu1 %v1969_v25  ;;  %4840 = vpow2.f32 %v7959_v12 }
 0x37e   : > { %v8368_v13 = vpop.eup %4814  ;;  %v8372_v52 = vrot.slane %v4813_v50, %v11732_v43  ;;  %v8376_v41 = vrot.slane %v4813_v50, %v11734_v18  ;;  %1973 = vadd.xlane.f32.xlu0 %v1972_v28  ;;  %v8387_v43 = vmul.f32 1.442695, %v11736_v14  ;;  %v11740_v25 = vsub.f32 %v11739_v57, %v11727_v61  ;;  %v8416_v61 = vld [vmem:[#allocation2 + $0xf8] sm:$0xff]  ;;  %v11744_v57 = vld [vmem:[#allocation184_spill] sm:$0xff] }
 0x37f   : > { %11729 = vst [vmem:[#allocation176_spill] sm:$0xff] %v8359_v58  ;;  %v8381_v2 = vpop.eup %4816  ;;  %v2950_v58 = vadd.f32 %v8255_v51, %v2949_v53  ;;  %v3019_v21 = vadd.f32 %v8265_v22, %v3018_v9  ;;  %v2463_v51 = vsub.f32 %v6494_v20, %v7889_v56  ;;  %v8405_v5 = vmax.f32 %v8366_v59, %v6494_v20  ;;  %v2127_v59 = vld [vmem:[#allocation3] sm:$0xff] }
 0x380   : > { %11733 = vst [vmem:[#allocation147_spill] sm:$0xff] %v8372_v52  ;;  %11737 = vst [vmem:[#allocation172_spill] sm:$0xff] %v8387_v43  ;;  %v8389_v52 = vmul.f32 1.442695, %v2460_v30  ;;  %v8393_v6 = vpop.eup %4818  ;;  %v8399_v28 = vmul.f32 1.442695, %v11740_v25  ;;  %v1975_v53 = vadd.f32 %v8285_v26, %v8273_v60  ;;  %v1978_v22 = vadd.f32 %v8306_v7, %v8296_v29 }
 0x381   : > { %11742 = vst [vmem:[#allocation153_spill] sm:$0xff] %v8405_v5  ;;  %v8407_v14 = vpop.eup %4820  ;;  %v2951_v40 = vadd.f32 %v8273_v60, %v2950_v58  ;;  %v8414_v30 = vmul.f32 1.442695, %v2461_v45  ;;  %v3020_v9 = vadd.f32 %v8285_v26, %v3019_v21  ;;  %v11745_v25 = vsub.f32 %v11744_v57, %v7850_v23  ;;  %2862 = vst.msk [vmem:[#allocation2 + $0xf0] sm:$0xff] %vm11100_vm3, %v8405_v5  ;;  %v11748_v26 = vld [vmem:[#allocation161_spill] sm:$0xff]  ;;  %v11751_v57 = vld [vmem:[#allocation143_spill] sm:$0xff] }
 0x382   : > { %11738 = vst [vmem:[#allocation151_spill] sm:$0xff] %v8389_v52  ;;  %11741 = vst [vmem:[#allocation146_spill] sm:$0xff] %v8399_v28  ;;  %v8418_v18 = vpop.eup %4822  ;;  %v8426_v28 = vmul.f32 1.442695, %v2462_v62  ;;  %1976 = vadd.xlane.f32.xlu1 %v1975_v53  ;;  %1979 = vadd.xlane.f32.xlu0 %v1978_v22  ;;  %v11749_v21 = vsub.f32 %v11748_v26, %v7889_v56  ;;  %v2464_v62 = vsub.f32 %v6494_v20, %v11751_v57 }
 0x383   : > { %11743 = vst [vmem:[#allocation177_spill] sm:$0xff] %v8414_v30  ;;  %v8424_v50 = vmul.f32 1.442695, %v11745_v25  ;;  %v4825_v45 = vpop.eup %4824  ;;  %v2952_v58 = vadd.f32 %v8296_v29, %v2951_v40  ;;  %v2128_v30 = vld [vmem:[#allocation3 + $0x8] sm:$0xff]  ;;  %v2465_v25 = vsub.f32 %v6494_v20, %v7963_v31  ;;  %v2466_v29 = vsub.f32 %v6494_v20, %v7993_v27 }
 0x384   : > { %11747 = vst [vmem:[#allocation149_spill] sm:$0xff] %v8426_v28  ;;  %v8436_v23 = vmul.f32 1.442695, %v11749_v21  ;;  %v4827_v60 = vpop.eup %4826  ;;  %v3021_v28 = vadd.f32 %v8306_v7, %v3020_v9  ;;  %v8449_v53 = vmax.f32 %v8416_v61, %v6494_v20  ;;  %v1981_v40 = vadd.f32 %v8329_v8, %v8321_v35  ;;  %v1812_v21 = vpop.xlane.xlu1 %1811  ;;  %v11753_v7 = vld [vmem:[#allocation142_spill] sm:$0xff] }
 0x385   : > { %11746 = vst [vmem:[#allocation148_spill] sm:$0xff] %v8424_v50  ;;  %v8443_v50 = vmul.f32 1.442695, %v2463_v51  ;;  %v4829_v56 = vpop.eup %4828  ;;  %v2953_v22 = vadd.f32 %v8321_v35, %v2952_v58  ;;  %v1984_v26 = vadd.f32 %v8368_v13, %v8342_v47  ;;  %v11754_v51 = vsub.f32 %v11753_v7, %v11751_v57  ;;  %v8466_v35 = vld [vmem:[#allocation2 + $0x100] sm:$0xff] }
 0x386   : > { %11750 = vst [vmem:[#allocation178_spill] sm:$0xff] %v8436_v23  ;;  %v3022_v23 = vadd.f32 %v8329_v8, %v3021_v28  ;;  %v2384_v52 = vmul.f32 %v4825_v45, %v2128_v30  ;;  %v2640_v43 = vmul.f32 %v4829_v56, %v1812_v21  ;;  %2863 = vst.msk [vmem:[#allocation2 + $0xf8] sm:$0xff] %vm11100_vm3, %v8449_v53  ;;  %1982 = vadd.xlane.f32.xlu1 %v1981_v40 }
 0x387   : > { %11752 = vst [vmem:[#allocation180_spill] sm:$0xff] %v8443_v50  ;;  %v8459_v9 = vmul.f32 1.442695, %v11754_v51  ;;  %v4831_v50 = vpop.eup %4830  ;;  %1985 = vadd.xlane.f32.xlu0 %v1984_v26  ;;  %v2954_v57 = vadd.f32 %v8342_v47, %v2953_v22  ;;  %v8469_v7 = vmul.f32 1.442695, %v2464_v62  ;;  %v11755_v8 = vsub.f32 %v7929_v10, %v7963_v31  ;;  %v8486_v47 = vld [vmem:[#allocation2 + $0x108] sm:$0xff] }
 0x388   : > { %v4833_v58 = vpop.eup %4832  ;;  %v8476_v30 = vmul.f32 1.442695, %v2465_v25  ;;  %v3023_v56 = vadd.f32 %v8368_v13, %v3022_v23  ;;  %v2704_v21 = vadd.f32 %v2640_v43, %v2384_v52  ;;  %v11756_v51 = vsub.f32 %v7965_v54, %v7993_v27  ;;  %v1809_v13 = vpop.xlane.xlu0 %1808 }
 0x389   : > { %v8474_v28 = vmul.f32 1.442695, %v11755_v8  ;;  %v4835_v45 = vpop.eup %4834  ;;  %v8484_v26 = vmul.f32 1.442695, %v2466_v29  ;;  %v1987_v10 = vadd.f32 %v8393_v6, %v8381_v2  ;;  %v2955_v31 = vadd.f32 %v8381_v2, %v2954_v57  ;;  %v11782_v57 = vld [vmem:[#allocation174_spill] sm:$0xff] }
 0x38a   : > { %v8482_v40 = vmul.f32 1.442695, %v11756_v51  ;;  %v4837_v62 = vpop.eup %4836  ;;  %v1990_v25 = vadd.f32 %v8418_v18, %v8407_v14  ;;  %v2467_v52 = vsub.f32 %v6494_v20, %v8026_v37  ;;  %v3024_v27 = vadd.f32 %v8393_v6, %v3023_v56  ;;  %2769 = vst.msk [vmem:[#allocation3 + $0x8] sm:$0xff] %vm11100_vm3, %v2704_v21  ;;  %v11757_v56 = vld [vmem:[#allocation164_spill] sm:$0xff] }
 0x38b   : > { %v4839_v54 = vpop.eup %4838  ;;  %v2383_v43 = vmul.f32 %v4833_v58, %v2127_v59  ;;  %v2639_v23 = vmul.f32 %v4837_v62, %v1809_v13  ;;  %v8499_v29 = vmax.f32 %v8466_v35, %v6494_v20  ;;  %1988 = vadd.xlane.f32.xlu1 %v1987_v10  ;;  %v2956_v2 = vadd.f32 %v8407_v14, %v2955_v31  ;;  %v8527_v62 = vld [vmem:[#allocation2 + $0x110] sm:$0xff]  ;;  %v11760_v31 = vld [vmem:[#allocation158_spill] sm:$0xff] }
 0x38c   : > { %1991 = vadd.xlane.f32.xlu0 %v1990_v25  ;;  %v2468_v22 = vsub.f32 %v6494_v20, %v8067_v36  ;;  %v8507_v6 = vmax.f32 %v8486_v47, %v6494_v20  ;;  %v3025_v59 = vadd.f32 %v8418_v18, %v3024_v27  ;;  %4842 = vpow2.f32 %v7973_v46  ;;  %v11762_v27 = vld [vmem:[#allocation165_spill] sm:$0xff] }
 0x38d   : > { %v2703_v58 = vadd.f32 %v2639_v23, %v2383_v43  ;;  %2864 = vst.msk [vmem:[#allocation2 + $0x100] sm:$0xff] %vm11100_vm3, %v8499_v29  ;;  %v1993_v14 = vadd.f32 %v4831_v50, %v4827_v60  ;;  %v2957_v12 = vadd.f32 %v4827_v60, %v2956_v2  ;;  %v1996_v8 = vadd.f32 %v4839_v54, %v4835_v45 }
 0x38e   : > { %4844 = vpow2.f32 %v11757_v56  ;;  %2865 = vst.msk [vmem:[#allocation2 + $0x108] sm:$0xff] %vm11100_vm3, %v8507_v6  ;;  %v3026_v21 = vadd.f32 %v4831_v50, %v3025_v59  ;;  %v11758_v46 = vsub.f32 %v7995_v39, %v8026_v37  ;;  %v8525_v51 = vmul.f32 1.442695, %v2467_v52  ;;  %v8537_v39 = vld [vmem:[#allocation2 + $0x118] sm:$0xff]  ;;  %v11765_v59 = vld [vmem:[#allocation159_spill] sm:$0xff]  ;;  %v11768_v56 = vld [vmem:[#allocation170_spill] sm:$0xff] }
 0x38f   : > { %2768 = vst.msk [vmem:[#allocation3] sm:$0xff] %vm11100_vm3, %v2703_v58  ;;  %4846 = vpow2.f32 %v8032_v19  ;;  %1994 = vadd.xlane.f32.xlu1 %v1993_v14  ;;  %v2958_v60 = vadd.f32 %v4835_v45, %v2957_v12  ;;  %v11759_v50 = vsub.f32 %v8036_v44, %v8067_v36  ;;  %v2469_v19 = vsub.f32 %v6494_v20, %v8103_v15  ;;  %v11766_v14 = vld [vmem:[#allocation163_spill] sm:$0xff] }
 0x390   : > { %v8523_v18 = vmul.f32 1.442695, %v11758_v46  ;;  %1997 = vadd.xlane.f32.xlu0 %v1996_v8  ;;  %4848 = vpow2.f32 %v8045_v34  ;;  %v3027_v37 = vadd.f32 %v4839_v54, %v3026_v21  ;;  %v8540_v25 = vmul.f32 1.442695, %v2468_v22  ;;  %v11761_v34 = vld [vmem:[#allocation162_spill] sm:$0xff]  ;;  %v11763_v54 = vld [vmem:[#allocation157_spill] sm:$0xff] }
 0x391   : > { %v8533_v10 = vmul.f32 1.442695, %v11759_v50  ;;  %4850 = vpow2.f32 %v11760_v31  ;;  %v2470_v45 = vsub.f32 %v6494_v20, %v8133_v63  ;;  %v2959_v13 = vrot.slane %v2958_v60, 4  ;;  %v8588_v31 = vld [vmem:[#allocation2 + $0x128] sm:$0xff] }
 0x392   : > { %4852 = vpow2.f32 %v11761_v34  ;;  %v2471_v44 = vsub.f32 %v6494_v20, %v8177_v17  ;;  %v8549_v36 = vmax.f32 %v8527_v62, %v6494_v20  ;;  %v3028_v52 = vrot.slane %v3027_v37, 4 }
 0x393   : > { %4854 = vpow2.f32 %v11762_v27  ;;  %v11764_v43 = vsub.f32 %v11763_v54, %v8103_v15  ;;  %v8559_v2 = vmax.f32 %v8537_v39, %v6494_v20  ;;  %v2960_v22 = vadd.f32 %v2959_v13, %v2958_v60 }
 0x394   : > { %4856 = vpow2.f32 %v11765_v59  ;;  %v8562_v58 = vmul.f32 1.442695, %v2469_v19  ;;  %v11767_v12 = vsub.f32 %v11766_v14, %v8133_v63  ;;  %2866 = vst.msk [vmem:[#allocation2 + $0x110] sm:$0xff] %vm11100_vm3, %v8549_v36  ;;  %v3029_v15 = vadd.f32 %v3028_v52, %v3027_v37  ;;  %v8586_v37 = vld [vmem:[#allocation2 + $0x120] sm:$0xff]  ;;  %v4841_v52 = vpop.eup %4840 }
 0x395   : > { %v8555_v23 = vmul.f32 1.442695, %v11764_v43  ;;  %4858 = vpow2.f32 %v11768_v56  ;;  %v8572_v21 = vmul.f32 1.442695, %v2470_v45  ;;  %v11769_v46 = vsub.f32 %v8143_v16, %v8177_v17  ;;  %2867 = vst.msk [vmem:[#allocation2 + $0x118] sm:$0xff] %vm11100_vm3, %v8559_v2  ;;  %v11772_v43 = vld [vmem:[#allocation168_spill] sm:$0xff] }
 0x396   : > { %v8567_v8 = vmul.f32 1.442695, %v11767_v12  ;;  %v2961_v50 = vrot.slane %v2960_v22, 2  ;;  %4860 = vpow2.f32 %v8162_v1  ;;  %v8582_v63 = vmul.f32 1.442695, %v2471_v44 }
 0x397   : > { %v8577_v60 = vmul.f32 1.442695, %v11769_v46  ;;  %v2472_v19 = vsub.f32 %v6494_v20, %v8207_v33  ;;  %v3030_v45 = vrot.slane %v3029_v15, 2  ;;  %4862 = vpow2.f32 %v8164_v24  ;;  %v11771_v24 = vld [vmem:[#allocation173_spill] sm:$0xff] }
 0x398   : > { %v11770_v16 = vsub.f32 %v8179_v48, %v8207_v33  ;;  %v2473_v1 = vsub.f32 %v6494_v20, %v8240_v42  ;;  %v2962_v13 = vadd.f32 %v2961_v50, %v2960_v22  ;;  %4864 = vpow2.f32 %v8173_v38 }
 0x399   : > { %v2474_v34 = vsub.f32 %v6494_v20, %v8281_v55  ;;  %v2475_v44 = vsub.f32 %v6494_v20, %v8317_v11  ;;  %v3031_v27 = vadd.f32 %v3030_v45, %v3029_v15  ;;  %4866 = vpow2.f32 %v11771_v24  ;;  %v4843_v54 = vpop.eup %4842 }
 0x39a   : > { %v8594_v17 = vmul.f32 1.442695, %v11770_v16  ;;  %v8606_v48 = vmax.f32 %v8586_v37, %v6494_v20  ;;  %v8610_v33 = vmax.f32 %v8588_v31, %v6494_v20  ;;  %v2963_v38 = vrot.slane %v2962_v13, 1  ;;  %v11777_v16 = vld [vmem:[#allocation144_spill] sm:$0xff] }
 0x39b   : > { %4868 = vpow2.f32 %v11772_v43  ;;  %v8613_v22 = vmul.f32 1.442695, %v2472_v19  ;;  %v2476_v59 = vsub.f32 %v6494_v20, %v8350_v0  ;;  %v4845_v14 = vpop.eup %4844  ;;  %v3032_v12 = vrot.slane %v3031_v27, 1  ;;  %v2129_v19 = vld [vmem:[#allocation3 + $0x10] sm:$0xff] }
 0x39c   : > { %4870 = vpow2.f32 %v8246_v49  ;;  %v11774_v15 = vsub.f32 %v8209_v3, %v8240_v42  ;;  %v8623_v46 = vmul.f32 1.442695, %v2473_v1  ;;  %2868 = vst.msk [vmem:[#allocation2 + $0x120] sm:$0xff] %vm11100_vm3, %v8606_v48  ;;  %2869 = vst.msk [vmem:[#allocation2 + $0x128] sm:$0xff] %vm11100_vm3, %v8610_v33  ;;  %v4847_v50 = vpop.eup %4846  ;;  %v2964_v45 = vadd.f32 %v2963_v38, %v2962_v13  ;;  %v8637_v42 = vld [vmem:[#allocation2 + $0x130] sm:$0xff]  ;;  %v8647_v38 = vld [vmem:[#allocation2 + $0x138] sm:$0xff] }
 0x39d   : > { %11773 = vst [vmem:[#allocation152_spill] sm:$0xff] %v8613_v22  ;;  %4872 = vpow2.f32 %v11777_v16  ;;  %v11778_v49 = vsub.f32 %v8253_v32, %v8281_v55  ;;  %v8635_v3 = vmul.f32 1.442695, %v2474_v34  ;;  %v4849_v1 = vpop.eup %4848  ;;  %v3033_v43 = vadd.f32 %v3032_v12, %v3031_v27  ;;  %11786 = vst [vmem:[#allocation160_spill] sm:$0xff] %v8647_v38  ;;  %v8649_v32 = vld [vmem:[#allocation2 + $0x140] sm:$0xff]  ;;  %v2130_v34 = vld [vmem:[#allocation3 + $0x18] sm:$0xff] }
 0x39e   : > { %v8621_v56 = vmul.f32 1.442695, %v11774_v15  ;;  %11776 = vst [vmem:[#allocation150_spill] sm:$0xff] %v8623_v46  ;;  %v11781_v15 = vld [vmem:[#allocation166_spill] sm:$0xff]  ;;  %v11783_v5 = vsub.f32 %v11782_v57, %v8317_v11  ;;  %v8645_v13 = vmul.f32 1.442695, %v2475_v44  ;;  %v4851_v55 = vpop.eup %4850  ;;  %v11790_v27 = vsub.f32 %v8319_v4, %v8350_v0 }
 0x39f   : > { %v8633_v24 = vmul.f32 1.442695, %v11778_v49  ;;  %11780 = vst [vmem:[#allocation154_spill] sm:$0xff] %v8635_v3  ;;  %4874 = vpow2.f32 %v11781_v15  ;;  %11787 = vst [vmem:[#allocation179_spill] sm:$0xff] %v8649_v32  ;;  %v11788_v16 = vld [vmem:[#allocation147_spill] sm:$0xff]  ;;  %v3065_v57 = vmul.f32 %v8376_v41, %v3033_v43  ;;  %v11794_v15 = vld [vmem:[#allocation153_spill] sm:$0xff]  ;;  %v8671_v0 = vmax.f32 %v8647_v38, %v6494_v20  ;;  %v1815_v43 = vpop.xlane.xlu1 %1814 }
 0x3a0   : > { %11775 = vst [vmem:[#allocation183_spill] sm:$0xff] %v8621_v56  ;;  %v8643_v46 = vmul.f32 1.442695, %v11783_v5  ;;  %11785 = vst [vmem:[#allocation156_spill] sm:$0xff] %v8645_v13  ;;  %v3064_v49 = vmul.f32 %v11788_v16, %v2964_v45  ;;  %v11789_v3 = vld [vmem:[#allocation167_spill] sm:$0xff]  ;;  %v4853_v5 = vpop.eup %4852  ;;  %v2477_v13 = vsub.f32 %v6494_v20, %v11794_v15  ;;  %v8666_v45 = vmax.f32 %v8637_v42, %v6494_v20  ;;  %v11802_v22 = vld [vmem:[#allocation172_spill] sm:$0xff] }
 0x3a1   : > { %11779 = vst [vmem:[#allocation155_spill] sm:$0xff] %v8633_v24  ;;  %4876 = vpow2.f32 %v11789_v3  ;;  %v8656_v12 = vmul.f32 1.442695, %v11790_v27  ;;  %v8658_v11 = vmul.f32 1.442695, %v2476_v59  ;;  %v11793_v44 = vld [vmem:[#allocation171_spill] sm:$0xff]  ;;  %v4855_v3 = vpop.eup %4854  ;;  %v2385_v16 = vmul.f32 %v4841_v52, %v2129_v19 }
 0x3a2   : > { %11784 = vst [vmem:[#allocation181_spill] sm:$0xff] %v8643_v46  ;;  %4878 = vpow2.f32 %v11793_v44  ;;  %v2131_v46 = vld [vmem:[#allocation3 + $0x20] sm:$0xff]  ;;  %v11795_v4 = vld [vmem:[#allocation175_spill] sm:$0xff]  ;;  %11796 = vst [vmem:[#allocation161_spill] sm:$0xff] %v8671_v0  ;;  %v8675_v41 = vmax.f32 %v8649_v32, %v6494_v20  ;;  %v4857_v59 = vpop.eup %4856  ;;  %v2386_v27 = vmul.f32 %v4845_v14, %v2130_v34  ;;  %v1818_v44 = vpop.xlane.xlu0 %1817  ;;  %v2641_v56 = vmul.f32 %v4843_v54, %v1815_v43 }
 0x3a3   : > { %11791 = vst [vmem:[#allocation182_spill] sm:$0xff] %v8656_v12  ;;  %11792 = vst [vmem:[#allocation184_spill] sm:$0xff] %v8658_v11  ;;  %4880 = vpow2.f32 %v11795_v4  ;;  %v3068_v11 = vcombine.low %v3064_v49, %v3065_v57  ;;  %v11798_v12 = vld [vmem:[#allocation169_spill] sm:$0xff]  ;;  %v4859_v4 = vpop.eup %4858  ;;  %v2642_v38 = vmul.f32 %v4847_v50, %v1818_v44  ;;  %v2132_v32 = vld [vmem:[#allocation3 + $0x28] sm:$0xff]  ;;  %v2478_v14 = vsub.f32 %v6494_v20, %v8449_v53 }
 0x3a4   : > { %11797 = vst [vmem:[#allocation143_spill] sm:$0xff] %v8675_v41  ;;  %4882 = vpow2.f32 %v11798_v12  ;;  %v11799_v24 = vld [vmem:[#allocation145_spill] sm:$0xff]  ;;  %2870 = vst.msk [vmem:[#allocation2 + $0x130] sm:$0xff] %vm11100_vm3, %v8666_v45  ;;  %v2387_v34 = vmul.f32 %v4849_v1, %v2131_v46  ;;  %v11803_v49 = vld [vmem:[#allocation140_spill] sm:$0xff]  ;;  %v8694_v54 = vmul.f32 1.442695, %v2477_v13  ;;  %v2388_v46 = vmul.f32 %v4853_v5, %v2132_v32 }
 0x3a5   : > { %v11800_v52 = vsub.f32 %v11799_v24, %v11794_v15  ;;  %4884 = vpow2.f32 %v11802_v22  ;;  %2871 = vst.msk [vmem:[#allocation2 + $0x138] sm:$0xff] %vm11100_vm3, %v8671_v0  ;;  %2872 = vst.msk [vmem:[#allocation2 + $0x140] sm:$0xff] %vm11100_vm3, %v8675_v41  ;;  %v4861_v24 = vpop.eup %4860  ;;  %v3075_v12 = vrot.slane %v3068_v11, %v11803_v49  ;;  %v11804_v57 = vld [vmem:[#allocation151_spill] sm:$0xff]  ;;  %v2705_v15 = vadd.f32 %v2641_v56, %v2385_v16  ;;  %v2133_v43 = vld [vmem:[#allocation3 + $0x30] sm:$0xff]  ;;  %v1821_v0 = vpop.xlane.xlu1 %1820 }
 0x3a6   : > { %4886 = vpow2.f32 %v11804_v57  ;;  %v4863_v50 = vpop.eup %4862  ;;  %v2706_v22 = vadd.f32 %v2642_v38, %v2386_v27  ;;  %v11805_v44 = vld [vmem:[#allocation146_spill] sm:$0xff]  ;;  %v1824_v1 = vpop.xlane.xlu0 %1823  ;;  %v2134_v11 = vld [vmem:[#allocation3 + $0x38] sm:$0xff]  ;;  %v2479_v56 = vsub.f32 %v6494_v20, %v8499_v29  ;;  %v11809_v27 = vld [vmem:[#allocation148_spill] sm:$0xff]  ;;  %v8709_v32 = vmul.f32 1.442695, %v2478_v14 }
 0x3a7   : > { %v8681_v19 = vmul.f32 1.442695, %v11800_v52  ;;  %4888 = vpow2.f32 %v11805_v44  ;;  %v11806_v52 = vsub.f32 %v8416_v61, %v8449_v53  ;;  %v4865_v41 = vpop.eup %4864  ;;  %v3082_v57 = vrot.slane %v3075_v12, %v11803_v49  ;;  %v11808_v13 = vld [vmem:[#allocation177_spill] sm:$0xff]  ;;  %2770 = vst.msk [vmem:[#allocation3 + $0x10] sm:$0xff] %vm11100_vm3, %v2705_v15  ;;  %v2135_v16 = vld [vmem:[#allocation3 + $0x40] sm:$0xff]  ;;  %v11811_v12 = vld [vmem:[#allocation176_spill] sm:$0xff] }
 0x3a8   : > { %4890 = vpow2.f32 %v11808_v13  ;;  %v4867_v38 = vpop.eup %4866  ;;  %2771 = vst.msk [vmem:[#allocation3 + $0x18] sm:$0xff] %vm11100_vm3, %v2706_v22  ;;  %v2643_v61 = vmul.f32 %v4851_v55, %v1821_v0  ;;  %v2644_v53 = vmul.f32 %v4855_v3, %v1824_v1  ;;  %11810 = vst [vmem:[#allocation158_spill] sm:$0xff] %v8709_v32  ;;  %v2389_v49 = vmul.f32 %v4857_v59, %v2133_v43  ;;  %v11813_v3 = vld [vmem:[#allocation178_spill] sm:$0xff]  ;;  %v8716_v0 = vld [vmem:[#allocation2 + $0x148] sm:$0xff] }
 0x3a9   : > { %11801 = vst [vmem:[#allocation142_spill] sm:$0xff] %v8681_v19  ;;  %v8700_v19 = vmul.f32 1.442695, %v11806_v52  ;;  %4892 = vpow2.f32 %v11809_v27  ;;  %v4869_v5 = vpop.eup %4868  ;;  %v3084_v44 = vadd.f32 %v3082_v57, %v11811_v12  ;;  %v11812_v52 = vld [vmem:[#allocation149_spill] sm:$0xff]  ;;  %v2224_v13 = vsub.f32 %v8486_v47, %v8507_v6  ;;  %v1827_v1 = vpop.xlane.xlu1 %1826  ;;  %v2136_v59 = vld [vmem:[#allocation3 + $0x48] sm:$0xff]  ;;  %v11815_v57 = vld [vmem:[#allocation180_spill] sm:$0xff] }
 0x3aa   : > { %4894 = vpow2.f32 %v11812_v52  ;;  %v4871_v15 = vpop.eup %4870  ;;  %v2708_v22 = vadd.f32 %v2644_v53, %v2388_v46  ;;  %v2390_v55 = vmul.f32 %v4861_v24, %v2134_v11  ;;  %v1830_v27 = vpop.xlane.xlu0 %1829  ;;  %v2391_v32 = vmul.f32 %v4865_v41, %v2135_v16  ;;  %v8735_v53 = vld [vmem:[#allocation2 + $0x150] sm:$0xff]  ;;  %v2140_v43 = vld [vmem:[#allocation3 + $0x68] sm:$0xff] }
 0x3ab   : > { %11807 = vst [vmem:[#allocation164_spill] sm:$0xff] %v8700_v19  ;;  %v2707_v19 = vadd.f32 %v2643_v61, %v2387_v34  ;;  %4896 = vpow2.f32 %v11813_v3  ;;  %v4873_v14 = vpop.eup %4872  ;;  %3089 = vst.msk [vmem:[%s3044_s8] ss:$2 sm:$0x3] %vm6562_vm2, %v3084_v44  ;;  %v11816_v47 = vsub.f32 %v8466_v35, %v8499_v29  ;;  %v8728_v24 = vmul.f32 1.442695, %v2479_v56 }
 0x3ac   : > { %4898 = vpow2.f32 %v11815_v57  ;;  %v4875_v46 = vpop.eup %4874  ;;  %2773 = vst.msk [vmem:[#allocation3 + $0x28] sm:$0xff] %vm11100_vm3, %v2708_v22  ;;  %v2645_v41 = vmul.f32 %v4859_v4, %v1827_v1  ;;  %v2646_v11 = vmul.f32 %v4863_v50, %v1830_v27  ;;  %v2480_v61 = vsub.f32 %v6494_v20, %v8507_v6  ;;  %v2137_v12 = vld [vmem:[#allocation3 + $0x50] sm:$0xff]  ;;  %v2138_v6 = vld [vmem:[#allocation3 + $0x58] sm:$0xff] }
 0x3ad   : > { %v8726_v34 = vmul.f32 1.442695, %v11816_v47  ;;  %2772 = vst.msk [vmem:[#allocation3 + $0x20] sm:$0xff] %vm11100_vm3, %v2707_v19  ;;  %4900 = vpow2.f32 %v8459_v9  ;;  %v8738_v35 = vmul.f32 1.442695, %v2224_v13  ;;  %v2225_v29 = vsub.f32 %v8527_v62, %v8549_v36  ;;  %v1833_v52 = vpop.xlane.xlu1 %1832  ;;  %v8763_v22 = vld [vmem:[#allocation2 + $0x158] sm:$0xff] }
 0x3ae   : > { %v4877_v16 = vpop.eup %4876  ;;  %4902 = vpow2.f32 %v8469_v7  ;;  %v8744_v19 = vmax.f32 %v8716_v0, %v6494_v20  ;;  %v2709_v50 = vadd.f32 %v2645_v41, %v2389_v49  ;;  %v2710_v9 = vadd.f32 %v2646_v11, %v2390_v55  ;;  %v1836_v7 = vpop.xlane.xlu0 %1835 }
 0x3af   : > { %v4879_v4 = vpop.eup %4878  ;;  %v2392_v56 = vmul.f32 %v4869_v5, %v2136_v59  ;;  %4904 = vpow2.f32 %v8474_v28  ;;  %v2481_v62 = vsub.f32 %v6494_v20, %v8549_v36  ;;  %v2226_v13 = vsub.f32 %v8537_v39, %v8559_v2 }
 0x3b0   : > { %v4881_v44 = vpop.eup %4880  ;;  %4906 = vpow2.f32 %v8476_v30  ;;  %2873 = vst.msk [vmem:[#allocation2 + $0x148] sm:$0xff] %vm11100_vm3, %v8744_v19  ;;  %v8756_v5 = vmax.f32 %v8735_v53, %v6494_v20  ;;  %2774 = vst.msk [vmem:[#allocation3 + $0x30] sm:$0xff] %vm11100_vm3, %v2709_v50  ;;  %v2647_v28 = vmul.f32 %v4867_v38, %v1833_v52  ;;  %v2648_v30 = vmul.f32 %v4871_v15, %v1836_v7  ;;  %v2139_v15 = vld [vmem:[#allocation3 + $0x60] sm:$0xff] }
 0x3b1   : > { %v4883_v49 = vpop.eup %4882  ;;  %2775 = vst.msk [vmem:[#allocation3 + $0x38] sm:$0xff] %vm11100_vm3, %v2710_v9  ;;  %4908 = vpow2.f32 %v8482_v40  ;;  %v8761_v36 = vmul.f32 1.442695, %v2480_v61  ;;  %v2393_v55 = vmul.f32 %v4873_v14, %v2137_v12  ;;  %v2394_v3 = vmul.f32 %v4877_v16, %v2138_v6  ;;  %v1839_v14 = vpop.xlane.xlu1 %1838  ;;  %v2141_v61 = vld [vmem:[#allocation3 + $0x70] sm:$0xff]  ;;  %v8787_v16 = vld [vmem:[#allocation2 + $0x160] sm:$0xff] }
 0x3b2   : > { %v4885_v39 = vpop.eup %4884  ;;  %4910 = vpow2.f32 %v8484_v26  ;;  %v8766_v1 = vmul.f32 1.442695, %v2225_v29  ;;  %2874 = vst.msk [vmem:[#allocation2 + $0x150] sm:$0xff] %vm11100_vm3, %v8756_v5  ;;  %v2711_v59 = vadd.f32 %v2647_v28, %v2391_v32  ;;  %v2712_v38 = vadd.f32 %v2648_v30, %v2392_v56  ;;  %v1842_v47 = vpop.xlane.xlu0 %1841 }
 0x3b3   : > { %v4887_v27 = vpop.eup %4886  ;;  %4912 = vpow2.f32 %v8523_v18  ;;  %v2482_v40 = vsub.f32 %v6494_v20, %v8559_v2  ;;  %v8774_v26 = vmul.f32 1.442695, %v2481_v62  ;;  %v8776_v41 = vmul.f32 1.442695, %v2226_v13 }
 0x3b4   : > { %v4889_v57 = vpop.eup %4888  ;;  %4914 = vpow2.f32 %v8525_v51  ;;  %v8780_v32 = vmax.f32 %v8763_v22, %v6494_v20  ;;  %2776 = vst.msk [vmem:[#allocation3 + $0x40] sm:$0xff] %vm11100_vm3, %v2711_v59  ;;  %2777 = vst.msk [vmem:[#allocation3 + $0x48] sm:$0xff] %vm11100_vm3, %v2712_v38  ;;  %v2649_v18 = vmul.f32 %v4875_v46, %v1839_v14  ;;  %v2650_v2 = vmul.f32 %v4879_v4, %v1842_v47  ;;  %v8823_v38 = vld [vmem:[#allocation2 + $0x170] sm:$0xff] }
 0x3b5   : > { %v4891_v11 = vpop.eup %4890  ;;  %4916 = vpow2.f32 %v8533_v10  ;;  %v2227_v51 = vsub.f32 %v8586_v37, %v8606_v48  ;;  %v2395_v50 = vmul.f32 %v4881_v44, %v2139_v15  ;;  %v2396_v9 = vmul.f32 %v4885_v39, %v2140_v43  ;;  %v8797_v37 = vld [vmem:[#allocation2 + $0x168] sm:$0xff]  ;;  %v1845_v44 = vpop.xlane.xlu1 %1844 }
 0x3b6   : > { %v4893_v29 = vpop.eup %4892  ;;  %4918 = vpow2.f32 %v8540_v25  ;;  %v2483_v56 = vsub.f32 %v6494_v20, %v8606_v48  ;;  %2875 = vst.msk [vmem:[#allocation2 + $0x158] sm:$0xff] %vm11100_vm3, %v8780_v32  ;;  %v2713_v4 = vadd.f32 %v2649_v18, %v2393_v55  ;;  %v2714_v12 = vadd.f32 %v2650_v2, %v2394_v3  ;;  %v1848_v52 = vpop.xlane.xlu0 %1847  ;;  %v2142_v25 = vld [vmem:[#allocation3 + $0x78] sm:$0xff] }
 0x3b7   : > { %v4895_v46 = vpop.eup %4894  ;;  %4920 = vpow2.f32 %v8555_v23  ;;  %v8795_v10 = vmul.f32 1.442695, %v2482_v40  ;;  %v2397_v7 = vmul.f32 %v4889_v57, %v2141_v61  ;;  %v2228_v48 = vsub.f32 %v8588_v31, %v8610_v33  ;;  %v2144_v40 = vld [vmem:[#allocation3 + $0x88] sm:$0xff] }
 0x3b8   : > { %v4897_v6 = vpop.eup %4896  ;;  %4922 = vpow2.f32 %v8562_v58  ;;  %v8804_v62 = vmax.f32 %v8787_v16, %v6494_v20  ;;  %2778 = vst.msk [vmem:[#allocation3 + $0x50] sm:$0xff] %vm11100_vm3, %v2713_v4  ;;  %2779 = vst.msk [vmem:[#allocation3 + $0x58] sm:$0xff] %vm11100_vm3, %v2714_v12  ;;  %v2651_v23 = vmul.f32 %v4883_v49, %v1845_v44  ;;  %v2652_v28 = vmul.f32 %v4887_v27, %v1848_v52  ;;  %v2143_v58 = vld [vmem:[#allocation3 + $0x80] sm:$0xff]  ;;  %v2146_v12 = vld [vmem:[#allocation3 + $0x98] sm:$0xff] }
 0x3b9   : > { %v4899_v13 = vpop.eup %4898  ;;  %4924 = vpow2.f32 %v8567_v8  ;;  %v8809_v30 = vmul.f32 1.442695, %v2227_v51  ;;  %v8812_v31 = vmul.f32 1.442695, %v2483_v56  ;;  %v2484_v55 = vsub.f32 %v6494_v20, %v8610_v33  ;;  %v1851_v15 = vpop.xlane.xlu1 %1850  ;;  %v11817_v51 = vld [vmem:[#allocation152_spill] sm:$0xff] }
 0x3ba   : > { %v4901_v39 = vpop.eup %4900  ;;  %4926 = vpow2.f32 %v8572_v21  ;;  %2876 = vst.msk [vmem:[#allocation2 + $0x160] sm:$0xff] %vm11100_vm3, %v8804_v62  ;;  %v8820_v49 = vmax.f32 %v8797_v37, %v6494_v20  ;;  %v2715_v8 = vadd.f32 %v2651_v23, %v2395_v50  ;;  %v2716_v27 = vadd.f32 %v2652_v28, %v2396_v9  ;;  %v1854_v43 = vpop.xlane.xlu0 %1853  ;;  %v11821_v23 = vld [vmem:[#allocation150_spill] sm:$0xff] }
 0x3bb   : > { %v4903_v3 = vpop.eup %4902  ;;  %v2398_v59 = vmul.f32 %v4893_v29, %v2142_v25  ;;  %4928 = vpow2.f32 %v8577_v60  ;;  %v8826_v33 = vmul.f32 1.442695, %v2228_v48  ;;  %v2229_v57 = vsub.f32 %v8637_v42, %v8666_v45  ;;  %v11819_v29 = vld [vmem:[#allocation160_spill] sm:$0xff] }
 0x3bc   : > { %v4905_v21 = vpop.eup %4904  ;;  %4930 = vpow2.f32 %v8582_v63  ;;  %v2485_v14 = vsub.f32 %v6494_v20, %v8666_v45  ;;  %2877 = vst.msk [vmem:[#allocation2 + $0x168] sm:$0xff] %vm11100_vm3, %v8820_v49  ;;  %2780 = vst.msk [vmem:[#allocation3 + $0x60] sm:$0xff] %vm11100_vm3, %v2715_v8  ;;  %v2653_v47 = vmul.f32 %v4891_v11, %v1851_v15  ;;  %v2654_v18 = vmul.f32 %v4895_v46, %v1854_v43  ;;  %v2145_v63 = vld [vmem:[#allocation3 + $0x90] sm:$0xff]  ;;  %v11818_v45 = vld [vmem:[#allocation161_spill] sm:$0xff] }
 0x3bd   : > { %v4907_v60 = vpop.eup %4906  ;;  %2781 = vst.msk [vmem:[#allocation3 + $0x68] sm:$0xff] %vm11100_vm3, %v2716_v27  ;;  %v2399_v2 = vmul.f32 %v4897_v6, %v2143_v58  ;;  %4932 = vpow2.f32 %v8594_v17  ;;  %v8838_v42 = vmul.f32 1.442695, %v2484_v55  ;;  %v2230_v50 = vsub.f32 %v11819_v29, %v11818_v45  ;;  %v11820_v6 = vld [vmem:[#allocation183_spill] sm:$0xff]  ;;  %v8847_v17 = vld [vmem:[#allocation2 + $0x178] sm:$0xff]  ;;  %v1857_v52 = vpop.xlane.xlu1 %1856  ;;  %v2147_v8 = vld [vmem:[#allocation3 + $0xa0] sm:$0xff] }
 0x3be   : > { %v4909_v61 = vpop.eup %4908  ;;  %4934 = vpow2.f32 %v11817_v51  ;;  %v8844_v9 = vmax.f32 %v8823_v38, %v6494_v20  ;;  %v2717_v4 = vadd.f32 %v2653_v47, %v2397_v7  ;;  %v2718_v11 = vadd.f32 %v2654_v18, %v2398_v59  ;;  %v1860_v25 = vpop.xlane.xlu0 %1859  ;;  %v11822_v27 = vld [vmem:[#allocation155_spill] sm:$0xff] }
 0x3bf   : > { %v4911_v56 = vpop.eup %4910  ;;  %v2400_v46 = vmul.f32 %v4901_v39, %v2144_v40  ;;  %4936 = vpow2.f32 %v11820_v6  ;;  %v2401_v48 = vmul.f32 %v4905_v21, %v2145_v63  ;;  %v8850_v28 = vmul.f32 1.442695, %v2229_v57  ;;  %v8861_v21 = vld [vmem:[#allocation2 + $0x180] sm:$0xff]  ;;  %v2148_v18 = vld [vmem:[#allocation3 + $0xa8] sm:$0xff]  ;;  %v11824_v63 = vld [vmem:[#allocation181_spill] sm:$0xff] }
 0x3c0   : > { %v4913_v44 = vpop.eup %4912  ;;  %4938 = vpow2.f32 %v11821_v23  ;;  %v8852_v58 = vmul.f32 1.442695, %v2485_v14  ;;  %2878 = vst.msk [vmem:[#allocation2 + $0x170] sm:$0xff] %vm11100_vm3, %v8844_v9  ;;  %2782 = vst.msk [vmem:[#allocation3 + $0x70] sm:$0xff] %vm11100_vm3, %v2717_v4  ;;  %v2655_v39 = vmul.f32 %v4899_v13, %v1857_v52  ;;  %v2656_v55 = vmul.f32 %v4903_v3, %v1860_v25  ;;  %v11823_v40 = vld [vmem:[#allocation154_spill] sm:$0xff]  ;;  %v11825_v51 = vld [vmem:[#allocation143_spill] sm:$0xff] }
 0x3c1   : > { %v4915_v7 = vpop.eup %4914  ;;  %2783 = vst.msk [vmem:[#allocation3 + $0x78] sm:$0xff] %vm11100_vm3, %v2718_v11  ;;  %4940 = vpow2.f32 %v11822_v27  ;;  %v2486_v59 = vsub.f32 %v6494_v20, %v11818_v45  ;;  %v2402_v43 = vmul.f32 %v4909_v61, %v2146_v12  ;;  %v8864_v57 = vmul.f32 1.442695, %v2230_v50  ;;  %v11826_v45 = vld [vmem:[#allocation179_spill] sm:$0xff]  ;;  %v1863_v11 = vpop.xlane.xlu1 %1862  ;;  %v11827_v6 = vld [vmem:[#allocation156_spill] sm:$0xff] }
 0x3c2   : > { %v4917_v15 = vpop.eup %4916  ;;  %4942 = vpow2.f32 %v11823_v40  ;;  %v8868_v14 = vmax.f32 %v8847_v17, %v6494_v20  ;;  %v2719_v3 = vadd.f32 %v2655_v39, %v2399_v2  ;;  %v2720_v47 = vadd.f32 %v2656_v55, %v2400_v46  ;;  %v1866_v61 = vpop.xlane.xlu0 %1865  ;;  %v8887_v39 = vld [vmem:[#allocation2 + $0x188] sm:$0xff]  ;;  %v2149_v27 = vld [vmem:[#allocation3 + $0xb0] sm:$0xff] }
 0x3c3   : > { %v4919_v13 = vpop.eup %4918  ;;  %4944 = vpow2.f32 %v11824_v63  ;;  %v2231_v29 = vsub.f32 %v11826_v45, %v11825_v51  ;;  %v2403_v12 = vmul.f32 %v4913_v44, %v2147_v8  ;;  %v2487_v50 = vsub.f32 %v6494_v20, %v11825_v51  ;;  %v11828_v44 = vld [vmem:[#allocation182_spill] sm:$0xff]  ;;  %v11829_v40 = vld [vmem:[#allocation184_spill] sm:$0xff] }
 0x3c4   : > { %v4921_v4 = vpop.eup %4920  ;;  %4946 = vpow2.f32 %v11827_v6  ;;  %2879 = vst.msk [vmem:[#allocation2 + $0x178] sm:$0xff] %vm11100_vm3, %v8868_v14  ;;  %v8880_v2 = vmax.f32 %v8861_v21, %v6494_v20  ;;  %2784 = vst.msk [vmem:[#allocation3 + $0x80] sm:$0xff] %vm11100_vm3, %v2719_v3  ;;  %v2657_v52 = vmul.f32 %v4907_v60, %v1863_v11  ;;  %v2658_v25 = vmul.f32 %v4911_v56, %v1866_v61  ;;  %v11830_v51 = vld [vmem:[#allocation142_spill] sm:$0xff] }
 0x3c5   : > { %v4923_v46 = vpop.eup %4922  ;;  %2785 = vst.msk [vmem:[#allocation3 + $0x88] sm:$0xff] %vm11100_vm3, %v2720_v47  ;;  %4948 = vpow2.f32 %v11828_v44  ;;  %v8885_v23 = vmul.f32 1.442695, %v2486_v59  ;;  %v2404_v8 = vmul.f32 %v4917_v15, %v2148_v18  ;;  %v2232_v63 = vsub.f32 %v8716_v0, %v8744_v19  ;;  %v2150_v47 = vld [vmem:[#allocation3 + $0xb8] sm:$0xff]  ;;  %v1869_v18 = vpop.xlane.xlu1 %1868 }
 0x3c6   : > { %v4925_v55 = vpop.eup %4924  ;;  %4950 = vpow2.f32 %v11829_v40  ;;  %v2488_v3 = vsub.f32 %v6494_v20, %v8744_v19  ;;  %2880 = vst.msk [vmem:[#allocation2 + $0x180] sm:$0xff] %vm11100_vm3, %v8880_v2  ;;  %v2721_v56 = vadd.f32 %v2657_v52, %v2401_v48  ;;  %v2722_v59 = vadd.f32 %v2658_v25, %v2402_v43  ;;  %v1872_v11 = vpop.xlane.xlu0 %1871  ;;  %v2151_v52 = vld [vmem:[#allocation3 + $0xc0] sm:$0xff]  ;;  %v11831_v25 = vld [vmem:[#allocation164_spill] sm:$0xff] }
 0x3c7   : > { %v4927_v60 = vpop.eup %4926  ;;  %4952 = vpow2.f32 %v11830_v51  ;;  %v8897_v45 = vmul.f32 1.442695, %v2231_v29  ;;  %v8900_v0 = vmul.f32 1.442695, %v2487_v50  ;;  %v2233_v19 = vsub.f32 %v8735_v53, %v8756_v5  ;;  %v11832_v53 = vld [vmem:[#allocation158_spill] sm:$0xff] }
 0x3c8   : > { %v4929_v15 = vpop.eup %4928  ;;  %4954 = vpow2.f32 %v8694_v54  ;;  %v8906_v61 = vmax.f32 %v8887_v39, %v6494_v20  ;;  %2786 = vst.msk [vmem:[#allocation3 + $0x90] sm:$0xff] %vm11100_vm3, %v2721_v56  ;;  %2787 = vst.msk [vmem:[#allocation3 + $0x98] sm:$0xff] %vm11100_vm3, %v2722_v59  ;;  %v2659_v43 = vmul.f32 %v4915_v7, %v1869_v18  ;;  %v2660_v29 = vmul.f32 %v4919_v13, %v1872_v11  ;;  %v8911_v54 = vld [vmem:[#allocation2 + $0x190] sm:$0xff]  ;;  %v8923_v59 = vld [vmem:[#allocation2 + $0x198] sm:$0xff] }
 0x3c9   : > { %v4931_v48 = vpop.eup %4930  ;;  %v2405_v6 = vmul.f32 %v4921_v4, %v2149_v27  ;;  %4956 = vpow2.f32 %v11831_v25  ;;  %v2406_v44 = vmul.f32 %v4925_v55, %v2150_v47  ;;  %v8914_v40 = vmul.f32 1.442695, %v2232_v63  ;;  %v2152_v4 = vld [vmem:[#allocation3 + $0xc8] sm:$0xff]  ;;  %v1875_v47 = vpop.xlane.xlu1 %1874  ;;  %v2153_v11 = vld [vmem:[#allocation3 + $0xd0] sm:$0xff]  ;;  %v8949_v25 = vld [vmem:[#allocation2 + $0x1a0] sm:$0xff] }
 0x3ca   : > { %v4933_v50 = vpop.eup %4932  ;;  %4958 = vpow2.f32 %v11832_v53  ;;  %v8916_v51 = vmul.f32 1.442695, %v2488_v3  ;;  %2881 = vst.msk [vmem:[#allocation2 + $0x188] sm:$0xff] %vm11100_vm3, %v8906_v61  ;;  %v2723_v7 = vadd.f32 %v2659_v43, %v2403_v12  ;;  %v2724_v13 = vadd.f32 %v2660_v29, %v2404_v8  ;;  %v1878_v63 = vpop.xlane.xlu0 %1877 }
 0x3cb   : > { %v4935_v56 = vpop.eup %4934  ;;  %4960 = vpow2.f32 %v8726_v34  ;;  %v2489_v27 = vsub.f32 %v6494_v20, %v8756_v5  ;;  %v2407_v18 = vmul.f32 %v4929_v15, %v2151_v52  ;;  %v8926_v3 = vmul.f32 1.442695, %v2233_v19  ;;  %v2154_v52 = vld [vmem:[#allocation3 + $0xd8] sm:$0xff] }
 0x3cc   : > { %v4937_v55 = vpop.eup %4936  ;;  %4962 = vpow2.f32 %v8728_v24  ;;  %v8930_v12 = vmax.f32 %v8911_v54, %v6494_v20  ;;  %2788 = vst.msk [vmem:[#allocation3 + $0xa0] sm:$0xff] %vm11100_vm3, %v2723_v7  ;;  %2789 = vst.msk [vmem:[#allocation3 + $0xa8] sm:$0xff] %vm11100_vm3, %v2724_v13  ;;  %v2661_v34 = vmul.f32 %v4923_v46, %v1875_v47  ;;  %v2662_v5 = vmul.f32 %v4927_v60, %v1878_v63 }
 0x3cd   : > { %v4939_v8 = vpop.eup %4938  ;;  %4964 = vpow2.f32 %v8738_v35  ;;  %v2234_v15 = vsub.f32 %v8763_v22, %v8780_v32  ;;  %v2408_v19 = vmul.f32 %v4933_v50, %v2152_v4  ;;  %v2490_v43 = vsub.f32 %v6494_v20, %v8780_v32  ;;  %v1881_v50 = vpop.xlane.xlu1 %1880  ;;  %v2155_v4 = vld [vmem:[#allocation3 + $0xe0] sm:$0xff] }
 0x3ce   : > { %v4941_v24 = vpop.eup %4940  ;;  %4966 = vpow2.f32 %v8761_v36  ;;  %2882 = vst.msk [vmem:[#allocation2 + $0x190] sm:$0xff] %vm11100_vm3, %v8930_v12  ;;  %v8944_v46 = vmax.f32 %v8923_v59, %v6494_v20  ;;  %v2725_v29 = vadd.f32 %v2661_v34, %v2405_v6  ;;  %v2726_v35 = vadd.f32 %v2662_v5, %v2406_v44  ;;  %v1884_v32 = vpop.xlane.xlu0 %1883 }
 0x3cf   : > { %v4943_v60 = vpop.eup %4942  ;;  %4968 = vpow2.f32 %v8766_v1  ;;  %v8947_v22 = vmul.f32 1.442695, %v2489_v27  ;;  %v2409_v53 = vmul.f32 %v4937_v55, %v2153_v11  ;;  %v2235_v7 = vsub.f32 %v8787_v16, %v8804_v62 }
 0x3d0   : > { %v4945_v36 = vpop.eup %4944  ;;  %4970 = vpow2.f32 %v8774_v26  ;;  %v2491_v6 = vsub.f32 %v6494_v20, %v8804_v62  ;;  %2883 = vst.msk [vmem:[#allocation2 + $0x198] sm:$0xff] %vm11100_vm3, %v8944_v46  ;;  %2790 = vst.msk [vmem:[#allocation3 + $0xb0] sm:$0xff] %vm11100_vm3, %v2725_v29  ;;  %v2663_v44 = vmul.f32 %v4931_v48, %v1881_v50  ;;  %v2664_v13 = vmul.f32 %v4935_v56, %v1884_v32  ;;  %v2156_v48 = vld [vmem:[#allocation3 + $0xe8] sm:$0xff]  ;;  %v8987_v29 = vld [vmem:[#allocation2 + $0x1b0] sm:$0xff] }
 0x3d1   : > { %v4947_v1 = vpop.eup %4946  ;;  %2791 = vst.msk [vmem:[#allocation3 + $0xb8] sm:$0xff] %vm11100_vm3, %v2726_v35  ;;  %4972 = vpow2.f32 %v8776_v41  ;;  %v8961_v26 = vmul.f32 1.442695, %v2234_v15  ;;  %v2410_v16 = vmul.f32 %v4941_v24, %v2154_v52  ;;  %v8964_v62 = vmul.f32 1.442695, %v2490_v43  ;;  %v8973_v56 = vld [vmem:[#allocation2 + $0x1a8] sm:$0xff]  ;;  %v1887_v11 = vpop.xlane.xlu1 %1886 }
 0x3d2   : > { %v4949_v27 = vpop.eup %4948  ;;  %4974 = vpow2.f32 %v8795_v10  ;;  %v8968_v55 = vmax.f32 %v8949_v25, %v6494_v20  ;;  %v2727_v63 = vadd.f32 %v2663_v44, %v2407_v18  ;;  %v2728_v34 = vadd.f32 %v2664_v13, %v2408_v19  ;;  %v1890_v10 = vpop.xlane.xlu0 %1889  ;;  %v2157_v19 = vld [vmem:[#allocation3 + $0xf0] sm:$0xff] }
 0x3d3   : > { %v4951_v47 = vpop.eup %4950  ;;  %4976 = vpow2.f32 %v8809_v30  ;;  %v2236_v41 = vsub.f32 %v8797_v37, %v8820_v49  ;;  %v2411_v15 = vmul.f32 %v4945_v36, %v2155_v4  ;;  %v8976_v24 = vmul.f32 1.442695, %v2235_v7 }
 0x3d4   : > { %v4953_v5 = vpop.eup %4952  ;;  %4978 = vpow2.f32 %v8812_v31  ;;  %v8978_v43 = vmul.f32 1.442695, %v2491_v6  ;;  %2884 = vst.msk [vmem:[#allocation2 + $0x1a0] sm:$0xff] %vm11100_vm3, %v8968_v55  ;;  %2792 = vst.msk [vmem:[#allocation3 + $0xc0] sm:$0xff] %vm11100_vm3, %v2727_v63  ;;  %v2665_v37 = vmul.f32 %v4939_v8, %v1887_v11  ;;  %v2666_v30 = vmul.f32 %v4943_v60, %v1890_v10 }
 0x3d5   : > { %v4955_v18 = vpop.eup %4954  ;;  %2793 = vst.msk [vmem:[#allocation3 + $0xc8] sm:$0xff] %vm11100_vm3, %v2728_v34  ;;  %4980 = vpow2.f32 %v8826_v33  ;;  %v2492_v31 = vsub.f32 %v6494_v20, %v8820_v49  ;;  %v2412_v52 = vmul.f32 %v4949_v27, %v2156_v48  ;;  %v2237_v36 = vsub.f32 %v8823_v38, %v8844_v9  ;;  %v2158_v33 = vld [vmem:[#allocation3 + $0xf8] sm:$0xff]  ;;  %v1893_v6 = vpop.xlane.xlu1 %1892  ;;  %v2159_v27 = vld [vmem:[#allocation3 + $0x100] sm:$0xff] }
 0x3d6   : > { %v4957_v35 = vpop.eup %4956  ;;  %4982 = vpow2.f32 %v8838_v42  ;;  %v8994_v50 = vmax.f32 %v8973_v56, %v6494_v20  ;;  %v2729_v60 = vadd.f32 %v2665_v37, %v2409_v53  ;;  %v2730_v32 = vadd.f32 %v2666_v30, %v2410_v16  ;;  %v1896_v44 = vpop.xlane.xlu0 %1895 }
 0x3d7   : > { %v4959_v8 = vpop.eup %4958  ;;  %4984 = vpow2.f32 %v8850_v28  ;;  %v8997_v49 = vmul.f32 1.442695, %v2236_v41  ;;  %v2413_v13 = vmul.f32 %v4953_v5, %v2157_v19  ;;  %v2493_v38 = vsub.f32 %v6494_v20, %v8844_v9  ;;  %v9013_v9 = vld [vmem:[#allocation2 + $0x1b8] sm:$0xff] }
 0x3d8   : > { %v4961_v7 = vpop.eup %4960  ;;  %4986 = vpow2.f32 %v8852_v58  ;;  %2885 = vst.msk [vmem:[#allocation2 + $0x1a8] sm:$0xff] %vm11100_vm3, %v8994_v50  ;;  %v9006_v42 = vmax.f32 %v8987_v29, %v6494_v20  ;;  %2794 = vst.msk [vmem:[#allocation3 + $0xd0] sm:$0xff] %vm11100_vm3, %v2729_v60  ;;  %v2667_v28 = vmul.f32 %v4947_v1, %v1893_v6  ;;  %v2668_v4 = vmul.f32 %v4951_v47, %v1896_v44 }
 0x3d9   : > { %v4963_v53 = vpop.eup %4962  ;;  %2795 = vst.msk [vmem:[#allocation3 + $0xd8] sm:$0xff] %vm11100_vm3, %v2730_v32  ;;  %4988 = vpow2.f32 %v8864_v57  ;;  %v9011_v58 = vmul.f32 1.442695, %v2492_v31  ;;  %v2414_v63 = vmul.f32 %v4957_v35, %v2158_v33  ;;  %v9016_v34 = vmul.f32 1.442695, %v2237_v36  ;;  %v2160_v57 = vld [vmem:[#allocation3 + $0x108] sm:$0xff]  ;;  %v1899_v10 = vpop.xlane.xlu1 %1898 }
 0x3da   : > { %v4965_v16 = vpop.eup %4964  ;;  %4990 = vpow2.f32 %v8885_v23  ;;  %v2238_v48 = vsub.f32 %v8847_v17, %v8868_v14  ;;  %2886 = vst.msk [vmem:[#allocation2 + $0x1b0] sm:$0xff] %vm11100_vm3, %v9006_v42  ;;  %v2731_v47 = vadd.f32 %v2667_v28, %v2411_v15  ;;  %v2732_v41 = vadd.f32 %v2668_v4, %v2412_v52  ;;  %v1902_v23 = vpop.xlane.xlu0 %1901  ;;  %v2162_v32 = vld [vmem:[#allocation3 + $0x118] sm:$0xff]  ;;  %v9049_v33 = vld [vmem:[#allocation2 + $0x1c8] sm:$0xff] }
 0x3db   : > { %v4967_v1 = vpop.eup %4966  ;;  %4992 = vpow2.f32 %v8897_v45  ;;  %v2494_v5 = vsub.f32 %v6494_v20, %v8868_v14  ;;  %v2415_v37 = vmul.f32 %v4961_v7, %v2159_v27  ;;  %v9026_v30 = vmul.f32 1.442695, %v2493_v38  ;;  %v2161_v14 = vld [vmem:[#allocation3 + $0x110] sm:$0xff]  ;;  %v2163_v38 = vld [vmem:[#allocation3 + $0x120] sm:$0xff] }
 0x3dc   : > { %v4969_v11 = vpop.eup %4968  ;;  %4994 = vpow2.f32 %v8900_v0  ;;  %v9030_v17 = vmax.f32 %v9013_v9, %v6494_v20  ;;  %2796 = vst.msk [vmem:[#allocation3 + $0xe0] sm:$0xff] %vm11100_vm3, %v2731_v47  ;;  %2797 = vst.msk [vmem:[#allocation3 + $0xe8] sm:$0xff] %vm11100_vm3, %v2732_v41  ;;  %v2669_v45 = vmul.f32 %v4955_v18, %v1899_v10  ;;  %v2670_v19 = vmul.f32 %v4959_v8, %v1902_v23  ;;  %v9037_v0 = vld [vmem:[#allocation2 + $0x1c0] sm:$0xff]  ;;  %v2164_v10 = vld [vmem:[#allocation3 + $0x128] sm:$0xff] }
 0x3dd   : > { %v4971_v15 = vpop.eup %4970  ;;  %4996 = vpow2.f32 %v8914_v40  ;;  %v2239_v31 = vsub.f32 %v8861_v21, %v8880_v2  ;;  %v2416_v52 = vmul.f32 %v4965_v16, %v2160_v57  ;;  %v9040_v36 = vmul.f32 1.442695, %v2238_v48  ;;  %v9076_v57 = vld [vmem:[#allocation2 + $0x1d8] sm:$0xff] }
 0x3de   : > { %v4973_v35 = vpop.eup %4972  ;;  %4998 = vpow2.f32 %v8916_v51  ;;  %v2495_v60 = vsub.f32 %v6494_v20, %v8880_v2  ;;  %2887 = vst.msk [vmem:[#allocation2 + $0x1b8] sm:$0xff] %vm11100_vm3, %v9030_v17  ;;  %v2733_v8 = vadd.f32 %v2669_v45, %v2413_v13  ;;  %v2734_v40 = vadd.f32 %v2670_v19, %v2414_v63  ;;  %v1905_v51 = vpop.xlane.xlu1 %1904 }
 0x3df   : > { %v4975_v18 = vpop.eup %4974  ;;  %5000 = vpow2.f32 %v8926_v3  ;;  %v9047_v21 = vmul.f32 1.442695, %v2494_v5  ;;  %v1908_v6 = vpop.xlane.xlu0 %1907  ;;  %v2417_v44 = vmul.f32 %v4969_v11, %v2161_v14  ;;  %v2240_v2 = vsub.f32 %v8887_v39, %v8906_v61 }
 0x3e0   : > { %v4977_v7 = vpop.eup %4976  ;;  %5002 = vpow2.f32 %v8961_v26  ;;  %v9056_v13 = vmax.f32 %v9037_v0, %v6494_v20  ;;  %2798 = vst.msk [vmem:[#allocation3 + $0xf0] sm:$0xff] %vm11100_vm3, %v2733_v8  ;;  %2799 = vst.msk [vmem:[#allocation3 + $0xf8] sm:$0xff] %vm11100_vm3, %v2734_v40  ;;  %v2671_v3 = vmul.f32 %v4963_v53, %v1905_v51  ;;  %v2672_v4 = vmul.f32 %v4967_v1, %v1908_v6  ;;  %v2166_v8 = vld [vmem:[#allocation3 + $0x138] sm:$0xff] }
 0x3e1   : > { %v4979_v28 = vpop.eup %4978  ;;  %v9060_v27 = vmul.f32 1.442695, %v2239_v31  ;;  %v2496_v16 = vsub.f32 %v6494_v20, %v8906_v61  ;;  %v2418_v63 = vmul.f32 %v4973_v35, %v2162_v32  ;;  %5004 = vpow2.f32 %v8947_v22  ;;  %v9074_v61 = vld [vmem:[#allocation2 + $0x1d0] sm:$0xff] }
 0x3e2   : > { %v4981_v26 = vpop.eup %4980  ;;  %v9065_v39 = vmul.f32 1.442695, %v2495_v60  ;;  %2888 = vst.msk [vmem:[#allocation2 + $0x1c0] sm:$0xff] %vm11100_vm3, %v9056_v13  ;;  %v9071_v48 = vmax.f32 %v9049_v33, %v6494_v20  ;;  %v2735_v1 = vadd.f32 %v2671_v3, %v2415_v37  ;;  %v2736_v47 = vadd.f32 %v2672_v4, %v2416_v52  ;;  %v1911_v5 = vpop.xlane.xlu1 %1910  ;;  %v2165_v31 = vld [vmem:[#allocation3 + $0x130] sm:$0xff]  ;;  %v9118_v3 = vld [vmem:[#allocation2 + $0x1e8] sm:$0xff] }
 0x3e3   : > { %v4983_v53 = vpop.eup %4982  ;;  %v2419_v41 = vmul.f32 %v4977_v7, %v2163_v38  ;;  %5006 = vpow2.f32 %v8964_v62  ;;  %v1914_v11 = vpop.xlane.xlu0 %1913  ;;  %v9079_v23 = vmul.f32 1.442695, %v2240_v2  ;;  %v2241_v45 = vsub.f32 %v8911_v54, %v8930_v12  ;;  %v9116_v2 = vld [vmem:[#allocation2 + $0x1e0] sm:$0xff] }
 0x3e4   : > { %v4985_v22 = vpop.eup %4984  ;;  %5008 = vpow2.f32 %v8976_v24  ;;  %v2497_v37 = vsub.f32 %v6494_v20, %v8930_v12  ;;  %2889 = vst.msk [vmem:[#allocation2 + $0x1c8] sm:$0xff] %vm11100_vm3, %v9071_v48  ;;  %2800 = vst.msk [vmem:[#allocation3 + $0x100] sm:$0xff] %vm11100_vm3, %v2735_v1  ;;  %v2673_v19 = vmul.f32 %v4971_v15, %v1911_v5  ;;  %v2674_v14 = vmul.f32 %v4975_v18, %v1914_v11 }
 0x3e5   : > { %v4987_v62 = vpop.eup %4986  ;;  %2801 = vst.msk [vmem:[#allocation3 + $0x108] sm:$0xff] %vm11100_vm3, %v2736_v47  ;;  %5010 = vpow2.f32 %v8978_v43  ;;  %v9090_v24 = vmul.f32 1.442695, %v2496_v16  ;;  %v2242_v54 = vsub.f32 %v8923_v59, %v8944_v46  ;;  %v9097_v12 = vmax.f32 %v9074_v61, %v6494_v20  ;;  %v2167_v59 = vld [vmem:[#allocation3 + $0x140] sm:$0xff] }
 0x3e6   : > { %v4989_v35 = vpop.eup %4988  ;;  %5012 = vpow2.f32 %v8997_v49  ;;  %v9101_v52 = vmax.f32 %v9076_v57, %v6494_v20  ;;  %v2737_v60 = vadd.f32 %v2673_v19, %v2417_v44  ;;  %v2738_v18 = vadd.f32 %v2674_v14, %v2418_v63  ;;  %v1917_v49 = vpop.xlane.xlu1 %1916 }
 0x3e7   : > { %v4991_v15 = vpop.eup %4990  ;;  %v2420_v43 = vmul.f32 %v4981_v26, %v2164_v10  ;;  %5014 = vpow2.f32 %v9011_v58  ;;  %v1920_v32 = vpop.xlane.xlu0 %1919  ;;  %v2421_v7 = vmul.f32 %v4985_v22, %v2165_v31  ;;  %v2355_v51 = vmul.f32 1.442695, %v2241_v45  ;;  %2890 = vst.msk [vmem:[#allocation2 + $0x1d0] sm:$0xff] %vm11100_vm3, %v9097_v12  ;;  %v2169_v45 = vld [vmem:[#allocation3 + $0x150] sm:$0xff] }
 0x3e8   : > { %v4993_v40 = vpop.eup %4992  ;;  %5016 = vpow2.f32 %v9016_v34  ;;  %v9105_v6 = vmul.f32 1.442695, %v2497_v37  ;;  %2891 = vst.msk [vmem:[#allocation2 + $0x1d8] sm:$0xff] %vm11100_vm3, %v9101_v52  ;;  %2802 = vst.msk [vmem:[#allocation3 + $0x110] sm:$0xff] %vm11100_vm3, %v2737_v60  ;;  %v2675_v58 = vmul.f32 %v4979_v28, %v1917_v49  ;;  %v2676_v38 = vmul.f32 %v4983_v53, %v1920_v32 }
 0x3e9   : > { %v4995_v44 = vpop.eup %4994  ;;  %2803 = vst.msk [vmem:[#allocation3 + $0x118] sm:$0xff] %vm11100_vm3, %v2738_v18  ;;  %5018 = vpow2.f32 %v9026_v30  ;;  %v2498_v34 = vsub.f32 %v6494_v20, %v8944_v46  ;;  %v2422_v16 = vmul.f32 %v4989_v35, %v2166_v8  ;;  %v2357_v26 = vmul.f32 1.442695, %v2242_v54  ;;  %v2168_v30 = vld [vmem:[#allocation3 + $0x148] sm:$0xff] }
 0x3ea   : > { %v4997_v4 = vpop.eup %4996  ;;  %5020 = vpow2.f32 %v9040_v36  ;;  %v2243_v63 = vsub.f32 %v8949_v25, %v8968_v55  ;;  %v2739_v28 = vadd.f32 %v2675_v58, %v2419_v41  ;;  %v2740_v53 = vadd.f32 %v2676_v38, %v2420_v43  ;;  %v1923_v22 = vpop.xlane.xlu1 %1922 }
 0x3eb   : > { %v4999_v1 = vpop.eup %4998  ;;  %v2423_v47 = vmul.f32 %v4993_v40, %v2167_v59  ;;  %5022 = vpow2.f32 %v9047_v21  ;;  %v1926_v5 = vpop.xlane.xlu0 %1925  ;;  %v2499_v11 = vsub.f32 %v6494_v20, %v8968_v55  ;;  %v9129_v36 = vmax.f32 %v9116_v2, %v6494_v20 }
 0x3ec   : > { %v5001_v46 = vpop.eup %5000  ;;  %5024 = vpow2.f32 %v9060_v27  ;;  %v9133_v25 = vmax.f32 %v9118_v3, %v6494_v20  ;;  %2804 = vst.msk [vmem:[#allocation3 + $0x120] sm:$0xff] %vm11100_vm3, %v2739_v28  ;;  %2805 = vst.msk [vmem:[#allocation3 + $0x128] sm:$0xff] %vm11100_vm3, %v2740_v53  ;;  %v2677_v21 = vmul.f32 %v4987_v62, %v1923_v22  ;;  %v2678_v10 = vmul.f32 %v4991_v15, %v1926_v5  ;;  %v2170_v27 = vld [vmem:[#allocation3 + $0x158] sm:$0xff]  ;;  %v9145_v62 = vld [vmem:[#allocation2 + $0x1f0] sm:$0xff] }
 0x3ed   : > { %v5003_v41 = vpop.eup %5002  ;;  %5026 = vpow2.f32 %v9065_v39  ;;  %v2613_v55 = vmul.f32 1.442695, %v2498_v34  ;;  %v2424_v37 = vmul.f32 %v4997_v4, %v2168_v30  ;;  %v2359_v19 = vmul.f32 1.442695, %v2243_v63  ;;  %2892 = vst.msk [vmem:[#allocation2 + $0x1e0] sm:$0xff] %vm11100_vm3, %v9129_v36 }
 0x3ee   : > { %5028 = vpow2.f32 %v9079_v23  ;;  %v2244_v14 = vsub.f32 %v8973_v56, %v8994_v50  ;;  %2893 = vst.msk [vmem:[#allocation2 + $0x1e8] sm:$0xff] %vm11100_vm3, %v9133_v25  ;;  %v5005_v31 = vpop.eup %5004  ;;  %v2741_v35 = vadd.f32 %v2677_v21, %v2421_v7  ;;  %v2742_v54 = vadd.f32 %v2678_v10, %v2422_v16  ;;  %v9150_v23 = vld [vmem:[#allocation2 + $0x1f8] sm:$0xff]  ;;  %v1929_v56 = vpop.xlane.xlu1 %1928  ;;  %v2172_v16 = vld [vmem:[#allocation3 + $0x168] sm:$0xff]  ;;  %v2173_v10 = vld [vmem:[#allocation3 + $0x170] sm:$0xff] }
 0x3ef   : > { %5030 = vpow2.f32 %v9090_v24  ;;  %v2500_v39 = vsub.f32 %v6494_v20, %v8994_v50  ;;  %v1932_v60 = vpop.xlane.xlu0 %1931  ;;  %v2425_v18 = vmul.f32 %v5001_v46, %v2169_v45  ;;  %v2426_v43 = vmul.f32 %v5003_v41, %v2170_v27  ;;  %v2171_v24 = vld [vmem:[#allocation3 + $0x160] sm:$0xff] }
 0x3f0   : > { %v5007_v15 = vpop.eup %5006  ;;  %5032 = vpow2.f32 %v2355_v51  ;;  %v2615_v8 = vmul.f32 1.442695, %v2499_v11  ;;  %2806 = vst.msk [vmem:[#allocation3 + $0x130] sm:$0xff] %vm11100_vm3, %v2741_v35  ;;  %2807 = vst.msk [vmem:[#allocation3 + $0x138] sm:$0xff] %vm11100_vm3, %v2742_v54  ;;  %v2679_v49 = vmul.f32 %v4995_v44, %v1929_v56  ;;  %v2680_v32 = vmul.f32 %v4999_v1, %v1932_v60 }
 0x3f1   : > { %v5009_v40 = vpop.eup %5008  ;;  %v2245_v50 = vsub.f32 %v8987_v29, %v9006_v42  ;;  %v9158_v7 = vmax.f32 %v9145_v62, %v6494_v20  ;;  %5034 = vpow2.f32 %v9105_v6  ;;  %v2361_v51 = vmul.f32 1.442695, %v2244_v14 }
 0x3f2   : > { %v5011_v59 = vpop.eup %5010  ;;  %v2501_v58 = vsub.f32 %v6494_v20, %v9006_v42  ;;  %v9165_v38 = vmax.f32 %v9150_v23, %v6494_v20  ;;  %v2743_v34 = vadd.f32 %v2679_v49, %v2423_v47  ;;  %v2744_v4 = vadd.f32 %v2680_v32, %v2424_v37  ;;  %v1935_v1 = vpop.xlane.xlu1 %1934 }
 0x3f3   : > { %v5013_v44 = vpop.eup %5012  ;;  %5036 = vpow2.f32 %v2357_v26  ;;  %v2617_v29 = vmul.f32 1.442695, %v2500_v39  ;;  %2894 = vst.msk [vmem:[#allocation2 + $0x1f0] sm:$0xff] %vm11100_vm3, %v9158_v7  ;;  %v1938_v6 = vpop.xlane.xlu0 %1937  ;;  %v2427_v28 = vmul.f32 %v5009_v40, %v2171_v24  ;;  %v2246_v42 = vsub.f32 %v9013_v9, %v9030_v17  ;;  %v2174_v39 = vld [vmem:[#allocation3 + $0x178] sm:$0xff]  ;;  %v2175_v40 = vld [vmem:[#allocation3 + $0x180] sm:$0xff] }
 0x3f4   : > { %v5015_v63 = vpop.eup %5014  ;;  %5038 = vpow2.f32 %v2613_v55  ;;  %v2502_v53 = vsub.f32 %v6494_v20, %v9030_v17  ;;  %2895 = vst.msk [vmem:[#allocation2 + $0x1f8] sm:$0xff] %vm11100_vm3, %v9165_v38  ;;  %2808 = vst.msk [vmem:[#allocation3 + $0x140] sm:$0xff] %vm11100_vm3, %v2743_v34  ;;  %v2681_v26 = vmul.f32 %v5005_v31, %v1935_v1  ;;  %v2682_v30 = vmul.f32 %v5007_v15, %v1938_v6 }
 0x3f5   : > { %v5017_v47 = vpop.eup %5016  ;;  %2809 = vst.msk [vmem:[#allocation3 + $0x148] sm:$0xff] %vm11100_vm3, %v2744_v4  ;;  %5040 = vpow2.f32 %v2359_v19  ;;  %v2363_v46 = vmul.f32 1.442695, %v2245_v50  ;;  %v2428_v5 = vmul.f32 %v5013_v44, %v2172_v16  ;;  %v2619_v11 = vmul.f32 1.442695, %v2501_v58  ;;  %v2176_v4 = vld [vmem:[#allocation3 + $0x188] sm:$0xff] }
 0x3f6   : > { %v5019_v22 = vpop.eup %5018  ;;  %5042 = vpow2.f32 %v2615_v8  ;;  %v2247_v9 = vsub.f32 %v9037_v0, %v9056_v13  ;;  %v2745_v41 = vadd.f32 %v2681_v26, %v2425_v18  ;;  %v2746_v21 = vadd.f32 %v2682_v30, %v2426_v43  ;;  %v1941_v55 = vpop.xlane.xlu1 %1940 }
 0x3f7   : > { %v5021_v17 = vpop.eup %5020  ;;  %5044 = vpow2.f32 %v2361_v51  ;;  %v2503_v45 = vsub.f32 %v6494_v20, %v9056_v13  ;;  %v1944_v37 = vpop.xlane.xlu0 %1943  ;;  %v2365_v19 = vmul.f32 1.442695, %v2246_v42  ;;  %v2621_v14 = vmul.f32 1.442695, %v2502_v53 }
 0x3f8   : > { %v5023_v27 = vpop.eup %5022  ;;  %5046 = vpow2.f32 %v2617_v29  ;;  %v2248_v31 = vsub.f32 %v9049_v33, %v9071_v48  ;;  %2810 = vst.msk [vmem:[#allocation3 + $0x150] sm:$0xff] %vm11100_vm3, %v2745_v41  ;;  %2811 = vst.msk [vmem:[#allocation3 + $0x158] sm:$0xff] %vm11100_vm3, %v2746_v21  ;;  %v2683_v0 = vmul.f32 %v5011_v59, %v1941_v55  ;;  %v2684_v54 = vmul.f32 %v5015_v63, %v1944_v37 }
 0x3f9   : > { %v5025_v35 = vpop.eup %5024  ;;  %5048 = vpow2.f32 %v2363_v46  ;;  %v2504_v13 = vsub.f32 %v6494_v20, %v9071_v48  ;;  %v2429_v56 = vmul.f32 %v5017_v47, %v2173_v10  ;;  %v2367_v60 = vmul.f32 1.442695, %v2247_v9  ;;  %v2178_v9 = vld [vmem:[#allocation3 + $0x198] sm:$0xff] }
 0x3fa   : > { %v5027_v15 = vpop.eup %5026  ;;  %5050 = vpow2.f32 %v2619_v11  ;;  %v2249_v18 = vsub.f32 %v9074_v61, %v9097_v12  ;;  %v2747_v43 = vadd.f32 %v2683_v0, %v2427_v28  ;;  %v2748_v8 = vadd.f32 %v2684_v54, %v2428_v5  ;;  %v1947_v50 = vpop.xlane.xlu1 %1946 }
 0x3fb   : > { %v5029_v33 = vpop.eup %5028  ;;  %v2623_v49 = vmul.f32 1.442695, %v2503_v45  ;;  %v2505_v32 = vsub.f32 %v6494_v20, %v9097_v12  ;;  %v2430_v59 = vmul.f32 %v5021_v17, %v2174_v39  ;;  %v1950_v51 = vpop.xlane.xlu0 %1949  ;;  %5052 = vpow2.f32 %v2365_v19 }
 0x3fc   : > { %v5031_v24 = vpop.eup %5030  ;;  %v2369_v48 = vmul.f32 1.442695, %v2248_v31  ;;  %v2250_v58 = vsub.f32 %v9076_v57, %v9101_v52  ;;  %2812 = vst.msk [vmem:[#allocation3 + $0x160] sm:$0xff] %vm11100_vm3, %v2747_v43  ;;  %2813 = vst.msk [vmem:[#allocation3 + $0x168] sm:$0xff] %vm11100_vm3, %v2748_v8  ;;  %v2685_v61 = vmul.f32 %v5019_v22, %v1947_v50  ;;  %v2686_v34 = vmul.f32 %v5023_v27, %v1950_v51  ;;  %v2177_v57 = vld [vmem:[#allocation3 + $0x190] sm:$0xff] }
 0x3fd   : > { %v5033_v44 = vpop.eup %5032  ;;  %5054 = vpow2.f32 %v2621_v14  ;;  %v2625_v16 = vmul.f32 1.442695, %v2504_v13  ;;  %v2431_v12 = vmul.f32 %v5025_v35, %v2175_v40  ;;  %v2371_v29 = vmul.f32 1.442695, %v2249_v18  ;;  %v2179_v13 = vld [vmem:[#allocation3 + $0x1a0] sm:$0xff] }
 0x3fe   : > { %5056 = vpow2.f32 %v2367_v60  ;;  %v2506_v63 = vsub.f32 %v6494_v20, %v9101_v52  ;;  %v5035_v1 = vpop.eup %5034  ;;  %v2749_v6 = vadd.f32 %v2685_v61, %v2429_v56  ;;  %v2750_v28 = vadd.f32 %v2686_v34, %v2430_v59  ;;  %v1953_v47 = vpop.xlane.xlu1 %1952  ;;  %v2182_v34 = vld [vmem:[#allocation3 + $0x1b8] sm:$0xff] }
 0x3ff   : > { %5058 = vpow2.f32 %v2623_v49  ;;  %v2627_v42 = vmul.f32 1.442695, %v2505_v32  ;;  %v2432_v26 = vmul.f32 %v5029_v33, %v2176_v4  ;;  %v1956_v30 = vpop.xlane.xlu0 %1955  ;;  %v2373_v46 = vmul.f32 1.442695, %v2250_v58  ;;  %v2181_v58 = vld [vmem:[#allocation3 + $0x1b0] sm:$0xff] }
 0x400   : > { %v5037_v53 = vpop.eup %5036  ;;  %5060 = vpow2.f32 %v2369_v48  ;;  %v2251_v22 = vsub.f32 %v9116_v2, %v9129_v36  ;;  %2814 = vst.msk [vmem:[#allocation3 + $0x170] sm:$0xff] %vm11100_vm3, %v2749_v6  ;;  %2815 = vst.msk [vmem:[#allocation3 + $0x178] sm:$0xff] %vm11100_vm3, %v2750_v28  ;;  %v2687_v52 = vmul.f32 %v5027_v15, %v1953_v47  ;;  %v2688_v11 = vmul.f32 %v5031_v24, %v1956_v30  ;;  %v2180_v15 = vld [vmem:[#allocation3 + $0x1a8] sm:$0xff] }
 0x401   : > { %v5039_v5 = vpop.eup %5038  ;;  %5062 = vpow2.f32 %v2625_v16  ;;  %v2252_v17 = vsub.f32 %v9118_v3, %v9133_v25  ;;  %v2433_v21 = vmul.f32 %v5033_v44, %v2177_v57  ;;  %v2629_v10 = vmul.f32 1.442695, %v2506_v63  ;;  %v2184_v30 = vld [vmem:[#allocation3 + $0x1c8] sm:$0xff] }
 0x402   : > { %v5041_v41 = vpop.eup %5040  ;;  %5064 = vpow2.f32 %v2371_v29  ;;  %v2507_v45 = vsub.f32 %v6494_v20, %v9129_v36  ;;  %v2751_v27 = vadd.f32 %v2687_v52, %v2431_v12  ;;  %v2752_v55 = vadd.f32 %v2688_v11, %v2432_v26  ;;  %v1959_v14 = vpop.xlane.xlu1 %1958  ;;  %v2183_v26 = vld [vmem:[#allocation3 + $0x1c0] sm:$0xff] }
 0x403   : > { %v5043_v2 = vpop.eup %5042  ;;  %5066 = vpow2.f32 %v2627_v42  ;;  %v2508_v37 = vsub.f32 %v6494_v20, %v9133_v25  ;;  %v2434_v31 = vmul.f32 %v5037_v53, %v2178_v9  ;;  %v1962_v35 = vpop.xlane.xlu0 %1961  ;;  %v2375_v3 = vmul.f32 1.442695, %v2251_v22 }
 0x404   : > { %v5045_v19 = vpop.eup %5044  ;;  %5068 = vpow2.f32 %v2373_v46  ;;  %v2253_v0 = vsub.f32 %v9145_v62, %v9158_v7  ;;  %2816 = vst.msk [vmem:[#allocation3 + $0x180] sm:$0xff] %vm11100_vm3, %v2751_v27  ;;  %2817 = vst.msk [vmem:[#allocation3 + $0x188] sm:$0xff] %vm11100_vm3, %v2752_v55  ;;  %v2689_v36 = vmul.f32 %v5035_v1, %v1959_v14  ;;  %v2690_v39 = vmul.f32 %v5039_v5, %v1962_v35  ;;  %v2186_v27 = vld [vmem:[#allocation3 + $0x1d8] sm:$0xff] }
 0x405   : > { %v5047_v54 = vpop.eup %5046  ;;  %v2377_v56 = vmul.f32 1.442695, %v2252_v17  ;;  %v2254_v25 = vsub.f32 %v9150_v23, %v9165_v38  ;;  %5070 = vpow2.f32 %v2629_v10  ;;  %v2631_v18 = vmul.f32 1.442695, %v2507_v45 }
 0x406   : > { %v5049_v60 = vpop.eup %5048  ;;  %v2509_v33 = vsub.f32 %v6494_v20, %v9158_v7  ;;  %v2753_v43 = vadd.f32 %v2689_v36, %v2433_v21  ;;  %v2754_v8 = vadd.f32 %v2690_v39, %v2434_v31  ;;  %v2633_v40 = vmul.f32 1.442695, %v2508_v37  ;;  %v1965_v24 = vpop.xlane.xlu1 %1964 }
 0x407   : > { %v5051_v62 = vpop.eup %5050  ;;  %v2510_v49 = vsub.f32 %v6494_v20, %v9165_v38  ;;  %v2435_v32 = vmul.f32 %v5041_v41, %v2179_v13  ;;  %v2436_v50 = vmul.f32 %v5045_v19, %v2180_v15  ;;  %v1968_v59 = vpop.xlane.xlu0 %1967  ;;  %5072 = vpow2.f32 %v2375_v3  ;;  %v2187_v13 = vld [vmem:[#allocation3 + $0x1e0] sm:$0xff]  ;;  %v2188_v15 = vld [vmem:[#allocation3 + $0x1e8] sm:$0xff] }
 0x408   : > { %v2379_v51 = vmul.f32 1.442695, %v2253_v0  ;;  %v5053_v23 = vpop.eup %5052  ;;  %2818 = vst.msk [vmem:[#allocation3 + $0x190] sm:$0xff] %vm11100_vm3, %v2753_v43  ;;  %2819 = vst.msk [vmem:[#allocation3 + $0x198] sm:$0xff] %vm11100_vm3, %v2754_v8  ;;  %v2691_v48 = vmul.f32 %v5043_v2, %v1965_v24  ;;  %v2692_v7 = vmul.f32 %v5047_v54, %v1968_v59  ;;  %5074 = vpow2.f32 %v2377_v56  ;;  %v2185_v2 = vld [vmem:[#allocation3 + $0x1d0] sm:$0xff]  ;;  %v2190_v59 = vld [vmem:[#allocation3 + $0x1f8] sm:$0xff] }
 0x409   : > { %v2381_v44 = vmul.f32 1.442695, %v2254_v25  ;;  %5076 = vpow2.f32 %v2631_v18  ;;  %v2635_v20 = vmul.f32 1.442695, %v2509_v33  ;;  %v2637_v12 = vmul.f32 1.442695, %v2510_v49 }
 0x40a   : > { %v5055_v61 = vpop.eup %5054  ;;  %v2755_v4 = vadd.f32 %v2691_v48, %v2435_v32  ;;  %v2756_v16 = vadd.f32 %v2692_v7, %v2436_v50  ;;  %5078 = vpow2.f32 %v2633_v40  ;;  %v2437_v63 = vmul.f32 %v5049_v60, %v2181_v58  ;;  %v1971_v1 = vpop.xlane.xlu1 %1970  ;;  %v2189_v50 = vld [vmem:[#allocation3 + $0x1f0] sm:$0xff] }
 0x40b   : > { %v5057_v38 = vpop.eup %5056  ;;  %v1974_v6 = vpop.xlane.xlu0 %1973  ;;  %5080 = vpow2.f32 %v2379_v51  ;;  %v2693_v57 = vmul.f32 %v5051_v62, %v1971_v1  ;;  %v2438_v42 = vmul.f32 %v5053_v23, %v2182_v34 }
 0x40c   : > { %v5059_v29 = vpop.eup %5058  ;;  %2820 = vst.msk [vmem:[#allocation3 + $0x1a0] sm:$0xff] %vm11100_vm3, %v2755_v4  ;;  %2821 = vst.msk [vmem:[#allocation3 + $0x1a8] sm:$0xff] %vm11100_vm3, %v2756_v16  ;;  %v2694_v53 = vmul.f32 %v5055_v61, %v1974_v6  ;;  %5082 = vpow2.f32 %v2381_v44  ;;  %v2439_v41 = vmul.f32 %v5057_v38, %v2183_v26 }
 0x40d   : > { %v5061_v28 = vpop.eup %5060  ;;  %5084 = vpow2.f32 %v2635_v20  ;;  %v2757_v22 = vadd.f32 %v2693_v57, %v2437_v63 }
 0x40e   : > { %v5063_v47 = vpop.eup %5062  ;;  %v2758_v5 = vadd.f32 %v2694_v53, %v2438_v42  ;;  %5086 = vpow2.f32 %v2637_v12  ;;  %v1977_v11 = vpop.xlane.xlu1 %1976  ;;  %v2440_v10 = vmul.f32 %v5061_v28, %v2184_v30 }
 0x40f   : > { %v5065_v46 = vpop.eup %5064  ;;  %v1980_v9 = vpop.xlane.xlu0 %1979  ;;  %2822 = vst.msk [vmem:[#allocation3 + $0x1b0] sm:$0xff] %vm11100_vm3, %v2757_v22  ;;  %v2695_v21 = vmul.f32 %v5059_v29, %v1977_v11 }
 0x410   : > { %v5067_v52 = vpop.eup %5066  ;;  %2823 = vst.msk [vmem:[#allocation3 + $0x1b8] sm:$0xff] %vm11100_vm3, %v2758_v5  ;;  %v2696_v45 = vmul.f32 %v5063_v47, %v1980_v9  ;;  %v2441_v3 = vmul.f32 %v5065_v46, %v2185_v2 }
 0x411   : > { %v5069_v17 = vpop.eup %5068  ;;  %v2759_v37 = vadd.f32 %v2695_v21, %v2439_v41 }
 0x412   : > { %v5071_v55 = vpop.eup %5070  ;;  %v2760_v19 = vadd.f32 %v2696_v45, %v2440_v10  ;;  %v1983_v14 = vpop.xlane.xlu1 %1982  ;;  %v2442_v54 = vmul.f32 %v5069_v17, %v2186_v27 }
 0x413   : > { %v1986_v31 = vpop.xlane.xlu0 %1985  ;;  %2824 = vst.msk [vmem:[#allocation3 + $0x1c0] sm:$0xff] %vm11100_vm3, %v2759_v37  ;;  %v2697_v0 = vmul.f32 %v5067_v52, %v1983_v14 }
 0x414   : > { %v5073_v35 = vpop.eup %5072  ;;  %2825 = vst.msk [vmem:[#allocation3 + $0x1c8] sm:$0xff] %vm11100_vm3, %v2760_v19  ;;  %v2698_v36 = vmul.f32 %v5071_v55, %v1986_v31 }
 0x415   : > { %v5075_v39 = vpop.eup %5074  ;;  %v2761_v25 = vadd.f32 %v2697_v0, %v2441_v3  ;;  %v2443_v8 = vmul.f32 %v5073_v35, %v2187_v13 }
 0x416   : > { %v5077_v56 = vpop.eup %5076  ;;  %v2762_v60 = vadd.f32 %v2698_v36, %v2442_v54  ;;  %v1989_v33 = vpop.xlane.xlu1 %1988  ;;  %v2444_v49 = vmul.f32 %v5075_v39, %v2188_v15 }
 0x417   : > { %v5079_v18 = vpop.eup %5078  ;;  %v1992_v62 = vpop.xlane.xlu0 %1991  ;;  %2826 = vst.msk [vmem:[#allocation3 + $0x1d0] sm:$0xff] %vm11100_vm3, %v2761_v25  ;;  %v2699_v40 = vmul.f32 %v5077_v56, %v1989_v33 }
 0x418   : > { %v5081_v43 = vpop.eup %5080  ;;  %2827 = vst.msk [vmem:[#allocation3 + $0x1d8] sm:$0xff] %vm11100_vm3, %v2762_v60  ;;  %v2700_v32 = vmul.f32 %v5079_v18, %v1992_v62 }
 0x419   : > { %v5083_v24 = vpop.eup %5082  ;;  %v2763_v23 = vadd.f32 %v2699_v40, %v2443_v8  ;;  %v2445_v61 = vmul.f32 %v5081_v43, %v2189_v50 }
 0x41a   : > { %v5085_v51 = vpop.eup %5084  ;;  %v2764_v48 = vadd.f32 %v2700_v32, %v2444_v49  ;;  %v1995_v58 = vpop.xlane.xlu1 %1994  ;;  %v2446_v20 = vmul.f32 %v5083_v24, %v2190_v59 }
 0x41b   : > { %v5087_v7 = vpop.eup %5086  ;;  %v1998_v44 = vpop.xlane.xlu0 %1997  ;;  %2828 = vst.msk [vmem:[#allocation3 + $0x1e0] sm:$0xff] %vm11100_vm3, %v2763_v23  ;;  %v2701_v34 = vmul.f32 %v5085_v51, %v1995_v58 }
 0x41c   : > { %2829 = vst.msk [vmem:[#allocation3 + $0x1e8] sm:$0xff] %vm11100_vm3, %v2764_v48  ;;  %v2702_v38 = vmul.f32 %v5087_v7, %v1998_v44  ;;  %3099 = sbr.rel (%p5585_p8) target bundleno = 1622 (0x656), region = 44 }
 0x41d   : > { %v2765_v4 = vadd.f32 %v2701_v34, %v2445_v61 }
 0x41e   : > { %v2766_v16 = vadd.f32 %v2702_v38, %v2446_v20 }
 0x41f   : > { %2830 = vst.msk [vmem:[#allocation3 + $0x1f0] sm:$0xff] %vm11100_vm3, %v2765_v4 }
 0x420   : > { %2831 = vst.msk [vmem:[#allocation3 + $0x1f8] sm:$0xff] %vm11100_vm3, %v2766_v16 }
 0x421   : > { %v11833_v12 = vld [vmem:[#allocation139_spill] sm:$0xff]  ;;  %v11834_v14 = vlaneseq  ;;  %v9386_v23 = vstv %s5567_s19  ;;  %s4355_s19 = sld [smem:[#allocation6 + $0x1]] }
 0x422   : > { %v9234_v29 = vadd.s32 128, %v11833_v12  ;;  %v9237_v63 = vadd.s32 136, %v11833_v12  ;;  %v9240_v1 = vadd.s32 144, %v11833_v12  ;;  %v9243_v6 = vadd.s32 152, %v11833_v12 }
 0x423   : > { %v9246_v28 = vadd.s32 160, %v11833_v12  ;;  %v9249_v57 = vadd.s32 168, %v11833_v12  ;;  %v9252_v42 = vadd.s32 176, %v11833_v12  ;;  %v9255_v53 = vadd.s32 184, %v11833_v12 }
 0x424   : > { %v9258_v47 = vadd.s32 192, %v11833_v12  ;;  %v9261_v26 = vadd.s32 200, %v11833_v12  ;;  %v9264_v30 = vadd.s32 208, %v11833_v12  ;;  %v9267_v46 = vadd.s32 216, %v11833_v12 }
 0x425   : > { %v9270_v22 = vadd.s32 224, %v11833_v12  ;;  %v9273_v5 = vadd.s32 232, %v11833_v12  ;;  %v9276_v52 = vadd.s32 240, %v11833_v12  ;;  %v9279_v11 = vadd.s32 248, %v11833_v12 }
 0x426   : > { %v9282_v9 = vadd.s32 256, %v11833_v12  ;;  %v9285_v17 = vadd.s32 264, %v11833_v12  ;;  %v9288_v41 = vadd.s32 272, %v11833_v12  ;;  %v9291_v21 = vadd.s32 280, %v11833_v12 }
 0x427   : > { %v9294_v10 = vadd.s32 288, %v11833_v12  ;;  %v9297_v45 = vadd.s32 296, %v11833_v12  ;;  %v9300_v2 = vadd.s32 304, %v11833_v12  ;;  %v9303_v27 = vadd.s32 312, %v11833_v12 }
 0x428   : > { %v9306_v55 = vadd.s32 320, %v11833_v12  ;;  %v9309_v37 = vadd.s32 328, %v11833_v12  ;;  %v9312_v19 = vadd.s32 336, %v11833_v12  ;;  %v9315_v31 = vand.u32 127, %v11834_v14 }
 0x429   : > { %v9318_v35 = vadd.s32 344, %v11833_v12  ;;  %v9321_v3 = vadd.s32 352, %v11833_v12  ;;  %v9324_v0 = vadd.s32 360, %v11833_v12  ;;  %v9327_v54 = vadd.s32 368, %v11833_v12 }
 0x42a   : > { %v9330_v36 = vadd.s32 376, %v11833_v12  ;;  %v9333_v39 = vadd.s32 384, %v11833_v12  ;;  %v9336_v13 = vadd.s32 392, %v11833_v12  ;;  %v9339_v15 = vadd.s32 400, %v11833_v12 }
 0x42b   : > { %v9342_v56 = vadd.s32 408, %v11833_v12  ;;  %v9345_v25 = vadd.s32 416, %v11833_v12  ;;  %v9348_v60 = vadd.s32 424, %v11833_v12  ;;  %v9351_v18 = vadd.s32 432, %v11833_v12 }
 0x42c   : > { %v9354_v33 = vadd.s32 440, %v11833_v12  ;;  %v9357_v62 = vadd.s32 448, %v11833_v12  ;;  %v9360_v43 = vadd.s32 456, %v11833_v12  ;;  %v9363_v8 = vadd.s32 128, %v9315_v31 }
 0x42d   : > { %v9366_v40 = vadd.s32 464, %v11833_v12  ;;  %v9369_v49 = vadd.s32 472, %v11833_v12  ;;  %v9372_v32 = vadd.s32 480, %v11833_v12  ;;  %v9375_v24 = vadd.s32 488, %v11833_v12 }
 0x42e   : > { %v9378_v50 = vadd.s32 496, %v11833_v12  ;;  %v9381_v59 = vadd.s32 504, %v11833_v12  ;;  %v3201_v51 = vsub.s32 %v9234_v29, %v9363_v8  ;;  %v3202_v48 = vsub.s32 %v9237_v63, %v9315_v31 }
 0x42f   : > { %v3203_v7 = vsub.s32 %v9237_v63, %v9363_v8  ;;  %v3204_v58 = vsub.s32 %v9240_v1, %v9315_v31  ;;  %v3205_v44 = vsub.s32 %v9240_v1, %v9363_v8  ;;  %v11845_v63 = vsub.s32 %v9243_v6, %v9315_v31 }
 0x430   : > { %vm9580_vm4 = vcmp.eq.s32.totalorder %v3201_v51, %v9386_v23  ;;  %vm9588_vm5 = vcmp.eq.s32.totalorder %v3202_v48, %v9386_v23  ;;  %v11851_v1 = vsub.s32 %v9246_v28, %v9315_v31  ;;  %v11868_v14 = vmov 0 }
 0x431   : > { %vm9596_vm6 = vcmp.eq.s32.totalorder %v3203_v7, %v9386_v23  ;;  %vm9604_vm7 = vcmp.eq.s32.totalorder %v3204_v58, %v9386_v23  ;;  %vm9612_vm8 = vcmp.eq.s32.totalorder %v3205_v44, %v9386_v23  ;;  %vm9620_vm9 = vcmp.eq.s32.totalorder %v11845_v63, %v9386_v23 }
 0x432   : > { %v11848_v58 = vsub.s32 %v9243_v6, %v9363_v8  ;;  %vm9636_vm11 = vcmp.eq.s32.totalorder %v11851_v1, %v9386_v23  ;;  %v11854_v63 = vsub.s32 %v9246_v28, %v9363_v8  ;;  %v11857_v6 = vsub.s32 %v9249_v57, %v9315_v31 }
 0x433   : > { %v11860_v1 = vsub.s32 %v9249_v57, %v9363_v8  ;;  %v11863_v28 = vsub.s32 %v9252_v42, %v9315_v31  ;;  %v11870_v57 = vsub.s32 %v9255_v53, %v9315_v31 }
 0x434   : > { %vm9628_vm10 = vcmp.eq.s32.totalorder %v11848_v58, %v9386_v23  ;;  %vm9644_vm12 = vcmp.eq.s32.totalorder %v11854_v63, %v9386_v23  ;;  %vm9652_vm13 = vcmp.eq.s32.totalorder %v11857_v6, %v9386_v23  ;;  %v11864_v63 = vmov 0 }
 0x435   : > { %vm9660_vm14 = vcmp.eq.s32.totalorder %v11860_v1, %v9386_v23  ;;  %vm9668_vm15 = vcmp.eq.s32.totalorder %v11863_v28, %v9386_v23  ;;  %v11867_v6 = vsub.s32 %v9252_v42, %v9363_v8  ;;  %vm9684_vm1 = vcmp.eq.s32.totalorder %v11870_v57, %v9386_v23 }
 0x436   : > { %v11865_v63 = vsel %vm9668_vm15, 4294967295, %v11864_v63  ;;  %v11871_v1 = vmov 0  ;;  %v11874_v28 = vsub.s32 %v9255_v53, %v9363_v8  ;;  %v11877_v42 = vsub.s32 %v9258_v47, %v9315_v31 }
 0x437   : > { %11866 = vst [vmem:[#allocation185_spill] sm:$0xff] %v11865_v63  ;;  %vm9676_vm0 = vcmp.eq.s32.totalorder %v11867_v6, %v9386_v23  ;;  %v11872_v1 = vsel %vm9684_vm1, 4294967295, %v11871_v1  ;;  %v11875_v63 = vmov 0  ;;  %v11878_v6 = vmov 0 }
 0x438   : > { %v11869_v14 = vsel %vm9676_vm0, 4294967295, %v11868_v14  ;;  %11873 = vst [vmem:[#allocation186_spill] sm:$0xff] %v11872_v1  ;;  %vm9692_vm2 = vcmp.eq.s32.totalorder %v11874_v28, %v9386_v23  ;;  %vm9700_vm3 = vcmp.eq.s32.totalorder %v11877_v42, %v9386_v23  ;;  %v11881_v57 = vsub.s32 %v9258_v47, %v9363_v8 }
 0x439   : > { %v11876_v63 = vsel %vm9692_vm2, 4294967295, %v11875_v63  ;;  %v11879_v6 = vsel %vm9700_vm3, 4294967295, %v11878_v6  ;;  %v11882_v1 = vmov 0  ;;  %v11884_v53 = vsub.s32 %v9261_v26, %v9315_v31 }
 0x43a   : > { %11880 = vst [vmem:[#allocation187_spill] sm:$0xff] %v11879_v6  ;;  %vm9708_vm1 = vcmp.eq.s32.totalorder %v11881_v57, %v9386_v23  ;;  %v11885_v28 = vmov 0  ;;  %v11888_v42 = vsub.s32 %v9261_v26, %v9363_v8  ;;  %v11889_v6 = vmov 0 }
 0x43b   : > { %v11883_v1 = vsel %vm9708_vm1, 4294967295, %v11882_v1  ;;  %vm9716_vm2 = vcmp.eq.s32.totalorder %v11884_v53, %v9386_v23  ;;  %v11891_v47 = vsub.s32 %v9264_v30, %v9315_v31  ;;  %v11892_v57 = vmov 0 }
 0x43c   : > { %v11886_v28 = vsel %vm9716_vm2, 4294967295, %v11885_v28  ;;  %vm9724_vm3 = vcmp.eq.s32.totalorder %v11888_v42, %v9386_v23  ;;  %v11895_v53 = vsub.s32 %v9264_v30, %v9363_v8  ;;  %v11898_v26 = vsub.s32 %v9267_v46, %v9315_v31 }
 0x43d   : > { %11887 = vst [vmem:[#allocation188_spill] sm:$0xff] %v11886_v28  ;;  %v11890_v6 = vsel %vm9724_vm3, 4294967295, %v11889_v6  ;;  %vm9732_vm1 = vcmp.eq.s32.totalorder %v11891_v47, %v9386_v23  ;;  %v11896_v28 = vmov 0  ;;  %v11899_v42 = vmov 0 }
 0x43e   : > { %v11893_v57 = vsel %vm9732_vm1, 4294967295, %v11892_v57  ;;  %vm9740_vm2 = vcmp.eq.s32.totalorder %v11895_v53, %v9386_v23  ;;  %vm9748_vm3 = vcmp.eq.s32.totalorder %v11898_v26, %v9386_v23  ;;  %v11902_v47 = vsub.s32 %v9267_v46, %v9363_v8 }
 0x43f   : > { %11894 = vst [vmem:[#allocation189_spill] sm:$0xff] %v11893_v57  ;;  %v11897_v28 = vsel %vm9740_vm2, 4294967295, %v11896_v28  ;;  %v11900_v42 = vsel %vm9748_vm3, 4294967295, %v11899_v42  ;;  %v11903_v57 = vmov 0  ;;  %v11905_v30 = vsub.s32 %v9270_v22, %v9315_v31 }
 0x440   : > { %11901 = vst [vmem:[#allocation190_spill] sm:$0xff] %v11900_v42  ;;  %vm9756_vm1 = vcmp.eq.s32.totalorder %v11902_v47, %v9386_v23  ;;  %v11906_v53 = vmov 0  ;;  %v11909_v26 = vsub.s32 %v9270_v22, %v9363_v8  ;;  %v11910_v42 = vmov 0 }
 0x441   : > { %v11904_v57 = vsel %vm9756_vm1, 4294967295, %v11903_v57  ;;  %vm9764_vm2 = vcmp.eq.s32.totalorder %v11905_v30, %v9386_v23  ;;  %v11912_v46 = vsub.s32 %v9273_v5, %v9315_v31  ;;  %v11913_v47 = vmov 0 }
 0x442   : > { %v11907_v53 = vsel %vm9764_vm2, 4294967295, %v11906_v53  ;;  %vm9772_vm3 = vcmp.eq.s32.totalorder %v11909_v26, %v9386_v23  ;;  %v11916_v30 = vsub.s32 %v9273_v5, %v9363_v8  ;;  %v11919_v22 = vsub.s32 %v9276_v52, %v9315_v31 }
 0x443   : > { %11908 = vst [vmem:[#allocation191_spill] sm:$0xff] %v11907_v53  ;;  %v11911_v42 = vsel %vm9772_vm3, 4294967295, %v11910_v42  ;;  %vm9780_vm1 = vcmp.eq.s32.totalorder %v11912_v46, %v9386_v23  ;;  %v11917_v53 = vmov 0  ;;  %v11920_v26 = vmov 0 }
 0x444   : > { %v11914_v47 = vsel %vm9780_vm1, 4294967295, %v11913_v47  ;;  %vm9788_vm2 = vcmp.eq.s32.totalorder %v11916_v30, %v9386_v23  ;;  %vm9796_vm3 = vcmp.eq.s32.totalorder %v11919_v22, %v9386_v23  ;;  %v11923_v46 = vsub.s32 %v9276_v52, %v9363_v8 }
 0x445   : > { %11915 = vst [vmem:[#allocation192_spill] sm:$0xff] %v11914_v47  ;;  %v11918_v53 = vsel %vm9788_vm2, 4294967295, %v11917_v53  ;;  %v11921_v26 = vsel %vm9796_vm3, 4294967295, %v11920_v26  ;;  %v11924_v47 = vmov 0  ;;  %v11926_v5 = vsub.s32 %v9279_v11, %v9315_v31 }
 0x446   : > { %11922 = vst [vmem:[#allocation193_spill] sm:$0xff] %v11921_v26  ;;  %vm9804_vm1 = vcmp.eq.s32.totalorder %v11923_v46, %v9386_v23  ;;  %v11927_v30 = vmov 0  ;;  %v11930_v22 = vsub.s32 %v9279_v11, %v9363_v8  ;;  %v11931_v26 = vmov 0 }
 0x447   : > { %v11925_v47 = vsel %vm9804_vm1, 4294967295, %v11924_v47  ;;  %vm9812_vm2 = vcmp.eq.s32.totalorder %v11926_v5, %v9386_v23  ;;  %v11933_v52 = vsub.s32 %v9282_v9, %v9315_v31  ;;  %v11934_v46 = vmov 0 }
 0x448   : > { %v11928_v30 = vsel %vm9812_vm2, 4294967295, %v11927_v30  ;;  %vm9820_vm3 = vcmp.eq.s32.totalorder %v11930_v22, %v9386_v23  ;;  %v11937_v5 = vsub.s32 %v9282_v9, %v9363_v8  ;;  %v11940_v11 = vsub.s32 %v9285_v17, %v9315_v31 }
 0x449   : > { %11929 = vst [vmem:[#allocation194_spill] sm:$0xff] %v11928_v30  ;;  %v11932_v26 = vsel %vm9820_vm3, 4294967295, %v11931_v26  ;;  %vm9828_vm1 = vcmp.eq.s32.totalorder %v11933_v52, %v9386_v23  ;;  %v11938_v30 = vmov 0  ;;  %v11941_v22 = vmov 0 }
 0x44a   : > { %v11935_v46 = vsel %vm9828_vm1, 4294967295, %v11934_v46  ;;  %vm9836_vm2 = vcmp.eq.s32.totalorder %v11937_v5, %v9386_v23  ;;  %vm9844_vm3 = vcmp.eq.s32.totalorder %v11940_v11, %v9386_v23  ;;  %v11944_v52 = vsub.s32 %v9285_v17, %v9363_v8 }
 0x44b   : > { %11936 = vst [vmem:[#allocation195_spill] sm:$0xff] %v11935_v46  ;;  %v11939_v30 = vsel %vm9836_vm2, 4294967295, %v11938_v30  ;;  %v11942_v22 = vsel %vm9844_vm3, 4294967295, %v11941_v22  ;;  %v11945_v46 = vmov 0  ;;  %v11947_v9 = vsub.s32 %v9288_v41, %v9315_v31 }
 0x44c   : > { %11943 = vst [vmem:[#allocation196_spill] sm:$0xff] %v11942_v22  ;;  %vm9852_vm1 = vcmp.eq.s32.totalorder %v11944_v52, %v9386_v23  ;;  %v11948_v5 = vmov 0  ;;  %v11951_v11 = vsub.s32 %v9288_v41, %v9363_v8  ;;  %v11952_v22 = vmov 0 }
 0x44d   : > { %v11946_v46 = vsel %vm9852_vm1, 4294967295, %v11945_v46  ;;  %vm9860_vm2 = vcmp.eq.s32.totalorder %v11947_v9, %v9386_v23  ;;  %v11954_v17 = vsub.s32 %v9291_v21, %v9315_v31  ;;  %v11955_v52 = vmov 0 }
 0x44e   : > { %v11949_v5 = vsel %vm9860_vm2, 4294967295, %v11948_v5  ;;  %vm9868_vm3 = vcmp.eq.s32.totalorder %v11951_v11, %v9386_v23  ;;  %v11958_v9 = vsub.s32 %v9291_v21, %v9363_v8  ;;  %v11961_v41 = vsub.s32 %v9294_v10, %v9315_v31 }
 0x44f   : > { %11950 = vst [vmem:[#allocation197_spill] sm:$0xff] %v11949_v5  ;;  %v11953_v22 = vsel %vm9868_vm3, 4294967295, %v11952_v22  ;;  %vm9876_vm1 = vcmp.eq.s32.totalorder %v11954_v17, %v9386_v23  ;;  %v11959_v5 = vmov 0  ;;  %v11962_v11 = vmov 0 }
 0x450   : > { %v11956_v52 = vsel %vm9876_vm1, 4294967295, %v11955_v52  ;;  %vm9884_vm2 = vcmp.eq.s32.totalorder %v11958_v9, %v9386_v23  ;;  %vm9892_vm3 = vcmp.eq.s32.totalorder %v11961_v41, %v9386_v23  ;;  %v11965_v17 = vsub.s32 %v9294_v10, %v9363_v8 }
 0x451   : > { %11957 = vst [vmem:[#allocation198_spill] sm:$0xff] %v11956_v52  ;;  %v11960_v5 = vsel %vm9884_vm2, 4294967295, %v11959_v5  ;;  %v11963_v11 = vsel %vm9892_vm3, 4294967295, %v11962_v11  ;;  %v11966_v52 = vmov 0  ;;  %v11968_v21 = vsub.s32 %v9297_v45, %v9315_v31 }
 0x452   : > { %11964 = vst [vmem:[#allocation199_spill] sm:$0xff] %v11963_v11  ;;  %vm9900_vm1 = vcmp.eq.s32.totalorder %v11965_v17, %v9386_v23  ;;  %v11969_v9 = vmov 0  ;;  %v11972_v41 = vsub.s32 %v9297_v45, %v9363_v8  ;;  %v11973_v11 = vmov 0 }
 0x453   : > { %v11967_v52 = vsel %vm9900_vm1, 4294967295, %v11966_v52  ;;  %vm9908_vm2 = vcmp.eq.s32.totalorder %v11968_v21, %v9386_v23  ;;  %v11975_v10 = vsub.s32 %v9300_v2, %v9315_v31  ;;  %v11976_v17 = vmov 0 }
 0x454   : > { %v11970_v9 = vsel %vm9908_vm2, 4294967295, %v11969_v9  ;;  %vm9916_vm3 = vcmp.eq.s32.totalorder %v11972_v41, %v9386_v23  ;;  %v11979_v21 = vsub.s32 %v9300_v2, %v9363_v8  ;;  %v11982_v45 = vsub.s32 %v9303_v27, %v9315_v31 }
 0x455   : > { %11971 = vst [vmem:[#allocation200_spill] sm:$0xff] %v11970_v9  ;;  %v11974_v11 = vsel %vm9916_vm3, 4294967295, %v11973_v11  ;;  %vm9924_vm1 = vcmp.eq.s32.totalorder %v11975_v10, %v9386_v23  ;;  %v11980_v9 = vmov 0  ;;  %v11983_v41 = vmov 0 }
 0x456   : > { %v11977_v17 = vsel %vm9924_vm1, 4294967295, %v11976_v17  ;;  %vm9932_vm2 = vcmp.eq.s32.totalorder %v11979_v21, %v9386_v23  ;;  %vm9940_vm3 = vcmp.eq.s32.totalorder %v11982_v45, %v9386_v23  ;;  %v11986_v10 = vsub.s32 %v9303_v27, %v9363_v8 }
 0x457   : > { %11978 = vst [vmem:[#allocation201_spill] sm:$0xff] %v11977_v17  ;;  %v11981_v9 = vsel %vm9932_vm2, 4294967295, %v11980_v9  ;;  %v11984_v41 = vsel %vm9940_vm3, 4294967295, %v11983_v41  ;;  %v11987_v17 = vmov 0  ;;  %v11989_v2 = vsub.s32 %v9306_v55, %v9315_v31 }
 0x458   : > { %11985 = vst [vmem:[#allocation202_spill] sm:$0xff] %v11984_v41  ;;  %vm9948_vm1 = vcmp.eq.s32.totalorder %v11986_v10, %v9386_v23  ;;  %v11990_v21 = vmov 0  ;;  %v11993_v45 = vsub.s32 %v9306_v55, %v9363_v8  ;;  %v11994_v41 = vmov 0 }
 0x459   : > { %v11988_v17 = vsel %vm9948_vm1, 4294967295, %v11987_v17  ;;  %vm9956_vm2 = vcmp.eq.s32.totalorder %v11989_v2, %v9386_v23  ;;  %v11996_v27 = vsub.s32 %v9309_v37, %v9315_v31  ;;  %v11997_v10 = vmov 0 }
 0x45a   : > { %v11991_v21 = vsel %vm9956_vm2, 4294967295, %v11990_v21  ;;  %vm9964_vm3 = vcmp.eq.s32.totalorder %v11993_v45, %v9386_v23  ;;  %v12000_v2 = vsub.s32 %v9309_v37, %v9363_v8  ;;  %v12003_v55 = vsub.s32 %v9312_v19, %v9315_v31 }
 0x45b   : > { %11992 = vst [vmem:[#allocation203_spill] sm:$0xff] %v11991_v21  ;;  %v11995_v41 = vsel %vm9964_vm3, 4294967295, %v11994_v41  ;;  %vm9972_vm1 = vcmp.eq.s32.totalorder %v11996_v27, %v9386_v23  ;;  %v12001_v21 = vmov 0  ;;  %v12004_v45 = vmov 0 }
 0x45c   : > { %v11998_v10 = vsel %vm9972_vm1, 4294967295, %v11997_v10  ;;  %vm9980_vm2 = vcmp.eq.s32.totalorder %v12000_v2, %v9386_v23  ;;  %vm9988_vm3 = vcmp.eq.s32.totalorder %v12003_v55, %v9386_v23  ;;  %v12007_v27 = vsub.s32 %v9312_v19, %v9363_v8 }
 0x45d   : > { %11999 = vst [vmem:[#allocation204_spill] sm:$0xff] %v11998_v10  ;;  %v12002_v21 = vsel %vm9980_vm2, 4294967295, %v12001_v21  ;;  %v12005_v45 = vsel %vm9988_vm3, 4294967295, %v12004_v45  ;;  %v12008_v10 = vmov 0  ;;  %v12010_v37 = vsub.s32 %v9318_v35, %v9315_v31 }
 0x45e   : > { %12006 = vst [vmem:[#allocation205_spill] sm:$0xff] %v12005_v45  ;;  %vm9996_vm1 = vcmp.eq.s32.totalorder %v12007_v27, %v9386_v23  ;;  %v12011_v2 = vmov 0  ;;  %v12014_v55 = vsub.s32 %v9318_v35, %v9363_v8  ;;  %v12015_v45 = vmov 0 }
 0x45f   : > { %v12009_v10 = vsel %vm9996_vm1, 4294967295, %v12008_v10  ;;  %vm10004_vm2 = vcmp.eq.s32.totalorder %v12010_v37, %v9386_v23  ;;  %v12017_v19 = vsub.s32 %v9321_v3, %v9315_v31  ;;  %v12018_v27 = vmov 0 }
 0x460   : > { %v12012_v2 = vsel %vm10004_vm2, 4294967295, %v12011_v2  ;;  %vm10012_vm3 = vcmp.eq.s32.totalorder %v12014_v55, %v9386_v23  ;;  %v12021_v37 = vsub.s32 %v9321_v3, %v9363_v8  ;;  %v12024_v35 = vsub.s32 %v9324_v0, %v9315_v31 }
 0x461   : > { %12013 = vst [vmem:[#allocation206_spill] sm:$0xff] %v12012_v2  ;;  %v12016_v45 = vsel %vm10012_vm3, 4294967295, %v12015_v45  ;;  %vm10020_vm1 = vcmp.eq.s32.totalorder %v12017_v19, %v9386_v23  ;;  %v12022_v2 = vmov 0  ;;  %v12025_v55 = vmov 0 }
 0x462   : > { %v12019_v27 = vsel %vm10020_vm1, 4294967295, %v12018_v27  ;;  %vm10028_vm2 = vcmp.eq.s32.totalorder %v12021_v37, %v9386_v23  ;;  %vm10036_vm3 = vcmp.eq.s32.totalorder %v12024_v35, %v9386_v23  ;;  %v12028_v19 = vsub.s32 %v9324_v0, %v9363_v8 }
 0x463   : > { %12020 = vst [vmem:[#allocation207_spill] sm:$0xff] %v12019_v27  ;;  %v12023_v2 = vsel %vm10028_vm2, 4294967295, %v12022_v2  ;;  %v12026_v55 = vsel %vm10036_vm3, 4294967295, %v12025_v55  ;;  %v12029_v27 = vmov 0  ;;  %v12031_v3 = vsub.s32 %v9327_v54, %v9315_v31 }
 0x464   : > { %12027 = vst [vmem:[#allocation208_spill] sm:$0xff] %v12026_v55  ;;  %vm10044_vm1 = vcmp.eq.s32.totalorder %v12028_v19, %v9386_v23  ;;  %v12032_v37 = vmov 0  ;;  %v12035_v35 = vsub.s32 %v9327_v54, %v9363_v8  ;;  %v12036_v55 = vmov 0 }
 0x465   : > { %v12030_v27 = vsel %vm10044_vm1, 4294967295, %v12029_v27  ;;  %vm10052_vm2 = vcmp.eq.s32.totalorder %v12031_v3, %v9386_v23  ;;  %v12038_v0 = vsub.s32 %v9330_v36, %v9315_v31  ;;  %v12039_v19 = vmov 0 }
 0x466   : > { %v12033_v37 = vsel %vm10052_vm2, 4294967295, %v12032_v37  ;;  %vm10060_vm3 = vcmp.eq.s32.totalorder %v12035_v35, %v9386_v23  ;;  %v12042_v3 = vsub.s32 %v9330_v36, %v9363_v8  ;;  %v12045_v54 = vsub.s32 %v9333_v39, %v9315_v31 }
 0x467   : > { %12034 = vst [vmem:[#allocation209_spill] sm:$0xff] %v12033_v37  ;;  %v12037_v55 = vsel %vm10060_vm3, 4294967295, %v12036_v55  ;;  %vm10068_vm1 = vcmp.eq.s32.totalorder %v12038_v0, %v9386_v23  ;;  %v12043_v37 = vmov 0  ;;  %v12046_v35 = vmov 0 }
 0x468   : > { %v12040_v19 = vsel %vm10068_vm1, 4294967295, %v12039_v19  ;;  %vm10076_vm2 = vcmp.eq.s32.totalorder %v12042_v3, %v9386_v23  ;;  %vm10084_vm3 = vcmp.eq.s32.totalorder %v12045_v54, %v9386_v23  ;;  %v12049_v0 = vsub.s32 %v9333_v39, %v9363_v8 }
 0x469   : > { %12041 = vst [vmem:[#allocation210_spill] sm:$0xff] %v12040_v19  ;;  %v12044_v37 = vsel %vm10076_vm2, 4294967295, %v12043_v37  ;;  %v12047_v35 = vsel %vm10084_vm3, 4294967295, %v12046_v35  ;;  %v12050_v19 = vmov 0  ;;  %v12052_v36 = vsub.s32 %v9336_v13, %v9315_v31 }
 0x46a   : > { %12048 = vst [vmem:[#allocation211_spill] sm:$0xff] %v12047_v35  ;;  %vm10092_vm1 = vcmp.eq.s32.totalorder %v12049_v0, %v9386_v23  ;;  %v12053_v3 = vmov 0  ;;  %v12056_v54 = vsub.s32 %v9336_v13, %v9363_v8  ;;  %v12057_v35 = vmov 0 }
 0x46b   : > { %v12051_v19 = vsel %vm10092_vm1, 4294967295, %v12050_v19  ;;  %vm10100_vm2 = vcmp.eq.s32.totalorder %v12052_v36, %v9386_v23  ;;  %v12059_v39 = vsub.s32 %v9339_v15, %v9315_v31  ;;  %v12060_v0 = vmov 0 }
 0x46c   : > { %v12054_v3 = vsel %vm10100_vm2, 4294967295, %v12053_v3  ;;  %vm10108_vm3 = vcmp.eq.s32.totalorder %v12056_v54, %v9386_v23  ;;  %v12063_v36 = vsub.s32 %v9339_v15, %v9363_v8  ;;  %v12067_v13 = vsub.s32 %v9342_v56, %v9315_v31 }
 0x46d   : > { %12055 = vst [vmem:[#allocation212_spill] sm:$0xff] %v12054_v3  ;;  %v12058_v35 = vsel %vm10108_vm3, 4294967295, %v12057_v35  ;;  %vm10116_vm1 = vcmp.eq.s32.totalorder %v12059_v39, %v9386_v23  ;;  %v12064_v3 = vmov 0  ;;  %v12068_v54 = vmov 0 }
 0x46e   : > { %v12061_v0 = vsel %vm10116_vm1, 4294967295, %v12060_v0  ;;  %vm10124_vm2 = vcmp.eq.s32.totalorder %v12063_v36, %v9386_v23  ;;  %vm10132_vm3 = vcmp.eq.s32.totalorder %v12067_v13, %v9386_v23  ;;  %v12071_v39 = vsub.s32 %v9342_v56, %v9363_v8 }
 0x46f   : > { %12062 = vst [vmem:[#allocation213_spill] sm:$0xff] %v12061_v0  ;;  %v12065_v3 = vsel %vm10124_vm2, 4294967295, %v12064_v3  ;;  %v12069_v54 = vsel %vm10132_vm3, 4294967295, %v12068_v54  ;;  %v12072_v0 = vmov 0  ;;  %v12075_v15 = vsub.s32 %v9345_v25, %v9315_v31 }
 0x470   : > { %12066 = vst [vmem:[#allocation214_spill] sm:$0xff] %v12065_v3  ;;  %12070 = vst [vmem:[#allocation215_spill] sm:$0xff] %v12069_v54  ;;  %vm10140_vm1 = vcmp.eq.s32.totalorder %v12071_v39, %v9386_v23  ;;  %v12076_v36 = vmov 0  ;;  %v12079_v13 = vsub.s32 %v9345_v25, %v9363_v8  ;;  %v12080_v54 = vmov 0 }
 0x471   : > { %v12073_v0 = vsel %vm10140_vm1, 4294967295, %v12072_v0  ;;  %vm10148_vm2 = vcmp.eq.s32.totalorder %v12075_v15, %v9386_v23  ;;  %v12083_v56 = vsub.s32 %v9348_v60, %v9315_v31  ;;  %v12084_v39 = vmov 0 }
 0x472   : > { %12074 = vst [vmem:[#allocation216_spill] sm:$0xff] %v12073_v0  ;;  %v12077_v36 = vsel %vm10148_vm2, 4294967295, %v12076_v36  ;;  %vm10156_vm3 = vcmp.eq.s32.totalorder %v12079_v13, %v9386_v23  ;;  %v12087_v15 = vsub.s32 %v9348_v60, %v9363_v8  ;;  %v12091_v25 = vsub.s32 %v9351_v18, %v9315_v31  ;;  %v12176_v0 = vld [vmem:[#allocation54_spill] sm:$0xff] }
 0x473   : > { %12078 = vst [vmem:[#allocation217_spill] sm:$0xff] %v12077_v36  ;;  %v12081_v54 = vsel %vm10156_vm3, 4294967295, %v12080_v54  ;;  %vm10164_vm1 = vcmp.eq.s32.totalorder %v12083_v56, %v9386_v23  ;;  %v12088_v36 = vmov 0  ;;  %v12092_v13 = vmov 0 }
 0x474   : > { %12082 = vst [vmem:[#allocation218_spill] sm:$0xff] %v12081_v54  ;;  %v12085_v39 = vsel %vm10164_vm1, 4294967295, %v12084_v39  ;;  %vm10172_vm2 = vcmp.eq.s32.totalorder %v12087_v15, %v9386_v23  ;;  %vm10180_vm3 = vcmp.eq.s32.totalorder %v12091_v25, %v9386_v23  ;;  %v12095_v56 = vsub.s32 %v9351_v18, %v9363_v8 }
 0x475   : > { %12086 = vst [vmem:[#allocation219_spill] sm:$0xff] %v12085_v39  ;;  %v12089_v36 = vsel %vm10172_vm2, 4294967295, %v12088_v36  ;;  %v12093_v13 = vsel %vm10180_vm3, 4294967295, %v12092_v13  ;;  %v12096_v39 = vmov 0  ;;  %v12099_v60 = vsub.s32 %v9354_v33, %v9315_v31 }
 0x476   : > { %12090 = vst [vmem:[#allocation220_spill] sm:$0xff] %v12089_v36  ;;  %12094 = vst [vmem:[#allocation221_spill] sm:$0xff] %v12093_v13  ;;  %vm10188_vm1 = vcmp.eq.s32.totalorder %v12095_v56, %v9386_v23  ;;  %v12100_v15 = vmov 0  ;;  %v12103_v25 = vsub.s32 %v9354_v33, %v9363_v8  ;;  %v12104_v13 = vmov 0 }
 0x477   : > { %v12097_v39 = vsel %vm10188_vm1, 4294967295, %v12096_v39  ;;  %vm10196_vm2 = vcmp.eq.s32.totalorder %v12099_v60, %v9386_v23  ;;  %v12107_v18 = vsub.s32 %v9357_v62, %v9315_v31  ;;  %v12108_v56 = vmov 0 }
 0x478   : > { %12098 = vst [vmem:[#allocation222_spill] sm:$0xff] %v12097_v39  ;;  %v12101_v15 = vsel %vm10196_vm2, 4294967295, %v12100_v15  ;;  %vm10204_vm3 = vcmp.eq.s32.totalorder %v12103_v25, %v9386_v23  ;;  %v12111_v60 = vsub.s32 %v9357_v62, %v9363_v8  ;;  %v12115_v33 = vsub.s32 %v9360_v43, %v9315_v31  ;;  %v12174_v39 = vld [vmem:[#allocation62_spill] sm:$0xff] }
 0x479   : > { %12102 = vst [vmem:[#allocation223_spill] sm:$0xff] %v12101_v15  ;;  %v12105_v13 = vsel %vm10204_vm3, 4294967295, %v12104_v13  ;;  %vm10212_vm1 = vcmp.eq.s32.totalorder %v12107_v18, %v9386_v23  ;;  %v12112_v15 = vmov 0  ;;  %v12116_v25 = vmov 0 }
 0x47a   : > { %12106 = vst [vmem:[#allocation224_spill] sm:$0xff] %v12105_v13  ;;  %v12109_v56 = vsel %vm10212_vm1, 4294967295, %v12108_v56  ;;  %vm10220_vm2 = vcmp.eq.s32.totalorder %v12111_v60, %v9386_v23  ;;  %vm10228_vm3 = vcmp.eq.s32.totalorder %v12115_v33, %v9386_v23  ;;  %v12119_v18 = vsub.s32 %v9360_v43, %v9363_v8 }
 0x47b   : > { %12110 = vst [vmem:[#allocation225_spill] sm:$0xff] %v12109_v56  ;;  %v12113_v15 = vsel %vm10220_vm2, 4294967295, %v12112_v15  ;;  %v12117_v25 = vsel %vm10228_vm3, 4294967295, %v12116_v25  ;;  %v12120_v56 = vmov 0  ;;  %v12123_v62 = vsub.s32 %v9366_v40, %v9315_v31 }
 0x47c   : > { %12114 = vst [vmem:[#allocation226_spill] sm:$0xff] %v12113_v15  ;;  %12118 = vst [vmem:[#allocation227_spill] sm:$0xff] %v12117_v25  ;;  %vm10236_vm1 = vcmp.eq.s32.totalorder %v12119_v18, %v9386_v23  ;;  %v12124_v60 = vmov 0  ;;  %v12127_v33 = vsub.s32 %v9366_v40, %v9363_v8  ;;  %v12128_v25 = vmov 0  ;;  %v12173_v15 = vld [vmem:[#allocation59_spill] sm:$0xff] }
 0x47d   : > { %v12121_v56 = vsel %vm10236_vm1, 4294967295, %v12120_v56  ;;  %vm10244_vm2 = vcmp.eq.s32.totalorder %v12123_v62, %v9386_v23  ;;  %v12131_v43 = vsub.s32 %v9369_v49, %v9315_v31  ;;  %v12132_v18 = vmov 0 }
 0x47e   : > { %12122 = vst [vmem:[#allocation228_spill] sm:$0xff] %v12121_v56  ;;  %v12125_v60 = vsel %vm10244_vm2, 4294967295, %v12124_v60  ;;  %vm10252_vm3 = vcmp.eq.s32.totalorder %v12127_v33, %v9386_v23  ;;  %v12135_v62 = vsub.s32 %v9369_v49, %v9363_v8  ;;  %v12139_v40 = vsub.s32 %v9372_v32, %v9315_v31 }
 0x47f   : > { %12126 = vst [vmem:[#allocation229_spill] sm:$0xff] %v12125_v60  ;;  %v12129_v25 = vsel %vm10252_vm3, 4294967295, %v12128_v25  ;;  %vm10260_vm1 = vcmp.eq.s32.totalorder %v12131_v43, %v9386_v23  ;;  %v12136_v60 = vmov 0  ;;  %v12140_v33 = vmov 0 }
 0x480   : > { %12130 = vst [vmem:[#allocation230_spill] sm:$0xff] %v12129_v25  ;;  %v12133_v18 = vsel %vm10260_vm1, 4294967295, %v12132_v18  ;;  %vm10268_vm2 = vcmp.eq.s32.totalorder %v12135_v62, %v9386_v23  ;;  %vm10276_vm3 = vcmp.eq.s32.totalorder %v12139_v40, %v9386_v23  ;;  %v12143_v43 = vsub.s32 %v9372_v32, %v9363_v8 }
 0x481   : > { %12134 = vst [vmem:[#allocation231_spill] sm:$0xff] %v12133_v18  ;;  %v12137_v60 = vsel %vm10268_vm2, 4294967295, %v12136_v60  ;;  %v12141_v33 = vsel %vm10276_vm3, 4294967295, %v12140_v33  ;;  %v12144_v18 = vmov 0  ;;  %v12147_v49 = vsub.s32 %v9375_v24, %v9315_v31 }
 0x482   : > { %12138 = vst [vmem:[#allocation232_spill] sm:$0xff] %v12137_v60  ;;  %12142 = vst [vmem:[#allocation233_spill] sm:$0xff] %v12141_v33  ;;  %vm10284_vm1 = vcmp.eq.s32.totalorder %v12143_v43, %v9386_v23  ;;  %v12148_v62 = vmov 0  ;;  %v12151_v40 = vsub.s32 %v9375_v24, %v9363_v8  ;;  %v12152_v33 = vmov 0  ;;  %v12172_v60 = vld [vmem:[#allocation58_spill] sm:$0xff] }
 0x483   : > { %v12145_v18 = vsel %vm10284_vm1, 4294967295, %v12144_v18  ;;  %vm10292_vm2 = vcmp.eq.s32.totalorder %v12147_v49, %v9386_v23  ;;  %v12155_v32 = vsub.s32 %v9378_v50, %v9315_v31  ;;  %v12156_v43 = vmov 0 }
 0x484   : > { %12146 = vst [vmem:[#allocation234_spill] sm:$0xff] %v12145_v18  ;;  %v12149_v62 = vsel %vm10292_vm2, 4294967295, %v12148_v62  ;;  %vm10300_vm3 = vcmp.eq.s32.totalorder %v12151_v40, %v9386_v23  ;;  %v12159_v49 = vsub.s32 %v9378_v50, %v9363_v8  ;;  %v12163_v24 = vsub.s32 %v9381_v59, %v9315_v31 }
 0x485   : > { %12150 = vst [vmem:[#allocation235_spill] sm:$0xff] %v12149_v62  ;;  %v12153_v33 = vsel %vm10300_vm3, 4294967295, %v12152_v33  ;;  %vm10308_vm1 = vcmp.eq.s32.totalorder %v12155_v32, %v9386_v23  ;;  %v12160_v62 = vmov 0  ;;  %v12164_v40 = vmov 0 }
 0x486   : > { %12154 = vst [vmem:[#allocation236_spill] sm:$0xff] %v12153_v33  ;;  %v12157_v43 = vsel %vm10308_vm1, 4294967295, %v12156_v43  ;;  %vm10316_vm2 = vcmp.eq.s32.totalorder %v12159_v49, %v9386_v23  ;;  %vm10324_vm3 = vcmp.eq.s32.totalorder %v12163_v24, %v9386_v23  ;;  %v12167_v32 = vsub.s32 %v9381_v59, %v9363_v8 }
 0x487   : > { %12158 = vst [vmem:[#allocation237_spill] sm:$0xff] %v12157_v43  ;;  %v12161_v62 = vsel %vm10316_vm2, 4294967295, %v12160_v62  ;;  %v12165_v40 = vsel %vm10324_vm3, 4294967295, %v12164_v40  ;;  %v12168_v43 = vmov 0  ;;  %v3102_v50 = vadd.s32 8, %v11833_v12 }
 0x488   : > { %12162 = vst [vmem:[#allocation238_spill] sm:$0xff] %v12161_v62  ;;  %12166 = vst [vmem:[#allocation239_spill] sm:$0xff] %v12165_v40  ;;  %vm10332_vm1 = vcmp.eq.s32.totalorder %v12167_v32, %v9386_v23  ;;  %v3168_v49 = vsub.s32 %v11833_v12, %v9315_v31  ;;  %v3169_v62 = vsub.s32 %v11833_v12, %v9363_v8  ;;  %v3103_v24 = vadd.s32 16, %v11833_v12 }
 0x489   : > { %v12169_v43 = vsel %vm10332_vm1, 4294967295, %v12168_v43  ;;  %v3170_v40 = vsub.s32 %v3102_v50, %v9315_v31  ;;  %v3171_v33 = vsub.s32 %v3102_v50, %v9363_v8  ;;  %v3104_v59 = vadd.s32 24, %v11833_v12 }
 0x48a   : > { %12170 = vst [vmem:[#allocation240_spill] sm:$0xff] %v12169_v43  ;;  %vm3298_vm3 = vcmp.eq.s32.totalorder %v3168_v49, %v9386_v23  ;;  %vm3299_vm2 = vcmp.eq.s32.totalorder %v3169_v62, %v9386_v23  ;;  %v3172_v32 = vsub.s32 %v3103_v24, %v9315_v31  ;;  %v12171_v43 = vld [vmem:[#allocation52_spill] sm:$0xff]  ;;  %v3173_v56 = vsub.s32 %v3103_v24, %v9363_v8 }
 0x48b   : > { %vm3300_vm1 = vcmp.eq.s32.totalorder %v3170_v40, %v9386_v23  ;;  %v3426_v18 = vsel %vm3298_vm3, %v12171_v43, 0.0  ;;  %v3427_v25 = vsel %vm3299_vm2, %v12172_v60, 0.0  ;;  %vm3301_vm0 = vcmp.eq.s32.totalorder %v3171_v33, %v9386_v23  ;;  %v12175_v43 = vld [vmem:[#allocation50_spill] sm:$0xff] }
 0x48c   : > { %v3428_v50 = vsel %vm3300_vm1, %v12173_v15, 0.0  ;;  %v3105_v49 = vadd.s32 32, %v11833_v12  ;;  %v3174_v62 = vsub.s32 %v3104_v59, %v9315_v31  ;;  %vm3302_vm15 = vcmp.eq.s32.totalorder %v3172_v32, %v9386_v23 }
 0x48d   : > { %v3555_v13 = vadd.f32 %v3427_v25, %v3426_v18  ;;  %v3429_v36 = vsel %vm3301_vm0, %v12174_v39, 0.0  ;;  %v3175_v40 = vsub.s32 %v3104_v59, %v9363_v8  ;;  %vm3303_vm3 = vcmp.eq.s32.totalorder %v3173_v56, %v9386_v23  ;;  %v12177_v18 = vld [vmem:[#allocation55_spill] sm:$0xff] }
 0x48e   : > { %v3430_v24 = vsel %vm3302_vm15, %v12175_v43, 0.0  ;;  %v3106_v33 = vadd.s32 40, %v11833_v12  ;;  %v3176_v15 = vsub.s32 %v3105_v49, %v9315_v31  ;;  %vm3304_vm1 = vcmp.eq.s32.totalorder %v3174_v62, %v9386_v23 }
 0x48f   : > { %v3556_v60 = vadd.f32 %v3555_v13, %v3428_v50  ;;  %v3431_v3 = vsel %vm3303_vm3, %v12176_v0, 0.0  ;;  %v3177_v25 = vsub.s32 %v3105_v49, %v9363_v8  ;;  %vm3305_vm0 = vcmp.eq.s32.totalorder %v3175_v40, %v9386_v23  ;;  %v12178_v50 = vld [vmem:[#allocation60_spill] sm:$0xff]  ;;  %v12179_v49 = vld [vmem:[#allocation53_spill] sm:$0xff] }
 0x490   : > { %v3432_v59 = vsel %vm3304_vm1, %v12177_v18, 0.0  ;;  %v3107_v13 = vadd.s32 48, %v11833_v12  ;;  %v3178_v56 = vsub.s32 %v3106_v33, %v9315_v31  ;;  %vm3306_vm15 = vcmp.eq.s32.totalorder %v3176_v15, %v9386_v23 }
 0x491   : > { %v3557_v54 = vadd.f32 %v3556_v60, %v3429_v36  ;;  %v3433_v43 = vsel %vm3305_vm0, %v12178_v50, 0.0  ;;  %v3179_v36 = vsub.s32 %v3106_v33, %v9363_v8  ;;  %vm3307_vm2 = vcmp.eq.s32.totalorder %v3177_v25, %v9386_v23  ;;  %v12181_v33 = vld [vmem:[#allocation63_spill] sm:$0xff]  ;;  %v12182_v50 = vld [vmem:[#allocation65_spill] sm:$0xff] }
 0x492   : > { %v3434_v62 = vsel %vm3306_vm15, %v12179_v49, 0.0  ;;  %v3180_v40 = vsub.s32 %v3107_v13, %v9315_v31  ;;  %vm3308_vm3 = vcmp.eq.s32.totalorder %v3178_v56, %v9386_v23  ;;  %v3109_v25 = vadd.s32 64, %v11833_v12 }
 0x493   : > { %v3558_v39 = vadd.f32 %v3557_v54, %v3430_v24  ;;  %v3108_v54 = vadd.s32 56, %v11833_v12  ;;  %v12180_v24 = vld [vmem:[#allocation61_spill] sm:$0xff]  ;;  %vm3309_vm1 = vcmp.eq.s32.totalorder %v3179_v36, %v9386_v23  ;;  %v3110_v36 = vadd.s32 72, %v11833_v12 }
 0x494   : > { %v3435_v18 = vsel %vm3307_vm2, %v12180_v24, 0.0  ;;  %vm3310_vm0 = vcmp.eq.s32.totalorder %v3180_v40, %v9386_v23  ;;  %v3437_v49 = vsel %vm3309_vm1, %v12182_v50, 0.0  ;;  %v12184_v24 = vld [vmem:[#allocation66_spill] sm:$0xff]  ;;  %v3185_v40 = vsub.s32 %v3109_v25, %v9363_v8  ;;  %v12186_v50 = vld [vmem:[#allocation71_spill] sm:$0xff] }
 0x495   : > { %v3559_v32 = vadd.f32 %v3558_v39, %v3431_v3  ;;  %v3181_v3 = vsub.s32 %v3107_v13, %v9363_v8  ;;  %v3436_v39 = vsel %vm3308_vm3, %v12181_v33, 0.0  ;;  %v3183_v56 = vsub.s32 %v3108_v54, %v9363_v8  ;;  %v12183_v13 = vld [vmem:[#allocation56_spill] sm:$0xff] }
 0x497   : > { %v3560_v0 = vadd.f32 %v3559_v32, %v3432_v59  ;;  %v3182_v59 = vsub.s32 %v3108_v54, %v9315_v31  ;;  %vm3311_vm15 = vcmp.eq.s32.totalorder %v3181_v3, %v9386_v23  ;;  %vm3313_vm3 = vcmp.eq.s32.totalorder %v3183_v56, %v9386_v23  ;;  %v12185_v54 = vld [vmem:[#allocation69_spill] sm:$0xff] }
 0x498   : > { %v3439_v33 = vsel %vm3311_vm15, %v12184_v24, 0.0  ;;  %v3111_v3 = vadd.s32 80, %v11833_v12  ;;  %v3112_v56 = vadd.s32 88, %v11833_v12  ;;  %v12188_v24 = vld [vmem:[#allocation70_spill] sm:$0xff] }
 0x499   : > { %v3561_v60 = vadd.f32 %v3560_v0, %v3433_v43  ;;  %v3438_v0 = vsel %vm3310_vm0, %v12183_v13, 0.0  ;;  %vm3312_vm2 = vcmp.eq.s32.totalorder %v3182_v59, %v9386_v23  ;;  %v3441_v13 = vsel %vm3313_vm3, %v12186_v50, 0.0  ;;  %v12190_v50 = vld [vmem:[#allocation77_spill] sm:$0xff] }
 0x49a   : > { %v3187_v59 = vsub.s32 %v3110_v36, %v9363_v8  ;;  %vm3315_vm0 = vcmp.eq.s32.totalorder %v3185_v40, %v9386_v23  ;;  %v3113_v40 = vadd.s32 96, %v11833_v12 }
 0x49b   : > { %v3562_v15 = vadd.f32 %v3561_v60, %v3434_v62  ;;  %v3184_v62 = vsub.s32 %v3109_v25, %v9315_v31  ;;  %v12187_v25 = vld [vmem:[#allocation64_spill] sm:$0xff] }
 0x49d   : > { %v3563_v32 = vadd.f32 %v3562_v15, %v3435_v18  ;;  %v3440_v15 = vsel %vm3312_vm2, %v12185_v54, 0.0  ;;  %vm3314_vm1 = vcmp.eq.s32.totalorder %v3184_v62, %v9386_v23  ;;  %v3443_v54 = vsel %vm3315_vm0, %v12188_v24, 0.0  ;;  %v12192_v24 = vld [vmem:[#allocation74_spill] sm:$0xff] }
 0x49e   : > { %v3189_v62 = vsub.s32 %v3111_v3, %v9363_v8  ;;  %vm3317_vm2 = vcmp.eq.s32.totalorder %v3187_v59, %v9386_v23  ;;  %v3114_v59 = vadd.s32 104, %v11833_v12 }
 0x49f   : > { %v3564_v43 = vadd.f32 %v3563_v32, %v3436_v39  ;;  %v3186_v39 = vsub.s32 %v3110_v36, %v9315_v31  ;;  %v12189_v36 = vld [vmem:[#allocation73_spill] sm:$0xff] }
 0x4a1   : > { %v3565_v60 = vadd.f32 %v3564_v43, %v3437_v49  ;;  %v3442_v43 = vsel %vm3314_vm1, %v12187_v25, 0.0  ;;  %vm3316_vm15 = vcmp.eq.s32.totalorder %v3186_v39, %v9386_v23  ;;  %v3445_v25 = vsel %vm3317_vm2, %v12190_v50, 0.0  ;;  %v12194_v50 = vld [vmem:[#allocation81_spill] sm:$0xff] }
 0x4a2   : > { %v3191_v39 = vsub.s32 %v3112_v56, %v9363_v8  ;;  %vm3319_vm1 = vcmp.eq.s32.totalorder %v3189_v62, %v9386_v23  ;;  %v3115_v62 = vadd.s32 112, %v11833_v12 }
 0x4a3   : > { %v3566_v18 = vadd.f32 %v3565_v60, %v3438_v0  ;;  %v3188_v0 = vsub.s32 %v3111_v3, %v9315_v31  ;;  %v12191_v3 = vld [vmem:[#allocation67_spill] sm:$0xff] }
 0x4a5   : > { %v3567_v32 = vadd.f32 %v3566_v18, %v3439_v33  ;;  %v3444_v18 = vsel %vm3316_vm15, %v12189_v36, 0.0  ;;  %vm3318_vm3 = vcmp.eq.s32.totalorder %v3188_v0, %v9386_v23  ;;  %v3447_v36 = vsel %vm3319_vm1, %v12192_v24, 0.0  ;;  %v12196_v24 = vld [vmem:[#allocation78_spill] sm:$0xff] }
 0x4a6   : > { %v3193_v0 = vsub.s32 %v3113_v40, %v9363_v8  ;;  %vm3321_vm15 = vcmp.eq.s32.totalorder %v3191_v39, %v9386_v23  ;;  %v3116_v39 = vadd.s32 120, %v11833_v12  ;;  %v12198_v12 = vld [vmem:[#allocation87_spill] sm:$0xff] }
 0x4a7   : > { %v3568_v49 = vadd.f32 %v3567_v32, %v3440_v15  ;;  %v3190_v15 = vsub.s32 %v3112_v56, %v9315_v31  ;;  %v12193_v56 = vld [vmem:[#allocation79_spill] sm:$0xff] }
 0x4a9   : > { %v3569_v60 = vadd.f32 %v3568_v49, %v3441_v13  ;;  %v3446_v49 = vsel %vm3318_vm3, %v12191_v3, 0.0  ;;  %vm3320_vm0 = vcmp.eq.s32.totalorder %v3190_v15, %v9386_v23  ;;  %v3449_v3 = vsel %vm3321_vm15, %v12194_v50, 0.0 }
 0x4aa   : > { %v3195_v15 = vsub.s32 %v3114_v59, %v9363_v8  ;;  %vm3323_vm3 = vcmp.eq.s32.totalorder %v3193_v0, %v9386_v23  ;;  %v3198_v0 = vsub.s32 %v3116_v39, %v9315_v31  ;;  %v3199_v50 = vsub.s32 %v3116_v39, %v9363_v8  ;;  %v12202_v39 = vld [vmem:[#allocation95_spill] sm:$0xff] }
 0x4ab   : > { %v3570_v33 = vadd.f32 %v3569_v60, %v3442_v43  ;;  %v3192_v43 = vsub.s32 %v3113_v40, %v9315_v31  ;;  %v12195_v40 = vld [vmem:[#allocation72_spill] sm:$0xff] }
 0x4ad   : > { %v3571_v32 = vadd.f32 %v3570_v33, %v3443_v54  ;;  %v3448_v33 = vsel %vm3320_vm0, %v12193_v56, 0.0  ;;  %vm3322_vm2 = vcmp.eq.s32.totalorder %v3192_v43, %v9386_v23  ;;  %v3451_v56 = vsel %vm3323_vm3, %v12196_v24, 0.0 }
 0x4ae   : > { %v3197_v43 = vsub.s32 %v3115_v62, %v9363_v8  ;;  %vm3325_vm0 = vcmp.eq.s32.totalorder %v3195_v15, %v9386_v23  ;;  %vm3328_vm3 = vcmp.eq.s32.totalorder %v3198_v0, %v9386_v23 }
 0x4af   : > { %v3572_v13 = vadd.f32 %v3571_v32, %v3444_v18  ;;  %v3194_v18 = vsub.s32 %v3114_v59, %v9315_v31  ;;  %v12197_v59 = vld [vmem:[#allocation85_spill] sm:$0xff] }
 0x4b1   : > { %v3573_v60 = vadd.f32 %v3572_v13, %v3445_v25  ;;  %v3450_v13 = vsel %vm3322_vm2, %v12195_v40, 0.0  ;;  %vm3324_vm1 = vcmp.eq.s32.totalorder %v3194_v18, %v9386_v23  ;;  %vm3327_vm2 = vcmp.eq.s32.totalorder %v3197_v43, %v9386_v23  ;;  %v12200_v40 = vld [vmem:[#allocation82_spill] sm:$0xff] }
 0x4b3   : > { %v3574_v54 = vadd.f32 %v3573_v60, %v3446_v49  ;;  %v3196_v49 = vsub.s32 %v3115_v62, %v9315_v31  ;;  %v3200_v62 = vsub.s32 %v9234_v29, %v9315_v31  ;;  %v12204_v29 = vld [vmem:[#allocation86_spill] sm:$0xff] }
 0x4b4   : > { %v3459_v31 = vsel %vm9580_vm4, %v12204_v29, 0.0 }
 0x4b5   : > { %v3575_v32 = vadd.f32 %v3574_v54, %v3447_v36  ;;  %v3452_v54 = vsel %vm3324_vm1, %v12197_v59, 0.0  ;;  %vm3326_vm15 = vcmp.eq.s32.totalorder %v3196_v49, %v9386_v23  ;;  %vm3329_vm1 = vcmp.eq.s32.totalorder %v3199_v50, %v9386_v23  ;;  %v12206_v50 = vld [vmem:[#allocation101_spill] sm:$0xff] }
 0x4b7   : > { %v3576_v25 = vadd.f32 %v3575_v32, %v3448_v33  ;;  %v3453_v32 = vsel %vm3325_vm0, %v12198_v12, 0.0  ;;  %vm3330_vm0 = vcmp.eq.s32.totalorder %v3200_v62, %v9386_v23  ;;  %v3461_v23 = vsel %vm9596_vm6, %v12206_v50, 0.0  ;;  %v12220_v50 = vld [vmem:[#allocation106_spill] sm:$0xff] }
 0x4b9   : > { %v3577_v60 = vadd.f32 %v3576_v25, %v3449_v3  ;;  %v12199_v3 = vld [vmem:[#allocation75_spill] sm:$0xff] }
 0x4ba   : > { %v3454_v25 = vsel %vm3326_vm15, %v12199_v3, 0.0  ;;  %v12207_v3 = vld [vmem:[#allocation83_spill] sm:$0xff]  ;;  %vm12244_vm15 = vnez %v11904_v57 }
 0x4bb   : > { %v3578_v36 = vadd.f32 %v3577_v60, %v3450_v13  ;;  %v3455_v13 = vsel %vm3327_vm2, %v12200_v40, 0.0  ;;  %v12201_v60 = vld [vmem:[#allocation89_spill] sm:$0xff] }
 0x4bc   : > { %v3456_v24 = vsel %vm3328_vm3, %v12201_v60, 0.0  ;;  %v12210_v60 = vld [vmem:[#allocation105_spill] sm:$0xff]  ;;  %vm12249_vm3 = vnez %v11911_v42 }
 0x4bd   : > { %v3579_v33 = vadd.f32 %v3578_v36, %v3451_v56  ;;  %v3457_v56 = vsel %vm3329_vm1, %v12202_v39, 0.0  ;;  %v12203_v36 = vld [vmem:[#allocation80_spill] sm:$0xff]  ;;  %v3465_v16 = vsel %vm9628_vm10, %v12210_v60, 0.0 }
 0x4be   : > { %v3458_v59 = vsel %vm3330_vm0, %v12203_v36, 0.0  ;;  %v12213_v36 = vld [vmem:[#allocation102_spill] sm:$0xff]  ;;  %v12231_v60 = vld [vmem:[#allocation188_spill] sm:$0xff]  ;;  %vm12254_vm0 = vnez %v11918_v53 }
 0x4bf   : > { %v3580_v18 = vadd.f32 %v3579_v33, %v3452_v54  ;;  %v12205_v33 = vld [vmem:[#allocation93_spill] sm:$0xff]  ;;  %v3468_v7 = vsel %vm9652_vm13, %v12213_v36, 0.0  ;;  %vm12232_vm10 = vnez %v12231_v60  ;;  %v12238_v36 = vld [vmem:[#allocation107_spill] sm:$0xff]  ;;  %vm12239_vm13 = vnez %v11897_v28 }
 0x4c0   : > { %v3460_v12 = vsel %vm9588_vm5, %v12205_v33, 0.0  ;;  %vm12219_vm5 = vnez %v11869_v14 }
 0x4c1   : > { %v3581_v15 = vadd.f32 %v3580_v18, %v3453_v32 }
 0x4c3   : > { %v3582_v49 = vadd.f32 %v3581_v15, %v3454_v25  ;;  %v3462_v25 = vsel %vm9604_vm7, %v12207_v3, 0.0  ;;  %v12208_v15 = vld [vmem:[#allocation90_spill] sm:$0xff]  ;;  %v12223_v3 = vld [vmem:[#allocation113_spill] sm:$0xff]  ;;  %vm12224_vm7 = vnez %v11876_v63 }
 0x4c4   : > { %v3463_v61 = vsel %vm9612_vm8, %v12208_v15, 0.0  ;;  %v3473_v34 = vsel %vm12224_vm7, %v12223_v3, 0.0  ;;  %v12226_v15 = vld [vmem:[#allocation187_spill] sm:$0xff]  ;;  %vm12264_vm7 = vnez %v11932_v26 }
 0x4c5   : > { %v3583_v8 = vadd.f32 %v3582_v49, %v3455_v13  ;;  %v12209_v13 = vld [vmem:[#allocation97_spill] sm:$0xff]  ;;  %vm12227_vm8 = vnez %v12226_v15 }
 0x4c6   : > { %v3464_v38 = vsel %vm9620_vm9, %v12209_v13, 0.0  ;;  %v12228_v13 = vld [vmem:[#allocation103_spill] sm:$0xff]  ;;  %vm12229_vm9 = vnez %v11883_v1  ;;  %v3479_v1 = vsel %vm12239_vm13, %v12238_v36, 0.0  ;;  %v12256_v15 = vld [vmem:[#allocation193_spill] sm:$0xff]  ;;  %vm12279_vm13 = vnez %v11953_v22 }
 0x4c7   : > { %v3584_v43 = vadd.f32 %v3583_v8, %v3456_v24  ;;  %v12211_v8 = vld [vmem:[#allocation88_spill] sm:$0xff]  ;;  %v3475_v14 = vsel %vm12229_vm9, %v12228_v13, 0.0  ;;  %v12258_v13 = vld [vmem:[#allocation115_spill] sm:$0xff]  ;;  %vm12269_vm9 = vnez %v11939_v30  ;;  %v12270_v36 = vld [vmem:[#allocation13_spill] sm:$0xff] }
 0x4c8   : > { %v3466_v51 = vsel %vm9636_vm11, %v12211_v8, 0.0  ;;  %v12233_v8 = vld [vmem:[#allocation117_spill] sm:$0xff]  ;;  %vm12234_vm11 = vnez %v11890_v6 }
 0x4c9   : > { %v3585_v54 = vadd.f32 %v3584_v43, %v3457_v56  ;;  %v12212_v56 = vld [vmem:[#allocation94_spill] sm:$0xff]  ;;  %v3477_v63 = vsel %vm12234_vm11, %v12233_v8, 0.0  ;;  %vm12274_vm11 = vnez %v11946_v46 }
 0x4ca   : > { %v3467_v48 = vsel %vm9644_vm12, %v12212_v56, 0.0  ;;  %v12236_v56 = vld [vmem:[#allocation189_spill] sm:$0xff] }
 0x4cb   : > { %v3586_v0 = vadd.f32 %v3585_v54, %v3458_v59  ;;  %v12214_v54 = vld [vmem:[#allocation109_spill] sm:$0xff]  ;;  %vm12237_vm12 = vnez %v12236_v56 }
 0x4cc   : > { %v3469_v4 = vsel %vm9660_vm14, %v12214_v54, 0.0  ;;  %v12241_v54 = vld [vmem:[#allocation190_spill] sm:$0xff] }
 0x4cd   : > { %v3587_v32 = vadd.f32 %v3586_v0, %v3459_v31  ;;  %v12215_v31 = vld [vmem:[#allocation91_spill] sm:$0xff]  ;;  %v12216_v0 = vld [vmem:[#allocation185_spill] sm:$0xff]  ;;  %vm12242_vm14 = vnez %v12241_v54  ;;  %v12273_v54 = vld [vmem:[#allocation14_spill] sm:$0xff] }
 0x4ce   : > { %vm12217_vm4 = vnez %v12216_v0  ;;  %v3493_v26 = vsel %vm12274_vm11, %v12273_v54, 0.0  ;;  %v12311_v54 = vld [vmem:[#allocation204_spill] sm:$0xff]  ;;  %vm12314_vm11 = vnez %v12002_v21 }
 0x4cf   : > { %v3588_v18 = vadd.f32 %v3587_v32, %v3460_v12  ;;  %v3470_v44 = vsel %vm12217_vm4, %v12215_v31, 0.0  ;;  %v12218_v12 = vld [vmem:[#allocation98_spill] sm:$0xff]  ;;  %v12243_v31 = vld [vmem:[#allocation120_spill] sm:$0xff]  ;;  %vm12257_vm4 = vnez %v12256_v15 }
 0x4d0   : > { %v3471_v20 = vsel %vm12219_vm5, %v12218_v12, 0.0  ;;  %v3481_v6 = vsel %vm12244_vm15, %v12243_v31, 0.0  ;;  %vm12259_vm5 = vnez %v11925_v47  ;;  %v12276_v31 = vld [vmem:[#allocation197_spill] sm:$0xff]  ;;  %vm12284_vm15 = vnez %v11960_v5  ;;  %v12291_v15 = vld [vmem:[#allocation200_spill] sm:$0xff] }
 0x4d1   : > { %v3589_v62 = vadd.f32 %v3588_v18, %v3461_v23  ;;  %v12221_v23 = vld [vmem:[#allocation186_spill] sm:$0xff]  ;;  %v3487_v42 = vsel %vm12259_vm5, %v12258_v13, 0.0  ;;  %vm12299_vm5 = vnez %v11981_v9 }
 0x4d2   : > { %vm12222_vm6 = vnez %v12221_v23  ;;  %v12250_v23 = vld [vmem:[#allocation118_spill] sm:$0xff] }
 0x4d3   : > { %v3590_v40 = vadd.f32 %v3589_v62, %v3462_v25  ;;  %v3472_v58 = vsel %vm12222_vm6, %v12220_v50, 0.0  ;;  %v12225_v62 = vld [vmem:[#allocation96_spill] sm:$0xff]  ;;  %v12293_v13 = vld [vmem:[#allocation22_spill] sm:$0xff] }
 0x4d5   : > { %v3591_v49 = vadd.f32 %v3590_v40, %v3463_v61  ;;  %v3474_v61 = vsel %vm12227_vm8, %v12225_v62, 0.0  ;;  %v12255_v62 = vld [vmem:[#allocation112_spill] sm:$0xff] }
 0x4d7   : > { %v3592_v24 = vadd.f32 %v3591_v49, %v3464_v38  ;;  %v12230_v49 = vld [vmem:[#allocation110_spill] sm:$0xff] }
 0x4d9   : > { %v3593_v39 = vadd.f32 %v3592_v24, %v3465_v16  ;;  %v3476_v16 = vsel %vm12232_vm10, %v12230_v49, 0.0  ;;  %v12261_v49 = vld [vmem:[#allocation194_spill] sm:$0xff] }
 0x4da   : > { %vm12262_vm6 = vnez %v12261_v49 }
 0x4db   : > { %v3594_v43 = vadd.f32 %v3593_v39, %v3466_v51  ;;  %v12235_v39 = vld [vmem:[#allocation99_spill] sm:$0xff] }
 0x4dd   : > { %v3595_v59 = vadd.f32 %v3594_v43, %v3467_v48  ;;  %v3478_v48 = vsel %vm12237_vm12, %v12235_v39, 0.0  ;;  %vm12277_vm12 = vnez %v12276_v31 }
 0x4df   : > { %v3596_v29 = vadd.f32 %v3595_v59, %v3468_v7  ;;  %v12240_v59 = vld [vmem:[#allocation114_spill] sm:$0xff] }
 0x4e1   : > { %v3597_v33 = vadd.f32 %v3596_v29, %v3469_v4  ;;  %v3480_v4 = vsel %vm12242_vm14, %v12240_v59, 0.0 }
 0x4e3   : > { %v3598_v32 = vadd.f32 %v3597_v33, %v3470_v44  ;;  %v12245_v44 = vld [vmem:[#allocation104_spill] sm:$0xff]  ;;  %v12246_v33 = vld [vmem:[#allocation191_spill] sm:$0xff] }
 0x4e4   : > { %vm12247_vm2 = vnez %v12246_v33 }
 0x4e5   : > { %v3599_v18 = vadd.f32 %v3598_v32, %v3471_v20  ;;  %v3482_v12 = vsel %vm12247_vm2, %v12245_v44, 0.0  ;;  %v12248_v32 = vld [vmem:[#allocation111_spill] sm:$0xff]  ;;  %v12278_v44 = vld [vmem:[#allocation16_spill] sm:$0xff] }
 0x4e6   : > { %v3483_v28 = vsel %vm12249_vm3, %v12248_v32, 0.0  ;;  %v3495_v30 = vsel %vm12279_vm13, %v12278_v44, 0.0  ;;  %vm12289_vm3 = vnez %v11967_v52  ;;  %vm12319_vm13 = vnez %v12009_v10 }
 0x4e7   : > { %v3600_v25 = vadd.f32 %v3599_v18, %v3472_v58  ;;  %v12251_v58 = vld [vmem:[#allocation192_spill] sm:$0xff] }
 0x4e8   : > { %vm12252_vm1 = vnez %v12251_v58  ;;  %v12285_v58 = vld [vmem:[#allocation19_spill] sm:$0xff] }
 0x4e9   : > { %v3601_v40 = vadd.f32 %v3600_v25, %v3473_v34  ;;  %v3484_v18 = vsel %vm12252_vm1, %v12250_v23, 0.0  ;;  %v12253_v34 = vld [vmem:[#allocation122_spill] sm:$0xff]  ;;  %vm12292_vm1 = vnez %v12291_v15 }
 0x4ea   : > { %v3485_v57 = vsel %vm12254_vm0, %v12253_v34, 0.0  ;;  %vm12294_vm0 = vnez %v11974_v11 }
 0x4eb   : > { %v3602_v38 = vadd.f32 %v3601_v40, %v3474_v61  ;;  %v3486_v61 = vsel %vm12257_vm4, %v12255_v62, 0.0  ;;  %v12290_v62 = vld [vmem:[#allocation21_spill] sm:$0xff]  ;;  %v3501_v5 = vsel %vm12294_vm0, %v12293_v13, 0.0  ;;  %vm12334_vm0 = vnez %v12030_v27 }
 0x4ed   : > { %v3603_v24 = vadd.f32 %v3602_v38, %v3475_v14  ;;  %v12260_v38 = vld [vmem:[#allocation121_spill] sm:$0xff] }
 0x4ee   : > { %v3488_v60 = vsel %vm12262_vm6, %v12260_v38, 0.0  ;;  %v12296_v38 = vld [vmem:[#allocation201_spill] sm:$0xff] }
 0x4ef   : > { %v3604_v51 = vadd.f32 %v3603_v24, %v3476_v16  ;;  %v12263_v24 = vld [vmem:[#allocation123_spill] sm:$0xff]  ;;  %vm12297_vm4 = vnez %v12296_v38 }
 0x4f0   : > { %v3489_v53 = vsel %vm12264_vm7, %v12263_v24, 0.0  ;;  %vm12304_vm7 = vnez %v11988_v17 }
 0x4f1   : > { %v3605_v43 = vadd.f32 %v3604_v51, %v3477_v63  ;;  %v12265_v63 = vld [vmem:[#allocation11_spill] sm:$0xff] }
 0x4f2   : > { %v12266_v51 = vld [vmem:[#allocation195_spill] sm:$0xff] }
 0x4f3   : > { %v3606_v7 = vadd.f32 %v3605_v43, %v3478_v48  ;;  %vm12267_vm8 = vnez %v12266_v51  ;;  %v12268_v48 = vld [vmem:[#allocation12_spill] sm:$0xff] }
 0x4f4   : > { %v3490_v39 = vsel %vm12267_vm8, %v12265_v63, 0.0  ;;  %v3491_v47 = vsel %vm12269_vm9, %v12268_v48, 0.0  ;;  %v12305_v48 = vld [vmem:[#allocation27_spill] sm:$0xff]  ;;  %vm12309_vm9 = vnez %v11995_v41 }
 0x4f5   : > { %v3607_v29 = vadd.f32 %v3606_v7, %v3479_v1  ;;  %v12271_v1 = vld [vmem:[#allocation196_spill] sm:$0xff] }
 0x4f6   : > { %vm12272_vm10 = vnez %v12271_v1  ;;  %v12308_v1 = vld [vmem:[#allocation28_spill] sm:$0xff] }
 0x4f7   : > { %v3608_v0 = vadd.f32 %v3607_v29, %v3480_v4  ;;  %v3492_v7 = vsel %vm12272_vm10, %v12270_v36, 0.0  ;;  %v12275_v29 = vld [vmem:[#allocation15_spill] sm:$0xff]  ;;  %v3507_v9 = vsel %vm12309_vm9, %v12308_v1, 0.0  ;;  %vm12312_vm10 = vnez %v12311_v54 }
 0x4f8   : > { %vm12349_vm9 = vnez %v12051_v19  ;;  %v12355_v54 = vld [vmem:[#allocation47_spill] sm:$0xff] }
 0x4f9   : > { %v3609_v20 = vadd.f32 %v3608_v0, %v3481_v6  ;;  %v3494_v6 = vsel %vm12277_vm12, %v12275_v29, 0.0  ;;  %v12313_v29 = vld [vmem:[#allocation30_spill] sm:$0xff] }
 0x4fa   : > { %v3509_v17 = vsel %vm12314_vm11, %v12313_v29, 0.0  ;;  %vm12354_vm11 = vnez %v12058_v35 }
 0x4fb   : > { %v3610_v50 = vadd.f32 %v3609_v20, %v3482_v12  ;;  %v12280_v12 = vld [vmem:[#allocation17_spill] sm:$0xff]  ;;  %v12281_v20 = vld [vmem:[#allocation198_spill] sm:$0xff] }
 0x4fc   : > { %vm12282_vm14 = vnez %v12281_v20  ;;  %v12320_v20 = vld [vmem:[#allocation33_spill] sm:$0xff] }
 0x4fd   : > { %v3611_v3 = vadd.f32 %v3610_v50, %v3483_v28  ;;  %v3496_v32 = vsel %vm12282_vm14, %v12280_v12, 0.0  ;;  %v12283_v50 = vld [vmem:[#allocation18_spill] sm:$0xff] }
 0x4fe   : > { %v3497_v46 = vsel %vm12284_vm15, %v12283_v50, 0.0  ;;  %vm12324_vm15 = vnez %v12016_v45 }
 0x4ff   : > { %v3612_v25 = vadd.f32 %v3611_v3, %v3484_v18  ;;  %v12286_v18 = vld [vmem:[#allocation199_spill] sm:$0xff] }
 0x500   : > { %vm12287_vm2 = vnez %v12286_v18  ;;  %v12326_v18 = vld [vmem:[#allocation207_spill] sm:$0xff] }
 0x501   : > { %v3613_v40 = vadd.f32 %v3612_v25, %v3485_v57  ;;  %v3498_v3 = vsel %vm12287_vm2, %v12285_v58, 0.0  ;;  %v12288_v57 = vld [vmem:[#allocation20_spill] sm:$0xff]  ;;  %v12325_v58 = vld [vmem:[#allocation35_spill] sm:$0xff]  ;;  %vm12327_vm2 = vnez %v12326_v18 }
 0x502   : > { %v3499_v22 = vsel %vm12289_vm3, %v12288_v57, 0.0  ;;  %v12328_v57 = vld [vmem:[#allocation36_spill] sm:$0xff]  ;;  %vm12329_vm3 = vnez %v12023_v2 }
 0x503   : > { %v3614_v14 = vadd.f32 %v3613_v40, %v3486_v61  ;;  %v3500_v61 = vsel %vm12292_vm1, %v12290_v62, 0.0  ;;  %v3515_v10 = vsel %vm12329_vm3, %v12328_v57, 0.0  ;;  %v12331_v62 = vld [vmem:[#allocation208_spill] sm:$0xff] }
 0x504   : > { %vm12332_vm1 = vnez %v12331_v62 }
 0x505   : > { %v3615_v16 = vadd.f32 %v3614_v14, %v3487_v42  ;;  %v12295_v14 = vld [vmem:[#allocation23_spill] sm:$0xff] }
 0x506   : > { %v3502_v49 = vsel %vm12297_vm4, %v12295_v14, 0.0 }
 0x507   : > { %v3616_v8 = vadd.f32 %v3615_v16, %v3488_v60  ;;  %v12298_v16 = vld [vmem:[#allocation24_spill] sm:$0xff] }
 0x508   : > { %v3503_v52 = vsel %vm12299_vm5, %v12298_v16, 0.0  ;;  %vm12339_vm5 = vnez %v12037_v55  ;;  %v12340_v16 = vld [vmem:[#allocation41_spill] sm:$0xff] }
 0x509   : > { %v3617_v56 = vadd.f32 %v3616_v8, %v3489_v53  ;;  %v12300_v53 = vld [vmem:[#allocation25_spill] sm:$0xff]  ;;  %v12301_v8 = vld [vmem:[#allocation202_spill] sm:$0xff] }
 0x50a   : > { %vm12302_vm6 = vnez %v12301_v8  ;;  %v12343_v8 = vld [vmem:[#allocation42_spill] sm:$0xff] }
 0x50b   : > { %v3618_v43 = vadd.f32 %v3617_v56, %v3490_v39  ;;  %v3504_v63 = vsel %vm12302_vm6, %v12300_v53, 0.0  ;;  %v12303_v39 = vld [vmem:[#allocation26_spill] sm:$0xff] }
 0x50c   : > { %v3505_v11 = vsel %vm12304_vm7, %v12303_v39, 0.0  ;;  %vm12344_vm7 = vnez %v12044_v37  ;;  %v12346_v39 = vld [vmem:[#allocation211_spill] sm:$0xff] }
 0x50d   : > { %v3619_v59 = vadd.f32 %v3618_v43, %v3491_v47  ;;  %v12306_v47 = vld [vmem:[#allocation203_spill] sm:$0xff]  ;;  %v3521_v27 = vsel %vm12344_vm7, %v12343_v8, 0.0 }
 0x50e   : > { %vm12307_vm8 = vnez %v12306_v47 }
 0x50f   : > { %v3620_v4 = vadd.f32 %v3619_v59, %v3492_v7  ;;  %v3506_v43 = vsel %vm12307_vm8, %v12305_v48, 0.0  ;;  %v12310_v59 = vld [vmem:[#allocation29_spill] sm:$0xff]  ;;  %vm12347_vm8 = vnez %v12346_v39  ;;  %v12348_v48 = vld [vmem:[#allocation44_spill] sm:$0xff] }
 0x510   : > { %v3523_v55 = vsel %vm12349_vm9, %v12348_v48, 0.0 }
 0x511   : > { %v3621_v0 = vadd.f32 %v3620_v4, %v3493_v26  ;;  %v3508_v26 = vsel %vm12312_vm10, %v12310_v59, 0.0 }
 0x513   : > { %v3622_v33 = vadd.f32 %v3621_v0, %v3494_v6  ;;  %v12315_v6 = vld [vmem:[#allocation31_spill] sm:$0xff]  ;;  %v12316_v0 = vld [vmem:[#allocation205_spill] sm:$0xff] }
 0x514   : > { %vm12317_vm12 = vnez %v12316_v0  ;;  %v12361_v0 = vld [vmem:[#allocation49_spill] sm:$0xff] }
 0x515   : > { %v3623_v28 = vadd.f32 %v3622_v33, %v3495_v30  ;;  %v3510_v44 = vsel %vm12317_vm12, %v12315_v6, 0.0  ;;  %v12318_v33 = vld [vmem:[#allocation32_spill] sm:$0xff] }
 0x516   : > { %v3511_v41 = vsel %vm12319_vm13, %v12318_v33, 0.0 }
 0x517   : > { %v3624_v23 = vadd.f32 %v3623_v28, %v3496_v32  ;;  %v12321_v32 = vld [vmem:[#allocation206_spill] sm:$0xff] }
 0x518   : > { %vm12322_vm14 = vnez %v12321_v32  ;;  %v12367_v32 = vld [vmem:[#allocation57_spill] sm:$0xff] }
 0x519   : > { %v3625_v34 = vadd.f32 %v3624_v23, %v3497_v46  ;;  %v3512_v28 = vsel %vm12322_vm14, %v12320_v20, 0.0  ;;  %v12323_v46 = vld [vmem:[#allocation34_spill] sm:$0xff] }
 0x51a   : > { %v3513_v21 = vsel %vm12324_vm15, %v12323_v46, 0.0 }
 0x51b   : > { %v3626_v25 = vadd.f32 %v3625_v34, %v3498_v3  ;;  %v3514_v3 = vsel %vm12327_vm2, %v12325_v58, 0.0 }
 0x51d   : > { %v3627_v40 = vadd.f32 %v3626_v25, %v3499_v22  ;;  %v12330_v25 = vld [vmem:[#allocation37_spill] sm:$0xff] }
 0x51e   : > { %v3516_v15 = vsel %vm12332_vm1, %v12330_v25, 0.0  ;;  %v12377_v25 = vld [vmem:[#allocation220_spill] sm:$0xff] }
 0x51f   : > { %v3628_v42 = vadd.f32 %v3627_v40, %v3500_v61  ;;  %v12333_v40 = vld [vmem:[#allocation38_spill] sm:$0xff] }
 0x520   : > { %v3517_v45 = vsel %vm12334_vm0, %v12333_v40, 0.0  ;;  %vm12378_vm0 = vnez %v12377_v25  ;;  %v12380_v40 = vld [vmem:[#allocation221_spill] sm:$0xff]  ;;  %v12425_v25 = vld [vmem:[#allocation236_spill] sm:$0xff] }
 0x521   : > { %v3629_v60 = vadd.f32 %v3628_v42, %v3501_v5  ;;  %v12335_v5 = vld [vmem:[#allocation39_spill] sm:$0xff]  ;;  %v12336_v42 = vld [vmem:[#allocation209_spill] sm:$0xff] }
 0x522   : > { %vm12337_vm4 = vnez %v12336_v42  ;;  %v12383_v42 = vld [vmem:[#allocation222_spill] sm:$0xff] }
 0x523   : > { %v3630_v24 = vadd.f32 %v3629_v60, %v3502_v49  ;;  %v3518_v14 = vsel %vm12337_vm4, %v12335_v5, 0.0  ;;  %v12338_v49 = vld [vmem:[#allocation40_spill] sm:$0xff]  ;;  %vm12381_vm4 = vnez %v12380_v40  ;;  %v12428_v40 = vld [vmem:[#allocation237_spill] sm:$0xff] }
 0x524   : > { %v3519_v2 = vsel %vm12339_vm5, %v12338_v49, 0.0  ;;  %v12382_v5 = vld [vmem:[#allocation100_spill] sm:$0xff]  ;;  %vm12384_vm5 = vnez %v12383_v42  ;;  %v12431_v42 = vld [vmem:[#allocation238_spill] sm:$0xff] }
 0x525   : > { %v3631_v51 = vadd.f32 %v3630_v24, %v3503_v52  ;;  %v12341_v52 = vld [vmem:[#allocation210_spill] sm:$0xff]  ;;  %v12385_v49 = vld [vmem:[#allocation108_spill] sm:$0xff] }
 0x526   : > { %vm12342_vm6 = vnez %v12341_v52  ;;  %v12388_v52 = vld [vmem:[#allocation116_spill] sm:$0xff] }
 0x527   : > { %v3632_v56 = vadd.f32 %v3631_v51, %v3504_v63  ;;  %v3520_v24 = vsel %vm12342_vm6, %v12340_v16, 0.0  ;;  %v12345_v51 = vld [vmem:[#allocation43_spill] sm:$0xff] }
 0x529   : > { %v3633_v36 = vadd.f32 %v3632_v56, %v3505_v11  ;;  %v3522_v11 = vsel %vm12347_vm8, %v12345_v51, 0.0 }
 0x52b   : > { %v3634_v7 = vadd.f32 %v3633_v36, %v3506_v43  ;;  %v12350_v43 = vld [vmem:[#allocation45_spill] sm:$0xff]  ;;  %v12351_v36 = vld [vmem:[#allocation212_spill] sm:$0xff] }
 0x52c   : > { %vm12352_vm10 = vnez %v12351_v36 }
 0x52d   : > { %v3635_v4 = vadd.f32 %v3634_v7, %v3507_v9  ;;  %v3524_v1 = vsel %vm12352_vm10, %v12350_v43, 0.0  ;;  %v12353_v7 = vld [vmem:[#allocation46_spill] sm:$0xff]  ;;  %v12398_v43 = vld [vmem:[#allocation227_spill] sm:$0xff] }
 0x52e   : > { %v3525_v37 = vsel %vm12354_vm11, %v12353_v7, 0.0  ;;  %vm12399_vm10 = vnez %v12398_v43  ;;  %v12401_v7 = vld [vmem:[#allocation228_spill] sm:$0xff] }
 0x52f   : > { %v3636_v31 = vadd.f32 %v3635_v4, %v3508_v26  ;;  %v12356_v26 = vld [vmem:[#allocation213_spill] sm:$0xff]  ;;  %vm12402_vm11 = vnez %v12401_v7 }
 0x530   : > { %vm12357_vm12 = vnez %v12356_v26  ;;  %v12404_v26 = vld [vmem:[#allocation229_spill] sm:$0xff] }
 0x531   : > { %v3637_v30 = vadd.f32 %v3636_v31, %v3509_v17  ;;  %v3526_v4 = vsel %vm12357_vm12, %v12355_v54, 0.0  ;;  %v12358_v17 = vld [vmem:[#allocation48_spill] sm:$0xff]  ;;  %v12359_v31 = vld [vmem:[#allocation214_spill] sm:$0xff]  ;;  %v12403_v54 = vld [vmem:[#allocation127_spill] sm:$0xff]  ;;  %vm12405_vm12 = vnez %v12404_v26 }
 0x532   : > { %vm12360_vm13 = vnez %v12359_v31  ;;  %v12407_v31 = vld [vmem:[#allocation230_spill] sm:$0xff] }
 0x533   : > { %v3638_v12 = vadd.f32 %v3637_v30, %v3510_v44  ;;  %v3527_v19 = vsel %vm12360_vm13, %v12358_v17, 0.0  ;;  %v12362_v44 = vld [vmem:[#allocation215_spill] sm:$0xff]  ;;  %v12406_v17 = vld [vmem:[#allocation128_spill] sm:$0xff]  ;;  %vm12408_vm13 = vnez %v12407_v31 }
 0x534   : > { %vm12363_vm14 = vnez %v12362_v44  ;;  %v12410_v44 = vld [vmem:[#allocation231_spill] sm:$0xff] }
 0x535   : > { %v3639_v50 = vadd.f32 %v3638_v12, %v3511_v41  ;;  %v3528_v30 = vsel %vm12363_vm14, %v12361_v0, 0.0  ;;  %v12364_v41 = vld [vmem:[#allocation51_spill] sm:$0xff]  ;;  %v12365_v12 = vld [vmem:[#allocation216_spill] sm:$0xff]  ;;  %v12409_v0 = vld [vmem:[#allocation129_spill] sm:$0xff]  ;;  %vm12411_vm14 = vnez %v12410_v44 }
 0x536   : > { %vm12366_vm15 = vnez %v12365_v12  ;;  %v12413_v12 = vld [vmem:[#allocation232_spill] sm:$0xff] }
 0x537   : > { %v3640_v23 = vadd.f32 %v3639_v50, %v3512_v28  ;;  %v3529_v35 = vsel %vm12366_vm15, %v12364_v41, 0.0  ;;  %v12368_v28 = vld [vmem:[#allocation217_spill] sm:$0xff]  ;;  %v12412_v41 = vld [vmem:[#allocation130_spill] sm:$0xff]  ;;  %vm12414_vm15 = vnez %v12413_v12 }
 0x538   : > { %vm12369_vm2 = vnez %v12368_v28  ;;  %v12416_v28 = vld [vmem:[#allocation233_spill] sm:$0xff] }
 0x539   : > { %v3641_v34 = vadd.f32 %v3640_v23, %v3513_v21  ;;  %v3530_v50 = vsel %vm12369_vm2, %v12367_v32, 0.0  ;;  %v12370_v21 = vld [vmem:[#allocation68_spill] sm:$0xff]  ;;  %v12371_v23 = vld [vmem:[#allocation218_spill] sm:$0xff]  ;;  %v12415_v32 = vld [vmem:[#allocation131_spill] sm:$0xff]  ;;  %vm12417_vm2 = vnez %v12416_v28 }
 0x53a   : > { %vm12372_vm3 = vnez %v12371_v23  ;;  %v12419_v23 = vld [vmem:[#allocation234_spill] sm:$0xff] }
 0x53b   : > { %v3642_v22 = vadd.f32 %v3641_v34, %v3514_v3  ;;  %v3531_v58 = vsel %vm12372_vm3, %v12370_v21, 0.0  ;;  %v12373_v3 = vld [vmem:[#allocation76_spill] sm:$0xff]  ;;  %v12374_v34 = vld [vmem:[#allocation219_spill] sm:$0xff]  ;;  %vm12420_vm3 = vnez %v12419_v23 }
 0x53c   : > { %vm12375_vm1 = vnez %v12374_v34  ;;  %v12418_v21 = vld [vmem:[#allocation132_spill] sm:$0xff]  ;;  %v12422_v34 = vld [vmem:[#allocation235_spill] sm:$0xff] }
 0x53d   : > { %v3643_v61 = vadd.f32 %v3642_v22, %v3515_v10  ;;  %v3532_v57 = vsel %vm12375_vm1, %v12373_v3, 0.0  ;;  %v12376_v22 = vld [vmem:[#allocation84_spill] sm:$0xff]  ;;  %v12421_v3 = vld [vmem:[#allocation133_spill] sm:$0xff]  ;;  %vm12423_vm1 = vnez %v12422_v34 }
 0x53e   : > { %v3533_v62 = vsel %vm12378_vm0, %v12376_v22, 0.0  ;;  %v12424_v22 = vld [vmem:[#allocation134_spill] sm:$0xff]  ;;  %vm12426_vm0 = vnez %v12425_v25 }
 0x53f   : > { %v3644_v13 = vadd.f32 %v3643_v61, %v3516_v15  ;;  %v12379_v61 = vld [vmem:[#allocation92_spill] sm:$0xff] }
 0x541   : > { %v3645_v38 = vadd.f32 %v3644_v13, %v3517_v45  ;;  %v3534_v45 = vsel %vm12381_vm4, %v12379_v61, 0.0  ;;  %v12427_v61 = vld [vmem:[#allocation135_spill] sm:$0xff]  ;;  %vm12429_vm4 = vnez %v12428_v40 }
 0x543   : > { %v3646_v60 = vadd.f32 %v3645_v38, %v3518_v14  ;;  %v3535_v14 = vsel %vm12384_vm5, %v12382_v5, 0.0  ;;  %v12430_v5 = vld [vmem:[#allocation136_spill] sm:$0xff]  ;;  %vm12432_vm5 = vnez %v12431_v42 }
 0x545   : > { %v3647_v53 = vadd.f32 %v3646_v60, %v3519_v2  ;;  %v12386_v2 = vld [vmem:[#allocation223_spill] sm:$0xff] }
 0x546   : > { %vm12387_vm6 = vnez %v12386_v2  ;;  %v12434_v2 = vld [vmem:[#allocation239_spill] sm:$0xff] }
 0x547   : > { %v3648_v63 = vadd.f32 %v3647_v53, %v3520_v24  ;;  %v3536_v60 = vsel %vm12387_vm6, %v12385_v49, 0.0  ;;  %v12389_v24 = vld [vmem:[#allocation224_spill] sm:$0xff]  ;;  %v12433_v49 = vld [vmem:[#allocation137_spill] sm:$0xff]  ;;  %vm12435_vm6 = vnez %v12434_v2 }
 0x548   : > { %vm12390_vm7 = vnez %v12389_v24  ;;  %v12437_v24 = vld [vmem:[#allocation240_spill] sm:$0xff] }
 0x549   : > { %v3649_v56 = vadd.f32 %v3648_v63, %v3521_v27  ;;  %v3537_v53 = vsel %vm12390_vm7, %v12388_v52, 0.0  ;;  %v12391_v27 = vld [vmem:[#allocation119_spill] sm:$0xff]  ;;  %v12392_v63 = vld [vmem:[#allocation225_spill] sm:$0xff]  ;;  %v12436_v52 = vld [vmem:[#allocation138_spill] sm:$0xff]  ;;  %vm12438_vm7 = vnez %v12437_v24 }
 0x54a   : > { %vm12393_vm8 = vnez %v12392_v63 }
 0x54b   : > { %v3650_v47 = vadd.f32 %v3649_v56, %v3522_v11  ;;  %v3538_v51 = vsel %vm12393_vm8, %v12391_v27, 0.0  ;;  %v12394_v11 = vld [vmem:[#allocation124_spill] sm:$0xff]  ;;  %v12395_v56 = vld [vmem:[#allocation226_spill] sm:$0xff] }
 0x54c   : > { %vm12396_vm9 = vnez %v12395_v56 }
 0x54d   : > { %v3651_v9 = vadd.f32 %v3650_v47, %v3523_v55  ;;  %v3539_v48 = vsel %vm12396_vm9, %v12394_v11, 0.0  ;;  %v12397_v47 = vld [vmem:[#allocation125_spill] sm:$0xff] }
 0x54e   : > { %v3540_v36 = vsel %vm12399_vm10, %v12397_v47, 0.0 }
 0x54f   : > { %v3652_v59 = vadd.f32 %v3651_v9, %v3524_v1  ;;  %v12400_v9 = vld [vmem:[#allocation126_spill] sm:$0xff] }
 0x551   : > { %v3653_v29 = vadd.f32 %v3652_v59, %v3525_v37  ;;  %v3541_v37 = vsel %vm12402_vm11, %v12400_v9, 0.0 }
 0x553   : > { %v3654_v6 = vadd.f32 %v3653_v29, %v3526_v4  ;;  %v3542_v4 = vsel %vm12405_vm12, %v12403_v54, 0.0 }
 0x555   : > { %v3655_v33 = vadd.f32 %v3654_v6, %v3527_v19  ;;  %v3543_v19 = vsel %vm12408_vm13, %v12406_v17, 0.0 }
 0x557   : > { %v3656_v20 = vadd.f32 %v3655_v33, %v3528_v30  ;;  %v3544_v30 = vsel %vm12411_vm14, %v12409_v0, 0.0 }
 0x559   : > { %v3657_v46 = vadd.f32 %v3656_v20, %v3529_v35  ;;  %v3545_v35 = vsel %vm12414_vm15, %v12412_v41, 0.0 }
 0x55b   : > { %v3658_v18 = vadd.f32 %v3657_v46, %v3530_v50  ;;  %v3546_v50 = vsel %vm12417_vm2, %v12415_v32, 0.0 }
 0x55d   : > { %v3659_v10 = vadd.f32 %v3658_v18, %v3531_v58  ;;  %v3547_v58 = vsel %vm12420_vm3, %v12418_v21, 0.0 }
 0x55f   : > { %v3660_v15 = vadd.f32 %v3659_v10, %v3532_v57  ;;  %v3548_v57 = vsel %vm12423_vm1, %v12421_v3, 0.0 }
 0x561   : > { %v3661_v13 = vadd.f32 %v3660_v15, %v3533_v62  ;;  %v3549_v62 = vsel %vm12426_vm0, %v12424_v22, 0.0 }
 0x563   : > { %v3662_v38 = vadd.f32 %v3661_v13, %v3534_v45  ;;  %v3550_v45 = vsel %vm12429_vm4, %v12427_v61, 0.0 }
 0x565   : > { %v3663_v16 = vadd.f32 %v3662_v38, %v3535_v14  ;;  %v3551_v14 = vsel %vm12432_vm5, %v12430_v5, 0.0 }
 0x567   : > { %v3664_v8 = vadd.f32 %v3663_v16, %v3536_v60  ;;  %v3552_v60 = vsel %vm12435_vm6, %v12433_v49, 0.0 }
 0x569   : > { %v3665_v39 = vadd.f32 %v3664_v8, %v3537_v53  ;;  %v3553_v53 = vsel %vm12438_vm7, %v12436_v52, 0.0 }
 0x56b   : > { %v3666_v55 = vadd.f32 %v3665_v39, %v3538_v51 }
 0x56d   : > { %v3667_v1 = vadd.f32 %v3666_v55, %v3539_v48 }
 0x56f   : > { %v3668_v59 = vadd.f32 %v3667_v1, %v3540_v36 }
 0x571   : > { %v3669_v29 = vadd.f32 %v3668_v59, %v3541_v37 }
 0x573   : > { %v3670_v6 = vadd.f32 %v3669_v29, %v3542_v4 }
 0x575   : > { %v3671_v33 = vadd.f32 %v3670_v6, %v3543_v19 }
 0x577   : > { %v3672_v20 = vadd.f32 %v3671_v33, %v3544_v30 }
 0x579   : > { %v3673_v46 = vadd.f32 %v3672_v20, %v3545_v35 }
 0x57b   : > { %v3674_v18 = vadd.f32 %v3673_v46, %v3546_v50 }
 0x57d   : > { %v3675_v10 = vadd.f32 %v3674_v18, %v3547_v58 }
 0x57f   : > { %v3676_v15 = vadd.f32 %v3675_v10, %v3548_v57 }
 0x581   : > { %v3677_v13 = vadd.f32 %v3676_v15, %v3549_v62 }
 0x583   : > { %v3678_v38 = vadd.f32 %v3677_v13, %v3550_v45 }
 0x585   : > { %v3679_v16 = vadd.f32 %v3678_v38, %v3551_v14 }
 0x587   : > { %v3680_v8 = vadd.f32 %v3679_v16, %v3552_v60 }
 0x589   : > { %v3681_v27 = vadd.f32 %v3680_v8, %v3553_v53 }
 0x58b   : > { %3682 = vadd.xlane.f32.xlu0 %v3681_v27 }
 0x614   : > { %v3683_v63 = vpop.xlane.xlu0 %3682 }
 0x615   : > { %v3684_v51 = vrot.slane %v3683_v63, 4 }
 0x617   : > { %v3685_v39 = vadd.f32 %v3684_v51, %v3683_v63 }
 0x619   : > { %v3686_v11 = vrot.slane %v3685_v39, 2 }
 0x61b   : > { %v3687_v56 = vadd.f32 %v3686_v11, %v3685_v39 }
 0x61d   : > { %v3688_v48 = vrot.slane %v3687_v56, 1 }
 0x61f   : > { %v3689_v55 = vadd.f32 %v3688_v48, %v3687_v56 }
 0x621   : > { %4480 = vpush %v3689_v55 }
 0x652   : > { %s4481_s28 = spop %4480 }
 0x653   : > { %s3691_s9 = sadd.f32 %s4481_s28, %s4355_s19 }
 0x655   : > { %3693 = sst [smem:[#allocation6 + $0x1]] %s3691_s9 }
 0x656 PF: > { %p3694_p9 = scmp.eq.s32.totalorder %s5246_s14, 1  ;;  %p4356_p10 = scmp.ne.s32.totalorder %s5246_s14, 1 }
 0x657   : > { %s3698_s10 = sld [smem:[#allocation6]] (!%p4356_p10) }
 0x658   : > { %3697 = sbr.rel (%p4356_p10) target bundleno = 1979 (0x7bb), region = 48 }
 0x65d   : > { %v3763_v47 = vld [vmem:[#allocation3] sm:$0xff]  ;;  %v3764_v43 = vld [vmem:[#allocation3 + $0x8] sm:$0xff]  ;;  %v3765_v36 = vld [vmem:[#allocation3 + $0x10] sm:$0xff]  ;;  %vm12439_vm8 = vcmask 7168  }
 0x65e   : > { %v3766_v1 = vld [vmem:[#allocation3 + $0x18] sm:$0xff]  ;;  %5088 = vlog2.f32 %v3763_v47  ;;  %v3767_v9 = vld [vmem:[#allocation3 + $0x20] sm:$0xff]  ;;  %v3768_v7 = vld [vmem:[#allocation3 + $0x28] sm:$0xff] }
 0x65f   : > { %5090 = vlog2.f32 %v3764_v43  ;;  %v3769_v37 = vld [vmem:[#allocation3 + $0x30] sm:$0xff]  ;;  %v3770_v59 = vld [vmem:[#allocation3 + $0x38] sm:$0xff]  ;;  %v3771_v54 = vld [vmem:[#allocation3 + $0x40] sm:$0xff] }
 0x660   : > { %5092 = vlog2.f32 %v3765_v36  ;;  %v3772_v26 = vld [vmem:[#allocation3 + $0x48] sm:$0xff]  ;;  %v3773_v4 = vld [vmem:[#allocation3 + $0x50] sm:$0xff]  ;;  %v3774_v29 = vld [vmem:[#allocation3 + $0x58] sm:$0xff] }
 0x661   : > { %5094 = vlog2.f32 %v3766_v1  ;;  %v3699_v31 = vld [vmem:[#allocation2] sm:$0xff]  ;;  %v3700_v6 = vld [vmem:[#allocation2 + $0x8] sm:$0xff]  ;;  %v3701_v33 = vld [vmem:[#allocation2 + $0x10] sm:$0xff] }
 0x662   : > { %5096 = vlog2.f32 %v3767_v9  ;;  %v3775_v0 = vld [vmem:[#allocation3 + $0x60] sm:$0xff]  ;;  %v3702_v35 = vld [vmem:[#allocation2 + $0x18] sm:$0xff]  ;;  %v3776_v20 = vld [vmem:[#allocation3 + $0x68] sm:$0xff] }
 0x663   : > { %5098 = vlog2.f32 %v3768_v7  ;;  %v3703_v58 = vld [vmem:[#allocation2 + $0x20] sm:$0xff]  ;;  %v3777_v18 = vld [vmem:[#allocation3 + $0x70] sm:$0xff]  ;;  %vm12440_vm9 = vmmov %vm12439_vm8 }
 0x664   : > { %5100 = vlog2.f32 %v3769_v37  ;;  %v3704_v61 = vld [vmem:[#allocation2 + $0x28] sm:$0xff]  ;;  %v3778_v40 = vld [vmem:[#allocation3 + $0x78] sm:$0xff]  ;;  %vm12441_vm10 = vmmov %vm12439_vm8 }
 0x665   : > { %5102 = vlog2.f32 %v3770_v59  ;;  %v3705_v38 = vld [vmem:[#allocation2 + $0x30] sm:$0xff]  ;;  %v3779_v49 = vld [vmem:[#allocation3 + $0x80] sm:$0xff]  ;;  %vm12442_vm11 = vmmov %vm12439_vm8 }
 0x666   : > { %5104 = vlog2.f32 %v3771_v54  ;;  %v3706_v53 = vld [vmem:[#allocation2 + $0x38] sm:$0xff]  ;;  %v3780_v8 = vld [vmem:[#allocation3 + $0x88] sm:$0xff]  ;;  %vm12443_vm12 = vmmov %vm12439_vm8 }
 0x667   : > { %5106 = vlog2.f32 %v3772_v26  ;;  %v3707_v56 = vld [vmem:[#allocation2 + $0x40] sm:$0xff]  ;;  %v3781_v48 = vld [vmem:[#allocation3 + $0x90] sm:$0xff]  ;;  %vm12444_vm13 = vmmov %vm12439_vm8 }
 0x668   : > { %5108 = vlog2.f32 %v3773_v4  ;;  %v3708_v9 = vld [vmem:[#allocation2 + $0x48] sm:$0xff]  ;;  %v3782_v7 = vld [vmem:[#allocation3 + $0x98] sm:$0xff]  ;;  %vm12445_vm14 = vmmov %vm12439_vm8 }
 0x669   : > { %5110 = vlog2.f32 %v3774_v29  ;;  %v3709_v29 = vld [vmem:[#allocation2 + $0x50] sm:$0xff]  ;;  %vm12446_vm15 = vmmov %vm12439_vm8 }
 0x66a   : > { %5112 = vlog2.f32 %v3775_v0  ;;  %vm12447_vm2 = vmmov %vm12439_vm8 }
 0x66b   : > { %v5089_v17 = vpop.eup %5088  ;;  %5114 = vlog2.f32 %v3776_v20  ;;  %vm12448_vm3 = vmmov %vm12447_vm2 }
 0x66c   : > { %v5091_v19 = vpop.eup %5090  ;;  %v3828_v44 = vmul.f32 0.6931472, %v5089_v17  ;;  %5116 = vlog2.f32 %v3777_v18  ;;  %v3783_v17 = vld [vmem:[#allocation3 + $0xa0] sm:$0xff]  ;;  %vm12449_vm1 = vmmov %vm12447_vm2 }
 0x66d   : > { %v5093_v30 = vpop.eup %5092  ;;  %v3830_v41 = vmul.f32 0.6931472, %v5091_v19  ;;  %5118 = vlog2.f32 %v3778_v40  ;;  %v3788_v40 = vld [vmem:[#allocation3 + $0xc8] sm:$0xff]  ;;  %vm12450_vm0 = vmmov %vm12449_vm1 }
 0x66e   : > { %v5095_v12 = vpop.eup %5094  ;;  %v3832_v32 = vmul.f32 0.6931472, %v5093_v30  ;;  %v3955_v28 = vadd.f32 %v3828_v44, %v3699_v31  ;;  %5120 = vlog2.f32 %v3779_v49  ;;  %v3710_v30 = vld [vmem:[#allocation2 + $0x58] sm:$0xff]  ;;  %v3789_v49 = vld [vmem:[#allocation3 + $0xd0] sm:$0xff]  ;;  %vm12451_vm4 = vmmov %vm12450_vm0 }
 0x66f   : > { %v5097_v50 = vpop.eup %5096  ;;  %v3834_v46 = vmul.f32 0.6931472, %v5095_v12  ;;  %v3956_v21 = vadd.f32 %v3830_v41, %v3700_v6  ;;  %5122 = vlog2.f32 %v3780_v8  ;;  %v3790_v8 = vld [vmem:[#allocation3 + $0xd8] sm:$0xff]  ;;  %vm12452_vm5 = vmmov %vm12450_vm0 }
 0x670   : > { %v5099_v23 = vpop.eup %5098  ;;  %v3836_v3 = vmul.f32 0.6931472, %v5097_v50  ;;  %v3957_v34 = vadd.f32 %v3832_v32, %v3701_v33  ;;  %v4019_v57 = vsel %vm12439_vm8, %v3955_v28, 0.0  ;;  %5124 = vlog2.f32 %v3781_v48  ;;  %v3784_v33 = vld [vmem:[#allocation3 + $0xa8] sm:$0xff]  ;;  %v3711_v28 = vld [vmem:[#allocation2 + $0x60] sm:$0xff]  ;;  %v3785_v50 = vld [vmem:[#allocation3 + $0xb0] sm:$0xff] }
 0x671   : > { %v5101_v10 = vpop.eup %5100  ;;  %v3838_v22 = vmul.f32 0.6931472, %v5099_v23  ;;  %v3958_v25 = vadd.f32 %v3834_v46, %v3702_v35  ;;  %v4020_v62 = vsel %vm12440_vm9, %v3956_v21, 0.0  ;;  %5126 = vlog2.f32 %v3782_v7  ;;  %v3791_v48 = vld [vmem:[#allocation3 + $0xe0] sm:$0xff]  ;;  %vm12453_vm6 = vmmov %vm12450_vm0  ;;  %v3792_v7 = vld [vmem:[#allocation3 + $0xe8] sm:$0xff] }
 0x672   : > { %v5103_v15 = vpop.eup %5102  ;;  %v4021_v45 = vadd.f32 %v4020_v62, %v4019_v57  ;;  %v3840_v13 = vmul.f32 0.6931472, %v5101_v10  ;;  %v3959_v5 = vadd.f32 %v3836_v3, %v3703_v58  ;;  %v4022_v42 = vsel %vm12441_vm10, %v3957_v34, 0.0  ;;  %v3712_v3 = vld [vmem:[#allocation2 + $0x68] sm:$0xff]  ;;  %v3786_v34 = vld [vmem:[#allocation3 + $0xb8] sm:$0xff]  ;;  %v3787_v10 = vld [vmem:[#allocation3 + $0xc0] sm:$0xff] }
 0x673   : > { %v5105_v14 = vpop.eup %5104  ;;  %v3842_v60 = vmul.f32 0.6931472, %v5103_v15  ;;  %v3960_v16 = vadd.f32 %v3838_v22, %v3704_v61  ;;  %v4024_v52 = vsel %vm12442_vm11, %v3958_v25, 0.0  ;;  %5128 = vlog2.f32 %v3783_v17  ;;  %v3713_v61 = vld [vmem:[#allocation2 + $0x70] sm:$0xff]  ;;  %vm12454_vm7 = vmmov %vm12450_vm0 }
 0x674   : > { %v4023_v2 = vadd.f32 %v4022_v42, %v4021_v45  ;;  %v5107_v24 = vpop.eup %5106  ;;  %v3844_v63 = vmul.f32 0.6931472, %v5105_v14  ;;  %v3961_v51 = vadd.f32 %v3840_v13, %v3705_v38  ;;  %v4026_v39 = vsel %vm12443_vm12, %v3959_v5, 0.0  ;;  %v3714_v38 = vld [vmem:[#allocation2 + $0x78] sm:$0xff]  ;;  %v3793_v17 = vld [vmem:[#allocation3 + $0xf0] sm:$0xff]  ;;  %vm12455_vm8 = vmmov %vm12450_vm0 }
 0x675   : > { %v5109_v11 = vpop.eup %5108  ;;  %v3846_v47 = vmul.f32 0.6931472, %v5107_v24  ;;  %v3962_v43 = vadd.f32 %v3842_v60, %v3706_v53  ;;  %v4028_v36 = vsel %vm12444_vm13, %v3960_v16, 0.0  ;;  %5130 = vlog2.f32 %v3784_v33  ;;  %v3715_v53 = vld [vmem:[#allocation2 + $0x80] sm:$0xff]  ;;  %v3794_v33 = vld [vmem:[#allocation3 + $0xf8] sm:$0xff]  ;;  %vm12456_vm9 = vmmov %vm12450_vm0 }
 0x676   : > { %v4025_v27 = vadd.f32 %v4024_v52, %v4023_v2  ;;  %v5111_v1 = vpop.eup %5110  ;;  %v3848_v59 = vmul.f32 0.6931472, %v5109_v11  ;;  %v3963_v54 = vadd.f32 %v3844_v63, %v3707_v56  ;;  %v4030_v26 = vsel %vm12445_vm14, %v3961_v51, 0.0  ;;  %v3716_v56 = vld [vmem:[#allocation2 + $0x88] sm:$0xff]  ;;  %vm12457_vm10 = vmmov %vm12450_vm0 }
 0x677   : > { %v5113_v4 = vpop.eup %5112  ;;  %v3850_v19 = vmul.f32 0.6931472, %v5111_v1  ;;  %v3964_v6 = vadd.f32 %v3846_v47, %v3708_v9  ;;  %v4032_v0 = vsel %vm12446_vm15, %v3962_v43, 0.0  ;;  %5132 = vlog2.f32 %v3785_v50  ;;  %v3717_v9 = vld [vmem:[#allocation2 + $0x90] sm:$0xff]  ;;  %v3795_v50 = vld [vmem:[#allocation3 + $0x100] sm:$0xff]  ;;  %vm12458_vm11 = vmmov %vm12450_vm0 }
 0x678   : > { %v4027_v55 = vadd.f32 %v4026_v39, %v4025_v27  ;;  %v5115_v44 = vpop.eup %5114  ;;  %v3852_v12 = vmul.f32 0.6931472, %v5113_v4  ;;  %v3965_v35 = vadd.f32 %v3848_v59, %v3709_v29  ;;  %v4034_v20 = vsel %vm12447_vm2, %v3963_v54, 0.0  ;;  %v3718_v29 = vld [vmem:[#allocation2 + $0x98] sm:$0xff]  ;;  %vm12459_vm12 = vmmov %vm12450_vm0 }
 0x679   : > { %v5117_v32 = vpop.eup %5116  ;;  %v3854_v21 = vmul.f32 0.6931472, %v5115_v44  ;;  %v3966_v23 = vadd.f32 %v3850_v19, %v3710_v30  ;;  %v4036_v58 = vsel %vm12448_vm3, %v3964_v6, 0.0  ;;  %5134 = vlog2.f32 %v3786_v34  ;;  %v3719_v30 = vld [vmem:[#allocation2 + $0xa0] sm:$0xff]  ;;  %v3721_v34 = vld [vmem:[#allocation2 + $0xb0] sm:$0xff]  ;;  %vm12460_vm13 = vmmov %vm12450_vm0 }
 0x67a   : > { %v4029_v37 = vadd.f32 %v4028_v36, %v4027_v55  ;;  %v5119_v18 = vpop.eup %5118  ;;  %v3856_v22 = vmul.f32 0.6931472, %v5117_v32  ;;  %v3967_v25 = vadd.f32 %v3852_v12, %v3711_v28  ;;  %v4038_v62 = vsel %vm12449_vm1, %v3965_v35, 0.0  ;;  %v3720_v28 = vld [vmem:[#allocation2 + $0xa8] sm:$0xff]  ;;  %vm12461_vm14 = vmmov %vm12450_vm0 }
 0x67b   : > { %v5121_v15 = vpop.eup %5120  ;;  %v3858_v13 = vmul.f32 0.6931472, %v5119_v18  ;;  %v3968_v5 = vadd.f32 %v3854_v21, %v3712_v3  ;;  %v4040_v42 = vsel %vm12450_vm0, %v3966_v23, 0.0  ;;  %5136 = vlog2.f32 %v3787_v10  ;;  %vm12462_vm15 = vmmov %vm12450_vm0 }
 0x67c   : > { %v4031_v31 = vadd.f32 %v4030_v26, %v4029_v37  ;;  %v5123_v14 = vpop.eup %5122  ;;  %v3860_v60 = vmul.f32 0.6931472, %v5121_v15  ;;  %5138 = vlog2.f32 %v3788_v40  ;;  %v3969_v16 = vadd.f32 %v3856_v22, %v3713_v61  ;;  %v3722_v61 = vld [vmem:[#allocation2 + $0xb8] sm:$0xff]  ;;  %v3797_v40 = vld [vmem:[#allocation3 + $0x110] sm:$0xff]  ;;  %vm12463_vm2 = vmmov %vm12450_vm0 }
 0x67d   : > { %v4042_v52 = vsel %vm12451_vm4, %v3967_v25, 0.0  ;;  %v5125_v24 = vpop.eup %5124  ;;  %v3862_v63 = vmul.f32 0.6931472, %v5123_v14  ;;  %5140 = vlog2.f32 %v3789_v49  ;;  %v3970_v51 = vadd.f32 %v3858_v13, %v3714_v38  ;;  %vm12464_vm3 = vmmov %vm12450_vm0 }
 0x67e   : > { %v4033_v41 = vadd.f32 %v4032_v0, %v4031_v31  ;;  %v4044_v39 = vsel %vm12452_vm5, %v3968_v5, 0.0  ;;  %v5127_v11 = vpop.eup %5126  ;;  %v3864_v47 = vmul.f32 0.6931472, %v5125_v24  ;;  %5142 = vlog2.f32 %v3790_v8  ;;  %v3723_v5 = vld [vmem:[#allocation2 + $0xc0] sm:$0xff]  ;;  %vm12465_vm1 = vmmov %vm12450_vm0 }
 0x67f   : > { %v3971_v43 = vadd.f32 %v3860_v60, %v3715_v53  ;;  %v4046_v36 = vsel %vm12453_vm6, %v3969_v16, 0.0  ;;  %v3866_v59 = vmul.f32 0.6931472, %v5127_v11  ;;  %5144 = vlog2.f32 %v3791_v48  ;;  %v3798_v60 = vld [vmem:[#allocation3 + $0x118] sm:$0xff]  ;;  %vm12466_vm4 = vmmov %vm12450_vm0 }
 0x680   : > { %v4035_v46 = vadd.f32 %v4034_v20, %v4033_v41  ;;  %v5129_v1 = vpop.eup %5128  ;;  %v3972_v54 = vadd.f32 %v3862_v63, %v3716_v56  ;;  %v4048_v26 = vsel %vm12454_vm7, %v3970_v51, 0.0  ;;  %5146 = vlog2.f32 %v3792_v7  ;;  %v3799_v63 = vld [vmem:[#allocation3 + $0x120] sm:$0xff]  ;;  %vm12467_vm5 = vmmov %vm12450_vm0 }
 0x681   : > { %v3868_v19 = vmul.f32 0.6931472, %v5129_v1  ;;  %v3973_v6 = vadd.f32 %v3864_v47, %v3717_v9  ;;  %v4050_v0 = vsel %vm12455_vm8, %v3971_v43, 0.0  ;;  %5148 = vlog2.f32 %v3793_v17  ;;  %v3726_v47 = vld [vmem:[#allocation2 + $0xd8] sm:$0xff]  ;;  %v3800_v43 = vld [vmem:[#allocation3 + $0x128] sm:$0xff]  ;;  %vm12468_vm6 = vmmov %vm12450_vm0 }
 0x682   : > { %v4037_v57 = vadd.f32 %v4036_v58, %v4035_v46  ;;  %v5131_v4 = vpop.eup %5130  ;;  %v3974_v35 = vadd.f32 %v3866_v59, %v3718_v29  ;;  %v4052_v20 = vsel %vm12456_vm9, %v3972_v54, 0.0  ;;  %5150 = vlog2.f32 %v3794_v33  ;;  %v3727_v59 = vld [vmem:[#allocation2 + $0xe0] sm:$0xff]  ;;  %v3801_v54 = vld [vmem:[#allocation3 + $0x130] sm:$0xff]  ;;  %vm12469_vm7 = vmmov %vm12450_vm0 }
 0x683   : > { %v3870_v12 = vmul.f32 0.6931472, %v5131_v4  ;;  %v3975_v58 = vadd.f32 %v3868_v19, %v3719_v30  ;;  %v4054_v18 = vsel %vm12457_vm10, %v3973_v6, 0.0  ;;  %5152 = vlog2.f32 %v3795_v50  ;;  %v3728_v6 = vld [vmem:[#allocation2 + $0xe8] sm:$0xff]  ;;  %vm12470_vm8 = vmmov %vm12450_vm0 }
 0x684   : > { %v4039_v45 = vadd.f32 %v4038_v62, %v4037_v57  ;;  %v5133_v44 = vpop.eup %5132  ;;  %v3796_v57 = vld [vmem:[#allocation3 + $0x108] sm:$0xff]  ;;  %v4056_v62 = vsel %vm12458_vm11, %v3974_v35, 0.0  ;;  %v3729_v35 = vld [vmem:[#allocation2 + $0xf0] sm:$0xff]  ;;  %vm12471_vm9 = vmmov %vm12450_vm0 }
 0x685   : > { %v3872_v23 = vmul.f32 0.6931472, %v5133_v44  ;;  %v3976_v25 = vadd.f32 %v3870_v12, %v3720_v28  ;;  %5154 = vlog2.f32 %v3796_v57  ;;  %v4058_v38 = vsel %vm12459_vm12, %v3975_v58, 0.0  ;;  %v3804_v58 = vld [vmem:[#allocation3 + $0x148] sm:$0xff]  ;;  %vm12472_vm10 = vmmov %vm12450_vm0 }
 0x686   : > { %v4041_v2 = vadd.f32 %v4040_v42, %v4039_v45  ;;  %v5135_v32 = vpop.eup %5134  ;;  %5156 = vlog2.f32 %v3797_v40  ;;  %vm12473_vm11 = vmmov %vm12450_vm0 }
 0x687   : > { %v3874_v22 = vmul.f32 0.6931472, %v5135_v32  ;;  %v3977_v14 = vadd.f32 %v3872_v23, %v3721_v34  ;;  %v4060_v53 = vsel %vm12460_vm13, %v3976_v25, 0.0  ;;  %5158 = vlog2.f32 %v3798_v60  ;;  %v3730_v23 = vld [vmem:[#allocation2 + $0xf8] sm:$0xff]  ;;  %v3805_v25 = vld [vmem:[#allocation3 + $0x150] sm:$0xff]  ;;  %vm12474_vm12 = vmmov %vm12450_vm0 }
 0x688   : > { %v4043_v27 = vadd.f32 %v4042_v52, %v4041_v2  ;;  %v5137_v21 = vpop.eup %5136  ;;  %v3724_v2 = vld [vmem:[#allocation2 + $0xc8] sm:$0xff]  ;;  %5160 = vlog2.f32 %v3799_v63  ;;  %v3733_v60 = vld [vmem:[#allocation2 + $0x110] sm:$0xff]  ;;  %v3734_v63 = vld [vmem:[#allocation2 + $0x118] sm:$0xff] }
 0x689   : > { %v5139_v3 = vpop.eup %5138  ;;  %v3876_v45 = vmul.f32 0.6931472, %v5137_v21  ;;  %v3978_v24 = vadd.f32 %v3874_v22, %v3722_v61  ;;  %v4062_v48 = vsel %vm12461_vm14, %v3977_v14, 0.0  ;;  %5162 = vlog2.f32 %v3800_v43  ;;  %v3731_v22 = vld [vmem:[#allocation2 + $0x100] sm:$0xff]  ;;  %v3809_v43 = vld [vmem:[#allocation3 + $0x170] sm:$0xff]  ;;  %vm12475_vm13 = vmmov %vm12450_vm0 }
 0x68a   : > { %v4045_v55 = vadd.f32 %v4044_v39, %v4043_v27  ;;  %v5141_v15 = vpop.eup %5140  ;;  %v3878_v42 = vmul.f32 0.6931472, %v5139_v3  ;;  %v3725_v27 = vld [vmem:[#allocation2 + $0xd0] sm:$0xff]  ;;  %5164 = vlog2.f32 %v3801_v54  ;;  %v3810_v54 = vld [vmem:[#allocation3 + $0x178] sm:$0xff]  ;;  %vm12476_vm14 = vmmov %vm12450_vm0 }
 0x68b   : > { %v5143_v49 = vpop.eup %5142  ;;  %v3880_v52 = vmul.f32 0.6931472, %v5141_v15  ;;  %v3979_v51 = vadd.f32 %v3876_v45, %v3723_v5  ;;  %v4064_v7 = vsel %vm12462_vm15, %v3978_v24, 0.0  ;;  %v3806_v5 = vld [vmem:[#allocation3 + $0x158] sm:$0xff]  ;;  %vm12477_vm15 = vmmov %vm12450_vm0 }
 0x68c   : > { %v4047_v37 = vadd.f32 %v4046_v36, %v4045_v55  ;;  %v5145_v8 = vpop.eup %5144  ;;  %v3882_v11 = vmul.f32 0.6931472, %v5143_v49  ;;  %v3980_v56 = vadd.f32 %v3878_v42, %v3724_v2 }
 0x68d   : > { %v5147_v55 = vpop.eup %5146  ;;  %v3884_v1 = vmul.f32 0.6931472, %v5145_v8  ;;  %v3981_v9 = vadd.f32 %v3880_v52, %v3725_v27  ;;  %v4066_v4 = vsel %vm12463_vm2, %v3979_v51, 0.0  ;;  %v3808_v51 = vld [vmem:[#allocation3 + $0x168] sm:$0xff]  ;;  %vm12478_vm2 = vmmov %vm12450_vm0 }
 0x68e   : > { %v4049_v31 = vadd.f32 %v4048_v26, %v4047_v37  ;;  %v5149_v37 = vpop.eup %5148  ;;  %v3886_v29 = vmul.f32 0.6931472, %v5147_v55  ;;  %v3982_v17 = vadd.f32 %v3882_v11, %v3726_v47  ;;  %v3735_v47 = vld [vmem:[#allocation2 + $0x120] sm:$0xff] }
 0x68f   : > { %v5151_v19 = vpop.eup %5150  ;;  %v3888_v30 = vmul.f32 0.6931472, %v5149_v37  ;;  %v3983_v33 = vadd.f32 %v3884_v1, %v3727_v59  ;;  %v3736_v59 = vld [vmem:[#allocation2 + $0x128] sm:$0xff] }
 0x690   : > { %v4051_v41 = vadd.f32 %v4050_v0, %v4049_v31  ;;  %v4068_v31 = vsel %vm12464_vm3, %v3980_v56, 0.0  ;;  %v3802_v0 = vld [vmem:[#allocation3 + $0x138] sm:$0xff]  ;;  %v5153_v12 = vpop.eup %5152  ;;  %v3890_v28 = vmul.f32 0.6931472, %v5151_v19  ;;  %v3984_v50 = vadd.f32 %v3886_v29, %v3728_v6  ;;  %v3737_v19 = vld [vmem:[#allocation2 + $0x130] sm:$0xff]  ;;  %v3811_v6 = vld [vmem:[#allocation3 + $0x180] sm:$0xff] }
 0x691   : > { %5166 = vlog2.f32 %v3802_v0  ;;  %v3892_v3 = vmul.f32 0.6931472, %v5153_v12  ;;  %v3985_v34 = vadd.f32 %v3888_v30, %v3729_v35  ;;  %v4074_v57 = vsel %vm12466_vm4, %v3983_v33, 0.0  ;;  %v3738_v12 = vld [vmem:[#allocation2 + $0x138] sm:$0xff]  ;;  %v3812_v35 = vld [vmem:[#allocation3 + $0x188] sm:$0xff]  ;;  %vm12479_vm3 = vmmov %vm12450_vm0 }
 0x692   : > { %v4053_v46 = vadd.f32 %v4052_v20, %v4051_v41  ;;  %v4070_v41 = vsel %vm12465_vm1, %v3981_v9, 0.0  ;;  %v3803_v20 = vld [vmem:[#allocation3 + $0x140] sm:$0xff]  ;;  %v5155_v21 = vpop.eup %5154  ;;  %v3986_v61 = vadd.f32 %v3890_v28, %v3730_v23  ;;  %v4076_v40 = vsel %vm12467_vm5, %v3984_v50, 0.0  ;;  %v3813_v23 = vld [vmem:[#allocation3 + $0x190] sm:$0xff]  ;;  %vm12480_vm1 = vmmov %vm12450_vm0 }
 0x693   : > { %5168 = vlog2.f32 %v3803_v20  ;;  %v3894_v15 = vmul.f32 0.6931472, %v5155_v21  ;;  %v4078_v49 = vsel %vm12468_vm6, %v3985_v34, 0.0  ;;  %v3739_v21 = vld [vmem:[#allocation2 + $0x140] sm:$0xff]  ;;  %vm12481_vm4 = vmmov %vm12450_vm0 }
 0x694   : > { %v4055_v10 = vadd.f32 %v4054_v18, %v4053_v46  ;;  %v4072_v46 = vsel %vm12450_vm0, %v3982_v17, 0.0  ;;  %5170 = vlog2.f32 %v3804_v58  ;;  %v4080_v8 = vsel %vm12469_vm7, %v3986_v61, 0.0  ;;  %vm12482_vm5 = vmmov %vm12450_vm0 }
 0x695   : > { %5172 = vlog2.f32 %v3805_v25  ;;  %vm12483_vm6 = vmmov %vm12450_vm0 }
 0x696   : > { %v4057_v13 = vadd.f32 %v4056_v62, %v4055_v10  ;;  %v5157_v10 = vpop.eup %5156  ;;  %5174 = vlog2.f32 %v3806_v5  ;;  %vm12484_vm7 = vmmov %vm12450_vm0 }
 0x697   : > { %v5159_v45 = vpop.eup %5158  ;;  %v3896_v14 = vmul.f32 0.6931472, %v5157_v10  ;;  %v3740_v10 = vld [vmem:[#allocation2 + $0x148] sm:$0xff] }
 0x698   : > { %v4059_v16 = vadd.f32 %v4058_v38, %v4057_v13  ;;  %v3732_v13 = vld [vmem:[#allocation2 + $0x108] sm:$0xff]  ;;  %v3987_v38 = vadd.f32 %v3892_v3, %v3731_v22  ;;  %v5161_v2 = vpop.eup %5160  ;;  %v3898_v24 = vmul.f32 0.6931472, %v5159_v45  ;;  %v3814_v22 = vld [vmem:[#allocation3 + $0x198] sm:$0xff]  ;;  %v3741_v45 = vld [vmem:[#allocation2 + $0x150] sm:$0xff] }
 0x699   : > { %v5163_v27 = vpop.eup %5162  ;;  %v3900_v11 = vmul.f32 0.6931472, %v5161_v2  ;;  %v3989_v56 = vadd.f32 %v3896_v14, %v3733_v60  ;;  %v3742_v2 = vld [vmem:[#allocation2 + $0x158] sm:$0xff]  ;;  %v3816_v60 = vld [vmem:[#allocation3 + $0x1a8] sm:$0xff] }
 0x69a   : > { %v4061_v39 = vadd.f32 %v4060_v53, %v4059_v16  ;;  %v3807_v16 = vld [vmem:[#allocation3 + $0x160] sm:$0xff]  ;;  %v3988_v53 = vadd.f32 %v3894_v15, %v3732_v13  ;;  %v5165_v55 = vpop.eup %5164  ;;  %v3902_v1 = vmul.f32 0.6931472, %v5163_v27  ;;  %v3990_v9 = vadd.f32 %v3898_v24, %v3734_v63  ;;  %v3817_v63 = vld [vmem:[#allocation3 + $0x1b0] sm:$0xff] }
 0x69b   : > { %5176 = vlog2.f32 %v3807_v16  ;;  %v3991_v29 = vadd.f32 %v3900_v11, %v3735_v47  ;;  %v4086_v17 = vsel %vm12472_vm10, %v3989_v56, 0.0  ;;  %v3815_v13 = vld [vmem:[#allocation3 + $0x1a0] sm:$0xff]  ;;  %v3818_v47 = vld [vmem:[#allocation3 + $0x1b8] sm:$0xff]  ;;  %vm12487_vm10 = vmmov %vm12450_vm0 }
 0x69c   : > { %v4063_v36 = vadd.f32 %v4062_v48, %v4061_v39  ;;  %v4082_v48 = vsel %vm12470_vm8, %v3987_v38, 0.0  ;;  %5178 = vlog2.f32 %v3808_v51  ;;  %v3992_v30 = vadd.f32 %v3902_v1, %v3736_v59  ;;  %v3743_v27 = vld [vmem:[#allocation2 + $0x160] sm:$0xff]  ;;  %vm12485_vm8 = vmmov %vm12450_vm0 }
 0x69d   : > { %5180 = vlog2.f32 %v3809_v43  ;;  %v4088_v33 = vsel %vm12473_vm11, %v3990_v9, 0.0  ;;  %v4090_v50 = vsel %vm12474_vm12, %v3991_v29, 0.0  ;;  %v3819_v59 = vld [vmem:[#allocation3 + $0x1c0] sm:$0xff]  ;;  %vm12488_vm11 = vmmov %vm12450_vm0 }
 0x69e   : > { %v4065_v26 = vadd.f32 %v4064_v7, %v4063_v36  ;;  %v4084_v7 = vsel %vm12471_vm9, %v3988_v53, 0.0  ;;  %v5167_v37 = vpop.eup %5166  ;;  %5182 = vlog2.f32 %v3810_v54  ;;  %v4092_v34 = vsel %vm12475_vm13, %v3992_v30, 0.0  ;;  %vm12486_vm9 = vmmov %vm12450_vm0 }
 0x69f   : > { %5184 = vlog2.f32 %v3811_v6  ;;  %vm12489_vm12 = vmmov %vm12450_vm0 }
 0x6a0   : > { %v4067_v44 = vadd.f32 %v4066_v4, %v4065_v26  ;;  %v3904_v4 = vmul.f32 0.6931472, %v5165_v55  ;;  %5186 = vlog2.f32 %v3812_v35  ;;  %v3744_v55 = vld [vmem:[#allocation2 + $0x168] sm:$0xff]  ;;  %vm12490_vm13 = vmmov %vm12450_vm0 }
 0x6a1   : > { %5188 = vlog2.f32 %v3813_v23 }
 0x6a2   : > { %v4069_v32 = vadd.f32 %v4068_v31, %v4067_v44  ;;  %v5169_v31 = vpop.eup %5168  ;;  %v3906_v44 = vmul.f32 0.6931472, %v5167_v37  ;;  %v3993_v28 = vadd.f32 %v3904_v4, %v3737_v19  ;;  %5190 = vlog2.f32 %v3814_v22  ;;  %v3745_v37 = vld [vmem:[#allocation2 + $0x170] sm:$0xff]  ;;  %v3820_v19 = vld [vmem:[#allocation3 + $0x1c8] sm:$0xff] }
 0x6a3   : > { %5192 = vlog2.f32 %v3815_v13 }
 0x6a4   : > { %v4071_v18 = vadd.f32 %v4070_v41, %v4069_v32  ;;  %v5171_v41 = vpop.eup %5170  ;;  %v3908_v32 = vmul.f32 0.6931472, %v5169_v31  ;;  %v3994_v3 = vadd.f32 %v3906_v44, %v3738_v12  ;;  %v4094_v61 = vsel %vm12476_vm14, %v3993_v28, 0.0  ;;  %v3746_v31 = vld [vmem:[#allocation2 + $0x178] sm:$0xff]  ;;  %v3821_v12 = vld [vmem:[#allocation3 + $0x1d0] sm:$0xff]  ;;  %vm12491_vm14 = vmmov %vm12450_vm0 }
 0x6a5   : > { %5194 = vlog2.f32 %v3816_v60 }
 0x6a6   : > { %v4073_v62 = vadd.f32 %v4072_v46, %v4071_v18  ;;  %v5173_v46 = vpop.eup %5172  ;;  %v3910_v18 = vmul.f32 0.6931472, %v5171_v41  ;;  %v3995_v15 = vadd.f32 %v3908_v32, %v3739_v21  ;;  %v4096_v38 = vsel %vm12477_vm15, %v3994_v3, 0.0  ;;  %v3747_v41 = vld [vmem:[#allocation2 + $0x180] sm:$0xff]  ;;  %v3822_v21 = vld [vmem:[#allocation3 + $0x1d8] sm:$0xff]  ;;  %vm12492_vm15 = vmmov %vm12450_vm0 }
 0x6a7   : > { %5196 = vlog2.f32 %v3817_v63 }
 0x6a8   : > { %v4075_v42 = vadd.f32 %v4074_v57, %v4073_v62  ;;  %v5175_v57 = vpop.eup %5174  ;;  %v3912_v62 = vmul.f32 0.6931472, %v5173_v46  ;;  %v3996_v14 = vadd.f32 %v3910_v18, %v3740_v10  ;;  %v4098_v53 = vsel %vm12478_vm2, %v3995_v15, 0.0  ;;  %v3748_v46 = vld [vmem:[#allocation2 + $0x188] sm:$0xff]  ;;  %v3823_v10 = vld [vmem:[#allocation3 + $0x1e0] sm:$0xff]  ;;  %vm12493_vm2 = vmmov %vm12450_vm0 }
 0x6a9   : > { %5198 = vlog2.f32 %v3818_v47 }
 0x6aa   : > { %v4077_v52 = vadd.f32 %v4076_v40, %v4075_v42  ;;  %v5177_v40 = vpop.eup %5176  ;;  %v3914_v42 = vmul.f32 0.6931472, %v5175_v57  ;;  %v3997_v24 = vadd.f32 %v3912_v62, %v3741_v45  ;;  %v4100_v56 = vsel %vm12479_vm3, %v3996_v14, 0.0  ;;  %v3749_v57 = vld [vmem:[#allocation2 + $0x190] sm:$0xff]  ;;  %v3824_v45 = vld [vmem:[#allocation3 + $0x1e8] sm:$0xff]  ;;  %vm12494_vm3 = vmmov %vm12450_vm0 }
 0x6ab   : > { %5200 = vlog2.f32 %v3819_v59 }
 0x6ac   : > { %v4079_v39 = vadd.f32 %v4078_v49, %v4077_v52  ;;  %v5179_v49 = vpop.eup %5178  ;;  %v3916_v52 = vmul.f32 0.6931472, %v5177_v40  ;;  %v3998_v11 = vadd.f32 %v3914_v42, %v3742_v2  ;;  %v4102_v9 = vsel %vm12480_vm1, %v3997_v24, 0.0  ;;  %v3750_v40 = vld [vmem:[#allocation2 + $0x198] sm:$0xff]  ;;  %v3825_v2 = vld [vmem:[#allocation3 + $0x1f0] sm:$0xff]  ;;  %vm12495_vm1 = vmmov %vm12450_vm0 }
 0x6ad   : > { %5202 = vlog2.f32 %v3820_v19 }
 0x6ae   : > { %v4081_v36 = vadd.f32 %v4080_v8, %v4079_v39  ;;  %v5181_v8 = vpop.eup %5180  ;;  %v3918_v39 = vmul.f32 0.6931472, %v5179_v49  ;;  %v3999_v1 = vadd.f32 %v3916_v52, %v3743_v27  ;;  %v4104_v29 = vsel %vm12450_vm0, %v3998_v11, 0.0  ;;  %v3751_v49 = vld [vmem:[#allocation2 + $0x1a0] sm:$0xff]  ;;  %v3826_v27 = vld [vmem:[#allocation3 + $0x1f8] sm:$0xff] }
 0x6af   : > { %5204 = vlog2.f32 %v3821_v12 }
 0x6b0   : > { %v4083_v26 = vadd.f32 %v4082_v48, %v4081_v36  ;;  %v5183_v48 = vpop.eup %5182  ;;  %v3920_v36 = vmul.f32 0.6931472, %v5181_v8  ;;  %v4000_v4 = vadd.f32 %v3918_v39, %v3744_v55  ;;  %v4106_v30 = vsel %vm12481_vm4, %v3999_v1, 0.0  ;;  %v3752_v8 = vld [vmem:[#allocation2 + $0x1a8] sm:$0xff]  ;;  %vm12496_vm4 = vmmov %vm12450_vm0 }
 0x6b1   : > { %5206 = vlog2.f32 %v3822_v21  ;;  %v3758_v21 = vld [vmem:[#allocation2 + $0x1d8] sm:$0xff] }
 0x6b2   : > { %v4085_v0 = vadd.f32 %v4084_v7, %v4083_v26  ;;  %v5185_v7 = vpop.eup %5184  ;;  %v3922_v26 = vmul.f32 0.6931472, %v5183_v48  ;;  %v4001_v44 = vadd.f32 %v3920_v36, %v3745_v37  ;;  %v4108_v28 = vsel %vm12482_vm5, %v4000_v4, 0.0  ;;  %v3753_v48 = vld [vmem:[#allocation2 + $0x1b0] sm:$0xff]  ;;  %v3755_v4 = vld [vmem:[#allocation2 + $0x1c0] sm:$0xff]  ;;  %vm12497_vm5 = vmmov %vm12450_vm0 }
 0x6b3   : > { %5208 = vlog2.f32 %v3823_v10 }
 0x6b4   : > { %v4087_v20 = vadd.f32 %v4086_v17, %v4085_v0  ;;  %v5187_v17 = vpop.eup %5186  ;;  %v3924_v0 = vmul.f32 0.6931472, %v5185_v7  ;;  %v4002_v32 = vadd.f32 %v3922_v26, %v3746_v31  ;;  %v4110_v3 = vsel %vm12483_vm6, %v4001_v44, 0.0  ;;  %vm12498_vm6 = vmmov %vm12450_vm0 }
 0x6b5   : > { %5210 = vlog2.f32 %v3824_v45 }
 0x6b6   : > { %v4089_v58 = vadd.f32 %v4088_v33, %v4087_v20  ;;  %v5189_v33 = vpop.eup %5188  ;;  %v3926_v20 = vmul.f32 0.6931472, %v5187_v17  ;;  %v4003_v18 = vadd.f32 %v3924_v0, %v3747_v41  ;;  %v4112_v15 = vsel %vm12484_vm7, %v4002_v32, 0.0  ;;  %v3756_v0 = vld [vmem:[#allocation2 + $0x1c8] sm:$0xff]  ;;  %vm12499_vm7 = vmmov %vm12450_vm0 }
 0x6b7   : > { %5212 = vlog2.f32 %v3825_v2 }
 0x6b8   : > { %v4091_v25 = vadd.f32 %v4090_v50, %v4089_v58  ;;  %v5191_v50 = vpop.eup %5190  ;;  %v3928_v58 = vmul.f32 0.6931472, %v5189_v33  ;;  %v4004_v62 = vadd.f32 %v3926_v20, %v3748_v46  ;;  %v4114_v14 = vsel %vm12485_vm8, %v4003_v18, 0.0 }
 0x6b9   : > { %5214 = vlog2.f32 %v3826_v27 }
 0x6ba   : > { %v4093_v5 = vadd.f32 %v4092_v34, %v4091_v25  ;;  %v5193_v34 = vpop.eup %5192  ;;  %v3930_v25 = vmul.f32 0.6931472, %v5191_v50  ;;  %v4005_v42 = vadd.f32 %v3928_v58, %v3749_v57  ;;  %v4116_v24 = vsel %vm12486_vm9, %v4004_v62, 0.0  ;;  %v3759_v57 = vld [vmem:[#allocation2 + $0x1e0] sm:$0xff] }
 0x6bc   : > { %v4095_v16 = vadd.f32 %v4094_v61, %v4093_v5  ;;  %v5195_v61 = vpop.eup %5194  ;;  %v3932_v5 = vmul.f32 0.6931472, %v5193_v34  ;;  %v4006_v52 = vadd.f32 %v3930_v25, %v3750_v40  ;;  %v4118_v11 = vsel %vm12487_vm10, %v4005_v42, 0.0  ;;  %v3761_v42 = vld [vmem:[#allocation2 + $0x1f0] sm:$0xff] }
 0x6be   : > { %v4097_v51 = vadd.f32 %v4096_v38, %v4095_v16  ;;  %v5197_v38 = vpop.eup %5196  ;;  %v3934_v16 = vmul.f32 0.6931472, %v5195_v61  ;;  %v4007_v39 = vadd.f32 %v3932_v5, %v3751_v49  ;;  %v4120_v36 = vsel %vm12488_vm11, %v4006_v52, 0.0  ;;  %v3760_v61 = vld [vmem:[#allocation2 + $0x1e8] sm:$0xff] }
 0x6c0   : > { %v4099_v43 = vadd.f32 %v4098_v53, %v4097_v51  ;;  %v5199_v53 = vpop.eup %5198  ;;  %v3936_v51 = vmul.f32 0.6931472, %v5197_v38 }
 0x6c1   : > { %v3938_v47 = vmul.f32 0.6931472, %v5199_v53 }
 0x6c2   : > { %v4101_v54 = vadd.f32 %v4100_v56, %v4099_v43  ;;  %v5201_v56 = vpop.eup %5200  ;;  %v4008_v43 = vadd.f32 %v3934_v16, %v3752_v8  ;;  %v4009_v59 = vadd.f32 %v3936_v51, %v3753_v48 }
 0x6c3   : > { %v5203_v1 = vpop.eup %5202  ;;  %v3940_v37 = vmul.f32 0.6931472, %v5201_v56 }
 0x6c4   : > { %v4103_v6 = vadd.f32 %v4102_v9, %v4101_v54  ;;  %v3754_v9 = vld [vmem:[#allocation2 + $0x1b8] sm:$0xff]  ;;  %v4122_v54 = vsel %vm12489_vm12, %v4007_v39, 0.0  ;;  %v5205_v26 = vpop.eup %5204  ;;  %v3942_v17 = vmul.f32 0.6931472, %v5203_v1  ;;  %v4124_v19 = vsel %vm12490_vm13, %v4008_v43, 0.0 }
 0x6c5   : > { %v4010_v31 = vadd.f32 %v3938_v47, %v3754_v9  ;;  %v4011_v33 = vadd.f32 %v3940_v37, %v3755_v4  ;;  %v4126_v41 = vsel %vm12491_vm14, %v4009_v59, 0.0 }
 0x6c6   : > { %v4105_v35 = vadd.f32 %v4104_v29, %v4103_v6  ;;  %v5207_v6 = vpop.eup %5206 }
 0x6c7   : > { %v5209_v12 = vpop.eup %5208  ;;  %v3946_v32 = vmul.f32 0.6931472, %v5207_v6  ;;  %v4128_v50 = vsel %vm12492_vm15, %v4010_v31, 0.0 }
 0x6c8   : > { %v4107_v23 = vadd.f32 %v4106_v30, %v4105_v35  ;;  %v3944_v30 = vmul.f32 0.6931472, %v5205_v26  ;;  %v3757_v35 = vld [vmem:[#allocation2 + $0x1d0] sm:$0xff]  ;;  %v5211_v46 = vpop.eup %5210  ;;  %v3948_v58 = vmul.f32 0.6931472, %v5209_v12 }
 0x6c9   : > { %v5213_v34 = vpop.eup %5212  ;;  %v4014_v25 = vadd.f32 %v3946_v32, %v3758_v21 }
 0x6ca   : > { %v4109_v22 = vadd.f32 %v4108_v28, %v4107_v23  ;;  %v4012_v28 = vadd.f32 %v3942_v17, %v3756_v0  ;;  %v4013_v18 = vadd.f32 %v3944_v30, %v3757_v35  ;;  %v3952_v45 = vmul.f32 0.6931472, %v5213_v34 }
 0x6cb   : > { %v4136_v2 = vsel %vm12450_vm0, %v4014_v25, 0.0 }
 0x6cc   : > { %v4111_v13 = vadd.f32 %v4110_v3, %v4109_v22  ;;  %v4130_v3 = vsel %vm12493_vm2, %v4011_v33, 0.0  ;;  %v3950_v22 = vmul.f32 0.6931472, %v5211_v46  ;;  %v4132_v62 = vsel %vm12494_vm3, %v4012_v28, 0.0 }
 0x6cd   : > { %v4134_v5 = vsel %vm12495_vm1, %v4013_v18, 0.0  ;;  %v4017_v52 = vadd.f32 %v3952_v45, %v3761_v42 }
 0x6ce   : > { %v4113_v60 = vadd.f32 %v4112_v15, %v4111_v13  ;;  %v5215_v15 = vpop.eup %5214  ;;  %v4015_v13 = vadd.f32 %v3948_v58, %v3759_v57  ;;  %v4016_v49 = vadd.f32 %v3950_v22, %v3760_v61 }
 0x6cf   : > { %v3954_v38 = vmul.f32 0.6931472, %v5215_v15  ;;  %v4142_v51 = vsel %vm12498_vm6, %v4017_v52, 0.0 }
 0x6d0   : > { %v4115_v63 = vadd.f32 %v4114_v14, %v4113_v60  ;;  %v3762_v60 = vld [vmem:[#allocation2 + $0x1f8] sm:$0xff]  ;;  %v4140_v27 = vsel %vm12497_vm5, %v4016_v49, 0.0 }
 0x6d1   : > { %v4018_v8 = vadd.f32 %v3954_v38, %v3762_v60 }
 0x6d2   : > { %v4117_v55 = vadd.f32 %v4116_v24, %v4115_v63  ;;  %v4138_v24 = vsel %vm12496_vm4, %v4015_v13, 0.0 }
 0x6d4   : > { %v4119_v7 = vadd.f32 %v4118_v11, %v4117_v55  ;;  %v4144_v11 = vsel %vm12499_vm7, %v4018_v8, 0.0 }
 0x6d6   : > { %v4121_v29 = vadd.f32 %v4120_v36, %v4119_v7 }
 0x6d8   : > { %v4123_v44 = vadd.f32 %v4122_v54, %v4121_v29 }
 0x6da   : > { %v4125_v20 = vadd.f32 %v4124_v19, %v4123_v44 }
 0x6dc   : > { %v4127_v23 = vadd.f32 %v4126_v41, %v4125_v20 }
 0x6de   : > { %v4129_v10 = vadd.f32 %v4128_v50, %v4127_v23 }
 0x6e0   : > { %v4131_v40 = vadd.f32 %v4130_v3, %v4129_v10 }
 0x6e2   : > { %v4133_v14 = vadd.f32 %v4132_v62, %v4131_v40 }
 0x6e4   : > { %v4135_v16 = vadd.f32 %v4134_v5, %v4133_v14 }
 0x6e6   : > { %v4137_v53 = vadd.f32 %v4136_v2, %v4135_v16 }
 0x6e8   : > { %v4139_v63 = vadd.f32 %v4138_v24, %v4137_v53 }
 0x6ea   : > { %v4141_v39 = vadd.f32 %v4140_v27, %v4139_v63 }
 0x6ec   : > { %v4143_v56 = vadd.f32 %v4142_v51, %v4141_v39 }
 0x6ee   : > { %v4145_v48 = vadd.f32 %v4144_v11, %v4143_v56 }
 0x6f0   : > { %4146 = vadd.xlane.f32.xlu0 %v4145_v48 }
 0x779   : > { %v4147_v55 = vpop.xlane.xlu0 %4146 }
 0x77a   : > { %v4148_v47 = vrot.slane %v4147_v55, 4 }
 0x77c   : > { %v4149_v43 = vadd.f32 %v4148_v47, %v4147_v55 }
 0x77e   : > { %v4150_v36 = vrot.slane %v4149_v43, 2 }
 0x780   : > { %v4151_v1 = vadd.f32 %v4150_v36, %v4149_v43 }
 0x782   : > { %v4152_v9 = vrot.slane %v4151_v1, 1 }
 0x784   : > { %v4153_v7 = vadd.f32 %v4152_v9, %v4151_v1 }
 0x786   : > { %4482 = vpush %v4153_v7 }
 0x7b7   : > { %s4483_s11 = spop %4482 }
 0x7b8   : > { %s4155_s12 = sadd.f32 %s4483_s11, %s3698_s10 }
 0x7ba   : > { %4157 = sst [smem:[#allocation6]] %s4155_s12 }
 0x7bb PF: > { %4161 = sbr.rel (!%p3694_p9) target bundleno = 2214 (0x8a6), region = 52  ;;  %v4163_v37 = vld [vmem:[#allocation5] sm:$0xf] (%p3694_p9)  ;;  %v5262_v59 = vmov (%p3694_p9), 1983009808   ;;  %v12500_v31 = vld [vmem:[#allocation139_spill] sm:$0xff] (%p3694_p9) }
 0x7bc   : > { %5216 = vlog2.f32 (%p3694_p9), %v4163_v37  ;;  %v4170_v54 = vunpack.c.l.s4 (%p3694_p9), %v5262_v59  ;;  %v4162_v29 = vld [vmem:[#allocation4] sm:$0xf] (%p3694_p9)  ;;  %vm4179_vm8 = vcmask (%p3694_p9), 1041408   ;;  %s4167_s14 = sld [smem:[#allocation6]] (%p3694_p9) }
 0x7bd   : > { %s4358_s13 = sld [smem:[#allocation6 + $0x1]] (%p3694_p9) }
 0x7be   : > { %v4171_v26 = vunpack.c.0.s8 (%p3694_p9), %v4170_v54 }
 0x7c0   : > { %v4174_v19 = vsub.s32 %v4171_v26, %v12500_v31 }
 0x7c9   : > { %v5217_v4 = vpop.eup %5216 }
 0x7ca   : > { %v4165_v17 = vmul.f32 0.6931472, %v5217_v4 }
 0x7cc   : > { %v4166_v6 = vadd.f32 %v4165_v17, %v4162_v29 }
 0x7ce   : > { %v4175_v0 = vrot.slane %v4166_v6, %v4174_v19 }
 0x7d0   : > { %v4176_v44 = vcombine.high %v4175_v0, %v4175_v0  ;;  %v4180_v30 = vsel %vm4179_vm8, %v4175_v0, 0.0 }
 0x7d2   : > { %v4181_v33 = vsel %vm4179_vm8, %v4176_v44, 0.0 }
 0x7d3   : > { %v4182_v41 = vadd.f32 %v4181_v33, %v4180_v30 }
 0x7d5   : > { %4183 = vadd.xlane.f32.xlu0 %v4182_v41 }
 0x85e   : > { %v4184_v12 = vpop.xlane.xlu0 %4183 }
 0x85f   : > { %v4185_v35 = vrot.slane %v4184_v12, 4 }
 0x861   : > { %v4186_v20 = vadd.f32 %v4185_v35, %v4184_v12 }
 0x863   : > { %v4187_v32 = vrot.slane %v4186_v20, 2 }
 0x865   : > { %v4188_v28 = vadd.f32 %v4187_v32, %v4186_v20 }
 0x867   : > { %v4189_v50 = vrot.slane %v4188_v28, 1 }
 0x869   : > { %v4190_v46 = vadd.f32 %v4189_v50, %v4188_v28 }
 0x86b   : > { %4484 = vpush %v4190_v46 }
 0x89c   : > { %s4485_s18 = spop %4484 }
 0x89d   : > { %s4192_s20 = sadd.f32 %s4485_s18, %s4167_s14 }
 0x89f   : > { %s4193_s21 = smul.f32 0.5, %s4192_s20 }
 0x8a1   : > { %s4195_s22 = ssub.f32 %s4193_s21, %s4358_s13 }
 0x8a3   : > { %s4196_s23 = smul.f32 0.001953125, %s4195_s22 }
 0x8a5   : > { %4198 = sst [smem:[#allocation8]] %s4196_s23 }
 0x8a6 PF: > { %p4490_p11 = scmp.eq.s32.totalorder %s4264_s0, 1  ;;  %s5263_s24 = smov [#allocation8]  }
 0x8a8   : > { %4487 = dma.smem_to_hbm (%p4490_p11), %s5263_s24, 16, %s10824_s3, [#allocation9]  }
 0x8a9   : > { %5241 = dma.done.wait (%p4490_p11), [#allocation9], 16  }
 0x8aa   : > { %5243 = vsyncadd (%p4490_p11), [#allocation9], 4294967280 }
 0x8ab   : > { %4212 = sfence }
 0x8ac PF: > { %s15_s16 = sadd.s32 1, %s5254_s16   ;;  %s12501_s14 = smov %s5250_s15 }
 0x8ad   : > { %p12_p12 = scmp.ge.s32.totalorder %s15_s16, 4   ;;  %s12502_s15 = smov %s12504_s17 }
 0x8af   :  { %14 = sbr.rel (!%p12_p12) target bundleno = 4 (0x4), region = 87 }
 0x8b4   :  { %4218 = vsyncpa [#allocation9], 1 }
 0x8b5   :  { %4220 = vsyncpa [#allocation9 + $0x1], 1 }

</bundles_post_ra>
